<compile_context>
chip_gen: v7x
topology: tpu7x:2x2x1
jax: 0.10.0
libtpu: 0.0.40
codegen_flags: <defaults>
</compile_context>

<pallas_src>
import functools

import jax
import jax.numpy as jnp
from jax.experimental import pallas as pl
from jax.experimental.pallas import tpu as pltpu

# High-precision f32 matmuls everywhere so the Pallas kernel and the pure-JAX
# reference agree tightly.
jax.config.update("jax_default_matmul_precision", "highest")

F32 = jnp.float32

CFG = dict(
    in_channels=4, H=16, W=16, dim=32, num_classes=10,
    # (in_channels, out_channels, pool) per MoeBlock, mirroring a tiny VGG
    features=[(4, 8, False), (8, 16, True), (16, 16, True)],
    emb_channels=8,
)


def _log2(n):
    assert n & (n - 1) == 0, "spatial dims must be powers of two"
    return (n - 1).bit_length()


# ----------------------------------------------------------------------------
# In-kernel building blocks (traced inside the Pallas kernel)
# ----------------------------------------------------------------------------
def _shift_lanes(x, s):
    """Lane rotation: result[:, p] = x[:, (p + s) % n].  Static slices+concat
    (unambiguous semantics; lowers to lane shifts, no MXU)."""
    n = x.shape[-1]
    k = s % n
    if k == 0:
        return x
    return jnp.concatenate([x[:, k:], x[:, :k]], axis=1)


def _conv3x3(x, wflat, h, w):
    """3x3 / stride 1 / pad 1 conv on a (Cin, H*W) slab.

    wflat: (Cout, 9*Cin) with columns ordered tap-major (t, ci).  For each tap
    the shifted + border-masked input is built with a lane rotation and a
    (1, HW) iota mask; the 9 slabs are stacked and contracted with ONE matmul.
    Returns (Cout, H*W) in f32.
    """
    hw = h * w
    col = jax.lax.broadcasted_iota(jnp.int32, (1, hw), 1)   # output position p
    x_of = jnp.bitwise_and(col, w - 1)                      # p % w
    y_of = jnp.right_shift(col, _log2(w))                   # p // w
    taps = []
    for oy in (-1, 0, 1):
        for ox in (-1, 0, 1):
            s = oy * w + ox
            shifted = _shift_lanes(x, s)                     # x[:, p+s] (wrapped)
            valid = None
            if ox:
                valid = (x_of + ox >= 0) & (x_of + ox <= w - 1)
            if oy:
                vy = (y_of + oy >= 0) & (y_of + oy <= h - 1)
                valid = vy if valid is None else (valid & vy)
            if valid is not None:
                shifted = jnp.where(valid, shifted, F32(0.0))
            taps.append(shifted)
    stacked = jnp.concatenate(taps, axis=0)                  # (9*Cin, HW)
    return jnp.dot(wflat, stacked, preferred_element_type=F32)


def _maxpool2x2(x, h, w):
    """2x2 / stride 2 max pool on a (C, H*W) slab -> (C, H*W/4).

    Pairwise maxima via two lane shifts, then one 0/1 selection matmul to
    compact the even-(y,x) positions into the pooled (Hp*Wp) layout.
    """
    hp, wp = h // 2, w // 2
    hw, hwp = h * w, hp * wp
    v = jnp.maximum(x, _shift_lanes(x, 1))                   # max over dx at even x
    v = jnp.maximum(v, _shift_lanes(v, w))                   # max over dy at even y
    row = jax.lax.broadcasted_iota(jnp.int32, (hw, hwp), 0)
    col = jax.lax.broadcasted_iota(jnp.int32, (1, hwp), 1)
    xq = jnp.bitwise_and(col, wp - 1)
    yq = jnp.right_shift(col, _log2(wp))
    tgt = (2 * yq) * w + 2 * xq
    sel = jnp.where(row == tgt, F32(1.0), F32(0.0))
    return jnp.dot(v, sel, preferred_element_type=F32)


# ----------------------------------------------------------------------------
# The fused whole-network kernel (one grid step == one sample)
# ----------------------------------------------------------------------------
def _deepmoe_kernel(x_ref,
                    emb_w_ref, emb_b_ref, fc_w_ref, fc_b_ref,
                    gat_w_ref, gat_b_ref,
                    w0_ref, p0_ref, w1_ref, p1_ref, w2_ref, p2_ref,
                    cls_w_ref, cls_b_ref, ecw_ref, ecb_ref,
                    logits_ref, gates_ref, embcls_ref,
                    *, h, w, pools):
    x = x_ref[...]                                                    # (Cin, H*W)

    # --- ShallowEmbeddingNetwork: conv3x3 + ReLU -> GAP -> Linear ---
    e = jnp.maximum(_conv3x3(x, emb_w_ref[...], h, w) + emb_b_ref[...], 0.0)
    gap = jnp.sum(e, axis=1, keepdims=True) * F32(1.0 / (h * w))      # (ec, 1)
    emb = jnp.dot(fc_w_ref[...], gap, preferred_element_type=F32) + fc_b_ref[...]

    # --- all gating heads fused into one matmul: relu(Wg @ emb + bg) ---
    gall = jnp.maximum(
        jnp.dot(gat_w_ref[...], emb, preferred_element_type=F32) + gat_b_ref[...],
        0.0)                                                          # (G, 1)
    gates_ref[...] = gall

    # --- MoE blocks: gated 3x3 conv -> folded BN -> ReLU -> (maxpool) ---
    block_refs = ((w0_ref, p0_ref), (w1_ref, p1_ref), (w2_ref, p2_ref))
    act = x
    cur_h, cur_w = h, w
    off = 0
    for (wb_ref, pb_ref), pool in zip(block_refs, pools):
        cout = wb_ref.shape[0]
        gate = gall[off:off + cout, :]                                # (cout, 1)
        off += cout
        ge = gate * pb_ref[1]                        # gate * bn_scale
        add = pb_ref[0] * ge + pb_ref[2]             # bias*gate*scale + bn_shift
        acc = _conv3x3(act, wb_ref[...], cur_h, cur_w)                # (cout, HW)
        act = jnp.maximum(acc * ge + add, 0.0)
        if pool:
            act = _maxpool2x2(act, cur_h, cur_w)
            cur_h //= 2
            cur_w //= 2

    # --- classifier on NCHW-flattened features (channel-major, free in this
    #     layout): logits = sum_c act[c, :] @ Wcls[c] + b ---
    logits = cls_b_ref[...]                                           # (1, ncls)
    for c in range(act.shape[0]):
        logits = logits + jnp.dot(act[c:c + 1, :], cls_w_ref[c],
                                  preferred_element_type=F32)
    logits_ref[...] = logits

    # --- embedding classifier ---
    embcls_ref[...] = (jnp.dot(ecw_ref[...], emb, preferred_element_type=F32)
                       + ecb_ref[...])


# ----------------------------------------------------------------------------
# Wrapper
# ----------------------------------------------------------------------------
def _const_index_map(ndim):
    return lambda b: (0,) * ndim


def _flatten_conv_w(w9):
    """(9, Cout, Cin) -> (Cout, 9*Cin), columns ordered tap-major (t, ci)."""
    t, co, ci = w9.shape
    return jnp.transpose(w9, (1, 0, 2)).reshape(co, t * ci)


def forward(params, x_nchw, predict=False):
    B, cin, H, W = x_nchw.shape
    hw = H * W
    ncls = CFG["num_classes"]
    dim = CFG["dim"]
    ec = CFG["emb_channels"]
    feats = params["features"]
    pools = tuple(fp["pool"] for fp in feats)
    couts = [fp["w"].shape[1] for fp in feats]
    G = sum(couts)

    x_flat = x_nchw.reshape(B, cin, hw).astype(F32)      # NCHW-flattened, HW on lanes

    emb_w = _flatten_conv_w(params["emb"]["conv_w"])     # (ec, 9*cin)
    emb_b = params["emb"]["conv_b"].reshape(ec, 1)
    fc_w = params["emb"]["fc_w"]                         # (dim, ec)
    fc_b = params["emb"]["fc_b"].reshape(dim, 1)
    gat_w = params["gate_w"]                             # (G, dim)
    gat_b = params["gate_b"].reshape(G, 1)

    block_in = []
    for fp in feats:
        pvec = jnp.stack([fp["b"], fp["bn_scale"], fp["bn_shift"]],
                         axis=0).reshape(3, -1, 1)       # (3, cout, 1)
        block_in += [_flatten_conv_w(fp["w"]), pvec]     # (cout, 9*cin), (3,cout,1)

    cls_w = params["cls_w"]                              # (c_last, hwf, ncls)
    cls_b = params["cls_b"].reshape(1, ncls)
    ec_w = params["ec_w"]                                # (ncls, dim)
    ec_b = params["ec_b"].reshape(ncls, 1)

    in_arrays = [x_flat, emb_w, emb_b, fc_w, fc_b, gat_w, gat_b,
                 *block_in, cls_w, cls_b, ec_w, ec_b]
    in_specs = ([pl.BlockSpec((None, cin, hw), lambda b: (b, 0, 0))] +
                [pl.BlockSpec(a.shape, _const_index_map(a.ndim))
                 for a in in_arrays[1:]])

    out_shape = (jax.ShapeDtypeStruct((B, 1, ncls), F32),
                 jax.ShapeDtypeStruct((B, G, 1), F32),
                 jax.ShapeDtypeStruct((B, ncls, 1), F32))
    out_specs = (pl.BlockSpec((None, 1, ncls), lambda b: (b, 0, 0)),
                 pl.BlockSpec((None, G, 1), lambda b: (b, 0, 0)),
                 pl.BlockSpec((None, ncls, 1), lambda b: (b, 0, 0)))

    kernel = functools.partial(_deepmoe_kernel, h=H, w=W, pools=pools)
    logits3, gates3, embcls3 = pl.pallas_call(
        kernel,
        grid=(B,),
        out_shape=out_shape,
        in_specs=in_specs,
        out_specs=out_specs,
        compiler_params=pltpu.CompilerParams(
            dimension_semantics=("parallel",)),
    )(*in_arrays)

    logits = logits3.reshape(B, ncls)
    gates_cat = gates3.reshape(B, G)
    gates, off = [], 0
    for c in couts:
        gates.append(gates_cat[:, off:off + c])
        off += c
    emb_class = embcls3.reshape(B, ncls)
    if predict:
        return logits
    return logits, gates, emb_class


# ----------------------------------------------------------------------------
# Parameter construction (deterministic, synthetic)
# ----------------------------------------------------------------------------
def _normal(key, shape, scale=0.1):
    return scale * jax.random.normal(key, shape, dtype=F32)


def _fold_bn(gamma, beta, mean, var, eps=1e-5):
    inv_std = 1.0 / jnp.sqrt(var + eps)
    scale = gamma * inv_std
    shift = beta - mean * scale
    return scale, shift


def init_params(key):
    keys = iter(jax.random.split(key, 64))
    p = {}
    cin = CFG["in_channels"]
    ec = CFG["emb_channels"]
    dim = CFG["dim"]
    ncls = CFG["num_classes"]

    # ShallowEmbeddingNetwork: conv3x3(cin->ec)+ReLU -> GAP -> Linear(ec->dim)
    p["emb"] = dict(
        conv_w=_normal(next(keys), (9, ec, cin)),
        conv_b=_normal(next(keys), (ec,)),
        fc_w=_normal(next(keys), (dim, ec)),
        fc_b=_normal(next(keys), (dim,)),
    )

    # MoeBlocks (conv weight stored per tap as (9, cout, cin))
    p["features"] = []
    for c_in, c_out, pool in CFG["features"]:
        gamma = 1.0 + _normal(next(keys), (c_out,))
        beta = _normal(next(keys), (c_out,))
        mean = _normal(next(keys), (c_out,))
        var = 1.0 + jnp.abs(_normal(next(keys), (c_out,)))
        scale, shift = _fold_bn(gamma, beta, mean, var)
        p["features"].append(dict(
            w=_normal(next(keys), (9, c_out, c_in)),
            b=_normal(next(keys), (c_out,)),
            bn_scale=scale, bn_shift=shift, pool=pool,
        ))

    # MultiHeadedSparseGatingNetwork heads (Linear(dim->cout)+ReLU), concatenated
    couts = [c for _, c, _ in CFG["features"]]
    G = sum(couts)
    p["gate_w"] = _normal(next(keys), (G, dim))
    p["gate_b"] = 0.5 + _normal(next(keys), (G,))   # bias >0 so gates mostly active

    # classifier: Linear(c_last * Hf * Wf -> num_classes), stored (c_last, HfWf, ncls)
    n_pool = sum(1 for *_, pool in CFG["features"] if pool)
    hf = CFG["H"] // (2 ** n_pool)
    wf = CFG["W"] // (2 ** n_pool)
    c_last = CFG["features"][-1][1]
    p["cls_w"] = _normal(next(keys), (c_last, hf * wf, ncls))
    p["cls_b"] = _normal(next(keys), (ncls,))

    # embedding_classifier: Linear(dim -> num_classes)
    p["ec_w"] = _normal(next(keys), (ncls, dim))
    p["ec_b"] = _normal(next(keys), (ncls,))
    return p


# ----------------------------------------------------------------------------
# Pure-JAX reference (independent of the kernel's shift/stack machinery)
# ----------------------------------------------------------------------------
def ref_forward(params, x_nchw):
    B = x_nchw.shape[0]
    x = x_nchw.astype(F32)
    ncls = CFG["num_classes"]

    def conv3x3(a, w9):
        hh, ww = a.shape[2], a.shape[3]
        ap = jnp.pad(a, ((0, 0), (0, 0), (1, 1), (1, 1)))
        out = 0.0
        for ky in range(3):
            for kx in range(3):
                out = out + jnp.einsum("oc,bchw->bohw", w9[ky * 3 + kx],
                                       ap[:, :, ky:ky + hh, kx:kx + ww])
        return out

    def maxpool(a):
        b, c, hh, ww = a.shape
        return a.reshape(b, c, hh // 2, 2, ww // 2, 2).max(axis=(3, 5))

    e = jax.nn.relu(conv3x3(x, params["emb"]["conv_w"])
                    + params["emb"]["conv_b"][None, :, None, None])
    gap = e.mean(axis=(2, 3))
    emb = gap @ params["emb"]["fc_w"].T + params["emb"]["fc_b"]

    gates = []
    a = x
    off = 0
    for fp in params["features"]:
        c_out = fp["w"].shape[1]
        gw = params["gate_w"][off:off + c_out]
        gb = params["gate_b"][off:off + c_out]
        off += c_out
        gate = jax.nn.relu(emb @ gw.T + gb)
        gates.append(gate)
        z = conv3x3(a, fp["w"]) + fp["b"][None, :, None, None]
        z = z * gate[:, :, None, None]
        z = z * fp["bn_scale"][None, :, None, None] + fp["bn_shift"][None, :, None, None]
        a = jax.nn.relu(z)
        if fp["pool"]:
            a = maxpool(a)

    flat = a.reshape(B, -1)                                 # NCHW flatten
    logits = flat @ params["cls_w"].reshape(-1, ncls) + params["cls_b"]
    emb_class = emb @ params["ec_w"].T + params["ec_b"]
    return logits, gates, emb_class


# ----------------------------------------------------------------------------
if __name__ == "__main__":
    key = jax.random.PRNGKey(0)
    k_param, k_x = jax.random.split(key)
    params = init_params(k_param)

    # PyTorch-convention NCHW input: batch=2, channels=4, 16x16 spatial
    x = jax.random.normal(k_x, (2, CFG["in_channels"], CFG["H"], CFG["W"]),
                          dtype=F32)

    logits, gates, emb_class = forward(params, x, predict=False)
    jax.block_until_ready(logits)
    jax.block_until_ready(emb_class)
    for g in gates:
        jax.block_until_ready(g)

    # sanity check against the pure-JAX reference
    r_logits, r_gates, r_emb_class = ref_forward(params, x)

    def check(a, b, name):
        err = float(jnp.max(jnp.abs(a - b)))
        assert jnp.allclose(a, b, atol=1e-2, rtol=1e-2), \
            f"{name} mismatch, max abs err {err}"

    check(logits, r_logits, "logits")
    check(emb_class, r_emb_class, "emb_class")
    for i, (g, rg) in enumerate(zip(gates, r_gates)):
        check(g, rg, f"gate{i}")

    print("KERNEL_OK")
</pallas_src>

<mosaic_0001>
module attributes {stable_mosaic.version = 11 : i64} {
  func.func @_deepmoe_kernel(%arg0: i32, %arg1: memref<1x4x256xf32, #tpu.memory_space<vmem>>, %arg2: memref<8x36xf32, #tpu.memory_space<vmem>>, %arg3: memref<8x1xf32, #tpu.memory_space<vmem>>, %arg4: memref<32x8xf32, #tpu.memory_space<vmem>>, %arg5: memref<32x1xf32, #tpu.memory_space<vmem>>, %arg6: memref<40x32xf32, #tpu.memory_space<vmem>>, %arg7: memref<40x1xf32, #tpu.memory_space<vmem>>, %arg8: memref<8x36xf32, #tpu.memory_space<vmem>>, %arg9: memref<3x8x1xf32, #tpu.memory_space<vmem>>, %arg10: memref<16x72xf32, #tpu.memory_space<vmem>>, %arg11: memref<3x16x1xf32, #tpu.memory_space<vmem>>, %arg12: memref<16x144xf32, #tpu.memory_space<vmem>>, %arg13: memref<3x16x1xf32, #tpu.memory_space<vmem>>, %arg14: memref<16x16x10xf32, #tpu.memory_space<vmem>>, %arg15: memref<1x10xf32, #tpu.memory_space<vmem>>, %arg16: memref<10x32xf32, #tpu.memory_space<vmem>>, %arg17: memref<10x1xf32, #tpu.memory_space<vmem>>, %arg18: memref<1x1x10xf32, #tpu.memory_space<vmem>>, %arg19: memref<1x40x1xf32, #tpu.memory_space<vmem>>, %arg20: memref<1x10x1xf32, #tpu.memory_space<vmem>>) attributes {dimension_semantics = [#tpu.dimension_semantics<parallel>], iteration_bounds = array<i64: 2>, scalar_prefetch = 0 : i64, scratch_operands = 0 : i64, tpu.core_type = #tpu.core_type<tc>, window_params = [{transform_indices = @transform_0, window_bounds = array<i64: 1, 4, 256>}, {pipeline_mode = #tpu.pipeline_mode<synchronous>, transform_indices = @transform_1, window_bounds = array<i64: 8, 36>}, {pipeline_mode = #tpu.pipeline_mode<synchronous>, transform_indices = @transform_2, window_bounds = array<i64: 8, 1>}, {pipeline_mode = #tpu.pipeline_mode<synchronous>, transform_indices = @transform_3, window_bounds = array<i64: 32, 8>}, {pipeline_mode = #tpu.pipeline_mode<synchronous>, transform_indices = @transform_4, window_bounds = array<i64: 32, 1>}, {pipeline_mode = #tpu.pipeline_mode<synchronous>, transform_indices = @transform_5, window_bounds = array<i64: 40, 32>}, {pipeline_mode = #tpu.pipeline_mode<synchronous>, transform_indices = @transform_6, window_bounds = array<i64: 40, 1>}, {pipeline_mode = #tpu.pipeline_mode<synchronous>, transform_indices = @transform_7, window_bounds = array<i64: 8, 36>}, {pipeline_mode = #tpu.pipeline_mode<synchronous>, transform_indices = @transform_8, window_bounds = array<i64: 3, 8, 1>}, {pipeline_mode = #tpu.pipeline_mode<synchronous>, transform_indices = @transform_9, window_bounds = array<i64: 16, 72>}, {pipeline_mode = #tpu.pipeline_mode<synchronous>, transform_indices = @transform_10, window_bounds = array<i64: 3, 16, 1>}, {pipeline_mode = #tpu.pipeline_mode<synchronous>, transform_indices = @transform_11, window_bounds = array<i64: 16, 144>}, {pipeline_mode = #tpu.pipeline_mode<synchronous>, transform_indices = @transform_12, window_bounds = array<i64: 3, 16, 1>}, {pipeline_mode = #tpu.pipeline_mode<synchronous>, transform_indices = @transform_13, window_bounds = array<i64: 16, 16, 10>}, {pipeline_mode = #tpu.pipeline_mode<synchronous>, transform_indices = @transform_14, window_bounds = array<i64: 1, 10>}, {pipeline_mode = #tpu.pipeline_mode<synchronous>, transform_indices = @transform_15, window_bounds = array<i64: 10, 32>}, {pipeline_mode = #tpu.pipeline_mode<synchronous>, transform_indices = @transform_16, window_bounds = array<i64: 10, 1>}, {transform_indices = @transform_17, window_bounds = array<i64: 1, 1, 10>}, {transform_indices = @transform_18, window_bounds = array<i64: 1, 40, 1>}, {transform_indices = @transform_19, window_bounds = array<i64: 1, 10, 1>}]} {
    %c0 = arith.constant 0 : index
    %c0_0 = arith.constant 0 : index
    %c0_1 = arith.constant 0 : index
    %0 = vector.load %arg1[%c0, %c0_0, %c0_1] : memref<1x4x256xf32, #tpu.memory_space<vmem>>, vector<1x4x256xf32>
    %1 = vector.shape_cast %0 : vector<1x4x256xf32> to vector<4x256xf32>
    %c0_2 = arith.constant 0 : index
    %c0_3 = arith.constant 0 : index
    %2 = vector.load %arg2[%c0_2, %c0_3] : memref<8x36xf32, #tpu.memory_space<vmem>>, vector<8x36xf32>
    %3 = tpu.iota {dimensions = array<i32: 1>} : vector<1x256xi32>
    %c15_i32 = arith.constant 15 : i32
    %4 = vector.broadcast %c15_i32 : i32 to vector<1x256xi32>
    %5 = arith.andi %3, %4 : vector<1x256xi32>
    %c4_i32 = arith.constant 4 : i32
    %6 = vector.broadcast %c4_i32 : i32 to vector<1x256xi32>
    %7 = arith.shrsi %3, %6 : vector<1x256xi32>
    %8 = vector.extract_strided_slice %1 {offsets = [0, 239], sizes = [4, 17], strides = [1, 1]} : vector<4x256xf32> to vector<4x17xf32>
    %9 = vector.extract_strided_slice %1 {offsets = [0, 0], sizes = [4, 239], strides = [1, 1]} : vector<4x256xf32> to vector<4x239xf32>
    %10 = tpu.concatenate %8, %9 in 1 : vector<4x17xf32>, vector<4x239xf32> -> vector<4x256xf32>
    %c-1_i32 = arith.constant -1 : i32
    %11 = vector.broadcast %c-1_i32 : i32 to vector<1x256xi32>
    %12 = arith.addi %5, %11 : vector<1x256xi32>
    %c0_i32 = arith.constant 0 : i32
    %13 = vector.broadcast %c0_i32 : i32 to vector<1x256xi32>
    %14 = arith.cmpi sge, %12, %13 : vector<1x256xi32>
    %c-1_i32_4 = arith.constant -1 : i32
    %15 = vector.broadcast %c-1_i32_4 : i32 to vector<1x256xi32>
    %16 = arith.addi %5, %15 : vector<1x256xi32>
    %c15_i32_5 = arith.constant 15 : i32
    %17 = vector.broadcast %c15_i32_5 : i32 to vector<1x256xi32>
    %18 = arith.cmpi sle, %16, %17 : vector<1x256xi32>
    %19 = arith.andi %14, %18 : vector<1x256xi1>
    %c-1_i32_6 = arith.constant -1 : i32
    %20 = vector.broadcast %c-1_i32_6 : i32 to vector<1x256xi32>
    %21 = arith.addi %7, %20 : vector<1x256xi32>
    %c0_i32_7 = arith.constant 0 : i32
    %22 = vector.broadcast %c0_i32_7 : i32 to vector<1x256xi32>
    %23 = arith.cmpi sge, %21, %22 : vector<1x256xi32>
    %c-1_i32_8 = arith.constant -1 : i32
    %24 = vector.broadcast %c-1_i32_8 : i32 to vector<1x256xi32>
    %25 = arith.addi %7, %24 : vector<1x256xi32>
    %c15_i32_9 = arith.constant 15 : i32
    %26 = vector.broadcast %c15_i32_9 : i32 to vector<1x256xi32>
    %27 = arith.cmpi sle, %25, %26 : vector<1x256xi32>
    %28 = arith.andi %23, %27 : vector<1x256xi1>
    %29 = arith.andi %19, %28 : vector<1x256xi1>
    %cst = arith.constant 0.000000e+00 : f32
    %30 = vector.shape_cast %29 : vector<1x256xi1> to vector<1x256xi1>
    %31 = vector.broadcast %30 : vector<1x256xi1> to vector<4x256xi1>
    %32 = vector.broadcast %cst : f32 to vector<4x256xf32>
    %33 = arith.select %31, %10, %32 : vector<4x256xi1>, vector<4x256xf32>
    %34 = vector.extract_strided_slice %1 {offsets = [0, 240], sizes = [4, 16], strides = [1, 1]} : vector<4x256xf32> to vector<4x16xf32>
    %35 = vector.extract_strided_slice %1 {offsets = [0, 0], sizes = [4, 240], strides = [1, 1]} : vector<4x256xf32> to vector<4x240xf32>
    %36 = tpu.concatenate %34, %35 in 1 : vector<4x16xf32>, vector<4x240xf32> -> vector<4x256xf32>
    %c-1_i32_10 = arith.constant -1 : i32
    %37 = vector.broadcast %c-1_i32_10 : i32 to vector<1x256xi32>
    %38 = arith.addi %7, %37 : vector<1x256xi32>
    %c0_i32_11 = arith.constant 0 : i32
    %39 = vector.broadcast %c0_i32_11 : i32 to vector<1x256xi32>
    %40 = arith.cmpi sge, %38, %39 : vector<1x256xi32>
    %c-1_i32_12 = arith.constant -1 : i32
    %41 = vector.broadcast %c-1_i32_12 : i32 to vector<1x256xi32>
    %42 = arith.addi %7, %41 : vector<1x256xi32>
    %c15_i32_13 = arith.constant 15 : i32
    %43 = vector.broadcast %c15_i32_13 : i32 to vector<1x256xi32>
    %44 = arith.cmpi sle, %42, %43 : vector<1x256xi32>
    %45 = arith.andi %40, %44 : vector<1x256xi1>
    %cst_14 = arith.constant 0.000000e+00 : f32
    %46 = vector.shape_cast %45 : vector<1x256xi1> to vector<1x256xi1>
    %47 = vector.broadcast %46 : vector<1x256xi1> to vector<4x256xi1>
    %48 = vector.broadcast %cst_14 : f32 to vector<4x256xf32>
    %49 = arith.select %47, %36, %48 : vector<4x256xi1>, vector<4x256xf32>
    %50 = vector.extract_strided_slice %1 {offsets = [0, 241], sizes = [4, 15], strides = [1, 1]} : vector<4x256xf32> to vector<4x15xf32>
    %51 = vector.extract_strided_slice %1 {offsets = [0, 0], sizes = [4, 241], strides = [1, 1]} : vector<4x256xf32> to vector<4x241xf32>
    %52 = tpu.concatenate %50, %51 in 1 : vector<4x15xf32>, vector<4x241xf32> -> vector<4x256xf32>
    %c1_i32 = arith.constant 1 : i32
    %53 = vector.broadcast %c1_i32 : i32 to vector<1x256xi32>
    %54 = arith.addi %5, %53 : vector<1x256xi32>
    %c0_i32_15 = arith.constant 0 : i32
    %55 = vector.broadcast %c0_i32_15 : i32 to vector<1x256xi32>
    %56 = arith.cmpi sge, %54, %55 : vector<1x256xi32>
    %c1_i32_16 = arith.constant 1 : i32
    %57 = vector.broadcast %c1_i32_16 : i32 to vector<1x256xi32>
    %58 = arith.addi %5, %57 : vector<1x256xi32>
    %c15_i32_17 = arith.constant 15 : i32
    %59 = vector.broadcast %c15_i32_17 : i32 to vector<1x256xi32>
    %60 = arith.cmpi sle, %58, %59 : vector<1x256xi32>
    %61 = arith.andi %56, %60 : vector<1x256xi1>
    %c-1_i32_18 = arith.constant -1 : i32
    %62 = vector.broadcast %c-1_i32_18 : i32 to vector<1x256xi32>
    %63 = arith.addi %7, %62 : vector<1x256xi32>
    %c0_i32_19 = arith.constant 0 : i32
    %64 = vector.broadcast %c0_i32_19 : i32 to vector<1x256xi32>
    %65 = arith.cmpi sge, %63, %64 : vector<1x256xi32>
    %c-1_i32_20 = arith.constant -1 : i32
    %66 = vector.broadcast %c-1_i32_20 : i32 to vector<1x256xi32>
    %67 = arith.addi %7, %66 : vector<1x256xi32>
    %c15_i32_21 = arith.constant 15 : i32
    %68 = vector.broadcast %c15_i32_21 : i32 to vector<1x256xi32>
    %69 = arith.cmpi sle, %67, %68 : vector<1x256xi32>
    %70 = arith.andi %65, %69 : vector<1x256xi1>
    %71 = arith.andi %61, %70 : vector<1x256xi1>
    %cst_22 = arith.constant 0.000000e+00 : f32
    %72 = vector.shape_cast %71 : vector<1x256xi1> to vector<1x256xi1>
    %73 = vector.broadcast %72 : vector<1x256xi1> to vector<4x256xi1>
    %74 = vector.broadcast %cst_22 : f32 to vector<4x256xf32>
    %75 = arith.select %73, %52, %74 : vector<4x256xi1>, vector<4x256xf32>
    %76 = vector.extract_strided_slice %1 {offsets = [0, 255], sizes = [4, 1], strides = [1, 1]} : vector<4x256xf32> to vector<4x1xf32>
    %77 = vector.extract_strided_slice %1 {offsets = [0, 0], sizes = [4, 255], strides = [1, 1]} : vector<4x256xf32> to vector<4x255xf32>
    %78 = tpu.concatenate %76, %77 in 1 : vector<4x1xf32>, vector<4x255xf32> -> vector<4x256xf32>
    %c-1_i32_23 = arith.constant -1 : i32
    %79 = vector.broadcast %c-1_i32_23 : i32 to vector<1x256xi32>
    %80 = arith.addi %5, %79 : vector<1x256xi32>
    %c0_i32_24 = arith.constant 0 : i32
    %81 = vector.broadcast %c0_i32_24 : i32 to vector<1x256xi32>
    %82 = arith.cmpi sge, %80, %81 : vector<1x256xi32>
    %c-1_i32_25 = arith.constant -1 : i32
    %83 = vector.broadcast %c-1_i32_25 : i32 to vector<1x256xi32>
    %84 = arith.addi %5, %83 : vector<1x256xi32>
    %c15_i32_26 = arith.constant 15 : i32
    %85 = vector.broadcast %c15_i32_26 : i32 to vector<1x256xi32>
    %86 = arith.cmpi sle, %84, %85 : vector<1x256xi32>
    %87 = arith.andi %82, %86 : vector<1x256xi1>
    %cst_27 = arith.constant 0.000000e+00 : f32
    %88 = vector.shape_cast %87 : vector<1x256xi1> to vector<1x256xi1>
    %89 = vector.broadcast %88 : vector<1x256xi1> to vector<4x256xi1>
    %90 = vector.broadcast %cst_27 : f32 to vector<4x256xf32>
    %91 = arith.select %89, %78, %90 : vector<4x256xi1>, vector<4x256xf32>
    %92 = vector.extract_strided_slice %1 {offsets = [0, 1], sizes = [4, 255], strides = [1, 1]} : vector<4x256xf32> to vector<4x255xf32>
    %93 = vector.extract_strided_slice %1 {offsets = [0, 0], sizes = [4, 1], strides = [1, 1]} : vector<4x256xf32> to vector<4x1xf32>
    %94 = tpu.concatenate %92, %93 in 1 : vector<4x255xf32>, vector<4x1xf32> -> vector<4x256xf32>
    %c1_i32_28 = arith.constant 1 : i32
    %95 = vector.broadcast %c1_i32_28 : i32 to vector<1x256xi32>
    %96 = arith.addi %5, %95 : vector<1x256xi32>
    %c0_i32_29 = arith.constant 0 : i32
    %97 = vector.broadcast %c0_i32_29 : i32 to vector<1x256xi32>
    %98 = arith.cmpi sge, %96, %97 : vector<1x256xi32>
    %c1_i32_30 = arith.constant 1 : i32
    %99 = vector.broadcast %c1_i32_30 : i32 to vector<1x256xi32>
    %100 = arith.addi %5, %99 : vector<1x256xi32>
    %c15_i32_31 = arith.constant 15 : i32
    %101 = vector.broadcast %c15_i32_31 : i32 to vector<1x256xi32>
    %102 = arith.cmpi sle, %100, %101 : vector<1x256xi32>
    %103 = arith.andi %98, %102 : vector<1x256xi1>
    %cst_32 = arith.constant 0.000000e+00 : f32
    %104 = vector.shape_cast %103 : vector<1x256xi1> to vector<1x256xi1>
    %105 = vector.broadcast %104 : vector<1x256xi1> to vector<4x256xi1>
    %106 = vector.broadcast %cst_32 : f32 to vector<4x256xf32>
    %107 = arith.select %105, %94, %106 : vector<4x256xi1>, vector<4x256xf32>
    %108 = vector.extract_strided_slice %1 {offsets = [0, 15], sizes = [4, 241], strides = [1, 1]} : vector<4x256xf32> to vector<4x241xf32>
    %109 = vector.extract_strided_slice %1 {offsets = [0, 0], sizes = [4, 15], strides = [1, 1]} : vector<4x256xf32> to vector<4x15xf32>
    %110 = tpu.concatenate %108, %109 in 1 : vector<4x241xf32>, vector<4x15xf32> -> vector<4x256xf32>
    %c-1_i32_33 = arith.constant -1 : i32
    %111 = vector.broadcast %c-1_i32_33 : i32 to vector<1x256xi32>
    %112 = arith.addi %5, %111 : vector<1x256xi32>
    %c0_i32_34 = arith.constant 0 : i32
    %113 = vector.broadcast %c0_i32_34 : i32 to vector<1x256xi32>
    %114 = arith.cmpi sge, %112, %113 : vector<1x256xi32>
    %c-1_i32_35 = arith.constant -1 : i32
    %115 = vector.broadcast %c-1_i32_35 : i32 to vector<1x256xi32>
    %116 = arith.addi %5, %115 : vector<1x256xi32>
    %c15_i32_36 = arith.constant 15 : i32
    %117 = vector.broadcast %c15_i32_36 : i32 to vector<1x256xi32>
    %118 = arith.cmpi sle, %116, %117 : vector<1x256xi32>
    %119 = arith.andi %114, %118 : vector<1x256xi1>
    %c1_i32_37 = arith.constant 1 : i32
    %120 = vector.broadcast %c1_i32_37 : i32 to vector<1x256xi32>
    %121 = arith.addi %7, %120 : vector<1x256xi32>
    %c0_i32_38 = arith.constant 0 : i32
    %122 = vector.broadcast %c0_i32_38 : i32 to vector<1x256xi32>
    %123 = arith.cmpi sge, %121, %122 : vector<1x256xi32>
    %c1_i32_39 = arith.constant 1 : i32
    %124 = vector.broadcast %c1_i32_39 : i32 to vector<1x256xi32>
    %125 = arith.addi %7, %124 : vector<1x256xi32>
    %c15_i32_40 = arith.constant 15 : i32
    %126 = vector.broadcast %c15_i32_40 : i32 to vector<1x256xi32>
    %127 = arith.cmpi sle, %125, %126 : vector<1x256xi32>
    %128 = arith.andi %123, %127 : vector<1x256xi1>
    %129 = arith.andi %119, %128 : vector<1x256xi1>
    %cst_41 = arith.constant 0.000000e+00 : f32
    %130 = vector.shape_cast %129 : vector<1x256xi1> to vector<1x256xi1>
    %131 = vector.broadcast %130 : vector<1x256xi1> to vector<4x256xi1>
    %132 = vector.broadcast %cst_41 : f32 to vector<4x256xf32>
    %133 = arith.select %131, %110, %132 : vector<4x256xi1>, vector<4x256xf32>
    %134 = vector.extract_strided_slice %1 {offsets = [0, 16], sizes = [4, 240], strides = [1, 1]} : vector<4x256xf32> to vector<4x240xf32>
    %135 = vector.extract_strided_slice %1 {offsets = [0, 0], sizes = [4, 16], strides = [1, 1]} : vector<4x256xf32> to vector<4x16xf32>
    %136 = tpu.concatenate %134, %135 in 1 : vector<4x240xf32>, vector<4x16xf32> -> vector<4x256xf32>
    %c1_i32_42 = arith.constant 1 : i32
    %137 = vector.broadcast %c1_i32_42 : i32 to vector<1x256xi32>
    %138 = arith.addi %7, %137 : vector<1x256xi32>
    %c0_i32_43 = arith.constant 0 : i32
    %139 = vector.broadcast %c0_i32_43 : i32 to vector<1x256xi32>
    %140 = arith.cmpi sge, %138, %139 : vector<1x256xi32>
    %c1_i32_44 = arith.constant 1 : i32
    %141 = vector.broadcast %c1_i32_44 : i32 to vector<1x256xi32>
    %142 = arith.addi %7, %141 : vector<1x256xi32>
    %c15_i32_45 = arith.constant 15 : i32
    %143 = vector.broadcast %c15_i32_45 : i32 to vector<1x256xi32>
    %144 = arith.cmpi sle, %142, %143 : vector<1x256xi32>
    %145 = arith.andi %140, %144 : vector<1x256xi1>
    %cst_46 = arith.constant 0.000000e+00 : f32
    %146 = vector.shape_cast %145 : vector<1x256xi1> to vector<1x256xi1>
    %147 = vector.broadcast %146 : vector<1x256xi1> to vector<4x256xi1>
    %148 = vector.broadcast %cst_46 : f32 to vector<4x256xf32>
    %149 = arith.select %147, %136, %148 : vector<4x256xi1>, vector<4x256xf32>
    %150 = vector.extract_strided_slice %1 {offsets = [0, 17], sizes = [4, 239], strides = [1, 1]} : vector<4x256xf32> to vector<4x239xf32>
    %151 = vector.extract_strided_slice %1 {offsets = [0, 0], sizes = [4, 17], strides = [1, 1]} : vector<4x256xf32> to vector<4x17xf32>
    %152 = tpu.concatenate %150, %151 in 1 : vector<4x239xf32>, vector<4x17xf32> -> vector<4x256xf32>
    %c1_i32_47 = arith.constant 1 : i32
    %153 = vector.broadcast %c1_i32_47 : i32 to vector<1x256xi32>
    %154 = arith.addi %5, %153 : vector<1x256xi32>
    %c0_i32_48 = arith.constant 0 : i32
    %155 = vector.broadcast %c0_i32_48 : i32 to vector<1x256xi32>
    %156 = arith.cmpi sge, %154, %155 : vector<1x256xi32>
    %c1_i32_49 = arith.constant 1 : i32
    %157 = vector.broadcast %c1_i32_49 : i32 to vector<1x256xi32>
    %158 = arith.addi %5, %157 : vector<1x256xi32>
    %c15_i32_50 = arith.constant 15 : i32
    %159 = vector.broadcast %c15_i32_50 : i32 to vector<1x256xi32>
    %160 = arith.cmpi sle, %158, %159 : vector<1x256xi32>
    %161 = arith.andi %156, %160 : vector<1x256xi1>
    %c1_i32_51 = arith.constant 1 : i32
    %162 = vector.broadcast %c1_i32_51 : i32 to vector<1x256xi32>
    %163 = arith.addi %7, %162 : vector<1x256xi32>
    %c0_i32_52 = arith.constant 0 : i32
    %164 = vector.broadcast %c0_i32_52 : i32 to vector<1x256xi32>
    %165 = arith.cmpi sge, %163, %164 : vector<1x256xi32>
    %c1_i32_53 = arith.constant 1 : i32
    %166 = vector.broadcast %c1_i32_53 : i32 to vector<1x256xi32>
    %167 = arith.addi %7, %166 : vector<1x256xi32>
    %c15_i32_54 = arith.constant 15 : i32
    %168 = vector.broadcast %c15_i32_54 : i32 to vector<1x256xi32>
    %169 = arith.cmpi sle, %167, %168 : vector<1x256xi32>
    %170 = arith.andi %165, %169 : vector<1x256xi1>
    %171 = arith.andi %161, %170 : vector<1x256xi1>
    %cst_55 = arith.constant 0.000000e+00 : f32
    %172 = vector.shape_cast %171 : vector<1x256xi1> to vector<1x256xi1>
    %173 = vector.broadcast %172 : vector<1x256xi1> to vector<4x256xi1>
    %174 = vector.broadcast %cst_55 : f32 to vector<4x256xf32>
    %175 = arith.select %173, %152, %174 : vector<4x256xi1>, vector<4x256xf32>
    %176 = tpu.concatenate %33, %49, %75, %91, %1, %107, %133, %149, %175 in 0 : vector<4x256xf32>, vector<4x256xf32>, vector<4x256xf32>, vector<4x256xf32>, vector<4x256xf32>, vector<4x256xf32>, vector<4x256xf32>, vector<4x256xf32>, vector<4x256xf32> -> vector<36x256xf32>
    %cst_56 = arith.constant dense<0.000000e+00> : vector<8x256xf32>
    %177 = tpu.matmul %2, %176, %cst_56 {dimension_numbers = #tpu.dot_dimension_numbers<[1], [0], [0], [1], [0, 0, 1, 1], [], []>, precision = #tpu.contract_precision<fp32>} : vector<8x36xf32>, vector<36x256xf32>, vector<8x256xf32> -> vector<8x256xf32>
    %c0_57 = arith.constant 0 : index
    %c0_58 = arith.constant 0 : index
    %178 = vector.load %arg3[%c0_57, %c0_58] : memref<8x1xf32, #tpu.memory_space<vmem>>, vector<8x1xf32>
    %179 = vector.broadcast %178 : vector<8x1xf32> to vector<8x256xf32>
    %180 = arith.addf %177, %179 : vector<8x256xf32>
    %cst_59 = arith.constant 0.000000e+00 : f32
    %181 = vector.broadcast %cst_59 : f32 to vector<8x256xf32>
    %182 = arith.maximumf %180, %181 : vector<8x256xf32>
    %cst_60 = arith.constant dense<0.000000e+00> : vector<8xf32>
    %183 = vector.multi_reduction <add>, %182, %cst_60 [1] : vector<8x256xf32> to vector<8xf32>
    %184 = vector.shape_cast %183 : vector<8xf32> to vector<8x1xf32>
    %cst_61 = arith.constant 3.906250e-03 : f32
    %185 = vector.broadcast %cst_61 : f32 to vector<8x1xf32>
    %186 = arith.mulf %184, %185 : vector<8x1xf32>
    %c0_62 = arith.constant 0 : index
    %c0_63 = arith.constant 0 : index
    %187 = vector.load %arg4[%c0_62, %c0_63] : memref<32x8xf32, #tpu.memory_space<vmem>>, vector<32x8xf32>
    %cst_64 = arith.constant dense<0.000000e+00> : vector<32x1xf32>
    %188 = tpu.matmul %187, %186, %cst_64 {dimension_numbers = #tpu.dot_dimension_numbers<[1], [0], [0], [1], [0, 0, 1, 1], [], []>, precision = #tpu.contract_precision<fp32>} : vector<32x8xf32>, vector<8x1xf32>, vector<32x1xf32> -> vector<32x1xf32>
    %c0_65 = arith.constant 0 : index
    %c0_66 = arith.constant 0 : index
    %189 = vector.load %arg5[%c0_65, %c0_66] : memref<32x1xf32, #tpu.memory_space<vmem>>, vector<32x1xf32>
    %190 = arith.addf %188, %189 : vector<32x1xf32>
    %c0_67 = arith.constant 0 : index
    %c0_68 = arith.constant 0 : index
    %191 = vector.load %arg6[%c0_67, %c0_68] : memref<40x32xf32, #tpu.memory_space<vmem>>, vector<40x32xf32>
    %cst_69 = arith.constant dense<0.000000e+00> : vector<40x1xf32>
    %192 = tpu.matmul %191, %190, %cst_69 {dimension_numbers = #tpu.dot_dimension_numbers<[1], [0], [0], [1], [0, 0, 1, 1], [], []>, precision = #tpu.contract_precision<fp32>} : vector<40x32xf32>, vector<32x1xf32>, vector<40x1xf32> -> vector<40x1xf32>
    %c0_70 = arith.constant 0 : index
    %c0_71 = arith.constant 0 : index
    %193 = vector.load %arg7[%c0_70, %c0_71] : memref<40x1xf32, #tpu.memory_space<vmem>>, vector<40x1xf32>
    %194 = arith.addf %192, %193 : vector<40x1xf32>
    %cst_72 = arith.constant 0.000000e+00 : f32
    %195 = vector.broadcast %cst_72 : f32 to vector<40x1xf32>
    %196 = arith.maximumf %194, %195 : vector<40x1xf32>
    %c0_73 = arith.constant 0 : index
    %c0_74 = arith.constant 0 : index
    %c0_75 = arith.constant 0 : index
    %197 = vector.load %arg19[%c0_73, %c0_74, %c0_75] : memref<1x40x1xf32, #tpu.memory_space<vmem>>, vector<1x40x1xf32>
    %198 = vector.shape_cast %197 : vector<1x40x1xf32> to vector<40x1xf32>
    %199 = vector.shape_cast %196 : vector<40x1xf32> to vector<1x40x1xf32>
    tpu.vector_store %arg19[%c0_73, %c0_74, %c0_75], %199 {strides = array<i32>} : memref<1x40x1xf32, #tpu.memory_space<vmem>>, vector<1x40x1xf32>,
    %200 = vector.extract_strided_slice %196 {offsets = [0, 0], sizes = [8, 1], strides = [1, 1]} : vector<40x1xf32> to vector<8x1xf32>
    %c1 = arith.constant 1 : index
    %c0_76 = arith.constant 0 : index
    %c0_77 = arith.constant 0 : index
    %201 = vector.load %arg9[%c1, %c0_76, %c0_77] : memref<3x8x1xf32, #tpu.memory_space<vmem>>, vector<1x8x1xf32>
    %202 = vector.shape_cast %201 : vector<1x8x1xf32> to vector<8x1xf32>
    %203 = arith.mulf %200, %202 : vector<8x1xf32>
    %c0_78 = arith.constant 0 : index
    %c0_79 = arith.constant 0 : index
    %c0_80 = arith.constant 0 : index
    %204 = vector.load %arg9[%c0_78, %c0_79, %c0_80] : memref<3x8x1xf32, #tpu.memory_space<vmem>>, vector<1x8x1xf32>
    %205 = vector.shape_cast %204 : vector<1x8x1xf32> to vector<8x1xf32>
    %206 = arith.mulf %205, %203 : vector<8x1xf32>
    %c2 = arith.constant 2 : index
    %c0_81 = arith.constant 0 : index
    %c0_82 = arith.constant 0 : index
    %207 = vector.load %arg9[%c2, %c0_81, %c0_82] : memref<3x8x1xf32, #tpu.memory_space<vmem>>, vector<1x8x1xf32>
    %208 = vector.shape_cast %207 : vector<1x8x1xf32> to vector<8x1xf32>
    %209 = arith.addf %206, %208 : vector<8x1xf32>
    %c0_83 = arith.constant 0 : index
    %c0_84 = arith.constant 0 : index
    %210 = vector.load %arg8[%c0_83, %c0_84] : memref<8x36xf32, #tpu.memory_space<vmem>>, vector<8x36xf32>
    %211 = tpu.iota {dimensions = array<i32: 1>} : vector<1x256xi32>
    %c15_i32_85 = arith.constant 15 : i32
    %212 = vector.broadcast %c15_i32_85 : i32 to vector<1x256xi32>
    %213 = arith.andi %211, %212 : vector<1x256xi32>
    %c4_i32_86 = arith.constant 4 : i32
    %214 = vector.broadcast %c4_i32_86 : i32 to vector<1x256xi32>
    %215 = arith.shrsi %211, %214 : vector<1x256xi32>
    %216 = vector.extract_strided_slice %1 {offsets = [0, 239], sizes = [4, 17], strides = [1, 1]} : vector<4x256xf32> to vector<4x17xf32>
    %217 = vector.extract_strided_slice %1 {offsets = [0, 0], sizes = [4, 239], strides = [1, 1]} : vector<4x256xf32> to vector<4x239xf32>
    %218 = tpu.concatenate %216, %217 in 1 : vector<4x17xf32>, vector<4x239xf32> -> vector<4x256xf32>
    %c-1_i32_87 = arith.constant -1 : i32
    %219 = vector.broadcast %c-1_i32_87 : i32 to vector<1x256xi32>
    %220 = arith.addi %213, %219 : vector<1x256xi32>
    %c0_i32_88 = arith.constant 0 : i32
    %221 = vector.broadcast %c0_i32_88 : i32 to vector<1x256xi32>
    %222 = arith.cmpi sge, %220, %221 : vector<1x256xi32>
    %c-1_i32_89 = arith.constant -1 : i32
    %223 = vector.broadcast %c-1_i32_89 : i32 to vector<1x256xi32>
    %224 = arith.addi %213, %223 : vector<1x256xi32>
    %c15_i32_90 = arith.constant 15 : i32
    %225 = vector.broadcast %c15_i32_90 : i32 to vector<1x256xi32>
    %226 = arith.cmpi sle, %224, %225 : vector<1x256xi32>
    %227 = arith.andi %222, %226 : vector<1x256xi1>
    %c-1_i32_91 = arith.constant -1 : i32
    %228 = vector.broadcast %c-1_i32_91 : i32 to vector<1x256xi32>
    %229 = arith.addi %215, %228 : vector<1x256xi32>
    %c0_i32_92 = arith.constant 0 : i32
    %230 = vector.broadcast %c0_i32_92 : i32 to vector<1x256xi32>
    %231 = arith.cmpi sge, %229, %230 : vector<1x256xi32>
    %c-1_i32_93 = arith.constant -1 : i32
    %232 = vector.broadcast %c-1_i32_93 : i32 to vector<1x256xi32>
    %233 = arith.addi %215, %232 : vector<1x256xi32>
    %c15_i32_94 = arith.constant 15 : i32
    %234 = vector.broadcast %c15_i32_94 : i32 to vector<1x256xi32>
    %235 = arith.cmpi sle, %233, %234 : vector<1x256xi32>
    %236 = arith.andi %231, %235 : vector<1x256xi1>
    %237 = arith.andi %227, %236 : vector<1x256xi1>
    %cst_95 = arith.constant 0.000000e+00 : f32
    %238 = vector.shape_cast %237 : vector<1x256xi1> to vector<1x256xi1>
    %239 = vector.broadcast %238 : vector<1x256xi1> to vector<4x256xi1>
    %240 = vector.broadcast %cst_95 : f32 to vector<4x256xf32>
    %241 = arith.select %239, %218, %240 : vector<4x256xi1>, vector<4x256xf32>
    %242 = vector.extract_strided_slice %1 {offsets = [0, 240], sizes = [4, 16], strides = [1, 1]} : vector<4x256xf32> to vector<4x16xf32>
    %243 = vector.extract_strided_slice %1 {offsets = [0, 0], sizes = [4, 240], strides = [1, 1]} : vector<4x256xf32> to vector<4x240xf32>
    %244 = tpu.concatenate %242, %243 in 1 : vector<4x16xf32>, vector<4x240xf32> -> vector<4x256xf32>
    %c-1_i32_96 = arith.constant -1 : i32
    %245 = vector.broadcast %c-1_i32_96 : i32 to vector<1x256xi32>
    %246 = arith.addi %215, %245 : vector<1x256xi32>
    %c0_i32_97 = arith.constant 0 : i32
    %247 = vector.broadcast %c0_i32_97 : i32 to vector<1x256xi32>
    %248 = arith.cmpi sge, %246, %247 : vector<1x256xi32>
    %c-1_i32_98 = arith.constant -1 : i32
    %249 = vector.broadcast %c-1_i32_98 : i32 to vector<1x256xi32>
    %250 = arith.addi %215, %249 : vector<1x256xi32>
    %c15_i32_99 = arith.constant 15 : i32
    %251 = vector.broadcast %c15_i32_99 : i32 to vector<1x256xi32>
    %252 = arith.cmpi sle, %250, %251 : vector<1x256xi32>
    %253 = arith.andi %248, %252 : vector<1x256xi1>
    %cst_100 = arith.constant 0.000000e+00 : f32
    %254 = vector.shape_cast %253 : vector<1x256xi1> to vector<1x256xi1>
    %255 = vector.broadcast %254 : vector<1x256xi1> to vector<4x256xi1>
    %256 = vector.broadcast %cst_100 : f32 to vector<4x256xf32>
    %257 = arith.select %255, %244, %256 : vector<4x256xi1>, vector<4x256xf32>
    %258 = vector.extract_strided_slice %1 {offsets = [0, 241], sizes = [4, 15], strides = [1, 1]} : vector<4x256xf32> to vector<4x15xf32>
    %259 = vector.extract_strided_slice %1 {offsets = [0, 0], sizes = [4, 241], strides = [1, 1]} : vector<4x256xf32> to vector<4x241xf32>
    %260 = tpu.concatenate %258, %259 in 1 : vector<4x15xf32>, vector<4x241xf32> -> vector<4x256xf32>
    %c1_i32_101 = arith.constant 1 : i32
    %261 = vector.broadcast %c1_i32_101 : i32 to vector<1x256xi32>
    %262 = arith.addi %213, %261 : vector<1x256xi32>
    %c0_i32_102 = arith.constant 0 : i32
    %263 = vector.broadcast %c0_i32_102 : i32 to vector<1x256xi32>
    %264 = arith.cmpi sge, %262, %263 : vector<1x256xi32>
    %c1_i32_103 = arith.constant 1 : i32
    %265 = vector.broadcast %c1_i32_103 : i32 to vector<1x256xi32>
    %266 = arith.addi %213, %265 : vector<1x256xi32>
    %c15_i32_104 = arith.constant 15 : i32
    %267 = vector.broadcast %c15_i32_104 : i32 to vector<1x256xi32>
    %268 = arith.cmpi sle, %266, %267 : vector<1x256xi32>
    %269 = arith.andi %264, %268 : vector<1x256xi1>
    %c-1_i32_105 = arith.constant -1 : i32
    %270 = vector.broadcast %c-1_i32_105 : i32 to vector<1x256xi32>
    %271 = arith.addi %215, %270 : vector<1x256xi32>
    %c0_i32_106 = arith.constant 0 : i32
    %272 = vector.broadcast %c0_i32_106 : i32 to vector<1x256xi32>
    %273 = arith.cmpi sge, %271, %272 : vector<1x256xi32>
    %c-1_i32_107 = arith.constant -1 : i32
    %274 = vector.broadcast %c-1_i32_107 : i32 to vector<1x256xi32>
    %275 = arith.addi %215, %274 : vector<1x256xi32>
    %c15_i32_108 = arith.constant 15 : i32
    %276 = vector.broadcast %c15_i32_108 : i32 to vector<1x256xi32>
    %277 = arith.cmpi sle, %275, %276 : vector<1x256xi32>
    %278 = arith.andi %273, %277 : vector<1x256xi1>
    %279 = arith.andi %269, %278 : vector<1x256xi1>
    %cst_109 = arith.constant 0.000000e+00 : f32
    %280 = vector.shape_cast %279 : vector<1x256xi1> to vector<1x256xi1>
    %281 = vector.broadcast %280 : vector<1x256xi1> to vector<4x256xi1>
    %282 = vector.broadcast %cst_109 : f32 to vector<4x256xf32>
    %283 = arith.select %281, %260, %282 : vector<4x256xi1>, vector<4x256xf32>
    %284 = vector.extract_strided_slice %1 {offsets = [0, 255], sizes = [4, 1], strides = [1, 1]} : vector<4x256xf32> to vector<4x1xf32>
    %285 = vector.extract_strided_slice %1 {offsets = [0, 0], sizes = [4, 255], strides = [1, 1]} : vector<4x256xf32> to vector<4x255xf32>
    %286 = tpu.concatenate %284, %285 in 1 : vector<4x1xf32>, vector<4x255xf32> -> vector<4x256xf32>
    %c-1_i32_110 = arith.constant -1 : i32
    %287 = vector.broadcast %c-1_i32_110 : i32 to vector<1x256xi32>
    %288 = arith.addi %213, %287 : vector<1x256xi32>
    %c0_i32_111 = arith.constant 0 : i32
    %289 = vector.broadcast %c0_i32_111 : i32 to vector<1x256xi32>
    %290 = arith.cmpi sge, %288, %289 : vector<1x256xi32>
    %c-1_i32_112 = arith.constant -1 : i32
    %291 = vector.broadcast %c-1_i32_112 : i32 to vector<1x256xi32>
    %292 = arith.addi %213, %291 : vector<1x256xi32>
    %c15_i32_113 = arith.constant 15 : i32
    %293 = vector.broadcast %c15_i32_113 : i32 to vector<1x256xi32>
    %294 = arith.cmpi sle, %292, %293 : vector<1x256xi32>
    %295 = arith.andi %290, %294 : vector<1x256xi1>
    %cst_114 = arith.constant 0.000000e+00 : f32
    %296 = vector.shape_cast %295 : vector<1x256xi1> to vector<1x256xi1>
    %297 = vector.broadcast %296 : vector<1x256xi1> to vector<4x256xi1>
    %298 = vector.broadcast %cst_114 : f32 to vector<4x256xf32>
    %299 = arith.select %297, %286, %298 : vector<4x256xi1>, vector<4x256xf32>
    %300 = vector.extract_strided_slice %1 {offsets = [0, 1], sizes = [4, 255], strides = [1, 1]} : vector<4x256xf32> to vector<4x255xf32>
    %301 = vector.extract_strided_slice %1 {offsets = [0, 0], sizes = [4, 1], strides = [1, 1]} : vector<4x256xf32> to vector<4x1xf32>
    %302 = tpu.concatenate %300, %301 in 1 : vector<4x255xf32>, vector<4x1xf32> -> vector<4x256xf32>
    %c1_i32_115 = arith.constant 1 : i32
    %303 = vector.broadcast %c1_i32_115 : i32 to vector<1x256xi32>
    %304 = arith.addi %213, %303 : vector<1x256xi32>
    %c0_i32_116 = arith.constant 0 : i32
    %305 = vector.broadcast %c0_i32_116 : i32 to vector<1x256xi32>
    %306 = arith.cmpi sge, %304, %305 : vector<1x256xi32>
    %c1_i32_117 = arith.constant 1 : i32
    %307 = vector.broadcast %c1_i32_117 : i32 to vector<1x256xi32>
    %308 = arith.addi %213, %307 : vector<1x256xi32>
    %c15_i32_118 = arith.constant 15 : i32
    %309 = vector.broadcast %c15_i32_118 : i32 to vector<1x256xi32>
    %310 = arith.cmpi sle, %308, %309 : vector<1x256xi32>
    %311 = arith.andi %306, %310 : vector<1x256xi1>
    %cst_119 = arith.constant 0.000000e+00 : f32
    %312 = vector.shape_cast %311 : vector<1x256xi1> to vector<1x256xi1>
    %313 = vector.broadcast %312 : vector<1x256xi1> to vector<4x256xi1>
    %314 = vector.broadcast %cst_119 : f32 to vector<4x256xf32>
    %315 = arith.select %313, %302, %314 : vector<4x256xi1>, vector<4x256xf32>
    %316 = vector.extract_strided_slice %1 {offsets = [0, 15], sizes = [4, 241], strides = [1, 1]} : vector<4x256xf32> to vector<4x241xf32>
    %317 = vector.extract_strided_slice %1 {offsets = [0, 0], sizes = [4, 15], strides = [1, 1]} : vector<4x256xf32> to vector<4x15xf32>
    %318 = tpu.concatenate %316, %317 in 1 : vector<4x241xf32>, vector<4x15xf32> -> vector<4x256xf32>
    %c-1_i32_120 = arith.constant -1 : i32
    %319 = vector.broadcast %c-1_i32_120 : i32 to vector<1x256xi32>
    %320 = arith.addi %213, %319 : vector<1x256xi32>
    %c0_i32_121 = arith.constant 0 : i32
    %321 = vector.broadcast %c0_i32_121 : i32 to vector<1x256xi32>
    %322 = arith.cmpi sge, %320, %321 : vector<1x256xi32>
    %c-1_i32_122 = arith.constant -1 : i32
    %323 = vector.broadcast %c-1_i32_122 : i32 to vector<1x256xi32>
    %324 = arith.addi %213, %323 : vector<1x256xi32>
    %c15_i32_123 = arith.constant 15 : i32
    %325 = vector.broadcast %c15_i32_123 : i32 to vector<1x256xi32>
    %326 = arith.cmpi sle, %324, %325 : vector<1x256xi32>
    %327 = arith.andi %322, %326 : vector<1x256xi1>
    %c1_i32_124 = arith.constant 1 : i32
    %328 = vector.broadcast %c1_i32_124 : i32 to vector<1x256xi32>
    %329 = arith.addi %215, %328 : vector<1x256xi32>
    %c0_i32_125 = arith.constant 0 : i32
    %330 = vector.broadcast %c0_i32_125 : i32 to vector<1x256xi32>
    %331 = arith.cmpi sge, %329, %330 : vector<1x256xi32>
    %c1_i32_126 = arith.constant 1 : i32
    %332 = vector.broadcast %c1_i32_126 : i32 to vector<1x256xi32>
    %333 = arith.addi %215, %332 : vector<1x256xi32>
    %c15_i32_127 = arith.constant 15 : i32
    %334 = vector.broadcast %c15_i32_127 : i32 to vector<1x256xi32>
    %335 = arith.cmpi sle, %333, %334 : vector<1x256xi32>
    %336 = arith.andi %331, %335 : vector<1x256xi1>
    %337 = arith.andi %327, %336 : vector<1x256xi1>
    %cst_128 = arith.constant 0.000000e+00 : f32
    %338 = vector.shape_cast %337 : vector<1x256xi1> to vector<1x256xi1>
    %339 = vector.broadcast %338 : vector<1x256xi1> to vector<4x256xi1>
    %340 = vector.broadcast %cst_128 : f32 to vector<4x256xf32>
    %341 = arith.select %339, %318, %340 : vector<4x256xi1>, vector<4x256xf32>
    %342 = vector.extract_strided_slice %1 {offsets = [0, 16], sizes = [4, 240], strides = [1, 1]} : vector<4x256xf32> to vector<4x240xf32>
    %343 = vector.extract_strided_slice %1 {offsets = [0, 0], sizes = [4, 16], strides = [1, 1]} : vector<4x256xf32> to vector<4x16xf32>
    %344 = tpu.concatenate %342, %343 in 1 : vector<4x240xf32>, vector<4x16xf32> -> vector<4x256xf32>
    %c1_i32_129 = arith.constant 1 : i32
    %345 = vector.broadcast %c1_i32_129 : i32 to vector<1x256xi32>
    %346 = arith.addi %215, %345 : vector<1x256xi32>
    %c0_i32_130 = arith.constant 0 : i32
    %347 = vector.broadcast %c0_i32_130 : i32 to vector<1x256xi32>
    %348 = arith.cmpi sge, %346, %347 : vector<1x256xi32>
    %c1_i32_131 = arith.constant 1 : i32
    %349 = vector.broadcast %c1_i32_131 : i32 to vector<1x256xi32>
    %350 = arith.addi %215, %349 : vector<1x256xi32>
    %c15_i32_132 = arith.constant 15 : i32
    %351 = vector.broadcast %c15_i32_132 : i32 to vector<1x256xi32>
    %352 = arith.cmpi sle, %350, %351 : vector<1x256xi32>
    %353 = arith.andi %348, %352 : vector<1x256xi1>
    %cst_133 = arith.constant 0.000000e+00 : f32
    %354 = vector.shape_cast %353 : vector<1x256xi1> to vector<1x256xi1>
    %355 = vector.broadcast %354 : vector<1x256xi1> to vector<4x256xi1>
    %356 = vector.broadcast %cst_133 : f32 to vector<4x256xf32>
    %357 = arith.select %355, %344, %356 : vector<4x256xi1>, vector<4x256xf32>
    %358 = vector.extract_strided_slice %1 {offsets = [0, 17], sizes = [4, 239], strides = [1, 1]} : vector<4x256xf32> to vector<4x239xf32>
    %359 = vector.extract_strided_slice %1 {offsets = [0, 0], sizes = [4, 17], strides = [1, 1]} : vector<4x256xf32> to vector<4x17xf32>
    %360 = tpu.concatenate %358, %359 in 1 : vector<4x239xf32>, vector<4x17xf32> -> vector<4x256xf32>
    %c1_i32_134 = arith.constant 1 : i32
    %361 = vector.broadcast %c1_i32_134 : i32 to vector<1x256xi32>
    %362 = arith.addi %213, %361 : vector<1x256xi32>
    %c0_i32_135 = arith.constant 0 : i32
    %363 = vector.broadcast %c0_i32_135 : i32 to vector<1x256xi32>
    %364 = arith.cmpi sge, %362, %363 : vector<1x256xi32>
    %c1_i32_136 = arith.constant 1 : i32
    %365 = vector.broadcast %c1_i32_136 : i32 to vector<1x256xi32>
    %366 = arith.addi %213, %365 : vector<1x256xi32>
    %c15_i32_137 = arith.constant 15 : i32
    %367 = vector.broadcast %c15_i32_137 : i32 to vector<1x256xi32>
    %368 = arith.cmpi sle, %366, %367 : vector<1x256xi32>
    %369 = arith.andi %364, %368 : vector<1x256xi1>
    %c1_i32_138 = arith.constant 1 : i32
    %370 = vector.broadcast %c1_i32_138 : i32 to vector<1x256xi32>
    %371 = arith.addi %215, %370 : vector<1x256xi32>
    %c0_i32_139 = arith.constant 0 : i32
    %372 = vector.broadcast %c0_i32_139 : i32 to vector<1x256xi32>
    %373 = arith.cmpi sge, %371, %372 : vector<1x256xi32>
    %c1_i32_140 = arith.constant 1 : i32
    %374 = vector.broadcast %c1_i32_140 : i32 to vector<1x256xi32>
    %375 = arith.addi %215, %374 : vector<1x256xi32>
    %c15_i32_141 = arith.constant 15 : i32
    %376 = vector.broadcast %c15_i32_141 : i32 to vector<1x256xi32>
    %377 = arith.cmpi sle, %375, %376 : vector<1x256xi32>
    %378 = arith.andi %373, %377 : vector<1x256xi1>
    %379 = arith.andi %369, %378 : vector<1x256xi1>
    %cst_142 = arith.constant 0.000000e+00 : f32
    %380 = vector.shape_cast %379 : vector<1x256xi1> to vector<1x256xi1>
    %381 = vector.broadcast %380 : vector<1x256xi1> to vector<4x256xi1>
    %382 = vector.broadcast %cst_142 : f32 to vector<4x256xf32>
    %383 = arith.select %381, %360, %382 : vector<4x256xi1>, vector<4x256xf32>
    %384 = tpu.concatenate %241, %257, %283, %299, %1, %315, %341, %357, %383 in 0 : vector<4x256xf32>, vector<4x256xf32>, vector<4x256xf32>, vector<4x256xf32>, vector<4x256xf32>, vector<4x256xf32>, vector<4x256xf32>, vector<4x256xf32>, vector<4x256xf32> -> vector<36x256xf32>
    %cst_143 = arith.constant dense<0.000000e+00> : vector<8x256xf32>
    %385 = tpu.matmul %210, %384, %cst_143 {dimension_numbers = #tpu.dot_dimension_numbers<[1], [0], [0], [1], [0, 0, 1, 1], [], []>, precision = #tpu.contract_precision<fp32>} : vector<8x36xf32>, vector<36x256xf32>, vector<8x256xf32> -> vector<8x256xf32>
    %386 = vector.broadcast %203 : vector<8x1xf32> to vector<8x256xf32>
    %387 = arith.mulf %385, %386 : vector<8x256xf32>
    %388 = vector.broadcast %209 : vector<8x1xf32> to vector<8x256xf32>
    %389 = arith.addf %387, %388 : vector<8x256xf32>
    %cst_144 = arith.constant 0.000000e+00 : f32
    %390 = vector.broadcast %cst_144 : f32 to vector<8x256xf32>
    %391 = arith.maximumf %389, %390 : vector<8x256xf32>
    %392 = vector.extract_strided_slice %196 {offsets = [8, 0], sizes = [16, 1], strides = [1, 1]} : vector<40x1xf32> to vector<16x1xf32>
    %c1_145 = arith.constant 1 : index
    %c0_146 = arith.constant 0 : index
    %c0_147 = arith.constant 0 : index
    %393 = vector.load %arg11[%c1_145, %c0_146, %c0_147] : memref<3x16x1xf32, #tpu.memory_space<vmem>>, vector<1x16x1xf32>
    %394 = vector.shape_cast %393 : vector<1x16x1xf32> to vector<16x1xf32>
    %395 = arith.mulf %392, %394 : vector<16x1xf32>
    %c0_148 = arith.constant 0 : index
    %c0_149 = arith.constant 0 : index
    %c0_150 = arith.constant 0 : index
    %396 = vector.load %arg11[%c0_148, %c0_149, %c0_150] : memref<3x16x1xf32, #tpu.memory_space<vmem>>, vector<1x16x1xf32>
    %397 = vector.shape_cast %396 : vector<1x16x1xf32> to vector<16x1xf32>
    %398 = arith.mulf %397, %395 : vector<16x1xf32>
    %c2_151 = arith.constant 2 : index
    %c0_152 = arith.constant 0 : index
    %c0_153 = arith.constant 0 : index
    %399 = vector.load %arg11[%c2_151, %c0_152, %c0_153] : memref<3x16x1xf32, #tpu.memory_space<vmem>>, vector<1x16x1xf32>
    %400 = vector.shape_cast %399 : vector<1x16x1xf32> to vector<16x1xf32>
    %401 = arith.addf %398, %400 : vector<16x1xf32>
    %c0_154 = arith.constant 0 : index
    %c0_155 = arith.constant 0 : index
    %402 = vector.load %arg10[%c0_154, %c0_155] : memref<16x72xf32, #tpu.memory_space<vmem>>, vector<16x72xf32>
    %403 = tpu.iota {dimensions = array<i32: 1>} : vector<1x256xi32>
    %c15_i32_156 = arith.constant 15 : i32
    %404 = vector.broadcast %c15_i32_156 : i32 to vector<1x256xi32>
    %405 = arith.andi %403, %404 : vector<1x256xi32>
    %c4_i32_157 = arith.constant 4 : i32
    %406 = vector.broadcast %c4_i32_157 : i32 to vector<1x256xi32>
    %407 = arith.shrsi %403, %406 : vector<1x256xi32>
    %408 = vector.extract_strided_slice %391 {offsets = [0, 239], sizes = [8, 17], strides = [1, 1]} : vector<8x256xf32> to vector<8x17xf32>
    %409 = vector.extract_strided_slice %391 {offsets = [0, 0], sizes = [8, 239], strides = [1, 1]} : vector<8x256xf32> to vector<8x239xf32>
    %410 = tpu.concatenate %408, %409 in 1 : vector<8x17xf32>, vector<8x239xf32> -> vector<8x256xf32>
    %c-1_i32_158 = arith.constant -1 : i32
    %411 = vector.broadcast %c-1_i32_158 : i32 to vector<1x256xi32>
    %412 = arith.addi %405, %411 : vector<1x256xi32>
    %c0_i32_159 = arith.constant 0 : i32
    %413 = vector.broadcast %c0_i32_159 : i32 to vector<1x256xi32>
    %414 = arith.cmpi sge, %412, %413 : vector<1x256xi32>
    %c-1_i32_160 = arith.constant -1 : i32
    %415 = vector.broadcast %c-1_i32_160 : i32 to vector<1x256xi32>
    %416 = arith.addi %405, %415 : vector<1x256xi32>
    %c15_i32_161 = arith.constant 15 : i32
    %417 = vector.broadcast %c15_i32_161 : i32 to vector<1x256xi32>
    %418 = arith.cmpi sle, %416, %417 : vector<1x256xi32>
    %419 = arith.andi %414, %418 : vector<1x256xi1>
    %c-1_i32_162 = arith.constant -1 : i32
    %420 = vector.broadcast %c-1_i32_162 : i32 to vector<1x256xi32>
    %421 = arith.addi %407, %420 : vector<1x256xi32>
    %c0_i32_163 = arith.constant 0 : i32
    %422 = vector.broadcast %c0_i32_163 : i32 to vector<1x256xi32>
    %423 = arith.cmpi sge, %421, %422 : vector<1x256xi32>
    %c-1_i32_164 = arith.constant -1 : i32
    %424 = vector.broadcast %c-1_i32_164 : i32 to vector<1x256xi32>
    %425 = arith.addi %407, %424 : vector<1x256xi32>
    %c15_i32_165 = arith.constant 15 : i32
    %426 = vector.broadcast %c15_i32_165 : i32 to vector<1x256xi32>
    %427 = arith.cmpi sle, %425, %426 : vector<1x256xi32>
    %428 = arith.andi %423, %427 : vector<1x256xi1>
    %429 = arith.andi %419, %428 : vector<1x256xi1>
    %cst_166 = arith.constant 0.000000e+00 : f32
    %430 = vector.shape_cast %429 : vector<1x256xi1> to vector<1x256xi1>
    %431 = vector.broadcast %430 : vector<1x256xi1> to vector<8x256xi1>
    %432 = vector.broadcast %cst_166 : f32 to vector<8x256xf32>
    %433 = arith.select %431, %410, %432 : vector<8x256xi1>, vector<8x256xf32>
    %434 = vector.extract_strided_slice %391 {offsets = [0, 240], sizes = [8, 16], strides = [1, 1]} : vector<8x256xf32> to vector<8x16xf32>
    %435 = vector.extract_strided_slice %391 {offsets = [0, 0], sizes = [8, 240], strides = [1, 1]} : vector<8x256xf32> to vector<8x240xf32>
    %436 = tpu.concatenate %434, %435 in 1 : vector<8x16xf32>, vector<8x240xf32> -> vector<8x256xf32>
    %c-1_i32_167 = arith.constant -1 : i32
    %437 = vector.broadcast %c-1_i32_167 : i32 to vector<1x256xi32>
    %438 = arith.addi %407, %437 : vector<1x256xi32>
    %c0_i32_168 = arith.constant 0 : i32
    %439 = vector.broadcast %c0_i32_168 : i32 to vector<1x256xi32>
    %440 = arith.cmpi sge, %438, %439 : vector<1x256xi32>
    %c-1_i32_169 = arith.constant -1 : i32
    %441 = vector.broadcast %c-1_i32_169 : i32 to vector<1x256xi32>
    %442 = arith.addi %407, %441 : vector<1x256xi32>
    %c15_i32_170 = arith.constant 15 : i32
    %443 = vector.broadcast %c15_i32_170 : i32 to vector<1x256xi32>
    %444 = arith.cmpi sle, %442, %443 : vector<1x256xi32>
    %445 = arith.andi %440, %444 : vector<1x256xi1>
    %cst_171 = arith.constant 0.000000e+00 : f32
    %446 = vector.shape_cast %445 : vector<1x256xi1> to vector<1x256xi1>
    %447 = vector.broadcast %446 : vector<1x256xi1> to vector<8x256xi1>
    %448 = vector.broadcast %cst_171 : f32 to vector<8x256xf32>
    %449 = arith.select %447, %436, %448 : vector<8x256xi1>, vector<8x256xf32>
    %450 = vector.extract_strided_slice %391 {offsets = [0, 241], sizes = [8, 15], strides = [1, 1]} : vector<8x256xf32> to vector<8x15xf32>
    %451 = vector.extract_strided_slice %391 {offsets = [0, 0], sizes = [8, 241], strides = [1, 1]} : vector<8x256xf32> to vector<8x241xf32>
    %452 = tpu.concatenate %450, %451 in 1 : vector<8x15xf32>, vector<8x241xf32> -> vector<8x256xf32>
    %c1_i32_172 = arith.constant 1 : i32
    %453 = vector.broadcast %c1_i32_172 : i32 to vector<1x256xi32>
    %454 = arith.addi %405, %453 : vector<1x256xi32>
    %c0_i32_173 = arith.constant 0 : i32
    %455 = vector.broadcast %c0_i32_173 : i32 to vector<1x256xi32>
    %456 = arith.cmpi sge, %454, %455 : vector<1x256xi32>
    %c1_i32_174 = arith.constant 1 : i32
    %457 = vector.broadcast %c1_i32_174 : i32 to vector<1x256xi32>
    %458 = arith.addi %405, %457 : vector<1x256xi32>
    %c15_i32_175 = arith.constant 15 : i32
    %459 = vector.broadcast %c15_i32_175 : i32 to vector<1x256xi32>
    %460 = arith.cmpi sle, %458, %459 : vector<1x256xi32>
    %461 = arith.andi %456, %460 : vector<1x256xi1>
    %c-1_i32_176 = arith.constant -1 : i32
    %462 = vector.broadcast %c-1_i32_176 : i32 to vector<1x256xi32>
    %463 = arith.addi %407, %462 : vector<1x256xi32>
    %c0_i32_177 = arith.constant 0 : i32
    %464 = vector.broadcast %c0_i32_177 : i32 to vector<1x256xi32>
    %465 = arith.cmpi sge, %463, %464 : vector<1x256xi32>
    %c-1_i32_178 = arith.constant -1 : i32
    %466 = vector.broadcast %c-1_i32_178 : i32 to vector<1x256xi32>
    %467 = arith.addi %407, %466 : vector<1x256xi32>
    %c15_i32_179 = arith.constant 15 : i32
    %468 = vector.broadcast %c15_i32_179 : i32 to vector<1x256xi32>
    %469 = arith.cmpi sle, %467, %468 : vector<1x256xi32>
    %470 = arith.andi %465, %469 : vector<1x256xi1>
    %471 = arith.andi %461, %470 : vector<1x256xi1>
    %cst_180 = arith.constant 0.000000e+00 : f32
    %472 = vector.shape_cast %471 : vector<1x256xi1> to vector<1x256xi1>
    %473 = vector.broadcast %472 : vector<1x256xi1> to vector<8x256xi1>
    %474 = vector.broadcast %cst_180 : f32 to vector<8x256xf32>
    %475 = arith.select %473, %452, %474 : vector<8x256xi1>, vector<8x256xf32>
    %476 = vector.extract_strided_slice %391 {offsets = [0, 255], sizes = [8, 1], strides = [1, 1]} : vector<8x256xf32> to vector<8x1xf32>
    %477 = vector.extract_strided_slice %391 {offsets = [0, 0], sizes = [8, 255], strides = [1, 1]} : vector<8x256xf32> to vector<8x255xf32>
    %478 = tpu.concatenate %476, %477 in 1 : vector<8x1xf32>, vector<8x255xf32> -> vector<8x256xf32>
    %c-1_i32_181 = arith.constant -1 : i32
    %479 = vector.broadcast %c-1_i32_181 : i32 to vector<1x256xi32>
    %480 = arith.addi %405, %479 : vector<1x256xi32>
    %c0_i32_182 = arith.constant 0 : i32
    %481 = vector.broadcast %c0_i32_182 : i32 to vector<1x256xi32>
    %482 = arith.cmpi sge, %480, %481 : vector<1x256xi32>
    %c-1_i32_183 = arith.constant -1 : i32
    %483 = vector.broadcast %c-1_i32_183 : i32 to vector<1x256xi32>
    %484 = arith.addi %405, %483 : vector<1x256xi32>
    %c15_i32_184 = arith.constant 15 : i32
    %485 = vector.broadcast %c15_i32_184 : i32 to vector<1x256xi32>
    %486 = arith.cmpi sle, %484, %485 : vector<1x256xi32>
    %487 = arith.andi %482, %486 : vector<1x256xi1>
    %cst_185 = arith.constant 0.000000e+00 : f32
    %488 = vector.shape_cast %487 : vector<1x256xi1> to vector<1x256xi1>
    %489 = vector.broadcast %488 : vector<1x256xi1> to vector<8x256xi1>
    %490 = vector.broadcast %cst_185 : f32 to vector<8x256xf32>
    %491 = arith.select %489, %478, %490 : vector<8x256xi1>, vector<8x256xf32>
    %492 = vector.extract_strided_slice %391 {offsets = [0, 1], sizes = [8, 255], strides = [1, 1]} : vector<8x256xf32> to vector<8x255xf32>
    %493 = vector.extract_strided_slice %391 {offsets = [0, 0], sizes = [8, 1], strides = [1, 1]} : vector<8x256xf32> to vector<8x1xf32>
    %494 = tpu.concatenate %492, %493 in 1 : vector<8x255xf32>, vector<8x1xf32> -> vector<8x256xf32>
    %c1_i32_186 = arith.constant 1 : i32
    %495 = vector.broadcast %c1_i32_186 : i32 to vector<1x256xi32>
    %496 = arith.addi %405, %495 : vector<1x256xi32>
    %c0_i32_187 = arith.constant 0 : i32
    %497 = vector.broadcast %c0_i32_187 : i32 to vector<1x256xi32>
    %498 = arith.cmpi sge, %496, %497 : vector<1x256xi32>
    %c1_i32_188 = arith.constant 1 : i32
    %499 = vector.broadcast %c1_i32_188 : i32 to vector<1x256xi32>
    %500 = arith.addi %405, %499 : vector<1x256xi32>
    %c15_i32_189 = arith.constant 15 : i32
    %501 = vector.broadcast %c15_i32_189 : i32 to vector<1x256xi32>
    %502 = arith.cmpi sle, %500, %501 : vector<1x256xi32>
    %503 = arith.andi %498, %502 : vector<1x256xi1>
    %cst_190 = arith.constant 0.000000e+00 : f32
    %504 = vector.shape_cast %503 : vector<1x256xi1> to vector<1x256xi1>
    %505 = vector.broadcast %504 : vector<1x256xi1> to vector<8x256xi1>
    %506 = vector.broadcast %cst_190 : f32 to vector<8x256xf32>
    %507 = arith.select %505, %494, %506 : vector<8x256xi1>, vector<8x256xf32>
    %508 = vector.extract_strided_slice %391 {offsets = [0, 15], sizes = [8, 241], strides = [1, 1]} : vector<8x256xf32> to vector<8x241xf32>
    %509 = vector.extract_strided_slice %391 {offsets = [0, 0], sizes = [8, 15], strides = [1, 1]} : vector<8x256xf32> to vector<8x15xf32>
    %510 = tpu.concatenate %508, %509 in 1 : vector<8x241xf32>, vector<8x15xf32> -> vector<8x256xf32>
    %c-1_i32_191 = arith.constant -1 : i32
    %511 = vector.broadcast %c-1_i32_191 : i32 to vector<1x256xi32>
    %512 = arith.addi %405, %511 : vector<1x256xi32>
    %c0_i32_192 = arith.constant 0 : i32
    %513 = vector.broadcast %c0_i32_192 : i32 to vector<1x256xi32>
    %514 = arith.cmpi sge, %512, %513 : vector<1x256xi32>
    %c-1_i32_193 = arith.constant -1 : i32
    %515 = vector.broadcast %c-1_i32_193 : i32 to vector<1x256xi32>
    %516 = arith.addi %405, %515 : vector<1x256xi32>
    %c15_i32_194 = arith.constant 15 : i32
    %517 = vector.broadcast %c15_i32_194 : i32 to vector<1x256xi32>
    %518 = arith.cmpi sle, %516, %517 : vector<1x256xi32>
    %519 = arith.andi %514, %518 : vector<1x256xi1>
    %c1_i32_195 = arith.constant 1 : i32
    %520 = vector.broadcast %c1_i32_195 : i32 to vector<1x256xi32>
    %521 = arith.addi %407, %520 : vector<1x256xi32>
    %c0_i32_196 = arith.constant 0 : i32
    %522 = vector.broadcast %c0_i32_196 : i32 to vector<1x256xi32>
    %523 = arith.cmpi sge, %521, %522 : vector<1x256xi32>
    %c1_i32_197 = arith.constant 1 : i32
    %524 = vector.broadcast %c1_i32_197 : i32 to vector<1x256xi32>
    %525 = arith.addi %407, %524 : vector<1x256xi32>
    %c15_i32_198 = arith.constant 15 : i32
    %526 = vector.broadcast %c15_i32_198 : i32 to vector<1x256xi32>
    %527 = arith.cmpi sle, %525, %526 : vector<1x256xi32>
    %528 = arith.andi %523, %527 : vector<1x256xi1>
    %529 = arith.andi %519, %528 : vector<1x256xi1>
    %cst_199 = arith.constant 0.000000e+00 : f32
    %530 = vector.shape_cast %529 : vector<1x256xi1> to vector<1x256xi1>
    %531 = vector.broadcast %530 : vector<1x256xi1> to vector<8x256xi1>
    %532 = vector.broadcast %cst_199 : f32 to vector<8x256xf32>
    %533 = arith.select %531, %510, %532 : vector<8x256xi1>, vector<8x256xf32>
    %534 = vector.extract_strided_slice %391 {offsets = [0, 16], sizes = [8, 240], strides = [1, 1]} : vector<8x256xf32> to vector<8x240xf32>
    %535 = vector.extract_strided_slice %391 {offsets = [0, 0], sizes = [8, 16], strides = [1, 1]} : vector<8x256xf32> to vector<8x16xf32>
    %536 = tpu.concatenate %534, %535 in 1 : vector<8x240xf32>, vector<8x16xf32> -> vector<8x256xf32>
    %c1_i32_200 = arith.constant 1 : i32
    %537 = vector.broadcast %c1_i32_200 : i32 to vector<1x256xi32>
    %538 = arith.addi %407, %537 : vector<1x256xi32>
    %c0_i32_201 = arith.constant 0 : i32
    %539 = vector.broadcast %c0_i32_201 : i32 to vector<1x256xi32>
    %540 = arith.cmpi sge, %538, %539 : vector<1x256xi32>
    %c1_i32_202 = arith.constant 1 : i32
    %541 = vector.broadcast %c1_i32_202 : i32 to vector<1x256xi32>
    %542 = arith.addi %407, %541 : vector<1x256xi32>
    %c15_i32_203 = arith.constant 15 : i32
    %543 = vector.broadcast %c15_i32_203 : i32 to vector<1x256xi32>
    %544 = arith.cmpi sle, %542, %543 : vector<1x256xi32>
    %545 = arith.andi %540, %544 : vector<1x256xi1>
    %cst_204 = arith.constant 0.000000e+00 : f32
    %546 = vector.shape_cast %545 : vector<1x256xi1> to vector<1x256xi1>
    %547 = vector.broadcast %546 : vector<1x256xi1> to vector<8x256xi1>
    %548 = vector.broadcast %cst_204 : f32 to vector<8x256xf32>
    %549 = arith.select %547, %536, %548 : vector<8x256xi1>, vector<8x256xf32>
    %550 = vector.extract_strided_slice %391 {offsets = [0, 17], sizes = [8, 239], strides = [1, 1]} : vector<8x256xf32> to vector<8x239xf32>
    %551 = vector.extract_strided_slice %391 {offsets = [0, 0], sizes = [8, 17], strides = [1, 1]} : vector<8x256xf32> to vector<8x17xf32>
    %552 = tpu.concatenate %550, %551 in 1 : vector<8x239xf32>, vector<8x17xf32> -> vector<8x256xf32>
    %c1_i32_205 = arith.constant 1 : i32
    %553 = vector.broadcast %c1_i32_205 : i32 to vector<1x256xi32>
    %554 = arith.addi %405, %553 : vector<1x256xi32>
    %c0_i32_206 = arith.constant 0 : i32
    %555 = vector.broadcast %c0_i32_206 : i32 to vector<1x256xi32>
    %556 = arith.cmpi sge, %554, %555 : vector<1x256xi32>
    %c1_i32_207 = arith.constant 1 : i32
    %557 = vector.broadcast %c1_i32_207 : i32 to vector<1x256xi32>
    %558 = arith.addi %405, %557 : vector<1x256xi32>
    %c15_i32_208 = arith.constant 15 : i32
    %559 = vector.broadcast %c15_i32_208 : i32 to vector<1x256xi32>
    %560 = arith.cmpi sle, %558, %559 : vector<1x256xi32>
    %561 = arith.andi %556, %560 : vector<1x256xi1>
    %c1_i32_209 = arith.constant 1 : i32
    %562 = vector.broadcast %c1_i32_209 : i32 to vector<1x256xi32>
    %563 = arith.addi %407, %562 : vector<1x256xi32>
    %c0_i32_210 = arith.constant 0 : i32
    %564 = vector.broadcast %c0_i32_210 : i32 to vector<1x256xi32>
    %565 = arith.cmpi sge, %563, %564 : vector<1x256xi32>
    %c1_i32_211 = arith.constant 1 : i32
    %566 = vector.broadcast %c1_i32_211 : i32 to vector<1x256xi32>
    %567 = arith.addi %407, %566 : vector<1x256xi32>
    %c15_i32_212 = arith.constant 15 : i32
    %568 = vector.broadcast %c15_i32_212 : i32 to vector<1x256xi32>
    %569 = arith.cmpi sle, %567, %568 : vector<1x256xi32>
    %570 = arith.andi %565, %569 : vector<1x256xi1>
    %571 = arith.andi %561, %570 : vector<1x256xi1>
    %cst_213 = arith.constant 0.000000e+00 : f32
    %572 = vector.shape_cast %571 : vector<1x256xi1> to vector<1x256xi1>
    %573 = vector.broadcast %572 : vector<1x256xi1> to vector<8x256xi1>
    %574 = vector.broadcast %cst_213 : f32 to vector<8x256xf32>
    %575 = arith.select %573, %552, %574 : vector<8x256xi1>, vector<8x256xf32>
    %576 = tpu.concatenate %433, %449, %475, %491, %391, %507, %533, %549, %575 in 0 : vector<8x256xf32>, vector<8x256xf32>, vector<8x256xf32>, vector<8x256xf32>, vector<8x256xf32>, vector<8x256xf32>, vector<8x256xf32>, vector<8x256xf32>, vector<8x256xf32> -> vector<72x256xf32>
    %cst_214 = arith.constant dense<0.000000e+00> : vector<16x256xf32>
    %577 = tpu.matmul %402, %576, %cst_214 {dimension_numbers = #tpu.dot_dimension_numbers<[1], [0], [0], [1], [0, 0, 1, 1], [], []>, precision = #tpu.contract_precision<fp32>} : vector<16x72xf32>, vector<72x256xf32>, vector<16x256xf32> -> vector<16x256xf32>
    %578 = vector.broadcast %395 : vector<16x1xf32> to vector<16x256xf32>
    %579 = arith.mulf %577, %578 : vector<16x256xf32>
    %580 = vector.broadcast %401 : vector<16x1xf32> to vector<16x256xf32>
    %581 = arith.addf %579, %580 : vector<16x256xf32>
    %cst_215 = arith.constant 0.000000e+00 : f32
    %582 = vector.broadcast %cst_215 : f32 to vector<16x256xf32>
    %583 = arith.maximumf %581, %582 : vector<16x256xf32>
    %584 = vector.extract_strided_slice %583 {offsets = [0, 1], sizes = [16, 255], strides = [1, 1]} : vector<16x256xf32> to vector<16x255xf32>
    %585 = vector.extract_strided_slice %583 {offsets = [0, 0], sizes = [16, 1], strides = [1, 1]} : vector<16x256xf32> to vector<16x1xf32>
    %586 = tpu.concatenate %584, %585 in 1 : vector<16x255xf32>, vector<16x1xf32> -> vector<16x256xf32>
    %587 = arith.maximumf %583, %586 : vector<16x256xf32>
    %588 = vector.extract_strided_slice %587 {offsets = [0, 16], sizes = [16, 240], strides = [1, 1]} : vector<16x256xf32> to vector<16x240xf32>
    %589 = vector.extract_strided_slice %587 {offsets = [0, 0], sizes = [16, 16], strides = [1, 1]} : vector<16x256xf32> to vector<16x16xf32>
    %590 = tpu.concatenate %588, %589 in 1 : vector<16x240xf32>, vector<16x16xf32> -> vector<16x256xf32>
    %591 = arith.maximumf %587, %590 : vector<16x256xf32>
    %592 = tpu.iota {dimensions = array<i32: 0>} : vector<256x64xi32>
    %593 = tpu.iota {dimensions = array<i32: 1>} : vector<1x64xi32>
    %c7_i32 = arith.constant 7 : i32
    %594 = vector.broadcast %c7_i32 : i32 to vector<1x64xi32>
    %595 = arith.andi %593, %594 : vector<1x64xi32>
    %c3_i32 = arith.constant 3 : i32
    %596 = vector.broadcast %c3_i32 : i32 to vector<1x64xi32>
    %597 = arith.shrsi %593, %596 : vector<1x64xi32>
    %c2_i32 = arith.constant 2 : i32
    %598 = vector.broadcast %c2_i32 : i32 to vector<1x64xi32>
    %599 = arith.muli %598, %597 : vector<1x64xi32>
    %c16_i32 = arith.constant 16 : i32
    %600 = vector.broadcast %c16_i32 : i32 to vector<1x64xi32>
    %601 = arith.muli %599, %600 : vector<1x64xi32>
    %c2_i32_216 = arith.constant 2 : i32
    %602 = vector.broadcast %c2_i32_216 : i32 to vector<1x64xi32>
    %603 = arith.muli %602, %595 : vector<1x64xi32>
    %604 = arith.addi %601, %603 : vector<1x64xi32>
    %605 = vector.broadcast %604 : vector<1x64xi32> to vector<256x64xi32>
    %606 = arith.cmpi eq, %592, %605 : vector<256x64xi32>
    %cst_217 = arith.constant 1.000000e+00 : f32
    %cst_218 = arith.constant 0.000000e+00 : f32
    %607 = vector.broadcast %cst_217 : f32 to vector<256x64xf32>
    %608 = vector.broadcast %cst_218 : f32 to vector<256x64xf32>
    %609 = arith.select %606, %607, %608 : vector<256x64xi1>, vector<256x64xf32>
    %cst_219 = arith.constant dense<0.000000e+00> : vector<16x64xf32>
    %610 = tpu.matmul %591, %609, %cst_219 {dimension_numbers = #tpu.dot_dimension_numbers<[1], [0], [0], [1], [0, 0, 1, 1], [], []>, precision = #tpu.contract_precision<fp32>} : vector<16x256xf32>, vector<256x64xf32>, vector<16x64xf32> -> vector<16x64xf32>
    %611 = vector.extract_strided_slice %196 {offsets = [24, 0], sizes = [16, 1], strides = [1, 1]} : vector<40x1xf32> to vector<16x1xf32>
    %c1_220 = arith.constant 1 : index
    %c0_221 = arith.constant 0 : index
    %c0_222 = arith.constant 0 : index
    %612 = vector.load %arg13[%c1_220, %c0_221, %c0_222] : memref<3x16x1xf32, #tpu.memory_space<vmem>>, vector<1x16x1xf32>
    %613 = vector.shape_cast %612 : vector<1x16x1xf32> to vector<16x1xf32>
    %614 = arith.mulf %611, %613 : vector<16x1xf32>
    %c0_223 = arith.constant 0 : index
    %c0_224 = arith.constant 0 : index
    %c0_225 = arith.constant 0 : index
    %615 = vector.load %arg13[%c0_223, %c0_224, %c0_225] : memref<3x16x1xf32, #tpu.memory_space<vmem>>, vector<1x16x1xf32>
    %616 = vector.shape_cast %615 : vector<1x16x1xf32> to vector<16x1xf32>
    %617 = arith.mulf %616, %614 : vector<16x1xf32>
    %c2_226 = arith.constant 2 : index
    %c0_227 = arith.constant 0 : index
    %c0_228 = arith.constant 0 : index
    %618 = vector.load %arg13[%c2_226, %c0_227, %c0_228] : memref<3x16x1xf32, #tpu.memory_space<vmem>>, vector<1x16x1xf32>
    %619 = vector.shape_cast %618 : vector<1x16x1xf32> to vector<16x1xf32>
    %620 = arith.addf %617, %619 : vector<16x1xf32>
    %c0_229 = arith.constant 0 : index
    %c0_230 = arith.constant 0 : index
    %621 = vector.load %arg12[%c0_229, %c0_230] : memref<16x144xf32, #tpu.memory_space<vmem>>, vector<16x144xf32>
    %622 = tpu.iota {dimensions = array<i32: 1>} : vector<1x64xi32>
    %c7_i32_231 = arith.constant 7 : i32
    %623 = vector.broadcast %c7_i32_231 : i32 to vector<1x64xi32>
    %624 = arith.andi %622, %623 : vector<1x64xi32>
    %c3_i32_232 = arith.constant 3 : i32
    %625 = vector.broadcast %c3_i32_232 : i32 to vector<1x64xi32>
    %626 = arith.shrsi %622, %625 : vector<1x64xi32>
    %627 = vector.extract_strided_slice %610 {offsets = [0, 55], sizes = [16, 9], strides = [1, 1]} : vector<16x64xf32> to vector<16x9xf32>
    %628 = vector.extract_strided_slice %610 {offsets = [0, 0], sizes = [16, 55], strides = [1, 1]} : vector<16x64xf32> to vector<16x55xf32>
    %629 = tpu.concatenate %627, %628 in 1 : vector<16x9xf32>, vector<16x55xf32> -> vector<16x64xf32>
    %c-1_i32_233 = arith.constant -1 : i32
    %630 = vector.broadcast %c-1_i32_233 : i32 to vector<1x64xi32>
    %631 = arith.addi %624, %630 : vector<1x64xi32>
    %c0_i32_234 = arith.constant 0 : i32
    %632 = vector.broadcast %c0_i32_234 : i32 to vector<1x64xi32>
    %633 = arith.cmpi sge, %631, %632 : vector<1x64xi32>
    %c-1_i32_235 = arith.constant -1 : i32
    %634 = vector.broadcast %c-1_i32_235 : i32 to vector<1x64xi32>
    %635 = arith.addi %624, %634 : vector<1x64xi32>
    %c7_i32_236 = arith.constant 7 : i32
    %636 = vector.broadcast %c7_i32_236 : i32 to vector<1x64xi32>
    %637 = arith.cmpi sle, %635, %636 : vector<1x64xi32>
    %638 = arith.andi %633, %637 : vector<1x64xi1>
    %c-1_i32_237 = arith.constant -1 : i32
    %639 = vector.broadcast %c-1_i32_237 : i32 to vector<1x64xi32>
    %640 = arith.addi %626, %639 : vector<1x64xi32>
    %c0_i32_238 = arith.constant 0 : i32
    %641 = vector.broadcast %c0_i32_238 : i32 to vector<1x64xi32>
    %642 = arith.cmpi sge, %640, %641 : vector<1x64xi32>
    %c-1_i32_239 = arith.constant -1 : i32
    %643 = vector.broadcast %c-1_i32_239 : i32 to vector<1x64xi32>
    %644 = arith.addi %626, %643 : vector<1x64xi32>
    %c7_i32_240 = arith.constant 7 : i32
    %645 = vector.broadcast %c7_i32_240 : i32 to vector<1x64xi32>
    %646 = arith.cmpi sle, %644, %645 : vector<1x64xi32>
    %647 = arith.andi %642, %646 : vector<1x64xi1>
    %648 = arith.andi %638, %647 : vector<1x64xi1>
    %cst_241 = arith.constant 0.000000e+00 : f32
    %649 = vector.shape_cast %648 : vector<1x64xi1> to vector<1x64xi1>
    %650 = vector.broadcast %649 : vector<1x64xi1> to vector<16x64xi1>
    %651 = vector.broadcast %cst_241 : f32 to vector<16x64xf32>
    %652 = arith.select %650, %629, %651 : vector<16x64xi1>, vector<16x64xf32>
    %653 = vector.extract_strided_slice %610 {offsets = [0, 56], sizes = [16, 8], strides = [1, 1]} : vector<16x64xf32> to vector<16x8xf32>
    %654 = vector.extract_strided_slice %610 {offsets = [0, 0], sizes = [16, 56], strides = [1, 1]} : vector<16x64xf32> to vector<16x56xf32>
    %655 = tpu.concatenate %653, %654 in 1 : vector<16x8xf32>, vector<16x56xf32> -> vector<16x64xf32>
    %c-1_i32_242 = arith.constant -1 : i32
    %656 = vector.broadcast %c-1_i32_242 : i32 to vector<1x64xi32>
    %657 = arith.addi %626, %656 : vector<1x64xi32>
    %c0_i32_243 = arith.constant 0 : i32
    %658 = vector.broadcast %c0_i32_243 : i32 to vector<1x64xi32>
    %659 = arith.cmpi sge, %657, %658 : vector<1x64xi32>
    %c-1_i32_244 = arith.constant -1 : i32
    %660 = vector.broadcast %c-1_i32_244 : i32 to vector<1x64xi32>
    %661 = arith.addi %626, %660 : vector<1x64xi32>
    %c7_i32_245 = arith.constant 7 : i32
    %662 = vector.broadcast %c7_i32_245 : i32 to vector<1x64xi32>
    %663 = arith.cmpi sle, %661, %662 : vector<1x64xi32>
    %664 = arith.andi %659, %663 : vector<1x64xi1>
    %cst_246 = arith.constant 0.000000e+00 : f32
    %665 = vector.shape_cast %664 : vector<1x64xi1> to vector<1x64xi1>
    %666 = vector.broadcast %665 : vector<1x64xi1> to vector<16x64xi1>
    %667 = vector.broadcast %cst_246 : f32 to vector<16x64xf32>
    %668 = arith.select %666, %655, %667 : vector<16x64xi1>, vector<16x64xf32>
    %669 = vector.extract_strided_slice %610 {offsets = [0, 57], sizes = [16, 7], strides = [1, 1]} : vector<16x64xf32> to vector<16x7xf32>
    %670 = vector.extract_strided_slice %610 {offsets = [0, 0], sizes = [16, 57], strides = [1, 1]} : vector<16x64xf32> to vector<16x57xf32>
    %671 = tpu.concatenate %669, %670 in 1 : vector<16x7xf32>, vector<16x57xf32> -> vector<16x64xf32>
    %c1_i32_247 = arith.constant 1 : i32
    %672 = vector.broadcast %c1_i32_247 : i32 to vector<1x64xi32>
    %673 = arith.addi %624, %672 : vector<1x64xi32>
    %c0_i32_248 = arith.constant 0 : i32
    %674 = vector.broadcast %c0_i32_248 : i32 to vector<1x64xi32>
    %675 = arith.cmpi sge, %673, %674 : vector<1x64xi32>
    %c1_i32_249 = arith.constant 1 : i32
    %676 = vector.broadcast %c1_i32_249 : i32 to vector<1x64xi32>
    %677 = arith.addi %624, %676 : vector<1x64xi32>
    %c7_i32_250 = arith.constant 7 : i32
    %678 = vector.broadcast %c7_i32_250 : i32 to vector<1x64xi32>
    %679 = arith.cmpi sle, %677, %678 : vector<1x64xi32>
    %680 = arith.andi %675, %679 : vector<1x64xi1>
    %c-1_i32_251 = arith.constant -1 : i32
    %681 = vector.broadcast %c-1_i32_251 : i32 to vector<1x64xi32>
    %682 = arith.addi %626, %681 : vector<1x64xi32>
    %c0_i32_252 = arith.constant 0 : i32
    %683 = vector.broadcast %c0_i32_252 : i32 to vector<1x64xi32>
    %684 = arith.cmpi sge, %682, %683 : vector<1x64xi32>
    %c-1_i32_253 = arith.constant -1 : i32
    %685 = vector.broadcast %c-1_i32_253 : i32 to vector<1x64xi32>
    %686 = arith.addi %626, %685 : vector<1x64xi32>
    %c7_i32_254 = arith.constant 7 : i32
    %687 = vector.broadcast %c7_i32_254 : i32 to vector<1x64xi32>
    %688 = arith.cmpi sle, %686, %687 : vector<1x64xi32>
    %689 = arith.andi %684, %688 : vector<1x64xi1>
    %690 = arith.andi %680, %689 : vector<1x64xi1>
    %cst_255 = arith.constant 0.000000e+00 : f32
    %691 = vector.shape_cast %690 : vector<1x64xi1> to vector<1x64xi1>
    %692 = vector.broadcast %691 : vector<1x64xi1> to vector<16x64xi1>
    %693 = vector.broadcast %cst_255 : f32 to vector<16x64xf32>
    %694 = arith.select %692, %671, %693 : vector<16x64xi1>, vector<16x64xf32>
    %695 = vector.extract_strided_slice %610 {offsets = [0, 63], sizes = [16, 1], strides = [1, 1]} : vector<16x64xf32> to vector<16x1xf32>
    %696 = vector.extract_strided_slice %610 {offsets = [0, 0], sizes = [16, 63], strides = [1, 1]} : vector<16x64xf32> to vector<16x63xf32>
    %697 = tpu.concatenate %695, %696 in 1 : vector<16x1xf32>, vector<16x63xf32> -> vector<16x64xf32>
    %c-1_i32_256 = arith.constant -1 : i32
    %698 = vector.broadcast %c-1_i32_256 : i32 to vector<1x64xi32>
    %699 = arith.addi %624, %698 : vector<1x64xi32>
    %c0_i32_257 = arith.constant 0 : i32
    %700 = vector.broadcast %c0_i32_257 : i32 to vector<1x64xi32>
    %701 = arith.cmpi sge, %699, %700 : vector<1x64xi32>
    %c-1_i32_258 = arith.constant -1 : i32
    %702 = vector.broadcast %c-1_i32_258 : i32 to vector<1x64xi32>
    %703 = arith.addi %624, %702 : vector<1x64xi32>
    %c7_i32_259 = arith.constant 7 : i32
    %704 = vector.broadcast %c7_i32_259 : i32 to vector<1x64xi32>
    %705 = arith.cmpi sle, %703, %704 : vector<1x64xi32>
    %706 = arith.andi %701, %705 : vector<1x64xi1>
    %cst_260 = arith.constant 0.000000e+00 : f32
    %707 = vector.shape_cast %706 : vector<1x64xi1> to vector<1x64xi1>
    %708 = vector.broadcast %707 : vector<1x64xi1> to vector<16x64xi1>
    %709 = vector.broadcast %cst_260 : f32 to vector<16x64xf32>
    %710 = arith.select %708, %697, %709 : vector<16x64xi1>, vector<16x64xf32>
    %711 = vector.extract_strided_slice %610 {offsets = [0, 1], sizes = [16, 63], strides = [1, 1]} : vector<16x64xf32> to vector<16x63xf32>
    %712 = vector.extract_strided_slice %610 {offsets = [0, 0], sizes = [16, 1], strides = [1, 1]} : vector<16x64xf32> to vector<16x1xf32>
    %713 = tpu.concatenate %711, %712 in 1 : vector<16x63xf32>, vector<16x1xf32> -> vector<16x64xf32>
    %c1_i32_261 = arith.constant 1 : i32
    %714 = vector.broadcast %c1_i32_261 : i32 to vector<1x64xi32>
    %715 = arith.addi %624, %714 : vector<1x64xi32>
    %c0_i32_262 = arith.constant 0 : i32
    %716 = vector.broadcast %c0_i32_262 : i32 to vector<1x64xi32>
    %717 = arith.cmpi sge, %715, %716 : vector<1x64xi32>
    %c1_i32_263 = arith.constant 1 : i32
    %718 = vector.broadcast %c1_i32_263 : i32 to vector<1x64xi32>
    %719 = arith.addi %624, %718 : vector<1x64xi32>
    %c7_i32_264 = arith.constant 7 : i32
    %720 = vector.broadcast %c7_i32_264 : i32 to vector<1x64xi32>
    %721 = arith.cmpi sle, %719, %720 : vector<1x64xi32>
    %722 = arith.andi %717, %721 : vector<1x64xi1>
    %cst_265 = arith.constant 0.000000e+00 : f32
    %723 = vector.shape_cast %722 : vector<1x64xi1> to vector<1x64xi1>
    %724 = vector.broadcast %723 : vector<1x64xi1> to vector<16x64xi1>
    %725 = vector.broadcast %cst_265 : f32 to vector<16x64xf32>
    %726 = arith.select %724, %713, %725 : vector<16x64xi1>, vector<16x64xf32>
    %727 = vector.extract_strided_slice %610 {offsets = [0, 7], sizes = [16, 57], strides = [1, 1]} : vector<16x64xf32> to vector<16x57xf32>
    %728 = vector.extract_strided_slice %610 {offsets = [0, 0], sizes = [16, 7], strides = [1, 1]} : vector<16x64xf32> to vector<16x7xf32>
    %729 = tpu.concatenate %727, %728 in 1 : vector<16x57xf32>, vector<16x7xf32> -> vector<16x64xf32>
    %c-1_i32_266 = arith.constant -1 : i32
    %730 = vector.broadcast %c-1_i32_266 : i32 to vector<1x64xi32>
    %731 = arith.addi %624, %730 : vector<1x64xi32>
    %c0_i32_267 = arith.constant 0 : i32
    %732 = vector.broadcast %c0_i32_267 : i32 to vector<1x64xi32>
    %733 = arith.cmpi sge, %731, %732 : vector<1x64xi32>
    %c-1_i32_268 = arith.constant -1 : i32
    %734 = vector.broadcast %c-1_i32_268 : i32 to vector<1x64xi32>
    %735 = arith.addi %624, %734 : vector<1x64xi32>
    %c7_i32_269 = arith.constant 7 : i32
    %736 = vector.broadcast %c7_i32_269 : i32 to vector<1x64xi32>
    %737 = arith.cmpi sle, %735, %736 : vector<1x64xi32>
    %738 = arith.andi %733, %737 : vector<1x64xi1>
    %c1_i32_270 = arith.constant 1 : i32
    %739 = vector.broadcast %c1_i32_270 : i32 to vector<1x64xi32>
    %740 = arith.addi %626, %739 : vector<1x64xi32>
    %c0_i32_271 = arith.constant 0 : i32
    %741 = vector.broadcast %c0_i32_271 : i32 to vector<1x64xi32>
    %742 = arith.cmpi sge, %740, %741 : vector<1x64xi32>
    %c1_i32_272 = arith.constant 1 : i32
    %743 = vector.broadcast %c1_i32_272 : i32 to vector<1x64xi32>
    %744 = arith.addi %626, %743 : vector<1x64xi32>
    %c7_i32_273 = arith.constant 7 : i32
    %745 = vector.broadcast %c7_i32_273 : i32 to vector<1x64xi32>
    %746 = arith.cmpi sle, %744, %745 : vector<1x64xi32>
    %747 = arith.andi %742, %746 : vector<1x64xi1>
    %748 = arith.andi %738, %747 : vector<1x64xi1>
    %cst_274 = arith.constant 0.000000e+00 : f32
    %749 = vector.shape_cast %748 : vector<1x64xi1> to vector<1x64xi1>
    %750 = vector.broadcast %749 : vector<1x64xi1> to vector<16x64xi1>
    %751 = vector.broadcast %cst_274 : f32 to vector<16x64xf32>
    %752 = arith.select %750, %729, %751 : vector<16x64xi1>, vector<16x64xf32>
    %753 = vector.extract_strided_slice %610 {offsets = [0, 8], sizes = [16, 56], strides = [1, 1]} : vector<16x64xf32> to vector<16x56xf32>
    %754 = vector.extract_strided_slice %610 {offsets = [0, 0], sizes = [16, 8], strides = [1, 1]} : vector<16x64xf32> to vector<16x8xf32>
    %755 = tpu.concatenate %753, %754 in 1 : vector<16x56xf32>, vector<16x8xf32> -> vector<16x64xf32>
    %c1_i32_275 = arith.constant 1 : i32
    %756 = vector.broadcast %c1_i32_275 : i32 to vector<1x64xi32>
    %757 = arith.addi %626, %756 : vector<1x64xi32>
    %c0_i32_276 = arith.constant 0 : i32
    %758 = vector.broadcast %c0_i32_276 : i32 to vector<1x64xi32>
    %759 = arith.cmpi sge, %757, %758 : vector<1x64xi32>
    %c1_i32_277 = arith.constant 1 : i32
    %760 = vector.broadcast %c1_i32_277 : i32 to vector<1x64xi32>
    %761 = arith.addi %626, %760 : vector<1x64xi32>
    %c7_i32_278 = arith.constant 7 : i32
    %762 = vector.broadcast %c7_i32_278 : i32 to vector<1x64xi32>
    %763 = arith.cmpi sle, %761, %762 : vector<1x64xi32>
    %764 = arith.andi %759, %763 : vector<1x64xi1>
    %cst_279 = arith.constant 0.000000e+00 : f32
    %765 = vector.shape_cast %764 : vector<1x64xi1> to vector<1x64xi1>
    %766 = vector.broadcast %765 : vector<1x64xi1> to vector<16x64xi1>
    %767 = vector.broadcast %cst_279 : f32 to vector<16x64xf32>
    %768 = arith.select %766, %755, %767 : vector<16x64xi1>, vector<16x64xf32>
    %769 = vector.extract_strided_slice %610 {offsets = [0, 9], sizes = [16, 55], strides = [1, 1]} : vector<16x64xf32> to vector<16x55xf32>
    %770 = vector.extract_strided_slice %610 {offsets = [0, 0], sizes = [16, 9], strides = [1, 1]} : vector<16x64xf32> to vector<16x9xf32>
    %771 = tpu.concatenate %769, %770 in 1 : vector<16x55xf32>, vector<16x9xf32> -> vector<16x64xf32>
    %c1_i32_280 = arith.constant 1 : i32
    %772 = vector.broadcast %c1_i32_280 : i32 to vector<1x64xi32>
    %773 = arith.addi %624, %772 : vector<1x64xi32>
    %c0_i32_281 = arith.constant 0 : i32
    %774 = vector.broadcast %c0_i32_281 : i32 to vector<1x64xi32>
    %775 = arith.cmpi sge, %773, %774 : vector<1x64xi32>
    %c1_i32_282 = arith.constant 1 : i32
    %776 = vector.broadcast %c1_i32_282 : i32 to vector<1x64xi32>
    %777 = arith.addi %624, %776 : vector<1x64xi32>
    %c7_i32_283 = arith.constant 7 : i32
    %778 = vector.broadcast %c7_i32_283 : i32 to vector<1x64xi32>
    %779 = arith.cmpi sle, %777, %778 : vector<1x64xi32>
    %780 = arith.andi %775, %779 : vector<1x64xi1>
    %c1_i32_284 = arith.constant 1 : i32
    %781 = vector.broadcast %c1_i32_284 : i32 to vector<1x64xi32>
    %782 = arith.addi %626, %781 : vector<1x64xi32>
    %c0_i32_285 = arith.constant 0 : i32
    %783 = vector.broadcast %c0_i32_285 : i32 to vector<1x64xi32>
    %784 = arith.cmpi sge, %782, %783 : vector<1x64xi32>
    %c1_i32_286 = arith.constant 1 : i32
    %785 = vector.broadcast %c1_i32_286 : i32 to vector<1x64xi32>
    %786 = arith.addi %626, %785 : vector<1x64xi32>
    %c7_i32_287 = arith.constant 7 : i32
    %787 = vector.broadcast %c7_i32_287 : i32 to vector<1x64xi32>
    %788 = arith.cmpi sle, %786, %787 : vector<1x64xi32>
    %789 = arith.andi %784, %788 : vector<1x64xi1>
    %790 = arith.andi %780, %789 : vector<1x64xi1>
    %cst_288 = arith.constant 0.000000e+00 : f32
    %791 = vector.shape_cast %790 : vector<1x64xi1> to vector<1x64xi1>
    %792 = vector.broadcast %791 : vector<1x64xi1> to vector<16x64xi1>
    %793 = vector.broadcast %cst_288 : f32 to vector<16x64xf32>
    %794 = arith.select %792, %771, %793 : vector<16x64xi1>, vector<16x64xf32>
    %795 = tpu.concatenate %652, %668, %694, %710, %610, %726, %752, %768, %794 in 0 : vector<16x64xf32>, vector<16x64xf32>, vector<16x64xf32>, vector<16x64xf32>, vector<16x64xf32>, vector<16x64xf32>, vector<16x64xf32>, vector<16x64xf32>, vector<16x64xf32> -> vector<144x64xf32>
    %cst_289 = arith.constant dense<0.000000e+00> : vector<16x64xf32>
    %796 = tpu.matmul %621, %795, %cst_289 {dimension_numbers = #tpu.dot_dimension_numbers<[1], [0], [0], [1], [0, 0, 1, 1], [], []>, precision = #tpu.contract_precision<fp32>} : vector<16x144xf32>, vector<144x64xf32>, vector<16x64xf32> -> vector<16x64xf32>
    %797 = vector.broadcast %614 : vector<16x1xf32> to vector<16x64xf32>
    %798 = arith.mulf %796, %797 : vector<16x64xf32>
    %799 = vector.broadcast %620 : vector<16x1xf32> to vector<16x64xf32>
    %800 = arith.addf %798, %799 : vector<16x64xf32>
    %cst_290 = arith.constant 0.000000e+00 : f32
    %801 = vector.broadcast %cst_290 : f32 to vector<16x64xf32>
    %802 = arith.maximumf %800, %801 : vector<16x64xf32>
    %803 = vector.extract_strided_slice %802 {offsets = [0, 1], sizes = [16, 63], strides = [1, 1]} : vector<16x64xf32> to vector<16x63xf32>
    %804 = vector.extract_strided_slice %802 {offsets = [0, 0], sizes = [16, 1], strides = [1, 1]} : vector<16x64xf32> to vector<16x1xf32>
    %805 = tpu.concatenate %803, %804 in 1 : vector<16x63xf32>, vector<16x1xf32> -> vector<16x64xf32>
    %806 = arith.maximumf %802, %805 : vector<16x64xf32>
    %807 = vector.extract_strided_slice %806 {offsets = [0, 8], sizes = [16, 56], strides = [1, 1]} : vector<16x64xf32> to vector<16x56xf32>
    %808 = vector.extract_strided_slice %806 {offsets = [0, 0], sizes = [16, 8], strides = [1, 1]} : vector<16x64xf32> to vector<16x8xf32>
    %809 = tpu.concatenate %807, %808 in 1 : vector<16x56xf32>, vector<16x8xf32> -> vector<16x64xf32>
    %810 = arith.maximumf %806, %809 : vector<16x64xf32>
    %811 = tpu.iota {dimensions = array<i32: 0>} : vector<64x16xi32>
    %812 = tpu.iota {dimensions = array<i32: 1>} : vector<1x16xi32>
    %c3_i32_291 = arith.constant 3 : i32
    %813 = vector.broadcast %c3_i32_291 : i32 to vector<1x16xi32>
    %814 = arith.andi %812, %813 : vector<1x16xi32>
    %c2_i32_292 = arith.constant 2 : i32
    %815 = vector.broadcast %c2_i32_292 : i32 to vector<1x16xi32>
    %816 = arith.shrsi %812, %815 : vector<1x16xi32>
    %c2_i32_293 = arith.constant 2 : i32
    %817 = vector.broadcast %c2_i32_293 : i32 to vector<1x16xi32>
    %818 = arith.muli %817, %816 : vector<1x16xi32>
    %c8_i32 = arith.constant 8 : i32
    %819 = vector.broadcast %c8_i32 : i32 to vector<1x16xi32>
    %820 = arith.muli %818, %819 : vector<1x16xi32>
    %c2_i32_294 = arith.constant 2 : i32
    %821 = vector.broadcast %c2_i32_294 : i32 to vector<1x16xi32>
    %822 = arith.muli %821, %814 : vector<1x16xi32>
    %823 = arith.addi %820, %822 : vector<1x16xi32>
    %824 = vector.broadcast %823 : vector<1x16xi32> to vector<64x16xi32>
    %825 = arith.cmpi eq, %811, %824 : vector<64x16xi32>
    %cst_295 = arith.constant 1.000000e+00 : f32
    %cst_296 = arith.constant 0.000000e+00 : f32
    %826 = vector.broadcast %cst_295 : f32 to vector<64x16xf32>
    %827 = vector.broadcast %cst_296 : f32 to vector<64x16xf32>
    %828 = arith.select %825, %826, %827 : vector<64x16xi1>, vector<64x16xf32>
    %cst_297 = arith.constant dense<0.000000e+00> : vector<16x16xf32>
    %829 = tpu.matmul %810, %828, %cst_297 {dimension_numbers = #tpu.dot_dimension_numbers<[1], [0], [0], [1], [0, 0, 1, 1], [], []>, precision = #tpu.contract_precision<fp32>} : vector<16x64xf32>, vector<64x16xf32>, vector<16x16xf32> -> vector<16x16xf32>
    %c0_298 = arith.constant 0 : index
    %c0_299 = arith.constant 0 : index
    %830 = vector.load %arg15[%c0_298, %c0_299] : memref<1x10xf32, #tpu.memory_space<vmem>>, vector<1x10xf32>
    %831 = vector.extract_strided_slice %829 {offsets = [0, 0], sizes = [1, 16], strides = [1, 1]} : vector<16x16xf32> to vector<1x16xf32>
    %c0_300 = arith.constant 0 : index
    %c0_301 = arith.constant 0 : index
    %c0_302 = arith.constant 0 : index
    %832 = vector.load %arg14[%c0_300, %c0_301, %c0_302] : memref<16x16x10xf32, #tpu.memory_space<vmem>>, vector<1x16x10xf32>
    %833 = vector.shape_cast %832 : vector<1x16x10xf32> to vector<16x10xf32>
    %cst_303 = arith.constant dense<0.000000e+00> : vector<1x10xf32>
    %834 = tpu.matmul %831, %833, %cst_303 {dimension_numbers = #tpu.dot_dimension_numbers<[1], [0], [0], [1], [0, 0, 1, 1], [], []>, precision = #tpu.contract_precision<fp32>} : vector<1x16xf32>, vector<16x10xf32>, vector<1x10xf32> -> vector<1x10xf32>
    %835 = arith.addf %830, %834 : vector<1x10xf32>
    %836 = vector.extract_strided_slice %829 {offsets = [1, 0], sizes = [1, 16], strides = [1, 1]} : vector<16x16xf32> to vector<1x16xf32>
    %c1_304 = arith.constant 1 : index
    %c0_305 = arith.constant 0 : index
    %c0_306 = arith.constant 0 : index
    %837 = vector.load %arg14[%c1_304, %c0_305, %c0_306] : memref<16x16x10xf32, #tpu.memory_space<vmem>>, vector<1x16x10xf32>
    %838 = vector.shape_cast %837 : vector<1x16x10xf32> to vector<16x10xf32>
    %cst_307 = arith.constant dense<0.000000e+00> : vector<1x10xf32>
    %839 = tpu.matmul %836, %838, %cst_307 {dimension_numbers = #tpu.dot_dimension_numbers<[1], [0], [0], [1], [0, 0, 1, 1], [], []>, precision = #tpu.contract_precision<fp32>} : vector<1x16xf32>, vector<16x10xf32>, vector<1x10xf32> -> vector<1x10xf32>
    %840 = arith.addf %835, %839 : vector<1x10xf32>
    %841 = vector.extract_strided_slice %829 {offsets = [2, 0], sizes = [1, 16], strides = [1, 1]} : vector<16x16xf32> to vector<1x16xf32>
    %c2_308 = arith.constant 2 : index
    %c0_309 = arith.constant 0 : index
    %c0_310 = arith.constant 0 : index
    %842 = vector.load %arg14[%c2_308, %c0_309, %c0_310] : memref<16x16x10xf32, #tpu.memory_space<vmem>>, vector<1x16x10xf32>
    %843 = vector.shape_cast %842 : vector<1x16x10xf32> to vector<16x10xf32>
    %cst_311 = arith.constant dense<0.000000e+00> : vector<1x10xf32>
    %844 = tpu.matmul %841, %843, %cst_311 {dimension_numbers = #tpu.dot_dimension_numbers<[1], [0], [0], [1], [0, 0, 1, 1], [], []>, precision = #tpu.contract_precision<fp32>} : vector<1x16xf32>, vector<16x10xf32>, vector<1x10xf32> -> vector<1x10xf32>
    %845 = arith.addf %840, %844 : vector<1x10xf32>
    %846 = vector.extract_strided_slice %829 {offsets = [3, 0], sizes = [1, 16], strides = [1, 1]} : vector<16x16xf32> to vector<1x16xf32>
    %c3 = arith.constant 3 : index
    %c0_312 = arith.constant 0 : index
    %c0_313 = arith.constant 0 : index
    %847 = vector.load %arg14[%c3, %c0_312, %c0_313] : memref<16x16x10xf32, #tpu.memory_space<vmem>>, vector<1x16x10xf32>
    %848 = vector.shape_cast %847 : vector<1x16x10xf32> to vector<16x10xf32>
    %cst_314 = arith.constant dense<0.000000e+00> : vector<1x10xf32>
    %849 = tpu.matmul %846, %848, %cst_314 {dimension_numbers = #tpu.dot_dimension_numbers<[1], [0], [0], [1], [0, 0, 1, 1], [], []>, precision = #tpu.contract_precision<fp32>} : vector<1x16xf32>, vector<16x10xf32>, vector<1x10xf32> -> vector<1x10xf32>
    %850 = arith.addf %845, %849 : vector<1x10xf32>
    %851 = vector.extract_strided_slice %829 {offsets = [4, 0], sizes = [1, 16], strides = [1, 1]} : vector<16x16xf32> to vector<1x16xf32>
    %c4 = arith.constant 4 : index
    %c0_315 = arith.constant 0 : index
    %c0_316 = arith.constant 0 : index
    %852 = vector.load %arg14[%c4, %c0_315, %c0_316] : memref<16x16x10xf32, #tpu.memory_space<vmem>>, vector<1x16x10xf32>
    %853 = vector.shape_cast %852 : vector<1x16x10xf32> to vector<16x10xf32>
    %cst_317 = arith.constant dense<0.000000e+00> : vector<1x10xf32>
    %854 = tpu.matmul %851, %853, %cst_317 {dimension_numbers = #tpu.dot_dimension_numbers<[1], [0], [0], [1], [0, 0, 1, 1], [], []>, precision = #tpu.contract_precision<fp32>} : vector<1x16xf32>, vector<16x10xf32>, vector<1x10xf32> -> vector<1x10xf32>
    %855 = arith.addf %850, %854 : vector<1x10xf32>
    %856 = vector.extract_strided_slice %829 {offsets = [5, 0], sizes = [1, 16], strides = [1, 1]} : vector<16x16xf32> to vector<1x16xf32>
    %c5 = arith.constant 5 : index
    %c0_318 = arith.constant 0 : index
    %c0_319 = arith.constant 0 : index
    %857 = vector.load %arg14[%c5, %c0_318, %c0_319] : memref<16x16x10xf32, #tpu.memory_space<vmem>>, vector<1x16x10xf32>
    %858 = vector.shape_cast %857 : vector<1x16x10xf32> to vector<16x10xf32>
    %cst_320 = arith.constant dense<0.000000e+00> : vector<1x10xf32>
    %859 = tpu.matmul %856, %858, %cst_320 {dimension_numbers = #tpu.dot_dimension_numbers<[1], [0], [0], [1], [0, 0, 1, 1], [], []>, precision = #tpu.contract_precision<fp32>} : vector<1x16xf32>, vector<16x10xf32>, vector<1x10xf32> -> vector<1x10xf32>
    %860 = arith.addf %855, %859 : vector<1x10xf32>
    %861 = vector.extract_strided_slice %829 {offsets = [6, 0], sizes = [1, 16], strides = [1, 1]} : vector<16x16xf32> to vector<1x16xf32>
    %c6 = arith.constant 6 : index
    %c0_321 = arith.constant 0 : index
    %c0_322 = arith.constant 0 : index
    %862 = vector.load %arg14[%c6, %c0_321, %c0_322] : memref<16x16x10xf32, #tpu.memory_space<vmem>>, vector<1x16x10xf32>
    %863 = vector.shape_cast %862 : vector<1x16x10xf32> to vector<16x10xf32>
    %cst_323 = arith.constant dense<0.000000e+00> : vector<1x10xf32>
    %864 = tpu.matmul %861, %863, %cst_323 {dimension_numbers = #tpu.dot_dimension_numbers<[1], [0], [0], [1], [0, 0, 1, 1], [], []>, precision = #tpu.contract_precision<fp32>} : vector<1x16xf32>, vector<16x10xf32>, vector<1x10xf32> -> vector<1x10xf32>
    %865 = arith.addf %860, %864 : vector<1x10xf32>
    %866 = vector.extract_strided_slice %829 {offsets = [7, 0], sizes = [1, 16], strides = [1, 1]} : vector<16x16xf32> to vector<1x16xf32>
    %c7 = arith.constant 7 : index
    %c0_324 = arith.constant 0 : index
    %c0_325 = arith.constant 0 : index
    %867 = vector.load %arg14[%c7, %c0_324, %c0_325] : memref<16x16x10xf32, #tpu.memory_space<vmem>>, vector<1x16x10xf32>
    %868 = vector.shape_cast %867 : vector<1x16x10xf32> to vector<16x10xf32>
    %cst_326 = arith.constant dense<0.000000e+00> : vector<1x10xf32>
    %869 = tpu.matmul %866, %868, %cst_326 {dimension_numbers = #tpu.dot_dimension_numbers<[1], [0], [0], [1], [0, 0, 1, 1], [], []>, precision = #tpu.contract_precision<fp32>} : vector<1x16xf32>, vector<16x10xf32>, vector<1x10xf32> -> vector<1x10xf32>
    %870 = arith.addf %865, %869 : vector<1x10xf32>
    %871 = vector.extract_strided_slice %829 {offsets = [8, 0], sizes = [1, 16], strides = [1, 1]} : vector<16x16xf32> to vector<1x16xf32>
    %c8 = arith.constant 8 : index
    %c0_327 = arith.constant 0 : index
    %c0_328 = arith.constant 0 : index
    %872 = vector.load %arg14[%c8, %c0_327, %c0_328] : memref<16x16x10xf32, #tpu.memory_space<vmem>>, vector<1x16x10xf32>
    %873 = vector.shape_cast %872 : vector<1x16x10xf32> to vector<16x10xf32>
    %cst_329 = arith.constant dense<0.000000e+00> : vector<1x10xf32>
    %874 = tpu.matmul %871, %873, %cst_329 {dimension_numbers = #tpu.dot_dimension_numbers<[1], [0], [0], [1], [0, 0, 1, 1], [], []>, precision = #tpu.contract_precision<fp32>} : vector<1x16xf32>, vector<16x10xf32>, vector<1x10xf32> -> vector<1x10xf32>
    %875 = arith.addf %870, %874 : vector<1x10xf32>
    %876 = vector.extract_strided_slice %829 {offsets = [9, 0], sizes = [1, 16], strides = [1, 1]} : vector<16x16xf32> to vector<1x16xf32>
    %c9 = arith.constant 9 : index
    %c0_330 = arith.constant 0 : index
    %c0_331 = arith.constant 0 : index
    %877 = vector.load %arg14[%c9, %c0_330, %c0_331] : memref<16x16x10xf32, #tpu.memory_space<vmem>>, vector<1x16x10xf32>
    %878 = vector.shape_cast %877 : vector<1x16x10xf32> to vector<16x10xf32>
    %cst_332 = arith.constant dense<0.000000e+00> : vector<1x10xf32>
    %879 = tpu.matmul %876, %878, %cst_332 {dimension_numbers = #tpu.dot_dimension_numbers<[1], [0], [0], [1], [0, 0, 1, 1], [], []>, precision = #tpu.contract_precision<fp32>} : vector<1x16xf32>, vector<16x10xf32>, vector<1x10xf32> -> vector<1x10xf32>
    %880 = arith.addf %875, %879 : vector<1x10xf32>
    %881 = vector.extract_strided_slice %829 {offsets = [10, 0], sizes = [1, 16], strides = [1, 1]} : vector<16x16xf32> to vector<1x16xf32>
    %c10 = arith.constant 10 : index
    %c0_333 = arith.constant 0 : index
    %c0_334 = arith.constant 0 : index
    %882 = vector.load %arg14[%c10, %c0_333, %c0_334] : memref<16x16x10xf32, #tpu.memory_space<vmem>>, vector<1x16x10xf32>
    %883 = vector.shape_cast %882 : vector<1x16x10xf32> to vector<16x10xf32>
    %cst_335 = arith.constant dense<0.000000e+00> : vector<1x10xf32>
    %884 = tpu.matmul %881, %883, %cst_335 {dimension_numbers = #tpu.dot_dimension_numbers<[1], [0], [0], [1], [0, 0, 1, 1], [], []>, precision = #tpu.contract_precision<fp32>} : vector<1x16xf32>, vector<16x10xf32>, vector<1x10xf32> -> vector<1x10xf32>
    %885 = arith.addf %880, %884 : vector<1x10xf32>
    %886 = vector.extract_strided_slice %829 {offsets = [11, 0], sizes = [1, 16], strides = [1, 1]} : vector<16x16xf32> to vector<1x16xf32>
    %c11 = arith.constant 11 : index
    %c0_336 = arith.constant 0 : index
    %c0_337 = arith.constant 0 : index
    %887 = vector.load %arg14[%c11, %c0_336, %c0_337] : memref<16x16x10xf32, #tpu.memory_space<vmem>>, vector<1x16x10xf32>
    %888 = vector.shape_cast %887 : vector<1x16x10xf32> to vector<16x10xf32>
    %cst_338 = arith.constant dense<0.000000e+00> : vector<1x10xf32>
    %889 = tpu.matmul %886, %888, %cst_338 {dimension_numbers = #tpu.dot_dimension_numbers<[1], [0], [0], [1], [0, 0, 1, 1], [], []>, precision = #tpu.contract_precision<fp32>} : vector<1x16xf32>, vector<16x10xf32>, vector<1x10xf32> -> vector<1x10xf32>
    %890 = arith.addf %885, %889 : vector<1x10xf32>
    %891 = vector.extract_strided_slice %829 {offsets = [12, 0], sizes = [1, 16], strides = [1, 1]} : vector<16x16xf32> to vector<1x16xf32>
    %c12 = arith.constant 12 : index
    %c0_339 = arith.constant 0 : index
    %c0_340 = arith.constant 0 : index
    %892 = vector.load %arg14[%c12, %c0_339, %c0_340] : memref<16x16x10xf32, #tpu.memory_space<vmem>>, vector<1x16x10xf32>
    %893 = vector.shape_cast %892 : vector<1x16x10xf32> to vector<16x10xf32>
    %cst_341 = arith.constant dense<0.000000e+00> : vector<1x10xf32>
    %894 = tpu.matmul %891, %893, %cst_341 {dimension_numbers = #tpu.dot_dimension_numbers<[1], [0], [0], [1], [0, 0, 1, 1], [], []>, precision = #tpu.contract_precision<fp32>} : vector<1x16xf32>, vector<16x10xf32>, vector<1x10xf32> -> vector<1x10xf32>
    %895 = arith.addf %890, %894 : vector<1x10xf32>
    %896 = vector.extract_strided_slice %829 {offsets = [13, 0], sizes = [1, 16], strides = [1, 1]} : vector<16x16xf32> to vector<1x16xf32>
    %c13 = arith.constant 13 : index
    %c0_342 = arith.constant 0 : index
    %c0_343 = arith.constant 0 : index
    %897 = vector.load %arg14[%c13, %c0_342, %c0_343] : memref<16x16x10xf32, #tpu.memory_space<vmem>>, vector<1x16x10xf32>
    %898 = vector.shape_cast %897 : vector<1x16x10xf32> to vector<16x10xf32>
    %cst_344 = arith.constant dense<0.000000e+00> : vector<1x10xf32>
    %899 = tpu.matmul %896, %898, %cst_344 {dimension_numbers = #tpu.dot_dimension_numbers<[1], [0], [0], [1], [0, 0, 1, 1], [], []>, precision = #tpu.contract_precision<fp32>} : vector<1x16xf32>, vector<16x10xf32>, vector<1x10xf32> -> vector<1x10xf32>
    %900 = arith.addf %895, %899 : vector<1x10xf32>
    %901 = vector.extract_strided_slice %829 {offsets = [14, 0], sizes = [1, 16], strides = [1, 1]} : vector<16x16xf32> to vector<1x16xf32>
    %c14 = arith.constant 14 : index
    %c0_345 = arith.constant 0 : index
    %c0_346 = arith.constant 0 : index
    %902 = vector.load %arg14[%c14, %c0_345, %c0_346] : memref<16x16x10xf32, #tpu.memory_space<vmem>>, vector<1x16x10xf32>
    %903 = vector.shape_cast %902 : vector<1x16x10xf32> to vector<16x10xf32>
    %cst_347 = arith.constant dense<0.000000e+00> : vector<1x10xf32>
    %904 = tpu.matmul %901, %903, %cst_347 {dimension_numbers = #tpu.dot_dimension_numbers<[1], [0], [0], [1], [0, 0, 1, 1], [], []>, precision = #tpu.contract_precision<fp32>} : vector<1x16xf32>, vector<16x10xf32>, vector<1x10xf32> -> vector<1x10xf32>
    %905 = arith.addf %900, %904 : vector<1x10xf32>
    %906 = vector.extract_strided_slice %829 {offsets = [15, 0], sizes = [1, 16], strides = [1, 1]} : vector<16x16xf32> to vector<1x16xf32>
    %c15 = arith.constant 15 : index
    %c0_348 = arith.constant 0 : index
    %c0_349 = arith.constant 0 : index
    %907 = vector.load %arg14[%c15, %c0_348, %c0_349] : memref<16x16x10xf32, #tpu.memory_space<vmem>>, vector<1x16x10xf32>
    %908 = vector.shape_cast %907 : vector<1x16x10xf32> to vector<16x10xf32>
    %cst_350 = arith.constant dense<0.000000e+00> : vector<1x10xf32>
    %909 = tpu.matmul %906, %908, %cst_350 {dimension_numbers = #tpu.dot_dimension_numbers<[1], [0], [0], [1], [0, 0, 1, 1], [], []>, precision = #tpu.contract_precision<fp32>} : vector<1x16xf32>, vector<16x10xf32>, vector<1x10xf32> -> vector<1x10xf32>
    %910 = arith.addf %905, %909 : vector<1x10xf32>
    %c0_351 = arith.constant 0 : index
    %c0_352 = arith.constant 0 : index
    %c0_353 = arith.constant 0 : index
    %911 = vector.load %arg18[%c0_351, %c0_352, %c0_353] : memref<1x1x10xf32, #tpu.memory_space<vmem>>, vector<1x1x10xf32>
    %912 = vector.shape_cast %911 : vector<1x1x10xf32> to vector<1x10xf32>
    %913 = vector.shape_cast %910 : vector<1x10xf32> to vector<1x1x10xf32>
    tpu.vector_store %arg18[%c0_351, %c0_352, %c0_353], %913 {strides = array<i32>} : memref<1x1x10xf32, #tpu.memory_space<vmem>>, vector<1x1x10xf32>,
    %c0_354 = arith.constant 0 : index
    %c0_355 = arith.constant 0 : index
    %914 = vector.load %arg16[%c0_354, %c0_355] : memref<10x32xf32, #tpu.memory_space<vmem>>, vector<10x32xf32>
    %cst_356 = arith.constant dense<0.000000e+00> : vector<10x1xf32>
    %915 = tpu.matmul %914, %190, %cst_356 {dimension_numbers = #tpu.dot_dimension_numbers<[1], [0], [0], [1], [0, 0, 1, 1], [], []>, precision = #tpu.contract_precision<fp32>} : vector<10x32xf32>, vector<32x1xf32>, vector<10x1xf32> -> vector<10x1xf32>
    %c0_357 = arith.constant 0 : index
    %c0_358 = arith.constant 0 : index
    %916 = vector.load %arg17[%c0_357, %c0_358] : memref<10x1xf32, #tpu.memory_space<vmem>>, vector<10x1xf32>
    %917 = arith.addf %915, %916 : vector<10x1xf32>
    %c0_359 = arith.constant 0 : index
    %c0_360 = arith.constant 0 : index
    %c0_361 = arith.constant 0 : index
    %918 = vector.load %arg20[%c0_359, %c0_360, %c0_361] : memref<1x10x1xf32, #tpu.memory_space<vmem>>, vector<1x10x1xf32>
    %919 = vector.shape_cast %918 : vector<1x10x1xf32> to vector<10x1xf32>
    %920 = vector.shape_cast %917 : vector<10x1xf32> to vector<1x10x1xf32>
    tpu.vector_store %arg20[%c0_359, %c0_360, %c0_361], %920 {strides = array<i32>} : memref<1x10x1xf32, #tpu.memory_space<vmem>>, vector<1x10x1xf32>,
    return
  }
  func.func @transform_0(%arg0: i32) -> (i32, i32, i32) {
    %c0_i32 = arith.constant 0 : i32
    %c0_i32_0 = arith.constant 0 : i32
    %c0_i32_1 = arith.constant 0 : i32
    return %arg0, %c0_i32, %c0_i32_0 : i32, i32, i32
  }
  func.func @transform_1(%arg0: i32) -> (i32, i32) {
    %c0_i32 = arith.constant 0 : i32
    %c0_i32_0 = arith.constant 0 : i32
    %c0_i32_1 = arith.constant 0 : i32
    return %c0_i32, %c0_i32_0 : i32, i32
  }
  func.func @transform_2(%arg0: i32) -> (i32, i32) {
    %c0_i32 = arith.constant 0 : i32
    %c0_i32_0 = arith.constant 0 : i32
    %c0_i32_1 = arith.constant 0 : i32
    return %c0_i32, %c0_i32_0 : i32, i32
  }
  func.func @transform_3(%arg0: i32) -> (i32, i32) {
    %c0_i32 = arith.constant 0 : i32
    %c0_i32_0 = arith.constant 0 : i32
    %c0_i32_1 = arith.constant 0 : i32
    return %c0_i32, %c0_i32_0 : i32, i32
  }
  func.func @transform_4(%arg0: i32) -> (i32, i32) {
    %c0_i32 = arith.constant 0 : i32
    %c0_i32_0 = arith.constant 0 : i32
    %c0_i32_1 = arith.constant 0 : i32
    return %c0_i32, %c0_i32_0 : i32, i32
  }
  func.func @transform_5(%arg0: i32) -> (i32, i32) {
    %c0_i32 = arith.constant 0 : i32
    %c0_i32_0 = arith.constant 0 : i32
    %c0_i32_1 = arith.constant 0 : i32
    return %c0_i32, %c0_i32_0 : i32, i32
  }
  func.func @transform_6(%arg0: i32) -> (i32, i32) {
    %c0_i32 = arith.constant 0 : i32
    %c0_i32_0 = arith.constant 0 : i32
    %c0_i32_1 = arith.constant 0 : i32
    return %c0_i32, %c0_i32_0 : i32, i32
  }
  func.func @transform_7(%arg0: i32) -> (i32, i32) {
    %c0_i32 = arith.constant 0 : i32
    %c0_i32_0 = arith.constant 0 : i32
    %c0_i32_1 = arith.constant 0 : i32
    return %c0_i32, %c0_i32_0 : i32, i32
  }
  func.func @transform_8(%arg0: i32) -> (i32, i32, i32) {
    %c0_i32 = arith.constant 0 : i32
    %c0_i32_0 = arith.constant 0 : i32
    %c0_i32_1 = arith.constant 0 : i32
    %c0_i32_2 = arith.constant 0 : i32
    return %c0_i32, %c0_i32_0, %c0_i32_1 : i32, i32, i32
  }
  func.func @transform_9(%arg0: i32) -> (i32, i32) {
    %c0_i32 = arith.constant 0 : i32
    %c0_i32_0 = arith.constant 0 : i32
    %c0_i32_1 = arith.constant 0 : i32
    return %c0_i32, %c0_i32_0 : i32, i32
  }
  func.func @transform_10(%arg0: i32) -> (i32, i32, i32) {
    %c0_i32 = arith.constant 0 : i32
    %c0_i32_0 = arith.constant 0 : i32
    %c0_i32_1 = arith.constant 0 : i32
    %c0_i32_2 = arith.constant 0 : i32
    return %c0_i32, %c0_i32_0, %c0_i32_1 : i32, i32, i32
  }
  func.func @transform_11(%arg0: i32) -> (i32, i32) {
    %c0_i32 = arith.constant 0 : i32
    %c0_i32_0 = arith.constant 0 : i32
    %c0_i32_1 = arith.constant 0 : i32
    return %c0_i32, %c0_i32_0 : i32, i32
  }
  func.func @transform_12(%arg0: i32) -> (i32, i32, i32) {
    %c0_i32 = arith.constant 0 : i32
    %c0_i32_0 = arith.constant 0 : i32
    %c0_i32_1 = arith.constant 0 : i32
    %c0_i32_2 = arith.constant 0 : i32
    return %c0_i32, %c0_i32_0, %c0_i32_1 : i32, i32, i32
  }
  func.func @transform_13(%arg0: i32) -> (i32, i32, i32) {
    %c0_i32 = arith.constant 0 : i32
    %c0_i32_0 = arith.constant 0 : i32
    %c0_i32_1 = arith.constant 0 : i32
    %c0_i32_2 = arith.constant 0 : i32
    return %c0_i32, %c0_i32_0, %c0_i32_1 : i32, i32, i32
  }
  func.func @transform_14(%arg0: i32) -> (i32, i32) {
    %c0_i32 = arith.constant 0 : i32
    %c0_i32_0 = arith.constant 0 : i32
    %c0_i32_1 = arith.constant 0 : i32
    return %c0_i32, %c0_i32_0 : i32, i32
  }
  func.func @transform_15(%arg0: i32) -> (i32, i32) {
    %c0_i32 = arith.constant 0 : i32
    %c0_i32_0 = arith.constant 0 : i32
    %c0_i32_1 = arith.constant 0 : i32
    return %c0_i32, %c0_i32_0 : i32, i32
  }
  func.func @transform_16(%arg0: i32) -> (i32, i32) {
    %c0_i32 = arith.constant 0 : i32
    %c0_i32_0 = arith.constant 0 : i32
    %c0_i32_1 = arith.constant 0 : i32
    return %c0_i32, %c0_i32_0 : i32, i32
  }
  func.func @transform_17(%arg0: i32) -> (i32, i32, i32) {
    %c0_i32 = arith.constant 0 : i32
    %c0_i32_0 = arith.constant 0 : i32
    %c0_i32_1 = arith.constant 0 : i32
    return %arg0, %c0_i32, %c0_i32_0 : i32, i32, i32
  }
  func.func @transform_18(%arg0: i32) -> (i32, i32, i32) {
    %c0_i32 = arith.constant 0 : i32
    %c0_i32_0 = arith.constant 0 : i32
    %c0_i32_1 = arith.constant 0 : i32
    return %arg0, %c0_i32, %c0_i32_0 : i32, i32, i32
  }
  func.func @transform_19(%arg0: i32) -> (i32, i32, i32) {
    %c0_i32 = arith.constant 0 : i32
    %c0_i32_0 = arith.constant 0 : i32
    %c0_i32_1 = arith.constant 0 : i32
    return %arg0, %c0_i32, %c0_i32_0 : i32, i32, i32
  }
}

</mosaic_0001>

<bundles_post_ra>
// kernel: tpu_custom_call.1
= control target key start
LH: loop header
LB: loop body
LE: loop exit
PB: predicated region body
PF: predicated region fallthrough
CT: control target
= control target key end

     0   :  { %s21621_s0 = inlined_call_operand.vmem [shape: f32[2,4,256], index: 0, kind: input, shape index: {}]   ;;  %s21622_s1 = inlined_call_operand.vmem [shape: f32[8,36], index: 1, kind: input, shape index: {}]   ;;  %s21623_s2 = inlined_call_operand.vmem [shape: f32[8,1], index: 2, kind: input, shape index: {}]   ;;  %s21624_s3 = inlined_call_operand.vmem [shape: f32[32,8], index: 3, kind: input, shape index: {}]   ;;  %s21625_s4 = inlined_call_operand.vmem [shape: f32[32,1], index: 4, kind: input, shape index: {}]   ;;  %s21626_s5 = inlined_call_operand.vmem [shape: f32[40,32], index: 5, kind: input, shape index: {}]   ;;  %s21627_s6 = inlined_call_operand.vmem [shape: f32[40,1], index: 6, kind: input, shape index: {}]   ;;  %s21628_s7 = inlined_call_operand.vmem [shape: f32[8,36], index: 7, kind: input, shape index: {}]   ;;  %s21629_s8 = inlined_call_operand.vmem [shape: f32[3,8,1], index: 8, kind: input, shape index: {}]   ;;  %s21630_s9 = inlined_call_operand.vmem [shape: f32[16,72], index: 9, kind: input, shape index: {}]   ;;  %s21631_s10 = inlined_call_operand.vmem [shape: f32[3,16,1], index: 10, kind: input, shape index: {}]   ;;  %s21632_s11 = inlined_call_operand.vmem [shape: f32[16,144], index: 11, kind: input, shape index: {}]   ;;  %s21633_s12 = inlined_call_operand.vmem [shape: f32[3,16,1], index: 12, kind: input, shape index: {}]   ;;  %s21634_s13 = inlined_call_operand.vmem [shape: f32[16,16,10], index: 13, kind: input, shape index: {}]   ;;  %s21635_s14 = inlined_call_operand.vmem [shape: f32[1,10], index: 14, kind: input, shape index: {}]   ;;  %s21636_s15 = inlined_call_operand.vmem [shape: f32[10,32], index: 15, kind: input, shape index: {}]   ;;  %s21637_s16 = inlined_call_operand.vmem [shape: f32[10,1], index: 16, kind: input, shape index: {}]   ;;  %s21638_s17 = inlined_call_operand.hbm [shape: f32[2,1,10], index: 17, kind: output, shape index: {0}]   ;;  %s21639_s18 = inlined_call_operand.vmem [shape: f32[2,40,1], index: 18, kind: output, shape index: {1}]   ;;  %s21640_s19 = inlined_call_operand.vmem [shape: f32[2,10,1], index: 19, kind: output, shape index: {2}]  }
   0x1   :  { %21850 = sst [smem:[#allocation47_spill]] %s21621_s0 }
   0x2   :  { %21851 = sst [smem:[#allocation48_spill]] %s21622_s1 }
   0x3   :  { %21852 = sst [smem:[#allocation49_spill]] %s21623_s2 }
   0x4   :  { %21853 = sst [smem:[#allocation50_spill]] %s21624_s3 }
   0x5   :  { %21854 = sst [smem:[#allocation51_spill]] %s21625_s4 }
   0x6   :  { %21855 = sst [smem:[#allocation52_spill]] %s21626_s5 }
   0x7   :  { %21856 = sst [smem:[#allocation53_spill]] %s21627_s6 }
   0x8   :  { %21857 = sst [smem:[#allocation54_spill]] %s21628_s7 }
   0x9   :  { %21858 = sst [smem:[#allocation55_spill]] %s21629_s8 }
   0xa   :  { %25 = vsyncpa [#allocation3], 0 }
   0xb   :  { %27 = vsyncpa [#allocation3 + $0x1], 0  ;;  %s18289_s0 = smov 0   ;;  %s18291_s30 = smov 0  }
   0xc   :  { %s18293_s20 = smov 0   ;;  %s18295_s21 = smov 0  }
   0xd LB: > { %21859 = sst [smem:[#allocation5_spill]] %s18155_s20  ;;  %s18310_s1 = sadd.s32 4294967295, %s18159_s21   ;;  %s18159_s21 = sphi %s18295_s21, %s22224_s21   ;;  %s18155_s20 = sphi %s18293_s20, %s22226_s20   ;;  %s18151_s30 = sphi %s18291_s30, %s22228_s30   ;;  %s18147_s0 = sphi %s18289_s0, %s22227_s0  }
   0xe   : > { %s14751_s22 = sadd.s32 4294967294, %s18159_s21   ;;  %s18314_s2 = sadd.s32 1, %s18159_s21  }
   0xf   : > { %21860 = sst [smem:[#allocation6_spill]] %s18314_s2  ;;  %s402_s23 = sadd.s32 1, %s18155_s20 }
  0x10   : > { %s399_s24 = ssub.s32 %s18159_s21, %s18314_s2  ;;  %p412_p0 = scmp.ne.s32.totalorder %s18155_s20, %s18151_s30 }
  0x11   : > { %p400_p1 = scmp.eq.s32.totalorder %s399_s24, 0  ;;  %p413_p2 = scmp.eq.s32.totalorder %s18310_s1, 1 }
  0x12   : > { %p418_p3 = scmp.ne.s32.totalorder %s18151_s30, %s18147_s0  ;;  %p419_p4 = scmp.eq.s32.totalorder %s14751_s22, 1 }
  0x13   : > { %s18325_s25 = scalar_select %p400_p1, %s18155_s20, %s402_s23  }
  0x14   : > { %p18327_p5 = por %p413_p2, %p412_p0  ;;  %p18331_p6 = por %p419_p4, %p418_p3 }
  0x15   : > { %21861 = sst [smem:[#allocation7_spill]] %s18325_s25  ;;  %p14754_p7 = scmp.ge.s32.totalorder %s18159_s21, 1 }
  0x16   : > { %p545_p8 = scmp.lt.s32.totalorder %s18159_s21, 3 }
  0x18   : > { %p546_p9 = pnand %p14754_p7, %p545_p8 }
  0x1a   : > { %549 = sbr.rel (%p546_p9) target bundleno = 4507 (0x119b), region = 88 }
  0x21   : > { %p610_p10 = scmp.lt.s32.totalorder %s18310_s1, 1  ;;  %s21864_s23 = sld [smem:[#allocation47_spill]]  ;;  %v21690_v2 = vmov 0.0   ;;  %v21683_v3 = vlaneseq  ;;  %vm21651_vm4 = vcmask 130048   ;;  %vm21654_vm9 = vcmask 293888   ;;  %v3329_v16 = vld [vmem:[%s21630_s9] sm:$0xff] }
  0x22   : > { %s21672_s25 = smov 1   ;;  %s21663_s20 = smov 16   ;;  %928 = vmatprep.mubr.f32.mxu0 %v21690_v2  ;;  %vm21653_vm10 = vcmask 7168   ;;  %vm21652_vm11 = vcmask 138240   ;;  %vm21659_vm13 = vcmask 1043456   ;;  %vm21655_vm15 = vcmask 121856  }
  0x23   : > { %s18339_s27 = scalar_select %p610_p10, %s18310_s1, 1  ;;  %v18385_v4 = vand.u32 127, %v21683_v3  ;;  %v3330_v45 = vld [vmem:[%s21630_s9 + $0x8] sm:$0xff] }
  0x24   : > { %s21669_s2 = smov 17   ;;  %s21645_s29 = smov 127  }
  0x25   : > { %s14923_s28 = sshll.u32 %s18339_s27, 3  ;;  %s21665_s22 = smov 112   ;;  %21865 = vst [vmem:[#allocation8_spill] sm:$0xff] %v18385_v4  ;;  %v629_v5 = vadd.s32 128, %v18385_v4  ;;  %v632_v6 = vshra.s32 %v18385_v4, 4  ;;  %v630_v8 = vand.u32 15, %v18385_v4 }
  0x26   : > { %s21899_s7 = sld [smem:[#allocation54_spill]]  ;;  %s21902_s5 = sld [smem:[#allocation52_spill]] }
  0x27   : > { %s614_s24 = scalar_lea.vmem %s21864_s23, %s14923_s28  ;;  %s21647_s28 = smov 15   ;;  %v633_v7 = vshra.s32 %v629_v5, 4  ;;  %v654_v9 = vadd.s32 4294967295, %v632_v6  ;;  %v631_v10 = vand.u32 15, %v629_v5  ;;  %v18390_v12 = vadd.s32 4294967295, %v630_v8 }
  0x28   : > { %v18345_v0 = vld [vmem:[%s614_s24] sm:$0xff]  ;;  %s21667_s23 = smov 113   ;;  %s21649_s24 = smov 111   ;;  %v18399_v17 = vadd.s32 1, %v630_v8  ;;  %v754_v28 = vadd.s32 1, %v632_v6 }
  0x29   : > { %715 = vrot.lane.b32.xlu1 %v18345_v0, %s21672_s25  ;;  %673 = vrot.lane.b32.xlu0 %v18345_v0, %s21663_s20  ;;  %v18353_v1 = vcombine.high %v18345_v0, %v18345_v0  ;;  %v655_v11 = vadd.s32 4294967295, %v633_v7  ;;  %vm656_vm0 = vcmp.ge.s32.totalorder %v654_v9, 0  ;;  %vm658_vm1 = vcmp.le.s32.totalorder %v654_v9, 15  ;;  %s21903_s4 = sld [smem:[#allocation51_spill]]  ;;  %s21912_s6 = sld [smem:[#allocation53_spill]] }
  0x2a   : > { %v18392_v15 = vadd.s32 4294967295, %v631_v10  ;;  %vm18394_vm5 = vmand %vm656_vm0, %vm658_vm1  ;;  %vm21657_vm6 = vcmp.ge.s32.totalorder %v18390_v12, 0  ;;  %v18401_v18 = vadd.s32 1, %v631_v10  ;;  %vm21678_vm0 = vcmp.le.s32.totalorder %v18399_v17, 15  ;;  %s21913_s8 = sld [smem:[#allocation55_spill]] }
  0x2b   : > { %vm657_vm2 = vcmp.ge.s32.totalorder %v655_v11, 0  ;;  %vm659_vm3 = vcmp.le.s32.totalorder %v655_v11, 15  ;;  %vm18419_vm12 = vmand %vm21657_vm6, %vm18394_vm5  ;;  %v755_v33 = vadd.s32 1, %v633_v7 }
  0x2c   : > { %vm21656_vm7 = vcmp.ge.s32.totalorder %v18392_v15, 0  ;;  %vm18404_vm8 = vmand %vm657_vm2, %vm659_vm3  ;;  %vm21677_vm1 = vcmp.le.s32.totalorder %v18401_v18, 15 }
  0x2d   : > { %639 = vrot.lane.b32.xlu1 %v18345_v0, %s21669_s2  ;;  %670 = vrot.lane.b32.xlu0 %v18353_v1, %s21663_s20  ;;  %vm18427_vm14 = vmand %vm21656_vm7, %vm18404_vm8  ;;  %s18027_s20 = smul.u32 40, %s18339_s27 }
  0x2e   : > { %vm18452_vm2 = vmand %vm21678_vm0, %vm18394_vm5 }
  0x2f   : > { %vm18460_vm3 = vmand %vm21677_vm1, %vm18404_vm8 }
  0x31   : > { %712 = vrot.lane.b32.xlu1 %v18353_v1, %s21672_s25  ;;  %636 = vrot.lane.b32.xlu0 %v18353_v1, %s21669_s2  ;;  %s21923_s2 = smov 112   ;;  %s21924_s25 = smov 16  }
  0x35   : > { %689 = vrot.lane.b32.xlu1 %v18345_v0, %s21647_s28  ;;  %686 = vrot.lane.b32.xlu0 %v18353_v1, %s21647_s28  ;;  %s18982_s28 = scalar_lea.vmem %s21639_s18, %s18027_s20  ;;  %s18183_s20 = smov 57  }
  0x39   : > { %730 = vrot.lane.b32.xlu1 %v18353_v1, %s21645_s29  ;;  %728 = vrot.lane.b32.xlu0 %v18345_v0, %s21645_s29  ;;  %s21901_s29 = sld [smem:[#allocation50_spill]] }
  0x3d   : > { %772 = vrot.lane.b32.xlu1 %v18353_v1, %s21665_s22  ;;  %770 = vrot.lane.b32.xlu0 %v18345_v0, %s21665_s22  ;;  %s21920_s22 = smov 1  }
  0x41   : > { %746 = vrot.lane.b32.xlu1 %v18353_v1, %s21667_s23  ;;  %744 = vrot.lane.b32.xlu0 %v18345_v0, %s21667_s23  ;;  %s21925_s23 = smov 111  }
  0x45   : > { %788 = vrot.lane.b32.xlu1 %v18353_v1, %s21649_s24  ;;  %786 = vrot.lane.b32.xlu0 %v18345_v0, %s21649_s24  ;;  %s21870_s24 = sld [smem:[#allocation48_spill]] }
  0x4b   : > { %v626_v24 = vld [vmem:[%s21870_s24] sm:$0xff]  ;;  %s21898_s24 = sld [smem:[#allocation49_spill]] }
  0x4c   : > { %v846_v34 = vsel %vm21654_vm9, %v626_v24, 0  ;;  %vm758_vm9 = vcmp.le.s32.totalorder %v754_v28, 15 }
  0x4d   : > { %v18465_v50 = vand.u32 4294901760, %v846_v34 }
  0x4f   : > { %v18479_v8 = vsub.f32 %v846_v34, %v18465_v50 }
  0x51   : > { %v931_v34 = vand.u32 4294901760, %v18479_v8 }
  0x9b   : > { %v716_v13 = vpop.permute.xlu1 %715  ;;  %v674_v14 = vpop.permute.xlu0 %673 }
  0x9f   : > { %v640_v19 = vpop.permute.xlu1 %639  ;;  %v671_v20 = vpop.permute.xlu0 %670 }
  0xa0   : > { %v676_v22 = vsel %vm21651_vm4, %v674_v14, %v671_v20  ;;  %v679_v23 = vsel %vm21651_vm4, %v671_v20, %v674_v14  ;;  %vm21658_vm4 = vcmask 1039360  }
  0xa1   : > { %v684_v25 = vsel %vm18394_vm5, %v679_v23, 0.0  ;;  %v685_v29 = vsel %vm18404_vm8, %v676_v22, 0.0 }
  0xa2   : > { %v806_v30 = vrot.slane %v684_v25, 4  ;;  %v807_v44 = vrot.slane %v685_v29, 4 }
  0xa3   : > { %v713_v31 = vpop.permute.xlu1 %712  ;;  %v637_v32 = vpop.permute.xlu0 %636 }
  0xa4   : > { %v718_v35 = vsel %vm21653_vm10, %v716_v13, %v713_v31  ;;  %v721_v36 = vsel %vm21653_vm10, %v713_v31, %v716_v13  ;;  %v642_v37 = vsel %vm21652_vm11, %v640_v19, %v637_v32  ;;  %v645_v38 = vsel %vm21652_vm11, %v637_v32, %v640_v19 }
  0xa5   : > { %v726_v39 = vsel %vm21657_vm6, %v721_v36, 0.0  ;;  %v727_v40 = vsel %vm21656_vm7, %v718_v35, 0.0  ;;  %v668_v41 = vsel %vm18419_vm12, %v645_v38, 0.0  ;;  %v669_v42 = vsel %vm18427_vm14, %v642_v37, 0.0 }
  0xa6   : > { %v812_v46 = vrot.slane %v726_v39, 4  ;;  %v830_v47 = vsel %vm21659_vm13, %v668_v41, %v806_v30  ;;  %v813_v51 = vrot.slane %v727_v40, 4  ;;  %v831_v52 = vsel %vm21659_vm13, %v669_v42, %v807_v44 }
  0xa7   : > { %v690_v48 = vpop.permute.xlu1 %689  ;;  %v687_v49 = vpop.permute.xlu0 %686  ;;  %vm756_vm11 = vcmp.ge.s32.totalorder %v754_v28, 0  ;;  %vm757_vm10 = vcmp.ge.s32.totalorder %v755_v33, 0  ;;  %v856_v57 = vand.u32 4294901760, %v830_v47  ;;  %v854_v60 = vand.u32 4294901760, %v831_v52 }
  0xa8   : > { %v692_v53 = vsel %vm21655_vm15, %v690_v48, %v687_v49  ;;  %v695_v54 = vsel %vm21655_vm15, %v687_v49, %v690_v48  ;;  %vm759_vm15 = vcmp.le.s32.totalorder %v755_v33, 15  ;;  %vm18488_vm7 = vmand %vm756_vm11, %vm758_vm9  ;;  %vm21660_vm6 = vcmask 916480  }
  0xa9   : > { %v710_v55 = vsel %vm18452_vm2, %v695_v54, 0.0  ;;  %v711_v56 = vsel %vm18460_vm3, %v692_v53, 0.0  ;;  %v18492_v14 = vsub.f32 %v830_v47, %v856_v57  ;;  %v18503_v23 = vsub.f32 %v831_v52, %v854_v60 }
  0xaa   : > { %v832_v58 = vsel %vm21659_vm13, %v710_v55, %v812_v46  ;;  %v833_v59 = vsel %vm21659_vm13, %v711_v56, %v813_v51  ;;  %vm21661_vm13 = vcmask 924672   ;;  %vm21883_vm9 = vcmask 1043456  }
  0xab   : > { %v858_v61 = vand.u32 4294901760, %v833_v59  ;;  %v860_v62 = vand.u32 4294901760, %v832_v58  ;;  %v731_v63 = vpop.permute.xlu1 %730  ;;  %v729_v5 = vpop.permute.xlu0 %728  ;;  %vm21885_vm11 = vcmp.ge.s32.totalorder %v18390_v12, 0  ;;  %v948_v40 = vand.u32 4294901760, %v18492_v14 }
  0xac   : > { %v733_v6 = vsel %vm21658_vm4, %v729_v5, %v731_v63  ;;  %v737_v7 = vsel %vm21658_vm4, %v731_v63, %v729_v5  ;;  %vm18499_vm4 = vmand %vm757_vm10, %vm759_vm15  ;;  %v942_v49 = vand.u32 4294901760, %v18503_v23 }
  0xad   : > { %v18481_v9 = vpack.c.bf16 %v858_v61, %v854_v60  ;;  %v18483_v10 = vpack.c.bf16 %v860_v62, %v856_v57  ;;  %v18485_v11 = vsub.f32 %v833_v59, %v858_v61  ;;  %v742_v19 = vsel %vm21678_vm0, %v733_v6, 0.0  ;;  %vm21884_vm10 = vmmov %vm21883_vm9 }
  0xae   : > { %v743_v20 = vsel %vm21677_vm1, %v737_v7, 0.0  ;;  %v18505_v24 = vsub.f32 %v832_v58, %v860_v62  ;;  %v819_v25 = vrot.slane %v742_v19, 4  ;;  %vm18525_vm15 = vmand %vm21885_vm11, %vm18488_vm7  ;;  %vm21662_vm11 = vcmask 908288  }
  0xaf   : > { %v820_v28 = vrot.slane %v743_v20, 4  ;;  %v773_v29 = vpop.permute.xlu1 %772  ;;  %16660 = vmatprep.subr.bf16.mxu0 %v18481_v9  ;;  %v771_v30 = vpop.permute.xlu0 %770  ;;  %v954_v33 = vand.u32 4294901760, %v18485_v11  ;;  %v932_v57 = vsub.f32 %v18479_v8, %v931_v34  ;;  %v943_v20 = vsub.f32 %v18503_v23, %v942_v49 }
  0xb0   : > { %v775_v31 = vsel %vm21660_vm6, %v771_v30, %v773_v29  ;;  %v779_v32 = vsel %vm21660_vm6, %v773_v29, %v771_v30  ;;  %16662 = vmatpush1.bf16.msra.mxu0 %v18483_v10  ;;  %v834_v35 = vsel %vm21883_vm9, %v18345_v0, %v819_v25  ;;  %vm21888_vm9 = vcmp.ge.s32.totalorder %v18392_v15, 0 }
  0xb1   : > { %v835_v36 = vsel %vm21884_vm10, %v18353_v1, %v820_v28  ;;  %v784_v37 = vsel %vm18488_vm7, %v775_v31, 0.0  ;;  %v785_v38 = vsel %vm18499_vm4, %v779_v32, 0.0  ;;  %v864_v41 = vand.u32 4294901760, %v834_v35  ;;  %vm18534_vm10 = vmand %vm21888_vm9, %vm18499_vm4 }
  0xb2   : > { %v862_v0 = vand.u32 4294901760, %v835_v36  ;;  %v960_v42 = vand.u32 4294901760, %v18505_v24  ;;  %v825_v44 = vrot.slane %v784_v37, 4  ;;  %v826_v46 = vrot.slane %v785_v38, 4 }
  0xb3   : > { %v747_v47 = vpop.permute.xlu1 %746  ;;  %v745_v48 = vpop.permute.xlu0 %744  ;;  %v955_v54 = vsub.f32 %v18485_v11, %v954_v33  ;;  %v18554_v58 = vsub.f32 %v834_v35, %v864_v41  ;;  %vm21891_vm9 = vcmask 1043456   ;;  %v949_v25 = vsub.f32 %v18492_v14, %v948_v40 }
  0xb4   : > { %v18540_v51 = vsub.f32 %v835_v36, %v862_v0  ;;  %v749_v52 = vsel %vm21661_vm13, %v745_v48, %v747_v47  ;;  %v753_v53 = vsel %vm21661_vm13, %v747_v47, %v745_v48  ;;  %vm21892_vm6 = vmmov %vm21891_vm9  ;;  %v961_v31 = vsub.f32 %v18505_v24, %v960_v42 }
  0xb5   : > { %v768_v55 = vsel %vm18525_vm15, %v749_v52, 0.0  ;;  %v769_v56 = vsel %vm18534_vm10, %v753_v53, 0.0  ;;  %vm18562_vm13 = vmand %vm21678_vm0, %vm18488_vm7  ;;  %v956_v30 = vand.u32 4294901760, %v955_v54  ;;  %v972_v47 = vand.u32 4294901760, %v18554_v58 }
  0xb6   : > { %v836_v59 = vsel %vm21891_vm9, %v768_v55, %v825_v44  ;;  %v837_v60 = vsel %vm21892_vm6, %v769_v56, %v826_v46  ;;  %v966_v62 = vand.u32 4294901760, %v18540_v51  ;;  %vm18571_vm9 = vmand %vm21677_vm1, %vm18499_vm4  ;;  %v962_v55 = vand.u32 4294901760, %v961_v31 }
  0xb7   : > { %v866_v63 = vand.u32 4294901760, %v837_v60  ;;  %v868_v5 = vand.u32 4294901760, %v836_v59  ;;  %v789_v6 = vpop.permute.xlu1 %788  ;;  %v787_v19 = vpop.permute.xlu0 %786  ;;  %v944_v56 = vand.u32 4294901760, %v943_v20  ;;  %vm21930_vm1 = vcmask 130048  }
  0xb8   : > { %v791_v28 = vsel %vm21662_vm11, %v787_v19, %v789_v6  ;;  %v795_v29 = vsel %vm21662_vm11, %v789_v6, %v787_v19  ;;  %v967_v46 = vsub.f32 %v18540_v51, %v966_v62  ;;  %vm21897_vm11 = vmmov %vm21892_vm6  ;;  %v950_v19 = vand.u32 4294901760, %v949_v25 }
  0xb9   : > { %v18586_v32 = vpack.c.bf16 %v866_v63, %v862_v0  ;;  %v18588_v35 = vpack.c.bf16 %v868_v5, %v864_v41  ;;  %v18590_v36 = vsub.f32 %v837_v60, %v866_v63  ;;  %v18592_v37 = vsub.f32 %v836_v59, %v868_v5  ;;  %vm21931_vm0 = vmmov %vm21930_vm1 }
  0xba   : > { %v802_v38 = vsel %vm18562_vm13, %v791_v28, 0.0  ;;  %v803_v44 = vsel %vm18571_vm9, %v795_v29, 0.0  ;;  %v933_v59 = vand.u32 4294901760, %v932_v57  ;;  %v973_v57 = vsub.f32 %v18554_v58, %v972_v47 }
  0xbb   : > { %v984_v0 = vand.u32 4294901760, %v18592_v37  ;;  %v849_v41 = vsel %vm21892_vm6, %v802_v38, 0  ;;  %v852_v48 = vsel %vm21897_vm11, %v803_v44, 0  ;;  %16664 = vmatprep.subr.bf16.mxu0 %v18586_v32  ;;  %v978_v52 = vand.u32 4294901760, %v18590_v36 }
  0xbc   : > { %v18607_v53 = vand.u32 4294901760, %v852_v48  ;;  %v18609_v54 = vand.u32 4294901760, %v849_v41  ;;  %16666 = vmatpush1.bf16.msra.mxu0 %v18588_v35  ;;  %v18628_v20 = vpack.c.bf16 %v956_v30, %v944_v56  ;;  %v968_v28 = vand.u32 4294901760, %v967_v46  ;;  %v838_v30 = vld [vmem:[%s21898_s24] sm:$0xff]  ;;  %s21926_s24 = smov 15  }
  0xbd   : > { %v979_v60 = vsub.f32 %v18590_v36, %v978_v52  ;;  %v985_v63 = vsub.f32 %v18592_v37, %v984_v0  ;;  %v18631_v31 = vpack.c.bf16 %v962_v55, %v950_v19  ;;  %v18170_v25 = vmov 0  }
  0xbe   : > { %v18619_v5 = vsub.f32 %v852_v48, %v18607_v53  ;;  %v18622_v6 = vsub.f32 %v849_v41, %v18609_v54  ;;  %871 = vmatprep.subr.mxu0 %v18607_v53  ;;  %18094 = vset.pattern.permute.xlu0 %v18170_v25  ;;  %v974_v48 = vand.u32 4294901760, %v973_v57  ;;  %v18662_v19 = vpack.c.bf16 %v18485_v11, %v18503_v23 }
  0xbf   : > { %v980_v29 = vand.u32 4294901760, %v979_v60  ;;  %v986_v38 = vand.u32 4294901760, %v985_v63  ;;  %841 = vperm.xlu0 %18094, %v838_v30   ;;  %18095 = vset.pattern.permute.xlu1 %v18170_v25  ;;  %v18667_v57 = vpack.c.bf16 %v18505_v24, %v18492_v14  ;;  %v16693_v25 = vpack.c.bf16 %v960_v42, %v948_v40  ;;  %v2726_v14 = vld [vmem:[%s21899_s7] sm:$0xff]  ;;  %s18178_s7 = smov 71  }
  0xc0   : > { %873 = vmatpush1.msra.mxu0 %v18609_v54  ;;  %v18634_v44 = vand.u32 4294901760, %v18619_v5  ;;  %v18637_v41 = vand.u32 4294901760, %v18622_v6  ;;  %v16695_v30 = vpack.c.bf16 %v978_v52, %v966_v62  ;;  %v16697_v11 = vpack.c.bf16 %v984_v0, %v972_v47 }
  0xc1   : > { %16668 = vmatprep.subr.bf16.mxu0 %v18628_v20  ;;  %934 = vmatmul.mubr.f32.vlgmr.msra.gmra.mrb[0].mxu0 %v933_v59  ;;  %v18643_v46 = vpack.c.bf16 %v980_v29, %v968_v28  ;;  %v18650_v56 = vpack.c.bf16 %v986_v38, %v974_v48  ;;  %v16679_v28 = vpack.c.bf16 %v18590_v36, %v18540_v51  ;;  %vm21900_vm11 = vcmask 293888  }
  0xc2   : > { %16670 = vmatpush1.bf16.msra.mxu0 %v18631_v31  ;;  %v991_v55 = vsub.f32 %v18619_v5, %v18634_v44  ;;  %1054 = vmatprep.mubr.f32.mxu0 %v21690_v2  ;;  %v997_v60 = vsub.f32 %v18622_v6, %v18637_v41  ;;  %v16681_v29 = vpack.c.bf16 %v18592_v37, %v18554_v58  ;;  %vm21671_vm6 = vcmask 64512  }
  0xc3   : > { %16672 = vmatprep.subr.bf16.mxu0 %v18643_v46  ;;  %v16691_v38 = vpack.c.bf16 %v954_v33, %v942_v49 }
  0xc4   : > { %v18654_v59 = vand.u32 4294901760, %v991_v55  ;;  %v18658_v63 = vand.u32 4294901760, %v997_v60 }
  0xc6   : > { %16674 = vmatpush1.bf16.msra.mxu0 %v18650_v56 }
  0xc7   : > { %993 = vmatprep.subr.mxu0 %v18654_v59 }
  0xca   : > { %999 = vmatpush1.msra.mxu0 %v18658_v63 }
  0xcb   : > { %16676 = vmatprep.subr.bf16.mxu0 %v18662_v19  ;;  %1056 = vmatmul.mubr.f32.vlgmr.msra.gmra.mrb[0].mxu0 %v18465_v50 }
  0xcc   : > { %16678 = vmatpush1.bf16.msra.mxu0 %v18667_v57  ;;  %1146 = vmatprep.mubr.f32.mxu0 %v21690_v2 }
  0xcd   : > { %16680 = vmatprep.subr.bf16.mxu0 %v16679_v28 }
  0xd0   : > { %16682 = vmatpush1.bf16.msra.mxu0 %v16681_v29 }
  0xd1   : > { %1088 = vmatprep.subr.mxu0 %v18619_v5 }
  0xd4   : > { %1091 = vmatpush1.msra.mxu0 %v18622_v6 }
  0xd5   : > { %16684 = vmatprep.subr.bf16.mxu0 %v18481_v9  ;;  %1149 = vmatmul.mubr.f32.vlgmr.msra.gmra.mrb[0].mxu0 %v18479_v8  ;;  %v2728_v8 = vsel %vm21900_vm11, %v2726_v14, 0  ;;  %vm21674_vm11 = vmmov 0  }
  0xd6   : > { %16686 = vmatpush1.bf16.msra.mxu0 %v18483_v10  ;;  %1229 = vmatprep.mubr.f32.mxu0 %v21690_v2  ;;  %v2805_v23 = vand.u32 4294901760, %v2728_v8 }
  0xd7   : > { %16688 = vmatprep.subr.bf16.mxu0 %v18586_v32 }
  0xd8   : > { %v2806_v24 = vsub.f32 %v2728_v8, %v2805_v23 }
  0xda   : > { %16690 = vmatpush1.bf16.msra.mxu0 %v18588_v35  ;;  %v2807_v33 = vand.u32 4294901760, %v2806_v24 }
  0xdb   : > { %1172 = vmatprep.subr.mxu0 %v18607_v53 }
  0xde   : > { %1174 = vmatpush1.msra.mxu0 %v18609_v54 }
  0xdf   : > { %16692 = vmatprep.subr.bf16.mxu0 %v16691_v38  ;;  %1233 = vmatmul.mubr.f32.vlgmr.msra.gmra.mrb[0].mxu0 %v931_v34  ;;  %v2808_v34 = vsub.f32 %v2806_v24, %v2807_v33 }
  0xe0   : > { %16694 = vmatpush1.bf16.msra.mxu0 %v16693_v25  ;;  %1333 = vmatprep.mubr.f32.mxu0 %v21690_v2 }
  0xe1   : > { %16696 = vmatprep.subr.bf16.mxu0 %v16695_v30  ;;  %v2809_v40 = vand.u32 4294901760, %v2808_v34  ;;  %v21681_v34 = vmov 0.0|0.0  }
  0xe4   : > { %16698 = vmatpush1.bf16.msra.mxu0 %v16697_v11 }
  0xe5   : > { %1274 = vmatprep.subr.mxu0 %v18634_v44 }
  0xe8   : > { %1278 = vmatpush1.msra.mxu0 %v18637_v41 }
  0xe9   : > { %16700 = vmatprep.subr.bf16.mxu0 %v18481_v9  ;;  %1335 = vmatmul.mubr.f32.vlgmr.msra.gmra.mrb[0].mxu0 %v18465_v50 }
  0xea   : > { %16702 = vmatpush1.bf16.msra.mxu0 %v18483_v10  ;;  %1415 = vmatprep.mubr.f32.mxu0 %v21690_v2 }
  0xeb   : > { %16704 = vmatprep.subr.bf16.mxu0 %v18586_v32 }
  0xee   : > { %16706 = vmatpush1.bf16.msra.mxu0 %v18588_v35 }
  0xef   : > { %1358 = vmatprep.subr.mxu0 %v18607_v53 }
  0xf2   : > { %1360 = vmatpush1.msra.mxu0 %v18609_v54 }
  0xf3   : > { %1417 = vmatmul.mubr.f32.vlgmr.msra.gmra.mrb[0].mxu0 %v18465_v50  ;;  %16744 = vmatprep.subr.bf16.mxu0 %v18481_v9 }
  0xf4   : > { %16746 = vmatpush1.bf16.msra.mxu0 %v18483_v10  ;;  %2804 = vmatprep.mubr.f32.mxu0 %v21690_v2 }
  0xf5   : > { %16748 = vmatprep.subr.bf16.mxu0 %v18586_v32 }
  0xf8   : > { %16750 = vmatpush1.bf16.msra.mxu0 %v18588_v35 }
  0xf9   : > { %2747 = vmatprep.subr.mxu0 %v18607_v53 }
  0xfc   : > { %2749 = vmatpush1.msra.mxu0 %v18609_v54 }
  0xfd   : > { %16752 = vmatprep.subr.bf16.mxu0 %v18628_v20  ;;  %2810 = vmatmul.mubr.f32.vlgmr.msra.gmra.mrb[2].mxu0 %v2809_v40  ;;  %v1432_v20 = vld [vmem:[%s21901_s29 + $0x18] sm:$0xff]  ;;  %v2025_v40 = vld [vmem:[%s21902_s5] sm:$0xff] }
  0xfe   : > { %16754 = vmatpush1.bf16.msra.mxu0 %v18631_v31  ;;  %2930 = vmatprep.mubr.f32.mxu0 %v21690_v2 }
  0xff   : > { %16756 = vmatprep.subr.bf16.mxu0 %v18643_v46 }
 0x102   : > { %16758 = vmatpush1.bf16.msra.mxu0 %v18650_v56 }
 0x103   : > { %2869 = vmatprep.subr.mxu0 %v18654_v59 }
 0x106   : > { %2875 = vmatpush1.msra.mxu0 %v18658_v63 }
 0x107   : > { %16760 = vmatprep.subr.bf16.mxu0 %v18662_v19  ;;  %2932 = vmatmul.mubr.f32.vlgmr.msra.gmra.mrb[2].mxu0 %v2805_v23 }
 0x108   : > { %16762 = vmatpush1.bf16.msra.mxu0 %v18667_v57  ;;  %3022 = vmatprep.mubr.f32.mxu0 %v21690_v2 }
 0x109   : > { %16764 = vmatprep.subr.bf16.mxu0 %v16679_v28 }
 0x10c   : > { %16766 = vmatpush1.bf16.msra.mxu0 %v16681_v29 }
 0x10d   : > { %2964 = vmatprep.subr.mxu0 %v18619_v5 }
 0x110   : > { %2967 = vmatpush1.msra.mxu0 %v18622_v6 }
 0x111   : > { %16768 = vmatprep.subr.bf16.mxu0 %v18481_v9  ;;  %3025 = vmatmul.mubr.f32.vlgmr.msra.gmra.mrb[2].mxu0 %v2806_v24 }
 0x112   : > { %16770 = vmatpush1.bf16.msra.mxu0 %v18483_v10  ;;  %3105 = vmatprep.mubr.f32.mxu0 %v21690_v2 }
 0x113   : > { %16772 = vmatprep.subr.bf16.mxu0 %v18586_v32 }
 0x116   : > { %16774 = vmatpush1.bf16.msra.mxu0 %v18588_v35 }
 0x117   : > { %3048 = vmatprep.subr.mxu0 %v18607_v53 }
 0x11a   : > { %3050 = vmatpush1.msra.mxu0 %v18609_v54 }
 0x11b   : > { %16776 = vmatprep.subr.bf16.mxu0 %v16691_v38  ;;  %3109 = vmatmul.mubr.f32.vlgmr.msra.gmra.mrb[2].mxu0 %v2807_v33 }
 0x11c   : > { %16778 = vmatpush1.bf16.msra.mxu0 %v16693_v25  ;;  %3209 = vmatprep.mubr.f32.mxu0 %v21690_v2 }
 0x11d   : > { %16780 = vmatprep.subr.bf16.mxu0 %v16695_v30 }
 0x120   : > { %16782 = vmatpush1.bf16.msra.mxu0 %v16697_v11 }
 0x121   : > { %3150 = vmatprep.subr.mxu0 %v18634_v44 }
 0x124   : > { %3154 = vmatpush1.msra.mxu0 %v18637_v41  ;;  %v1448_v41 = vsel %vm21671_vm6, %v1432_v20, 0 }
 0x125   : > { %16784 = vmatprep.subr.bf16.mxu0 %v18481_v9  ;;  %3211 = vmatmul.mubr.f32.vlgmr.msra.gmra.mrb[2].mxu0 %v2805_v23  ;;  %v1546_v48 = vand.u32 4294901760, %v1448_v41 }
 0x126   : > { %16786 = vmatpush1.bf16.msra.mxu0 %v18483_v10  ;;  %3291 = vmatprep.mubr.f32.mxu0 %v21690_v2 }
 0x127   : > { %16788 = vmatprep.subr.bf16.mxu0 %v18586_v32  ;;  %v1429_v32 = vld [vmem:[%s21901_s29] sm:$0xff]  ;;  %v1547_v60 = vsub.f32 %v1448_v41, %v1546_v48 }
 0x129   : > { %v1548_v19 = vand.u32 4294901760, %v1547_v60 }
 0x12a   : > { %16790 = vmatpush1.bf16.msra.mxu0 %v18588_v35  ;;  %v1439_v35 = vsel %vm21671_vm6, %v1429_v32, 0 }
 0x12b   : > { %3234 = vmatprep.subr.mxu0 %v18607_v53  ;;  %v18762_v36 = vand.u32 4294901760, %v1439_v35  ;;  %v1430_v53 = vld [vmem:[%s21901_s29 + $0x8] sm:$0xff]  ;;  %v1549_v30 = vsub.f32 %v1547_v60, %v1548_v19 }
 0x12c   : > { %v1442_v5 = vsel %vm21671_vm6, %v1430_v53, 0 }
 0x12d   : > { %v1517_v37 = vsub.f32 %v1439_v35, %v18762_v36  ;;  %v1526_v31 = vand.u32 4294901760, %v1442_v5  ;;  %v1550_v8 = vand.u32 4294901760, %v1549_v30  ;;  %v1433_v35 = vld [vmem:[%s21903_s4] sm:$0xff] }
 0x12e   : > { %3236 = vmatpush1.msra.mxu0 %v18609_v54  ;;  %v1431_v54 = vld [vmem:[%s21901_s29 + $0x10] sm:$0xff] }
 0x12f   : > { %3293 = vmatmul.mubr.f32.vlgmr.msra.gmra.mrb[2].mxu0 %v2805_v23  ;;  %v1518_v47 = vand.u32 4294901760, %v1517_v37  ;;  %v1445_v6 = vsel %vm21671_vm6, %v1431_v54, 0  ;;  %v1527_v46 = vsub.f32 %v1442_v5, %v1526_v31  ;;  %vm21676_vm6 = vcmask 261120   ;;  %v2028_v54 = vld [vmem:[%s21902_s5 + $0x18] sm:$0xff] }
 0x130   : > { %3802 = vmatprep.mubr.f32.mxu0 %v21690_v2  ;;  %v1536_v44 = vand.u32 4294901760, %v1445_v6 }
 0x131   : > { %v1519_v0 = vsub.f32 %v1517_v37, %v1518_v47  ;;  %v1528_v56 = vand.u32 4294901760, %v1527_v46 }
 0x132   : > { %v1537_v55 = vsub.f32 %v1445_v6, %v1536_v44  ;;  %v1436_v6 = vld [vmem:[%s21903_s4 + $0x18] sm:$0xff] }
 0x133   : > { %v1520_v52 = vand.u32 4294901760, %v1519_v0  ;;  %v1529_v63 = vsub.f32 %v1527_v46, %v1528_v56 }
 0x134   : > { %v1538_v59 = vand.u32 4294901760, %v1537_v55 }
 0x135   : > { %15623 = vmatprep.mubr.f32.mxu1 %v1520_v52  ;;  %v1530_v25 = vand.u32 4294901760, %v1529_v63 }
 0x136   : > { %v1539_v28 = vsub.f32 %v1537_v55, %v1538_v59 }
 0x138   : > { %v1540_v11 = vand.u32 4294901760, %v1539_v28 }
 0x13e   : > { %v842_v50 = vpop.permute.xlu0 %841 }
 0x1c6   : > { %v1418_v42 = vpop.f32.mrb[0].mxu0 }
 0x1c7   : > { %v17673_v49 = vadd.f32 %v1418_v42, %v842_v50  ;;  %v1420_v9 = vpop.f32.mrb[1].mxu0  ;;  %v2037_v42 = vsel %vm21676_vm6, %v2025_v40, 0 }
 0x1c8   : > { %v17674_v51 = vadd.f32 %v1420_v9, %v842_v50  ;;  %v2026_v50 = vld [vmem:[%s21902_s5 + $0x8] sm:$0xff]  ;;  %v18791_v9 = vand.u32 4294901760, %v2037_v42 }
 0x1c9   : > { %v1423_v58 = vmax.f32 %v17673_v49, 0.0  ;;  %v2040_v49 = vsel %vm21676_vm6, %v2026_v50, 0 }
 0x1ca   : > { %v1424_v10 = vmax.f32 %v17674_v51, 0.0  ;;  %v18793_v51 = vand.u32 4294901760, %v2040_v49 }
 0x1cc   : > { %v1425_v62 = vadd.f32 %v1424_v10, %v1423_v58  ;;  %v2027_v58 = vld [vmem:[%s21902_s5 + $0x10] sm:$0xff]  ;;  %v18799_v10 = vsub.f32 %v2037_v42, %v18791_v9 }
 0x1cd   : > { %v2043_v32 = vsel %vm21676_vm6, %v2027_v58, 0 }
 0x1ce   : > { %1426 = vadd.xlane.f32.xlu1 %v1425_v62  ;;  %v1434_v62 = vld [vmem:[%s21903_s4 + $0x8] sm:$0xff]  ;;  %v2122_v52 = vand.u32 4294901760, %v18799_v10  ;;  %v18812_v53 = vand.u32 4294901760, %v2043_v32 }
 0x1d0   : > { %v18829_v63 = vsub.f32 %v2043_v32, %v18812_v53 }
 0x1d2   : > { %v2142_v42 = vand.u32 4294901760, %v18829_v63 }
 0x25b   : > { %v1427_v57 = vpop.xlane.xlu1 %1426 }
 0x25c   : > { %v1428_v29 = vmul.f32 0.00390625, %v1427_v57 }
 0x25e   : > { %v1451_v38 = vand.u32 4294901760, %v1428_v29 }
 0x260   : > { %v1558_v14 = vsub.f32 %v1428_v29, %v1451_v38  ;;  %15621 = vmatprep.subr.mxu1 %v1451_v38 }
 0x261   : > { %15622 = vmatpush3.msra.mxu1 %v1451_v38 }
 0x262   : > { %15624 = vmatmul.mubr.f32.vlgmr.msra.gmra.mrb[0].mxu1 %v1530_v25  ;;  %v1559_v23 = vand.u32 4294901760, %v1558_v14 }
 0x263   : > { %15626 = vmatprep.mubr.f32.mxu1 %v1540_v11 }
 0x264   : > { %v1560_v24 = vsub.f32 %v1558_v14, %v1559_v23 }
 0x266   : > { %15627 = vmatmul.mubr.f32.gmra.mrb[2].mxu1 %v1550_v8  ;;  %v1561_v33 = vand.u32 4294901760, %v1560_v24 }
 0x267   : > { %15631 = vmatprep.mubr.f32.mxu1 %v18762_v36 }
 0x268   : > { %15629 = vmatprep.subr.mxu1 %v1561_v33 }
 0x269   : > { %15630 = vmatpush3.msra.mxu1 %v1561_v33 }
 0x26a   : > { %15632 = vmatmul.mubr.f32.vlgmr.msra.gmra.mrb[0].mxu1 %v1526_v31  ;;  %15637 = vmatprep.subr.mxu1 %v1558_v14 }
 0x26b   : > { %15638 = vmatpush3.msra.mxu1 %v1558_v14  ;;  %15634 = vmatprep.mubr.f32.mxu1 %v1536_v44 }
 0x26c   : > { %15645 = vmatprep.subr.mxu1 %v1451_v38 }
 0x26e   : > { %15635 = vmatmul.mubr.f32.gmra.mrb[2].mxu1 %v1546_v48 }
 0x26f   : > { %15639 = vmatprep.mubr.f32.mxu1 %v1517_v37 }
 0x272   : > { %15640 = vmatmul.mubr.f32.vlgmr.msra.gmra.mrb[0].mxu1 %v1527_v46 }
 0x273   : > { %15646 = vmatpush3.msra.mxu1 %v1451_v38  ;;  %15642 = vmatprep.mubr.f32.mxu1 %v1537_v55 }
 0x274   : > { %15653 = vmatprep.subr.mxu1 %v1559_v23 }
 0x276   : > { %15643 = vmatmul.mubr.f32.gmra.mrb[2].mxu1 %v1547_v60 }
 0x277   : > { %15647 = vmatprep.mubr.f32.mxu1 %v1518_v47 }
 0x27a   : > { %15648 = vmatmul.mubr.f32.vlgmr.msra.gmra.mrb[0].mxu1 %v1528_v56 }
 0x27b   : > { %15654 = vmatpush3.msra.mxu1 %v1559_v23  ;;  %15650 = vmatprep.mubr.f32.mxu1 %v1538_v59  ;;  %v2123_v59 = vsub.f32 %v18799_v10, %v2122_v52 }
 0x27c   : > { %15661 = vmatprep.subr.mxu1 %v1451_v38 }
 0x27d   : > { %v2124_v50 = vand.u32 4294901760, %v2123_v59 }
 0x27e   : > { %15651 = vmatmul.mubr.f32.gmra.mrb[2].mxu1 %v1548_v19  ;;  %v2029_v19 = vld [vmem:[%s21902_s5 + $0x20] sm:$0xff]  ;;  %s18177_s5 = smov 8  }
 0x27f   : > { %15655 = vmatprep.mubr.f32.mxu1 %v18762_v36  ;;  %v2049_v24 = vsel %vm21676_vm6, %v2029_v19, 0 }
 0x282   : > { %15656 = vmatmul.mubr.f32.vlgmr.msra.gmra.mrb[0].mxu1 %v1526_v31 }
 0x283   : > { %15662 = vmatpush3.msra.mxu1 %v1451_v38  ;;  %15658 = vmatprep.mubr.f32.mxu1 %v1536_v44 }
 0x284   : > { %16707 = vmatprep.subr.bf16.mxu1 %v21681_v34 }
 0x286   : > { %15659 = vmatmul.mubr.f32.gmra.mrb[2].mxu1 %v1546_v48 }
 0x287   : > { %15663 = vmatprep.mubr.f32.mxu1 %v18762_v36  ;;  %v18809_v36 = vsub.f32 %v2040_v49, %v18793_v51 }
 0x28a   : > { %15664 = vmatmul.mubr.f32.vlgmr.msra.gmra.mrb[0].mxu1 %v1526_v31  ;;  %v1435_v31 = vld [vmem:[%s21903_s4 + $0x10] sm:$0xff]  ;;  %s21921_s4 = smov 17  }
 0x28b   : > { %15666 = vmatprep.mubr.f32.mxu1 %v1536_v44  ;;  %v2132_v44 = vand.u32 4294901760, %v18809_v36 }
 0x28d   : > { %v2133_v30 = vsub.f32 %v18809_v36, %v2132_v44 }
 0x28e   : > { %15667 = vmatmul.mubr.f32.gmra.mrb[2].mxu1 %v1546_v48  ;;  %v2046_v48 = vsel %vm21676_vm6, %v2028_v54, 0 }
 0x28f   : > { %15677 = vmatprep.mubr.msk.f32.mxu1 %vm21674_vm11, %v21690_v2  ;;  %v18839_v11 = vand.u32 4294901760, %v2046_v48 }
 0x35d   : > { %v15665_v37 = vpop.f32.mrb[0].mxu1 }
 0x35e   : > { %v17675_v47 = vadd.f32 %v15665_v37, %v1434_v62  ;;  %v2003_v0 = vpop.f32.mrb[1].mxu1 }
 0x35f   : > { %v17676_v5 = vadd.f32 %v2003_v0, %v1433_v35  ;;  %v18854_v0 = vand.u32 4294901760, %v2049_v24 }
 0x360   : > { %v2055_v20 = vand.u32 4294901760, %v17675_v47 }
 0x361   : > { %v2052_v41 = vand.u32 4294901760, %v17676_v5  ;;  %v15668_v46 = vpop.f32.mrb[2].mxu1  ;;  %v2161_v59 = vsub.f32 %v2049_v24, %v18854_v0  ;;  %v2721_v24 = vld [vmem:[%s21913_s8] sm:$0xff] }
 0x362   : > { %v2179_v55 = vsub.f32 %v17675_v47, %v2055_v20  ;;  %v17677_v56 = vadd.f32 %v15668_v46, %v1436_v6  ;;  %v2015_v60 = vpop.f32.mrb[3].mxu1  ;;  %v18852_v47 = vsub.f32 %v2046_v48, %v18839_v11  ;;  %v2134_v46 = vand.u32 4294901760, %v2133_v30 }
 0x363   : > { %v18834_v57 = vpack.c.bf16 %v2055_v20, %v2052_v41  ;;  %v2172_v28 = vsub.f32 %v17676_v5, %v2052_v41  ;;  %v17678_v29 = vadd.f32 %v2015_v60, %v1435_v31  ;;  %v2143_v48 = vsub.f32 %v18829_v63, %v2142_v42 }
 0x364   : > { %v2180_v38 = vand.u32 4294901760, %v2179_v55  ;;  %v2061_v25 = vand.u32 4294901760, %v17677_v56  ;;  %v2152_v60 = vand.u32 4294901760, %v18852_v47 }
 0x365   : > { %21904 = vst [vmem:[#allocation9_spill] sm:$0xff] %v18834_v57  ;;  %v2173_v14 = vand.u32 4294901760, %v2172_v28  ;;  %v18841_v8 = vpack.c.bf16 %v2179_v55, %v2172_v28  ;;  %v2058_v23 = vand.u32 4294901760, %v17678_v29  ;;  %16709 = vmatpush3.bf16.msra.mxu1 %v18834_v57 }
 0x366   : > { %v2181_v33 = vsub.f32 %v2179_v55, %v2180_v38  ;;  %v2193_v40 = vsub.f32 %v17677_v56, %v2061_v25  ;;  %16710 = vmatprep.subr.bf16.mxu1 %v21681_v34 }
 0x367   : > { %21905 = vst [vmem:[#allocation10_spill] sm:$0xff] %v18841_v8  ;;  %v2174_v49 = vsub.f32 %v2172_v28, %v2173_v14  ;;  %v18847_v58 = vpack.c.bf16 %v2061_v25, %v2058_v23  ;;  %v2186_v62 = vsub.f32 %v17678_v29, %v2058_v23  ;;  %v18849_v32 = vpack.c.bf16 %v2180_v38, %v2173_v14 }
 0x368   : > { %v2182_v35 = vand.u32 4294901760, %v2181_v33  ;;  %v2194_v37 = vand.u32 4294901760, %v2193_v40  ;;  %v2144_v29 = vand.u32 4294901760, %v2143_v48  ;;  %v2153_v38 = vsub.f32 %v18852_v47, %v2152_v60 }
 0x369   : > { %21906 = vst [vmem:[#allocation11_spill] sm:$0xff] %v18847_v58  ;;  %21907 = vst [vmem:[#allocation12_spill] sm:$0xff] %v18849_v32  ;;  %v2175_v54 = vand.u32 4294901760, %v2174_v49  ;;  %v2187_v5 = vand.u32 4294901760, %v2186_v62  ;;  %v18856_v6 = vpack.c.bf16 %v2193_v40, %v2186_v62  ;;  %16712 = vmatpush3.bf16.msra.mxu1 %v18847_v58  ;;  %v2162_v25 = vand.u32 4294901760, %v2161_v59  ;;  %v2032_v49 = vld [vmem:[%s21912_s6 + $0x10] sm:$0xff] }
 0x36a   : > { %v2195_v20 = vsub.f32 %v2193_v40, %v2194_v37  ;;  %16713 = vmatprep.subr.bf16.mxu1 %v21681_v34  ;;  %v2154_v30 = vand.u32 4294901760, %v2153_v38 }
 0x36b   : > { %21908 = vst [vmem:[#allocation13_spill] sm:$0xff] %v18856_v6  ;;  %v2188_v31 = vsub.f32 %v2186_v62, %v2187_v5  ;;  %v18860_v41 = vpack.c.bf16 %v2182_v35, %v2175_v54  ;;  %v18862_v55 = vpack.c.bf16 %v2194_v37, %v2187_v5  ;;  %v2163_v14 = vsub.f32 %v2161_v59, %v2162_v25  ;;  %v14761_v62 = vld [vmem:[%s21913_s8 + $0x10] sm:$0xff] }
 0x36c   : > { %v2196_v56 = vand.u32 4294901760, %v2195_v20  ;;  %15678 = vmatmul.mubr.f32.vlgmr.msra.gmra.mrb[4].mxu1 %v2124_v50  ;;  %v2033_v20 = vld [vmem:[%s21912_s6 + $0x18] sm:$0xff] }
 0x36d   : > { %21909 = vst [vmem:[#allocation14_spill] sm:$0xff] %v18860_v41  ;;  %21910 = vst [vmem:[#allocation15_spill] sm:$0xff] %v18862_v55  ;;  %v2189_v19 = vand.u32 4294901760, %v2188_v31  ;;  %16715 = vmatpush3.bf16.msra.mxu1 %v18860_v41  ;;  %15680 = vmatprep.mubr.msk.f32.mxu1 %vm21674_vm11, %v21690_v2  ;;  %v2164_v23 = vand.u32 4294901760, %v2163_v14 }
 0x36e   : > { %16716 = vmatprep.subr.bf16.mxu1 %v21681_v34 }
 0x36f   : > { %v18873_v28 = vpack.c.bf16 %v2196_v56, %v2189_v19 }
 0x370   : > { %15681 = vmatmul.mubr.f32.gmra.mrb[6].mxu1 %v2134_v46 }
 0x371   : > { %21911 = vst [vmem:[#allocation16_spill] sm:$0xff] %v18873_v28  ;;  %16718 = vmatpush3.bf16.msra.mxu1 %v18873_v28  ;;  %15683 = vmatprep.mubr.msk.f32.mxu1 %vm21674_vm11, %v21690_v2 }
 0x372   : > { %16719 = vmatprep.subr.bf16.mxu1 %v21681_v34 }
 0x374   : > { %15684 = vmatmul.mubr.f32.gmra.mrb[8].mxu1 %v2144_v29 }
 0x375   : > { %15686 = vmatprep.mubr.msk.f32.mxu1 %vm21674_vm11, %v21690_v2 }
 0x378   : > { %15687 = vmatmul.mubr.f32.gmra.mrb[10].mxu1 %v2154_v30 }
 0x379   : > { %15689 = vmatprep.mubr.msk.f32.mxu1 %vm21674_vm11, %v21690_v2 }
 0x37c   : > { %15690 = vmatmul.mubr.f32.gmra.mrb[12].mxu1 %v2164_v23 }
 0x37d   : > { %15700 = vmatprep.mubr.msk.f32.mxu1 %vm21674_vm11, %v21690_v2 }
 0x380   : > { %15701 = vmatmul.mubr.f32.vlgmr.msra.gmra.mrb[4].mxu1 %v18791_v9 }
 0x381   : > { %16721 = vmatpush3.bf16.msra.mxu1 %v18841_v8  ;;  %15703 = vmatprep.mubr.msk.f32.mxu1 %vm21674_vm11, %v21690_v2 }
 0x382   : > { %16722 = vmatprep.subr.bf16.mxu1 %v21681_v34 }
 0x384   : > { %15704 = vmatmul.mubr.f32.gmra.mrb[6].mxu1 %v18793_v51 }
 0x385   : > { %16724 = vmatpush3.bf16.msra.mxu1 %v18856_v6  ;;  %15706 = vmatprep.mubr.msk.f32.mxu1 %vm21674_vm11, %v21690_v2 }
 0x386   : > { %16725 = vmatprep.subr.bf16.mxu1 %v21681_v34 }
 0x388   : > { %15707 = vmatmul.mubr.f32.gmra.mrb[8].mxu1 %v18812_v53 }
 0x389   : > { %15709 = vmatprep.mubr.msk.f32.mxu1 %vm21674_vm11, %v21690_v2 }
 0x38c   : > { %15710 = vmatmul.mubr.f32.gmra.mrb[10].mxu1 %v18839_v11 }
 0x38d   : > { %15712 = vmatprep.mubr.msk.f32.mxu1 %vm21674_vm11, %v21690_v2 }
 0x390   : > { %15713 = vmatmul.mubr.f32.gmra.mrb[12].mxu1 %v18854_v0 }
 0x391   : > { %15723 = vmatprep.mubr.msk.f32.mxu1 %vm21674_vm11, %v21690_v2 }
 0x394   : > { %15724 = vmatmul.mubr.f32.vlgmr.msra.gmra.mrb[4].mxu1 %v18799_v10 }
 0x395   : > { %16727 = vmatpush3.bf16.msra.mxu1 %v18834_v57  ;;  %15726 = vmatprep.mubr.msk.f32.mxu1 %vm21674_vm11, %v21690_v2 }
 0x396   : > { %16728 = vmatprep.subr.bf16.mxu1 %v21681_v34 }
 0x398   : > { %15727 = vmatmul.mubr.f32.gmra.mrb[6].mxu1 %v18809_v36 }
 0x399   : > { %16730 = vmatpush3.bf16.msra.mxu1 %v18847_v58  ;;  %15729 = vmatprep.mubr.msk.f32.mxu1 %vm21674_vm11, %v21690_v2 }
 0x39a   : > { %16731 = vmatprep.subr.bf16.mxu1 %v21681_v34 }
 0x39c   : > { %15730 = vmatmul.mubr.f32.gmra.mrb[8].mxu1 %v18829_v63  ;;  %v2031_v63 = vld [vmem:[%s21912_s6 + $0x8] sm:$0xff] }
 0x39d   : > { %15732 = vmatprep.mubr.msk.f32.mxu1 %vm21674_vm11, %v21690_v2 }
 0x3a0   : > { %15733 = vmatmul.mubr.f32.gmra.mrb[10].mxu1 %v18852_v47 }
 0x3a1   : > { %15735 = vmatprep.mubr.msk.f32.mxu1 %vm21674_vm11, %v21690_v2 }
 0x3a4   : > { %15736 = vmatmul.mubr.f32.gmra.mrb[12].mxu1 %v2161_v59 }
 0x3a5   : > { %15746 = vmatprep.mubr.msk.f32.mxu1 %vm21674_vm11, %v21690_v2 }
 0x3a8   : > { %15747 = vmatmul.mubr.f32.vlgmr.msra.gmra.mrb[4].mxu1 %v2122_v52 }
 0x3a9   : > { %16733 = vmatpush3.bf16.msra.mxu1 %v18849_v32  ;;  %15749 = vmatprep.mubr.msk.f32.mxu1 %vm21674_vm11, %v21690_v2 }
 0x3aa   : > { %16734 = vmatprep.subr.bf16.mxu1 %v21681_v34 }
 0x3ac   : > { %15750 = vmatmul.mubr.f32.gmra.mrb[6].mxu1 %v2132_v44  ;;  %v14760_v44 = vld [vmem:[%s21913_s8 + $0x8] sm:$0xff]  ;;  %s18180_s8 = smov 65  }
 0x3ad   : > { %16736 = vmatpush3.bf16.msra.mxu1 %v18862_v55  ;;  %15752 = vmatprep.mubr.msk.f32.mxu1 %vm21674_vm11, %v21690_v2 }
 0x3ae   : > { %16737 = vmatprep.subr.bf16.mxu1 %v21681_v34 }
 0x3b0   : > { %15753 = vmatmul.mubr.f32.gmra.mrb[8].mxu1 %v2142_v42 }
 0x3b1   : > { %15755 = vmatprep.mubr.msk.f32.mxu1 %vm21674_vm11, %v21690_v2 }
 0x3b4   : > { %15756 = vmatmul.mubr.f32.gmra.mrb[10].mxu1 %v2152_v60  ;;  %v2034_v60 = vld [vmem:[%s21912_s6 + $0x20] sm:$0xff] }
 0x3b5   : > { %15758 = vmatprep.mubr.msk.f32.mxu1 %vm21674_vm11, %v21690_v2 }
 0x3b8   : > { %15759 = vmatmul.mubr.f32.gmra.mrb[12].mxu1 %v2162_v25 }
 0x3b9   : > { %15769 = vmatprep.mubr.msk.f32.mxu1 %vm21674_vm11, %v21690_v2 }
 0x3bc   : > { %15770 = vmatmul.mubr.f32.vlgmr.msra.gmra.mrb[4].mxu1 %v18791_v9 }
 0x3bd   : > { %16739 = vmatpush3.bf16.msra.mxu1 %v18834_v57  ;;  %15772 = vmatprep.mubr.msk.f32.mxu1 %vm21674_vm11, %v21690_v2 }
 0x3be   : > { %16740 = vmatprep.subr.bf16.mxu1 %v21681_v34 }
 0x3c0   : > { %15773 = vmatmul.mubr.f32.gmra.mrb[6].mxu1 %v18793_v51 }
 0x3c1   : > { %16742 = vmatpush3.bf16.msra.mxu1 %v18847_v58  ;;  %15775 = vmatprep.mubr.msk.f32.mxu1 %vm21674_vm11, %v21690_v2 }
 0x3c4   : > { %15776 = vmatmul.mubr.f32.gmra.mrb[8].mxu1 %v18812_v53 }
 0x3c5   : > { %15778 = vmatprep.mubr.msk.f32.mxu1 %vm21674_vm11, %v21690_v2 }
 0x3c8   : > { %15779 = vmatmul.mubr.f32.gmra.mrb[10].mxu1 %v18839_v11 }
 0x3c9   : > { %15781 = vmatprep.mubr.msk.f32.mxu1 %vm21674_vm11, %v21690_v2 }
 0x3cc   : > { %15782 = vmatmul.mubr.f32.gmra.mrb[12].mxu1 %v18854_v0 }
 0x3cd   : > { %15792 = vmatprep.mubr.msk.f32.mxu1 %vm21674_vm11, %v21690_v2 }
 0x3d0   : > { %15793 = vmatmul.mubr.f32.vlgmr.msra.gmra.mrb[4].mxu1 %v18791_v9  ;;  %v3294_v9 = vpop.f32.mrb[2].mxu0 }
 0x3d1   : > { %15795 = vmatprep.mubr.msk.f32.mxu1 %vm21674_vm11, %v21690_v2  ;;  %v3296_v10 = vpop.f32.mrb[3].mxu0 }
 0x3d4   : > { %15796 = vmatmul.mubr.f32.gmra.mrb[6].mxu1 %v18793_v51  ;;  %v2030_v51 = vld [vmem:[%s21912_s6] sm:$0xff]  ;;  %s21927_s6 = smov 127  }
 0x3d5   : > { %15798 = vmatprep.mubr.msk.f32.mxu1 %vm21674_vm11, %v21690_v2 }
 0x3d8   : > { %15799 = vmatmul.mubr.f32.gmra.mrb[8].mxu1 %v18812_v53 }
 0x3d9   : > { %15801 = vmatprep.mubr.msk.f32.mxu1 %vm21674_vm11, %v21690_v2 }
 0x3dc   : > { %15802 = vmatmul.mubr.f32.gmra.mrb[10].mxu1 %v18839_v11 }
 0x3dd   : > { %15804 = vmatprep.mubr.msk.f32.mxu1 %vm21674_vm11, %v21690_v2  ;;  %vm21914_vm11 = vcmask 7168  }
 0x3de   : > { %vm21915_vm6 = vmmov %vm21914_vm11 }
 0x3e0   : > { %15805 = vmatmul.mubr.f32.gmra.mrb[12].mxu1 %v18854_v0 }
 0x3e1   : > { %3510 = vmatprep.mubr.f32.mxu1 %v21690_v2 }
 0x4a3   : > { %v2680_v36 = vpop.f32.mrb[4].mxu1 }
 0x4a4   : > { %v17679_v52 = vadd.f32 %v2680_v36, %v2030_v51  ;;  %v15794_v53 = vpop.f32.mrb[5].mxu1 }
 0x4a6   : > { %v2708_v11 = vmax.f32 %v17679_v52, 0.0 }
 0x4a7   : > { %v2686_v33 = vpop.f32.mrb[6].mxu1 }
 0x4a8   : > { %2713 = vst.msk [vmem:[%s18982_s28] sm:$0xff] %vm21914_vm11, %v2708_v11  ;;  %v2720_v40 = vmul.f32 %v14760_v44, %v2708_v11  ;;  %v17680_v50 = vadd.f32 %v2686_v33, %v2031_v63  ;;  %v15797_v42 = vpop.f32.mrb[7].mxu1  ;;  %vm21916_vm11 = vmmov %vm21915_vm6  ;;  %v14762_v63 = vld [vmem:[%s21631_s10 + $0x10] sm:$0xff]  ;;  %v14763_v11 = vld [vmem:[%s21631_s10 + $0x18] sm:$0xff] }
 0x4aa   : > { %v2722_v35 = vmul.f32 %v2721_v24, %v2720_v40  ;;  %v2709_v37 = vmax.f32 %v17680_v50, 0.0  ;;  %3301 = vperm.xlu0 %18094, %v2720_v40   ;;  %v3321_v40 = vld [vmem:[%s21631_s10 + $0x8] sm:$0xff]  ;;  %v14764_v50 = vld [vmem:[%s21631_s10 + $0x20] sm:$0xff] }
 0x4ab   : > { %v2692_v47 = vpop.f32.mrb[8].mxu1 }
 0x4ac   : > { %2714 = vst.msk [vmem:[%s18982_s28 + $0x8] sm:$0xff] %vm21915_vm6, %v2709_v37  ;;  %v17681_v0 = vadd.f32 %v2692_v47, %v2032_v49  ;;  %v15800_v54 = vpop.f32.mrb[9].mxu1  ;;  %v2725_v5 = vadd.f32 %v14761_v62, %v2722_v35  ;;  %v14765_v62 = vld [vmem:[%s21631_s10 + $0x28] sm:$0xff] }
 0x4ae   : > { %v2710_v31 = vmax.f32 %v17681_v0, 0.0  ;;  %3308 = vperm.xlu0 %18094, %v2725_v5  }
 0x4af   : > { %v2698_v46 = vpop.f32.mrb[10].mxu1 }
 0x4b0   : > { %2715 = vst.msk [vmem:[%s18982_s28 + $0x10] sm:$0xff] %vm21916_vm11, %v2710_v31  ;;  %v19008_v56 = vadd.f32 %v2698_v46, %v2033_v20  ;;  %v15803_v48 = vpop.f32.mrb[11].mxu1  ;;  %vm21919_vm11 = vmmov %vm21915_vm6  ;;  %v3319_v33 = vmul.f32 %v14763_v11, %v2710_v31 }
 0x4b2   : > { %21917 = vst [vmem:[#allocation17_spill] sm:$0xff] %v19008_v56  ;;  %v21680_v59 = vmax.f32 %v19008_v56, 0.0  ;;  %v3323_v42 = vmul.f32 %v3321_v40, %v3319_v33 }
 0x4b3   : > { %v2704_v19 = vpop.f32.mrb[12].mxu1 }
 0x4b4   : > { %2716 = vst.msk [vmem:[%s18982_s28 + $0x18] sm:$0xff] %vm21915_vm6, %v21680_v59  ;;  %v19018_v29 = vadd.f32 %v2704_v19, %v2034_v60  ;;  %v15806_v38 = vpop.f32.mrb[13].mxu1  ;;  %v3328_v35 = vadd.f32 %v14765_v62, %v3323_v42  ;;  %vm21928_vm6 = vcmask 138240  }
 0x4b6   : > { %21918 = vst [vmem:[#allocation18_spill] sm:$0xff] %v19018_v29  ;;  %v21679_v25 = vmax.f32 %v19018_v29, 0.0 }
 0x4b8   : > { %2717 = vst.msk [vmem:[%s18982_s28 + $0x20] sm:$0xff] %vm21919_vm11, %v21679_v25  ;;  %s21922_s28 = smov 113   ;;  %vm21929_vm11 = vmmov %vm21928_vm6 }
 0x529   : > { %v3302_v30 = vpop.permute.xlu0 %3301 }
 0x52a   : > { %v3305_v14 = vmul.f32 %v3302_v30, %v3296_v10  ;;  %v3304_v51 = vmul.f32 %v3302_v30, %v3294_v9  ;;  %v3318_v9 = vmul.f32 %v14762_v63, %v2709_v37  ;;  %v3320_v10 = vld [vmem:[%s21631_s10] sm:$0xff] }
 0x52c   : > { %v3322_v24 = vmul.f32 %v3320_v10, %v3318_v9 }
 0x52d   : > { %v3309_v23 = vpop.permute.xlu0 %3308 }
 0x52e   : > { %v3312_v36 = vadd.f32 %v3309_v23, %v3305_v14  ;;  %v3311_v52 = vadd.f32 %v3309_v23, %v3304_v51  ;;  %v3327_v49 = vadd.f32 %v14764_v50, %v3322_v24 }
 0x530   : > { %v19025_v53 = vmax.f32 %v3312_v36, 0.0  ;;  %v19031_v44 = vmax.f32 %v3311_v52, 0.0 }
 0x532   : > { %3366 = vrot.lane.b32.xlu1 %v19025_v53, %s21920_s22  ;;  %3332 = vrot.lane.b32.xlu0 %v19025_v53, %s21921_s4 }
 0x536   : > { %3390 = vrot.lane.b32.xlu1 %v19025_v53, %s21922_s28  ;;  %3336 = vrot.lane.b32.xlu0 %v19031_v44, %s21921_s4  ;;  %s18175_s4 = smov 9  }
 0x53a   : > { %3401 = vrot.lane.b32.xlu1 %v19025_v53, %s21923_s2  ;;  %3344 = vrot.lane.b32.xlu0 %v19025_v53, %s21924_s25 }
 0x53e   : > { %3412 = vrot.lane.b32.xlu1 %v19025_v53, %s21925_s23  ;;  %3347 = vrot.lane.b32.xlu0 %v19031_v44, %s21924_s25  ;;  %s18182_s25 = smov 121  }
 0x542   : > { %3355 = vrot.lane.b32.xlu0 %v19025_v53, %s21926_s24  ;;  %4166 = vperm.xlu1 %18095, %v3327_v49  }
 0x546   : > { %3358 = vrot.lane.b32.xlu0 %v19031_v44, %s21926_s24  ;;  %4171 = vperm.xlu1 %18095, %v3328_v35   ;;  %s18179_s24 = smov 7  }
 0x54a   : > { %3369 = vrot.lane.b32.xlu0 %v19031_v44, %s21920_s22 }
 0x54e   : > { %3377 = vrot.lane.b32.xlu0 %v19031_v44, %s21927_s6 }
 0x552   : > { %3379 = vrot.lane.b32.xlu0 %v19025_v53, %s21927_s6 }
 0x556   : > { %3388 = vrot.lane.b32.xlu0 %v19031_v44, %s21922_s28  ;;  %s18181_s28 = smov 63  }
 0x55a   : > { %3399 = vrot.lane.b32.xlu0 %v19031_v44, %s21923_s2 }
 0x55e   : > { %3410 = vrot.lane.b32.xlu0 %v19031_v44, %s21925_s23  ;;  %s18176_s23 = smov 72  }
 0x562   : > { %4152 = vperm.xlu0 %18094, %v3318_v9  }
 0x566   : > { %4157 = vperm.xlu0 %18094, %v3319_v33  }
 0x5a4   : > { %v3333_v37 = vpop.permute.xlu0 %3332  ;;  %v3367_v35 = vpop.permute.xlu1 %3366 }
 0x5a8   : > { %v3337_v47 = vpop.permute.xlu0 %3336 }
 0x5a9   : > { %v3338_v0 = vsel %vm21928_vm6, %v3337_v47, %v3333_v37  ;;  %v3341_v54 = vsel %vm21929_vm11, %v3333_v37, %v3337_v47  ;;  %v3444_v47 = vand.u32 4294901760, %v19025_v53  ;;  %vm21940_vm11 = vcmp.le.s32.totalorder %v18399_v17, 15 }
 0x5aa   : > { %v3342_v20 = vsel %vm18419_vm12, %v3341_v54, 0.0  ;;  %v3343_v31 = vsel %vm18427_vm14, %v3338_v0, 0.0  ;;  %vm3421_vm12 = vcmask 588800   ;;  %vm21934_vm14 = vcmask 7168  }
 0x5ab   : > { %v3428_v46 = vand.u32 4294901760, %v3343_v31  ;;  %v3430_v48 = vand.u32 4294901760, %v3342_v20  ;;  %v3423_v33 = vsel %vm3421_vm12, %v3329_v16, 0 }
 0x5ac   : > { %v3345_v5 = vpop.permute.xlu0 %3344  ;;  %v19119_v62 = vand.u32 4294901760, %v3423_v33 }
 0x5ad   : > { %v19091_v26 = vsub.f32 %v3343_v31, %v3428_v46  ;;  %v19093_v36 = vsub.f32 %v3342_v20, %v3430_v48 }
 0x5b0   : > { %v3348_v60 = vpop.permute.xlu0 %3347 }
 0x5b1   : > { %v3349_v19 = vsel %vm21930_vm1, %v3348_v60, %v3345_v5  ;;  %v3352_v38 = vsel %vm21931_vm0, %v3345_v5, %v3348_v60  ;;  %vm21935_vm0 = vmmov %vm21934_vm14  ;;  %vm21936_vm1 = vcmp.ge.s32.totalorder %v18390_v12, 0  ;;  %v19132_v60 = vsub.f32 %v3423_v33, %v19119_v62 }
 0x5b2   : > { %v3353_v30 = vsel %vm18394_vm5, %v3352_v38, 0.0  ;;  %v3354_v14 = vsel %vm18404_vm8, %v3349_v19, 0.0  ;;  %vm21932_vm5 = vcmask 121856   ;;  %v19135_v38 = vsub.f32 %v19025_v53, %v3444_v47 }
 0x5b3   : > { %v3432_v23 = vand.u32 4294901760, %v3354_v14  ;;  %v3434_v51 = vand.u32 4294901760, %v3353_v30  ;;  %vm21933_vm8 = vmmov %vm21932_vm5  ;;  %v21685_v53 = vand.u32 4294901760, %v19132_v60 }
 0x5b4   : > { %v3356_v27 = vpop.permute.xlu0 %3355  ;;  %v21684_v33 = vand.u32 4294901760, %v19135_v38 }
 0x5b5   : > { %v19095_v52 = vpack.c.bf16 %v3434_v51, %v3430_v48  ;;  %v19097_v63 = vsub.f32 %v3354_v14, %v3432_v23  ;;  %v19099_v9 = vsub.f32 %v3353_v30, %v3434_v51  ;;  %v19101_v10 = vpack.c.bf16 %v3432_v23, %v3428_v46 }
 0x5b6   : > { %v3426_v30 = vsel %vm3421_vm12, %v3330_v45, 0  ;;  %vm21941_vm12 = vcmp.le.s32.totalorder %v18401_v18, 15  ;;  %v19171_v45 = vsub.f32 %v19132_v60, %v21685_v53  ;;  %v19180_v17 = vsub.f32 %v19135_v38, %v21684_v33 }
 0x5b7   : > { %16792 = vmatprep.subr.bf16.mxu1 %v19101_v10  ;;  %v16823_v21 = vpack.c.bf16 %v19097_v63, %v19091_v26  ;;  %v16825_v11 = vpack.c.bf16 %v19099_v9, %v19093_v36 }
 0x5b8   : > { %16794 = vmatpush1.bf16.msra.mxu1 %v19095_v52  ;;  %v3359_v24 = vpop.permute.xlu0 %3358 }
 0x5b9   : > { %v3360_v40 = vsel %vm21932_vm5, %v3359_v24, %v3356_v27  ;;  %v3363_v50 = vsel %vm21933_vm8, %v3356_v27, %v3359_v24  ;;  %16824 = vmatprep.subr.bf16.mxu0 %v16823_v21  ;;  %vm21942_vm5 = vcmask 924672  }
 0x5ba   : > { %v3365_v42 = vsel %vm18460_vm3, %v3360_v40, 0.0  ;;  %16826 = vmatpush1.bf16.msra.mxu0 %v16825_v11  ;;  %v3364_v49 = vsel %vm18452_vm2, %v3363_v50, 0.0  ;;  %vm21937_vm2 = vcmp.ge.s32.totalorder %v18392_v15, 0  ;;  %v3446_v11 = vand.u32 4294901760, %v19031_v44  ;;  %v3391_v50 = vpop.permute.xlu1 %3390  ;;  %vm21943_vm8 = vmmov %vm21942_vm5 }
 0x5bb   : > { %v3436_v0 = vand.u32 4294901760, %v3365_v42  ;;  %v3438_v20 = vand.u32 4294901760, %v3364_v49  ;;  %v19158_v40 = vand.u32 4294901760, %v3426_v30  ;;  %vm21938_vm3 = vcmask 1039360  }
 0x5bc   : > { %v3370_v37 = vpop.permute.xlu0 %3369  ;;  %vm21939_vm6 = vmmov %vm21938_vm3 }
 0x5bd   : > { %v3371_v54 = vsel %vm21934_vm14, %v3370_v37, %v3367_v35  ;;  %v3374_v5 = vsel %vm21935_vm0, %v3367_v35, %v3370_v37  ;;  %v19138_v14 = vsub.f32 %v3365_v42, %v3436_v0  ;;  %v19146_v15 = vsub.f32 %v3364_v49, %v3438_v20 }
 0x5be   : > { %v3375_v43 = vsel %vm21936_vm1, %v3374_v5, 0.0  ;;  %v3376_v31 = vsel %vm21937_vm2, %v3371_v54, 0.0  ;;  %v21687_v35 = vand.u32 4294901760, %v19093_v36  ;;  %v19183_v18 = vsub.f32 %v3426_v30, %v19158_v40 }
 0x5bf   : > { %v3440_v46 = vand.u32 4294901760, %v3376_v31  ;;  %v3442_v48 = vand.u32 4294901760, %v3375_v43 }
 0x5c0   : > { %v3378_v19 = vpop.permute.xlu0 %3377 }
 0x5c1   : > { %v19140_v23 = vpack.c.bf16 %v3442_v48, %v3438_v20  ;;  %v19142_v12 = vsub.f32 %v3376_v31, %v3440_v46  ;;  %v19144_v51 = vsub.f32 %v3375_v43, %v3442_v48  ;;  %v19148_v27 = vpack.c.bf16 %v3440_v46, %v3436_v0 }
 0x5c2   : > { %v21688_v20 = vand.u32 4294901760, %v19091_v26  ;;  %v19175_v43 = vsub.f32 %v19031_v44, %v3446_v11  ;;  %v19195_v44 = vsub.f32 %v19093_v36, %v21687_v35 }
 0x5c3   : > { %v16827_v16 = vpack.c.bf16 %v19142_v12, %v19138_v14  ;;  %16796 = vmatprep.subr.bf16.mxu1 %v19148_v27  ;;  %v16829_v24 = vpack.c.bf16 %v19144_v51, %v19146_v15  ;;  %v21693_v13 = vand.u32 4294901760, %v19144_v51 }
 0x5c4   : > { %v3380_v21 = vpop.permute.xlu0 %3379  ;;  %16798 = vmatpush1.bf16.msra.mxu1 %v19140_v23  ;;  %v3543_v25 = vand.u32 4294901760, %v19195_v44  ;;  %v21694_v44 = vand.u32 4294901760, %v19138_v14 }
 0x5c5   : > { %v3381_v42 = vsel %vm21938_vm3, %v3378_v19, %v3380_v21  ;;  %v3385_v49 = vsel %vm21939_vm6, %v3380_v21, %v3378_v19  ;;  %16828 = vmatprep.subr.bf16.mxu0 %v16827_v16 }
 0x5c6   : > { %v3386_v37 = vsel %vm21940_vm11, %v3381_v42, 0.0  ;;  %v3387_v0 = vsel %vm21941_vm12, %v3385_v49, 0.0  ;;  %16830 = vmatpush1.bf16.msra.mxu0 %v16829_v24  ;;  %v21689_v42 = vand.u32 4294901760, %v19097_v63  ;;  %v21686_v49 = vand.u32 4294901760, %v19099_v9 }
 0x5c7   : > { %v3448_v54 = vand.u32 4294901760, %v3387_v0  ;;  %v3450_v5 = vand.u32 4294901760, %v3386_v37 }
 0x5c8   : > { %v3389_v31 = vpop.permute.xlu0 %3388  ;;  %v3548_v53 = vsub.f32 %v19097_v63, %v21689_v42 }
 0x5c9   : > { %v19185_v46 = vpack.c.bf16 %v3450_v5, %v3446_v11  ;;  %v19187_v48 = vsub.f32 %v3387_v0, %v3448_v54  ;;  %v19189_v19 = vsub.f32 %v3386_v37, %v3450_v5  ;;  %v3392_v16 = vsel %vm21942_vm5, %v3389_v31, %v3391_v50  ;;  %v3402_v11 = vpop.permute.xlu1 %3401 }
 0x5ca   : > { %v3396_v21 = vsel %vm21943_vm8, %v3391_v50, %v3389_v31  ;;  %v3397_v24 = vsel %vm18525_vm15, %v3392_v16, 0.0  ;;  %v19200_v30 = vpack.c.bf16 %v3448_v54, %v3444_v47  ;;  %v21692_v5 = vand.u32 4294901760, %v19142_v12 }
 0x5cb   : > { %v3398_v37 = vsel %vm18534_vm10, %v3396_v21, 0.0  ;;  %v16831_v39 = vpack.c.bf16 %v19187_v48, %v19135_v38  ;;  %v16833_v47 = vpack.c.bf16 %v19189_v19, %v19175_v43  ;;  %v3454_v31 = vand.u32 4294901760, %v3397_v24 }
 0x5cc   : > { %16800 = vmatprep.subr.bf16.mxu1 %v19200_v30  ;;  %v3400_v50 = vpop.permute.xlu0 %3399  ;;  %vm21944_vm15 = vcmask 916480   ;;  %v3536_v21 = vsub.f32 %v19091_v26, %v21688_v20  ;;  %v3452_v59 = vand.u32 4294901760, %v3398_v37 }
 0x5cd   : > { %v3403_v16 = vsel %vm21944_vm15, %v3400_v50, %v3402_v11  ;;  %vm21945_vm14 = vmmov %vm21944_vm15  ;;  %16802 = vmatpush1.bf16.msra.mxu1 %v19185_v46  ;;  %16832 = vmatprep.subr.bf16.mxu0 %v16831_v39  ;;  %v3572_v39 = vsub.f32 %v19142_v12, %v21692_v5  ;;  %v21697_v5 = vand.u32 4294901760, %v19146_v15 }
 0x5ce   : > { %v3407_v1 = vsel %vm21945_vm14, %v3402_v11, %v3400_v50  ;;  %v3408_v34 = vsel %vm18488_vm7, %v3403_v16, 0.0  ;;  %v3554_v11 = vsub.f32 %v19099_v9, %v21686_v49  ;;  %16834 = vmatpush1.bf16.msra.mxu0 %v16833_v47  ;;  %v19237_v49 = vsub.f32 %v3397_v24, %v3454_v31 }
 0x5cf   : > { %v3409_v3 = vsel %vm18499_vm4, %v3407_v1, 0.0  ;;  %v3458_v33 = vand.u32 4294901760, %v3408_v34  ;;  %v3413_v1 = vpop.permute.xlu1 %3412  ;;  %v19245_v42 = vsub.f32 %v3398_v37, %v3452_v59  ;;  %vm21946_vm4 = vcmask 908288  }
 0x5d0   : > { %v3456_v50 = vand.u32 4294901760, %v3409_v3  ;;  %v3411_v22 = vpop.permute.xlu0 %3410  ;;  %vm21947_vm7 = vmmov %vm21946_vm4  ;;  %v3555_v16 = vand.u32 4294901760, %v3554_v11  ;;  %v3573_v11 = vand.u32 4294901760, %v3572_v39 }
 0x5d1   : > { %v19239_v35 = vpack.c.bf16 %v3458_v33, %v3454_v31  ;;  %v19243_v20 = vsub.f32 %v3408_v34, %v3458_v33  ;;  %v3414_v2 = vsel %vm21946_vm4, %v3411_v22, %v3413_v1  ;;  %v3418_v0 = vsel %vm21947_vm7, %v3413_v1, %v3411_v22 }
 0x5d2   : > { %v19241_v47 = vsub.f32 %v3409_v3, %v3456_v50  ;;  %v19249_v54 = vpack.c.bf16 %v3456_v50, %v3452_v59  ;;  %v3419_v24 = vsel %vm18562_vm13, %v3414_v2, 0.0  ;;  %v3549_v31 = vand.u32 4294901760, %v3548_v53 }
 0x5d3   : > { %v3420_v3 = vsel %vm18571_vm9, %v3418_v0, 0.0  ;;  %v16837_v33 = vpack.c.bf16 %v19243_v20, %v19237_v49  ;;  %v3560_v59 = vsub.f32 %v19138_v14, %v21694_v44  ;;  %v3578_v2 = vsub.f32 %v19144_v51, %v21693_v13 }
 0x5d4   : > { %16804 = vmatprep.subr.bf16.mxu1 %v19249_v54  ;;  %v16835_v34 = vpack.c.bf16 %v19241_v47, %v19245_v42  ;;  %v19268_v7 = vand.u32 4294901760, %v3420_v3  ;;  %v19270_v53 = vand.u32 4294901760, %v3419_v24  ;;  %v3537_v0 = vand.u32 4294901760, %v3536_v21 }
 0x5d5   : > { %16806 = vmatpush1.bf16.msra.mxu1 %v19239_v35  ;;  %v21948_v50 = vand.u32 4294901760, %v19187_v48  ;;  %v3566_v1 = vsub.f32 %v19146_v15, %v21697_v5  ;;  %v3589_v44 = vand.u32 4294901760, %v19175_v43  ;;  %v3607_v39 = vand.u32 4294901760, %v19245_v42 }
 0x5d6   : > { %16836 = vmatprep.subr.bf16.mxu0 %v16835_v34  ;;  %v19281_v13 = vsub.f32 %v3420_v3, %v19268_v7  ;;  %3461 = vmatprep.subr.mxu1 %v19268_v7  ;;  %v21949_v34 = vand.u32 4294901760, %v19183_v18  ;;  %v16807_v37 = vpack.c.bf16 %v3549_v31, %v3537_v0  ;;  %v3561_v61 = vand.u32 4294901760, %v3560_v59 }
 0x5d7   : > { %v3596_v22 = vsub.f32 %v19187_v48, %v21948_v50  ;;  %16838 = vmatpush1.bf16.msra.mxu0 %v16837_v33  ;;  %v16809_v50 = vpack.c.bf16 %v3555_v16, %v3543_v25  ;;  %v3579_v55 = vand.u32 4294901760, %v3578_v2  ;;  %v21950_v5 = vand.u32 4294901760, %v19189_v19 }
 0x5d8   : > { %v3525_v21 = vsub.f32 %v19183_v18, %v21949_v34  ;;  %v3625_v32 = vand.u32 4294901760, %v19243_v20  ;;  %v19294_v33 = vsub.f32 %v3419_v24, %v19270_v53  ;;  %3752 = vmatprep.subr.mxu0 %v19281_v13  ;;  %v21951_v34 = vand.u32 4294901760, %v19171_v45 }
 0x5d9   : > { %v3602_v3 = vsub.f32 %v19189_v19, %v21950_v5  ;;  %3463 = vmatpush1.msra.mxu1 %v19270_v53  ;;  %v16811_v25 = vpack.c.bf16 %v3573_v11, %v3561_v61  ;;  %v3597_v16 = vand.u32 4294901760, %v3596_v22  ;;  %v21952_v31 = vand.u32 4294901760, %v19241_v47 }
 0x5da   : > { %16808 = vmatprep.subr.bf16.mxu1 %v16807_v37  ;;  %3516 = vmatmul.mubr.f32.vlgmr.msra.gmra.mrb[14].mxu1 %v21951_v34  ;;  %v3567_v5 = vand.u32 4294901760, %v3566_v1  ;;  %v3613_v2 = vand.u32 4294901760, %v19237_v49  ;;  %v3590_v24 = vsub.f32 %v19175_v43, %v3589_v44  ;;  %v3585_v45 = vand.u32 4294901760, %v19180_v17 }
 0x5db   : > { %v3620_v59 = vsub.f32 %v19241_v47, %v21952_v31  ;;  %16810 = vmatpush1.bf16.msra.mxu1 %v16809_v50  ;;  %3755 = vmatpush1.msra.mxu0 %v19294_v33  ;;  %v3608_v61 = vsub.f32 %v19245_v42, %v3607_v39  ;;  %v3526_v37 = vand.u32 4294901760, %v3525_v21  ;;  %v3603_v0 = vand.u32 4294901760, %v3602_v3 }
 0x5dc   : > { %16812 = vmatprep.subr.bf16.mxu1 %v16811_v25  ;;  %16840 = vmatprep.subr.bf16.mxu0 %v19101_v10  ;;  %v3626_v11 = vsub.f32 %v19243_v20, %v3625_v32  ;;  %v16813_v22 = vpack.c.bf16 %v3579_v55, %v3567_v5  ;;  %v21953_v1 = vmov 0.0   ;;  %v16815_v50 = vpack.c.bf16 %v3597_v16, %v3585_v45 }
 0x5dd   : > { %3805 = vmatmul.mubr.f32.vlgmr.msra.gmra.mrb[4].mxu0 %v19132_v60  ;;  %3521 = vmatprep.mubr.f32.mxu1 %v21953_v1  ;;  %v3621_v34 = vand.u32 4294901760, %v3620_v59  ;;  %v3631_v17 = vand.u32 4294901760, %v19281_v13  ;;  %v3614_v21 = vsub.f32 %v19237_v49, %v3613_v2  ;;  %v3591_v3 = vand.u32 4294901760, %v3590_v24 }
 0x5de   : > { %16842 = vmatpush1.bf16.msra.mxu0 %v19095_v52  ;;  %3810 = vmatprep.mubr.f32.mxu0 %v21953_v1  ;;  %v3609_v55 = vand.u32 4294901760, %v3608_v61  ;;  %v3627_v25 = vand.u32 4294901760, %v3626_v11  ;;  %v3637_v31 = vand.u32 4294901760, %v19294_v33  ;;  %v21955_v11 = vand.u32 4294901760, %v19097_v63 }
 0x5df   : > { %16844 = vmatprep.subr.bf16.mxu0 %v19148_v27  ;;  %16814 = vmatpush1.bf16.msra.mxu1 %v16813_v22  ;;  %v16817_v16 = vpack.c.bf16 %v3603_v0, %v3591_v3  ;;  %v3632_v5 = vsub.f32 %v19281_v13, %v3631_v17  ;;  %v3615_v45 = vand.u32 4294901760, %v3614_v21  ;;  %v21954_v13 = vand.u32 4294901760, %v19091_v26 }
 0x5e0   : > { %16816 = vmatprep.subr.bf16.mxu1 %v16815_v50  ;;  %3527 = vmatmul.mubr.f32.gmra.mrb[16].mxu1 %v3526_v37  ;;  %v16819_v59 = vpack.c.bf16 %v3621_v34, %v3609_v55  ;;  %v3638_v61 = vsub.f32 %v19294_v33, %v3637_v31  ;;  %v21956_v22 = vand.u32 4294901760, %v19093_v36  ;;  %v21957_v50 = vand.u32 4294901760, %v19099_v9 }
 0x5e1   : > { %3813 = vmatmul.mubr.f32.gmra.mrb[6].mxu0 %v19183_v18  ;;  %3687 = vmatprep.mubr.f32.mxu1 %v21953_v1  ;;  %v16821_v24 = vpack.c.bf16 %v3627_v25, %v3615_v45  ;;  %v3633_v37 = vand.u32 4294901760, %v3632_v5  ;;  %v16855_v33 = vpack.c.bf16 %v21955_v11, %v21954_v13  ;;  %v21958_v21 = vand.u32 4294901760, %v19132_v60 }
 0x5e2   : > { %16846 = vmatpush1.bf16.msra.mxu0 %v19140_v23  ;;  %3901 = vmatprep.mubr.f32.mxu0 %v21953_v1  ;;  %v3639_v0 = vand.u32 4294901760, %v3638_v61  ;;  %v16857_v34 = vpack.c.bf16 %v21957_v50, %v21956_v22  ;;  %v21959_v3 = vand.u32 4294901760, %v19138_v14  ;;  %v21960_v26 = vand.u32 4294901760, %v19142_v12 }
 0x5e3   : > { %16848 = vmatprep.subr.bf16.mxu0 %v19200_v30  ;;  %16818 = vmatpush1.bf16.msra.mxu1 %v16817_v16  ;;  %v21961_v36 = vand.u32 4294901760, %v19146_v15  ;;  %v21962_v63 = vand.u32 4294901760, %v19144_v51  ;;  %v21963_v25 = vand.u32 4294901760, %v19135_v38  ;;  %v21964_v60 = vand.u32 4294901760, %v19187_v48 }
 0x5e4   : > { %16820 = vmatprep.subr.bf16.mxu1 %v16819_v59  ;;  %v16859_v55 = vpack.c.bf16 %v21960_v26, %v21959_v3  ;;  %v21965_v14 = vand.u32 4294901760, %v19183_v18  ;;  %v21966_v12 = vand.u32 4294901760, %v19189_v19  ;;  %v21967_v51 = vand.u32 4294901760, %v19241_v47  ;;  %v4153_v19 = vpop.permute.xlu0 %4152 }
 0x5e5   : > { %v16861_v9 = vpack.c.bf16 %v21962_v63, %v21961_v36  ;;  %v16863_v16 = vpack.c.bf16 %v21964_v60, %v21963_v25  ;;  %v16869_v18 = vpack.c.bf16 %v3625_v32, %v3613_v2  ;;  %v19400_v20 = vand.u32 7, %v18385_v4 }
 0x5e6   : > { %16850 = vmatpush1.bf16.msra.mxu0 %v19185_v46  ;;  %v16865_v15 = vpack.c.bf16 %v21966_v12, %v3589_v44  ;;  %v16867_v38 = vpack.c.bf16 %v21967_v51, %v3607_v39  ;;  %v21973_v13 = vmov 0  ;;  %v21719_v50 = vmov 1.0|1.0  }
 0x5e7   : > { %16852 = vmatprep.subr.bf16.mxu0 %v19249_v54  ;;  %16822 = vmatpush1.bf16.msra.mxu1 %v16821_v24  ;;  %21969 = vst [vmem:[#allocation20_spill] sm:$0xff] %v19400_v20  ;;  %v21976_v26 = vmov 0  ;;  %v21981_v60 = vmov 0  ;;  %v21984_v12 = vmov 0 }
 0x5e8   : > { %3634 = vmatprep.subr.mxu1 %v3633_v37  ;;  %v4158_v45 = vpop.permute.xlu0 %4157 }
 0x5ea   : > { %16854 = vmatpush1.bf16.msra.mxu0 %v19239_v35 }
 0x5eb   : > { %3852 = vmatprep.subr.mxu0 %v19268_v7  ;;  %3640 = vmatpush1.msra.mxu1 %v3639_v0 }
 0x5ec   : > { %3689 = vmatmul.mubr.f32.vlgmr.msra.gmra.mrb[14].mxu1 %v19119_v62 }
 0x5ed   : > { %3694 = vmatprep.mubr.f32.mxu1 %v21953_v1 }
 0x5ee   : > { %3854 = vmatpush1.msra.mxu0 %v19270_v53 }
 0x5ef   : > { %16856 = vmatprep.subr.bf16.mxu0 %v16855_v33  ;;  %3905 = vmatmul.mubr.f32.vlgmr.msra.gmra.mrb[4].mxu0 %v21958_v21 }
 0x5f0   : > { %16858 = vmatpush1.bf16.msra.mxu0 %v16857_v34  ;;  %3910 = vmatprep.mubr.f32.mxu0 %v21953_v1 }
 0x5f1   : > { %16860 = vmatprep.subr.bf16.mxu0 %v16859_v55  ;;  %3696 = vmatmul.mubr.f32.gmra.mrb[16].mxu1 %v19158_v40 }
 0x5f3   : > { %3914 = vmatmul.mubr.f32.gmra.mrb[6].mxu0 %v21965_v14 }
 0x5f4   : > { %16862 = vmatpush1.bf16.msra.mxu0 %v16861_v9  ;;  %4038 = vmatprep.mubr.f32.mxu0 %v21953_v1 }
 0x5f5   : > { %16864 = vmatprep.subr.bf16.mxu0 %v16863_v16 }
 0x5f8   : > { %16866 = vmatpush1.bf16.msra.mxu0 %v16865_v15 }
 0x5f9   : > { %16868 = vmatprep.subr.bf16.mxu0 %v16867_v38  ;;  %v21989_v38 = vmov 0 }
 0x5fc   : > { %16870 = vmatpush1.bf16.msra.mxu0 %v16869_v18 }
 0x5fd   : > { %3987 = vmatprep.subr.mxu0 %v3631_v17 }
 0x600   : > { %3991 = vmatpush1.msra.mxu0 %v3637_v31 }
 0x601   : > { %16872 = vmatprep.subr.bf16.mxu0 %v19101_v10  ;;  %4040 = vmatmul.mubr.f32.vlgmr.msra.gmra.mrb[4].mxu0 %v19119_v62 }
 0x602   : > { %16874 = vmatpush1.bf16.msra.mxu0 %v19095_v52  ;;  %4045 = vmatprep.mubr.f32.mxu0 %v21953_v1 }
 0x603   : > { %16876 = vmatprep.subr.bf16.mxu0 %v19148_v27  ;;  %v19397_v27 = vshra.s32 %v18385_v4, 3 }
 0x605   : > { %4047 = vmatmul.mubr.f32.gmra.mrb[6].mxu0 %v19158_v40  ;;  %21968 = vst [vmem:[#allocation19_spill] sm:$0xff] %v19397_v27 }
 0x606   : > { %16878 = vmatpush1.bf16.msra.mxu0 %v19140_v23  ;;  %4135 = vmatprep.mubr.f32.mxu0 %v21953_v1 }
 0x607   : > { %16880 = vmatprep.subr.bf16.mxu0 %v19200_v30 }
 0x60a   : > { %16882 = vmatpush1.bf16.msra.mxu0 %v19185_v46  ;;  %v4271_v46 = vmul.u32 2, %v19400_v20  ;;  %v22047_v20 = vmov 0 }
 0x60b   : > { %16884 = vmatprep.subr.bf16.mxu0 %v19249_v54  ;;  %v4167_v54 = vpop.permute.xlu1 %4166 }
 0x60e   : > { %16886 = vmatpush1.bf16.msra.mxu0 %v19239_v35  ;;  %v4269_v35 = vmul.u32 2, %v19397_v27 }
 0x60f   : > { %4086 = vmatprep.subr.mxu0 %v19268_v7  ;;  %v4172_v11 = vpop.permute.xlu1 %4171 }
 0x610   : > { %v4270_v43 = vmul.u32 16, %v4269_v35  ;;  %v21997_v35 = vmov 0 }
 0x612   : > { %4088 = vmatpush1.msra.mxu0 %v19270_v53  ;;  %v19407_v49 = vadd.s32 %v4271_v46, %v4270_v43 }
 0x613   : > { %4137 = vmatmul.mubr.f32.vlgmr.msra.gmra.mrb[4].mxu0 %v19119_v62  ;;  %v21970_v62 = vlaneseq }
 0x614   : > { %4142 = vmatprep.mubr.f32.mxu0 %v21953_v1 }
 0x615   : > { %v19405_v48 = vshrl.u32 %v21970_v62, 7  ;;  %v22000_v62 = vmov 0 }
 0x617   : > { %4144 = vmatmul.mubr.f32.gmra.mrb[6].mxu0 %v19158_v40  ;;  %21971 = vst [vmem:[#allocation21_spill] sm:$0xff] %v19405_v48  ;;  %v19410_v39 = vadd.s32 128, %v19405_v48  ;;  %v19413_v2 = vadd.s32 136, %v19405_v48  ;;  %v19418_v5 = vadd.s32 8, %v19405_v48  ;;  %vm21713_vm0 = vcmp.eq.s32.totalorder %v19405_v48, %v19407_v49 }
 0x618   : > { %v4253_v21 = vadd.s32 144, %v19405_v48  ;;  %v4254_v55 = vadd.s32 152, %v19405_v48  ;;  %v19473_v63 = vadd.s32 16, %v19405_v48  ;;  %v19478_v25 = vadd.s32 24, %v19405_v48 }
 0x619   : > { %21972 = vst [vmem:[#allocation22_spill] sm:$0xff] %v19418_v5  ;;  %vm4289_vm13 = vcmp.eq.s32.totalorder %v19410_v39, %v19407_v49  ;;  %vm4290_vm10 = vcmp.eq.s32.totalorder %v19413_v2, %v19407_v49  ;;  %vm21712_vm1 = vcmp.eq.s32.totalorder %v19418_v5, %v19407_v49  ;;  %v4255_v16 = vadd.s32 160, %v19405_v48 }
 0x61a   : > { %vm19433_vm9 = vmpackc.low %vm4290_vm10, %vm4289_vm13  ;;  %vm21709_vm3 = vcmp.eq.s32.totalorder %v4253_v21, %v19407_v49  ;;  %21979 = vst [vmem:[#allocation25_spill] sm:$0xff] %v19473_v63  ;;  %vm21706_vm6 = vcmp.eq.s32.totalorder %v4254_v55, %v19407_v49  ;;  %vm21703_vm12 = vcmp.eq.s32.totalorder %v19473_v63, %v19407_v49  ;;  %vm21700_vm5 = vcmp.eq.s32.totalorder %v19478_v25, %v19407_v49 }
 0x61b   : > { %v21974_v13 = vsel %vm19433_vm9, 4294967295, %v21973_v13  ;;  %16888 = vmatprep.subr.msk.bf16.mxu1 %vm19433_vm9, %v21719_v50  ;;  %vm19462_vm2 = vmpackc.low %vm21712_vm1, %vm21713_vm0  ;;  %21980 = vst [vmem:[#allocation26_spill] sm:$0xff] %v19478_v25  ;;  %v4256_v14 = vadd.s32 168, %v19405_v48  ;;  %vm21702_vm15 = vcmp.eq.s32.totalorder %v4255_v16, %v19407_v49  ;;  %v19515_v15 = vadd.s32 32, %v19405_v48 }
 0x61c   : > { %21975 = vst [vmem:[#allocation23_spill] sm:$0xff] %v21974_v13  ;;  %v21977_v26 = vsel %vm19462_vm2, 4294967295, %v21976_v26  ;;  %16890 = vmatpush3.bf16.msk.msra.mxu1 %vm19462_vm2, %v21719_v50  ;;  %vm19487_vm11 = vmpackc.low %vm21706_vm6, %vm21709_vm3  ;;  %v19522_v51 = vadd.s32 40, %v19405_v48  ;;  %v4257_v18 = vadd.s32 176, %v19405_v48  ;;  %v4259_v43 = vadd.s32 192, %v19405_v48 }
 0x61d   : > { %21978 = vst [vmem:[#allocation24_spill] sm:$0xff] %v21977_v26  ;;  %v21982_v60 = vsel %vm19487_vm11, 4294967295, %v21981_v60  ;;  %16892 = vmatprep.subr.msk.bf16.mxu1 %vm19487_vm11, %v21719_v50  ;;  %vm19509_vm8 = vmpackc.low %vm21700_vm5, %vm21703_vm12  ;;  %vm21701_vm14 = vcmp.eq.s32.totalorder %v4256_v14, %v19407_v49  ;;  %vm21705_vm7 = vcmp.eq.s32.totalorder %v19515_v15, %v19407_v49  ;;  %v4260_v46 = vadd.s32 200, %v19405_v48 }
 0x61e   : > { %21983 = vst [vmem:[#allocation27_spill] sm:$0xff] %v21982_v60  ;;  %v21985_v12 = vsel %vm19509_vm8, 4294967295, %v21984_v12  ;;  %21987 = vst [vmem:[#allocation29_spill] sm:$0xff] %v19515_v15  ;;  %vm21704_vm5 = vcmp.eq.s32.totalorder %v19522_v51, %v19407_v49  ;;  %v4246_v6 = vadd.s32 88, %v19405_v48  ;;  %v4264_v41 = vadd.s32 232, %v19405_v48 }
 0x61f   : > { %21986 = vst [vmem:[#allocation28_spill] sm:$0xff] %v21985_v12  ;;  %21988 = vst [vmem:[#allocation30_spill] sm:$0xff] %v19522_v51  ;;  %vm21716_vm3 = vcmp.eq.s32.totalorder %v4260_v46, %v19407_v49 }
 0x620   : > { %16894 = vmatpush3.bf16.msk.msra.mxu1 %vm19509_vm8, %v21719_v50  ;;  %vm19528_vm4 = vmpackc.low %vm21701_vm14, %vm21702_vm15  ;;  %vm21708_vm15 = vcmp.eq.s32.totalorder %v4257_v18, %v19407_v49 }
 0x621   : > { %v21990_v38 = vsel %vm19528_vm4, 4294967295, %v21989_v38  ;;  %16896 = vmatprep.subr.msk.bf16.mxu1 %vm19528_vm4, %v21719_v50  ;;  %vm19547_vm14 = vmpackc.low %vm21704_vm5, %vm21705_vm7 }
 0x622   : > { %21991 = vst [vmem:[#allocation31_spill] sm:$0xff] %v21990_v38 }
 0x624   : > { %16898 = vmatpush3.bf16.msk.msra.mxu1 %vm19547_vm14, %v21719_v50 }
 0x6bf   : > { %v3690_v32 = vpop.f32.mrb[14].mxu1 }
 0x6c0   : > { %v3692_v52 = vpop.f32.mrb[15].mxu1 }
 0x6c4   : > { %v3697_v10 = vpop.f32.mrb[16].mxu1 }
 0x6c5   : > { %v3699_v23 = vpop.f32.mrb[17].mxu1 }
 0x6e6   : > { %v4138_v40 = vpop.f32.mrb[4].mxu0 }
 0x6e7   : > { %v17684_v30 = vadd.f32 %v4138_v40, %v3690_v32  ;;  %v4140_v42 = vpop.f32.mrb[5].mxu0  ;;  %v4258_v32 = vadd.s32 184, %v19405_v48  ;;  %v4244_v40 = vadd.s32 72, %v19405_v48 }
 0x6e8   : > { %v17685_v44 = vadd.f32 %v4140_v42, %v3692_v52  ;;  %v21992_v52 = vmov 0  ;;  %v22006_v42 = vmov 0 }
 0x6e9   : > { %v4160_v47 = vmul.f32 %v17684_v30, %v4153_v19  ;;  %v21993_v52 = vsel %vm19547_vm14, 4294967295, %v21992_v52  ;;  %vm21707_vm12 = vcmp.eq.s32.totalorder %v4258_v32, %v19407_v49  ;;  %v22003_v30 = vmov 0 }
 0x6ea   : > { %v4161_v7 = vmul.f32 %v17685_v44, %v4153_v19  ;;  %v4145_v53 = vpop.f32.mrb[6].mxu0  ;;  %21994 = vst [vmem:[#allocation32_spill] sm:$0xff] %v21993_v52  ;;  %vm19566_vm5 = vmpackc.low %vm21707_vm12, %vm21708_vm15  ;;  %vm4297_vm15 = vcmp.eq.s32.totalorder %v4259_v43, %v19407_v49  ;;  %v4243_v19 = vadd.s32 64, %v19405_v48  ;;  %vm21714_vm1 = vcmp.eq.s32.totalorder %v4244_v40, %v19407_v49 }
 0x6eb   : > { %v17686_v17 = vadd.f32 %v4145_v53, %v3697_v10  ;;  %v4147_v31 = vpop.f32.mrb[7].mxu0  ;;  %v19415_v59 = vadd.f32 %v4167_v54, %v4160_v47  ;;  %v19553_v10 = vadd.s32 48, %v19405_v48  ;;  %v21998_v35 = vsel %vm19566_vm5, 4294967295, %v21997_v35  ;;  %16900 = vmatprep.subr.msk.bf16.mxu1 %vm19566_vm5, %v21719_v50 }
 0x6ec   : > { %v17687_v24 = vadd.f32 %v4147_v31, %v3699_v23  ;;  %v19420_v61 = vadd.f32 %v4167_v54, %v4161_v7  ;;  %v19560_v23 = vadd.s32 56, %v19405_v48  ;;  %21999 = vst [vmem:[#allocation35_spill] sm:$0xff] %v21998_v35  ;;  %v4321_v54 = vsel %vm4289_vm13, 1.0, %v21953_v1 }
 0x6ed   : > { %v4162_v37 = vmul.f32 %v17686_v17, %v4158_v45  ;;  %v21722_v0 = vmax.f32 %v19415_v59, 0.0  ;;  %21995 = vst [vmem:[#allocation33_spill] sm:$0xff] %v19553_v10  ;;  %vm21711_vm7 = vcmp.eq.s32.totalorder %v19553_v10, %v19407_v49  ;;  %v4322_v44 = vsel %vm4290_vm10, 1.0, %v21953_v1 }
 0x6ee   : > { %v4163_v33 = vmul.f32 %v17687_v24, %v4158_v45  ;;  %v21721_v22 = vmax.f32 %v19420_v61, 0.0  ;;  %21996 = vst [vmem:[#allocation34_spill] sm:$0xff] %v19560_v23  ;;  %vm21710_vm6 = vcmp.eq.s32.totalorder %v19560_v23, %v19407_v49  ;;  %vm22012_vm13 = vcmp.eq.s32.totalorder %v4254_v55, %v19407_v49 }
 0x6ef   : > { %4186 = vrot.lane.b32.xlu0 %v21722_v0, %s21927_s6  ;;  %v19446_v34 = vadd.f32 %v4172_v11, %v4162_v37  ;;  %vm19585_vm12 = vmpackc.low %vm21710_vm6, %vm21711_vm7  ;;  %vm21715_vm7 = vcmp.eq.s32.totalorder %v4243_v19, %v19407_v49  ;;  %v4324_v39 = vsel %vm22012_vm13, 1.0, %v21953_v1  ;;  %v19642_v2 = vsub.f32 %v4321_v54, %v4321_v54 }
 0x6f0   : > { %4188 = vrot.lane.b32.xlu1 %v21721_v22, %s21927_s6  ;;  %v19454_v3 = vadd.f32 %v4172_v11, %v4163_v33  ;;  %v22001_v62 = vsel %vm19585_vm12, 4294967295, %v22000_v62  ;;  %16902 = vmatpush3.bf16.msk.msra.mxu1 %vm19585_vm12, %v21719_v50  ;;  %vm19600_vm6 = vmpackc.low %vm21716_vm3, %vm4297_vm15  ;;  %vm22011_vm3 = vcmp.eq.s32.totalorder %v4253_v21, %v19407_v49  ;;  %v19644_v17 = vsub.f32 %v4322_v44, %v4322_v44 }
 0x6f1   : > { %v21718_v36 = vmax.f32 %v19446_v34, 0.0  ;;  %22002 = vst [vmem:[#allocation36_spill] sm:$0xff] %v22001_v62  ;;  %v22004_v30 = vsel %vm19600_vm6, 4294967295, %v22003_v30  ;;  %16904 = vmatprep.subr.msk.bf16.mxu1 %vm19600_vm6, %v21719_v50  ;;  %vm19613_vm0 = vmpackc.low %vm21714_vm1, %vm21715_vm7  ;;  %vm22009_vm1 = vcmp.eq.s32.totalorder %v19405_v48, %v19407_v49  ;;  %vm22010_vm7 = vcmp.eq.s32.totalorder %v19418_v5, %v19407_v49 }
 0x6f2   : > { %v21717_v9 = vmax.f32 %v19454_v3, 0.0  ;;  %22005 = vst [vmem:[#allocation37_spill] sm:$0xff] %v22004_v30  ;;  %v22007_v42 = vsel %vm19613_vm0, 4294967295, %v22006_v42  ;;  %v4305_v47 = vsel %vm22009_vm1, 1.0, %v21953_v1  ;;  %v4306_v7 = vsel %vm22010_vm7, 1.0, %v21953_v1 }
 0x6f3   : > { %4190 = vrot.lane.b32.xlu0 %v21718_v36, %s21927_s6  ;;  %22008 = vst [vmem:[#allocation38_spill] sm:$0xff] %v22007_v42  ;;  %v4323_v53 = vsel %vm22011_vm3, 1.0, %v21953_v1  ;;  %vm22013_vm10 = vcmp.eq.s32.totalorder %v19473_v63, %v19407_v49  ;;  %vm22014_vm1 = vcmp.eq.s32.totalorder %v19478_v25, %v19407_v49  ;;  %v19654_v24 = vsub.f32 %v4305_v47, %v4305_v47 }
 0x6f4   : > { %4192 = vrot.lane.b32.xlu1 %v21717_v9, %s21927_s6  ;;  %16906 = vmatpush3.bf16.msk.msra.mxu1 %vm19613_vm0, %v21719_v50  ;;  %v4307_v31 = vsel %vm22013_vm10, 1.0, %v21953_v1  ;;  %v4308_v45 = vsel %vm22014_vm1, 1.0, %v21953_v1  ;;  %v19656_v37 = vsub.f32 %v4306_v7, %v4306_v7  ;;  %vm22015_vm3 = vcmp.eq.s32.totalorder %v4255_v16, %v19407_v49 }
 0x6f5   : > { %v4325_v11 = vsel %vm22015_vm3, 1.0, %v21953_v1  ;;  %vm22016_vm7 = vcmp.eq.s32.totalorder %v4256_v14, %v19407_v49  ;;  %v19664_v21 = vsub.f32 %v4323_v53, %v4323_v53  ;;  %v19666_v55 = vsub.f32 %v4324_v39, %v4324_v39 }
 0x6f6   : > { %v4326_v33 = vsel %vm22016_vm7, 1.0, %v21953_v1  ;;  %vm22017_vm13 = vcmp.eq.s32.totalorder %v19515_v15, %v19407_v49  ;;  %vm22018_vm10 = vcmp.eq.s32.totalorder %v19522_v51, %v19407_v49  ;;  %v19676_v16 = vsub.f32 %v4307_v31, %v4307_v31 }
 0x6f7   : > { %v4309_v54 = vsel %vm22017_vm13, 1.0, %v21953_v1  ;;  %v4310_v44 = vsel %vm22018_vm10, 1.0, %v21953_v1  ;;  %v19678_v47 = vsub.f32 %v4308_v45, %v4308_v45  ;;  %vm22019_vm1 = vcmp.eq.s32.totalorder %v4257_v18, %v19407_v49 }
 0x6f8   : > { %v4327_v14 = vsel %vm22019_vm1, 1.0, %v21953_v1  ;;  %vm22020_vm3 = vcmp.eq.s32.totalorder %v4258_v32, %v19407_v49  ;;  %v19686_v53 = vsub.f32 %v4325_v11, %v4325_v11  ;;  %v19688_v39 = vsub.f32 %v4326_v33, %v4326_v33 }
 0x6f9   : > { %v4328_v7 = vsel %vm22020_vm3, 1.0, %v21953_v1  ;;  %vm22021_vm7 = vcmp.eq.s32.totalorder %v19553_v10, %v19407_v49  ;;  %vm22022_vm13 = vcmp.eq.s32.totalorder %v19560_v23, %v19407_v49  ;;  %v19698_v18 = vsub.f32 %v4309_v54, %v4309_v54 }
 0x6fa   : > { %v4311_v31 = vsel %vm22021_vm7, 1.0, %v21953_v1  ;;  %v4312_v45 = vsel %vm22022_vm13, 1.0, %v21953_v1  ;;  %v19700_v9 = vsub.f32 %v4310_v44, %v4310_v44  ;;  %v4329_v32 = vsel %vm4297_vm15, 1.0, %v21953_v1 }
 0x6fb   : > { %vm22023_vm10 = vcmp.eq.s32.totalorder %v4260_v46, %v19407_v49  ;;  %v19708_v33 = vsub.f32 %v4327_v14, %v4327_v14  ;;  %v19710_v36 = vsub.f32 %v4328_v7, %v4328_v7  ;;  %vm22024_vm1 = vcmp.eq.s32.totalorder %v4243_v19, %v19407_v49 }
 0x6fc   : > { %v4330_v11 = vsel %vm22023_vm10, 1.0, %v21953_v1  ;;  %v4313_v50 = vsel %vm22024_vm1, 1.0, %v21953_v1  ;;  %vm22025_vm3 = vcmp.eq.s32.totalorder %v4244_v40, %v19407_v49  ;;  %v19718_v44 = vsub.f32 %v4311_v31, %v4311_v31 }
 0x6fd   : > { %v4314_v54 = vsel %vm22025_vm3, 1.0, %v21953_v1  ;;  %v19720_v43 = vsub.f32 %v4312_v45, %v4312_v45  ;;  %v4261_v22 = vadd.s32 208, %v19405_v48  ;;  %v4262_v46 = vadd.s32 216, %v19405_v48 }
 0x6fe   : > { %v19724_v0 = vsub.f32 %v4329_v32, %v4329_v32  ;;  %v19726_v7 = vsub.f32 %v4330_v11, %v4330_v11  ;;  %v4245_v19 = vadd.s32 80, %v19405_v48  ;;  %v19730_v40 = vsub.f32 %v4313_v50, %v4313_v50 }
 0x6ff   : > { %v19732_v31 = vsub.f32 %v4314_v54, %v4314_v54  ;;  %vm4299_vm15 = vcmp.eq.s32.totalorder %v4261_v22, %v19407_v49  ;;  %vm4300_vm7 = vcmp.eq.s32.totalorder %v4262_v46, %v19407_v49  ;;  %vm22026_vm13 = vcmask 1039360  }
 0x700   : > { %vm22027_vm10 = vmmov %vm22026_vm13  ;;  %v22028_v11 = vmov 0  ;;  %vm4283_vm3 = vcmp.eq.s32.totalorder %v4245_v19, %v19407_v49  ;;  %vm4284_vm0 = vcmp.eq.s32.totalorder %v4246_v6, %v19407_v49  ;;  %v22031_v50 = vmax.f32 %v19415_v59, 0.0 }
 0x701   : > { %vm19738_vm1 = vmpackc.low %vm4300_vm7, %vm4299_vm15  ;;  %v22032_v22 = vmax.f32 %v19420_v61, 0.0  ;;  %v4331_v46 = vsel %vm4299_vm15, 1.0, %v21953_v1  ;;  %v22034_v19 = vmov 0  ;;  %v4315_v61 = vsel %vm4283_vm3, 1.0, %v21953_v1 }
 0x702   : > { %v22029_v11 = vsel %vm19738_vm1, 4294967295, %v22028_v11  ;;  %v19761_v59 = vsub.f32 %v4331_v46, %v4331_v46  ;;  %v4247_v23 = vadd.s32 96, %v19405_v48  ;;  %v4248_v10 = vadd.s32 104, %v19405_v48 }
 0x703   : > { %22030 = vst [vmem:[#allocation39_spill] sm:$0xff] %v22029_v11  ;;  %v22039_v51 = vmax.f32 %v19446_v34, 0.0  ;;  %v22050_v63 = vmov 0  ;;  %v22056_v27 = vand.u32 4294901760, %v19656_v37  ;;  %v21800_v62 = vand.u32 4294901760, %v19726_v7 }
 0x705   : > { %v4441_v29 = vsub.f32 %v19656_v37, %v22056_v27 }
 0x761   : > { %v4187_v14 = vpop.permute.xlu0 %4186 }
 0x762   : > { %v4189_v8 = vpop.permute.xlu1 %4188 }
 0x763   : > { %v4194_v45 = vsel %vm22026_vm13, %v4187_v14, %v4189_v8  ;;  %v4202_v32 = vsel %vm22027_vm10, %v4189_v8, %v4187_v14  ;;  %v4332_v8 = vsel %vm4300_vm7, 1.0, %v21953_v1  ;;  %v22033_v14 = vmov 1.0|1.0   ;;  %vm19757_vm13 = vmpackc.low %vm4284_vm0, %vm4283_vm3 }
 0x764   : > { %v19746_v54 = vmax.f32 %v22031_v50, %v4194_v45  ;;  %v19750_v28 = vmax.f32 %v22032_v22, %v4202_v32  ;;  %16908 = vmatprep.subr.msk.bf16.mxu1 %vm19738_vm1, %v22033_v14  ;;  %v22035_v19 = vsel %vm19757_vm13, 4294967295, %v22034_v19  ;;  %v19763_v45 = vsub.f32 %v4332_v8, %v4332_v8 }
 0x765   : > { %22036 = vst [vmem:[#allocation40_spill] sm:$0xff] %v22035_v19  ;;  %v4191_v6 = vpop.permute.xlu0 %4190  ;;  %v4316_v32 = vsel %vm4284_vm0, 1.0, %v21953_v1  ;;  %16910 = vmatpush3.bf16.msk.msra.mxu1 %vm19757_vm13, %v22033_v14  ;;  %v19774_v22 = vsub.f32 %v4315_v61, %v4315_v61  ;;  %v4263_v8 = vadd.s32 224, %v19405_v48  ;;  %vm22037_vm0 = vmmov %vm22027_vm10  ;;  %v22040_v61 = vmax.f32 %v19454_v3, 0.0 }
 0x766   : > { %4212 = vrot.lane.b32.xlu0 %v19746_v54, %s21923_s2  ;;  %4214 = vrot.lane.b32.xlu1 %v19750_v28, %s21923_s2  ;;  %v4193_v50 = vpop.permute.xlu1 %4192  ;;  %v19776_v46 = vsub.f32 %v4316_v32, %v4316_v32  ;;  %vm22038_vm15 = vmmov %vm22037_vm0  ;;  %vm4302_vm10 = vcmp.eq.s32.totalorder %v4264_v41, %v19407_v49  ;;  %v22044_v3 = vmov 0 }
 0x767   : > { %v4195_v58 = vsel %vm22037_vm0, %v4191_v6, %v4193_v50  ;;  %v4203_v57 = vsel %vm22038_vm15, %v4193_v50, %v4191_v6  ;;  %vm4301_vm7 = vcmp.eq.s32.totalorder %v4263_v8, %v19407_v49  ;;  %v4334_v6 = vsel %vm4302_vm10, 1.0, %v21953_v1 }
 0x768   : > { %v19786_v15 = vmax.f32 %v22039_v51, %v4195_v58  ;;  %v19790_v32 = vmax.f32 %v22040_v61, %v4203_v57  ;;  %v4333_v25 = vsel %vm4301_vm7, 1.0, %v21953_v1  ;;  %vm19796_vm3 = vmpackc.low %vm4302_vm10, %vm4301_vm7  ;;  %v22041_v50 = vmov 0 }
 0x769   : > { %v22042_v50 = vsel %vm19796_vm3, 4294967295, %v22041_v50  ;;  %vm4285_vm0 = vcmp.eq.s32.totalorder %v4247_v23, %v19407_v49  ;;  %vm4286_vm15 = vcmp.eq.s32.totalorder %v4248_v10, %v19407_v49  ;;  %v19806_v57 = vsub.f32 %v4333_v25, %v4333_v25  ;;  %16912 = vmatprep.subr.msk.bf16.mxu1 %vm19796_vm3, %v22033_v14 }
 0x76a   : > { %22043 = vst [vmem:[#allocation41_spill] sm:$0xff] %v22042_v50  ;;  %4218 = vrot.lane.b32.xlu1 %v19790_v32, %s21923_s2  ;;  %4216 = vrot.lane.b32.xlu0 %v19786_v15, %s21923_s2  ;;  %v19808_v58 = vsub.f32 %v4334_v6, %v4334_v6  ;;  %v4317_v41 = vsel %vm4285_vm0, 1.0, %v21953_v1  ;;  %v4318_v34 = vsel %vm4286_vm15, 1.0, %v21953_v1  ;;  %vm19812_vm7 = vmpackc.low %vm4286_vm15, %vm4285_vm0  ;;  %v4265_v25 = vadd.s32 240, %v19405_v48  ;;  %s18174_s2 = smov 73  }
 0x76b   : > { %v22045_v3 = vsel %vm19812_vm7, 4294967295, %v22044_v3  ;;  %v19819_v51 = vsub.f32 %v4317_v41, %v4317_v41  ;;  %v19821_v10 = vsub.f32 %v4318_v34, %v4318_v34  ;;  %v4266_v23 = vadd.s32 248, %v19405_v48  ;;  %16914 = vmatpush3.bf16.msk.msra.mxu1 %vm19812_vm7, %v22033_v14 }
 0x76c   : > { %22046 = vst [vmem:[#allocation42_spill] sm:$0xff] %v22045_v3  ;;  %v4249_v8 = vadd.s32 112, %v19405_v48  ;;  %v4250_v61 = vadd.s32 120, %v19405_v48  ;;  %v21768_v6 = vand.u32 4294901760, %v19642_v2  ;;  %vm4303_vm10 = vcmp.eq.s32.totalorder %v4265_v25, %v19407_v49 }
 0x76d   : > { %vm4304_vm0 = vcmp.eq.s32.totalorder %v4266_v23, %v19407_v49  ;;  %v4335_v5 = vsel %vm4303_vm10, 1.0, %v21953_v1  ;;  %v21816_v12 = vand.u32 4294901760, %v19808_v58 }
 0x76e   : > { %v4336_v4 = vsel %vm4304_vm0, 1.0, %v21953_v1  ;;  %vm19838_vm15 = vmpackc.low %vm4304_vm0, %vm4303_vm10  ;;  %vm4287_vm7 = vcmp.eq.s32.totalorder %v4249_v8, %v19407_v49  ;;  %vm4288_vm3 = vcmp.eq.s32.totalorder %v4250_v61, %v19407_v49  ;;  %v19847_v25 = vsub.f32 %v4335_v5, %v4335_v5 }
 0x76f   : > { %v22048_v20 = vsel %vm19838_vm15, 4294967295, %v22047_v20  ;;  %16916 = vmatprep.subr.msk.bf16.mxu1 %vm19838_vm15, %v22033_v14  ;;  %v19849_v23 = vsub.f32 %v4336_v4, %v4336_v4  ;;  %v4319_v34 = vsel %vm4287_vm7, 1.0, %v21953_v1  ;;  %v4320_v41 = vsel %vm4288_vm3, 1.0, %v21953_v1  ;;  %vm19853_vm10 = vmpackc.low %vm4288_vm3, %vm4287_vm7 }
 0x770   : > { %22049 = vst [vmem:[#allocation43_spill] sm:$0xff] %v22048_v20  ;;  %v22051_v63 = vsel %vm19853_vm10, 4294967295, %v22050_v63  ;;  %16918 = vmatpush3.bf16.msk.msra.mxu1 %vm19853_vm10, %v22033_v14  ;;  %v19860_v49 = vsub.f32 %v4319_v34, %v4319_v34  ;;  %v19862_v8 = vsub.f32 %v4320_v41, %v4320_v41  ;;  %v4531_v4 = vsub.f32 %v19642_v2, %v21768_v6 }
 0x771   : > { %22052 = vst [vmem:[#allocation44_spill] sm:$0xff] %v22051_v63  ;;  %v22054_v5 = vand.u32 4294901760, %v19644_v17  ;;  %v22055_v1 = vand.u32 4294901760, %v19654_v24  ;;  %v21779_v34 = vand.u32 4294901760, %v19664_v21  ;;  %v21782_v41 = vand.u32 4294901760, %v19666_v55 }
 0x772   : > { %22053 = vst [vmem:[#allocation45_spill] sm:$0xff] %v19860_v49  ;;  %v4532_v56 = vand.u32 4294901760, %v4531_v4  ;;  %v21783_v6 = vand.u32 4294901760, %v19676_v16  ;;  %v21787_v20 = vand.u32 4294901760, %v19678_v47  ;;  %vm22058_vm3 = vcmask 916480  }
 0x773   : > { %v4537_v61 = vsub.f32 %v19644_v17, %v22054_v5  ;;  %v4435_v48 = vsub.f32 %v19654_v24, %v22055_v1  ;;  %v4442_v5 = vand.u32 4294901760, %v4441_v29  ;;  %v4543_v1 = vsub.f32 %v19664_v21, %v21779_v34  ;;  %vm22059_vm7 = vmmov %vm22058_vm3 }
 0x774   : > { %v4549_v27 = vsub.f32 %v19666_v55, %v21782_v41  ;;  %v4447_v4 = vsub.f32 %v19676_v16, %v21783_v6  ;;  %v21785_v34 = vand.u32 4294901760, %v19688_v39  ;;  %vm22060_vm0 = vmmov %vm22058_vm3 }
 0x775   : > { %v4538_v63 = vand.u32 4294901760, %v4537_v61  ;;  %v4436_v3 = vand.u32 4294901760, %v4435_v48  ;;  %v4453_v61 = vsub.f32 %v19678_v47, %v21787_v20  ;;  %v21784_v48 = vand.u32 4294901760, %v19686_v53  ;;  %vm22061_vm10 = vmmov %vm22060_vm0 }
 0x776   : > { %v4544_v19 = vand.u32 4294901760, %v4543_v1  ;;  %v4550_v11 = vand.u32 4294901760, %v4549_v27  ;;  %v4448_v42 = vand.u32 4294901760, %v4447_v4  ;;  %v21791_v1 = vand.u32 4294901760, %v19708_v33 }
 0x777   : > { %v16919_v50 = vpack.c.bf16 %v4538_v63, %v4532_v56  ;;  %v19893_v29 = vpack.c.bf16 %v4442_v5, %v4436_v3  ;;  %v4454_v41 = vand.u32 4294901760, %v4453_v61  ;;  %v4555_v56 = vsub.f32 %v19686_v53, %v21784_v48 }
 0x778   : > { %v21786_v63 = vand.u32 4294901760, %v19698_v18  ;;  %v19900_v6 = vpack.c.bf16 %v4550_v11, %v4544_v19  ;;  %v4561_v3 = vsub.f32 %v19688_v39, %v21785_v34  ;;  %v21790_v5 = vand.u32 4294901760, %v19700_v9 }
 0x779   : > { %16920 = vmatprep.subr.bf16.mxu1 %v16919_v50  ;;  %v19907_v27 = vpack.c.bf16 %v4454_v41, %v4448_v42  ;;  %v4556_v50 = vand.u32 4294901760, %v4555_v56  ;;  %v21792_v61 = vand.u32 4294901760, %v19710_v36  ;;  %v4567_v19 = vsub.f32 %v19708_v33, %v21791_v1 }
 0x77a   : > { %v4459_v4 = vsub.f32 %v19698_v18, %v21786_v63  ;;  %v4562_v48 = vand.u32 4294901760, %v4561_v3  ;;  %v4465_v11 = vsub.f32 %v19700_v9, %v21790_v5  ;;  %v21797_v34 = vand.u32 4294901760, %v19718_v44 }
 0x77b   : > { %v4573_v41 = vsub.f32 %v19710_v36, %v21792_v61  ;;  %v21798_v56 = vand.u32 4294901760, %v19720_v43  ;;  %v21799_v63 = vand.u32 4294901760, %v19724_v0  ;;  %v4568_v30 = vand.u32 4294901760, %v4567_v19 }
 0x77c   : > { %v4460_v42 = vand.u32 4294901760, %v4459_v4  ;;  %v19925_v3 = vpack.c.bf16 %v4562_v48, %v4556_v50  ;;  %v4466_v20 = vand.u32 4294901760, %v4465_v11  ;;  %v4471_v5 = vsub.f32 %v19718_v44, %v21797_v34 }
 0x77d   : > { %v4574_v1 = vand.u32 4294901760, %v4573_v41  ;;  %v4477_v4 = vsub.f32 %v19720_v43, %v21798_v56  ;;  %v4579_v61 = vsub.f32 %v19724_v0, %v21799_v63  ;;  %v21803_v50 = vand.u32 4294901760, %v19730_v40 }
 0x77e   : > { %v19937_v35 = vpack.c.bf16 %v4466_v20, %v4460_v42  ;;  %v4472_v48 = vand.u32 4294901760, %v4471_v5  ;;  %v21804_v11 = vand.u32 4294901760, %v19732_v31  ;;  %v4585_v56 = vsub.f32 %v19726_v7, %v21800_v62 }
 0x77f   : > { %v19941_v19 = vpack.c.bf16 %v4574_v1, %v4568_v30  ;;  %v4478_v41 = vand.u32 4294901760, %v4477_v4  ;;  %v4580_v34 = vand.u32 4294901760, %v4579_v61  ;;  %v4483_v63 = vsub.f32 %v19730_v40, %v21803_v50 }
 0x780   : > { %v4489_v20 = vsub.f32 %v19732_v31, %v21804_v11  ;;  %v21807_v5 = vand.u32 4294901760, %v19761_v59  ;;  %v21812_v42 = vand.u32 4294901760, %v19763_v45  ;;  %v4586_v1 = vand.u32 4294901760, %v4585_v56 }
 0x781   : > { %v19954_v30 = vpack.c.bf16 %v4478_v41, %v4472_v48  ;;  %v21813_v61 = vand.u32 4294901760, %v19774_v22  ;;  %v21814_v4 = vand.u32 4294901760, %v19776_v46  ;;  %v4484_v62 = vand.u32 4294901760, %v4483_v63 }
 0x782   : > { %v4490_v52 = vand.u32 4294901760, %v4489_v20  ;;  %v4591_v50 = vsub.f32 %v19761_v59, %v21807_v5  ;;  %v4597_v11 = vsub.f32 %v19763_v45, %v21812_v42  ;;  %v19964_v38 = vpack.c.bf16 %v4586_v1, %v4580_v34 }
 0x783   : > { %v4495_v56 = vsub.f32 %v19774_v22, %v21813_v61  ;;  %v4501_v48 = vsub.f32 %v19776_v46, %v21814_v4  ;;  %v21815_v63 = vand.u32 4294901760, %v19806_v57  ;;  %v21817_v1 = vand.u32 4294901760, %v19819_v51 }
 0x784   : > { %v19973_v41 = vpack.c.bf16 %v4490_v52, %v4484_v62  ;;  %v4592_v20 = vand.u32 4294901760, %v4591_v50  ;;  %v4598_v5 = vand.u32 4294901760, %v4597_v11  ;;  %v4609_v4 = vsub.f32 %v19808_v58, %v21816_v12 }
 0x785   : > { %v4496_v60 = vand.u32 4294901760, %v4495_v56  ;;  %v4502_v42 = vand.u32 4294901760, %v4501_v48  ;;  %v4603_v34 = vsub.f32 %v19806_v57, %v21815_v63  ;;  %v21820_v52 = vand.u32 4294901760, %v19821_v10 }
 0x786   : > { %v19980_v61 = vpack.c.bf16 %v4598_v5, %v4592_v20  ;;  %v21821_v62 = vand.u32 4294901760, %v19847_v25  ;;  %v4507_v56 = vsub.f32 %v19819_v51, %v21817_v1  ;;  %v21824_v48 = vand.u32 4294901760, %v19849_v23 }
 0x787   : > { %v19987_v50 = vpack.c.bf16 %v4502_v42, %v4496_v60  ;;  %v4604_v11 = vand.u32 4294901760, %v4603_v34  ;;  %v4610_v63 = vand.u32 4294901760, %v4609_v4  ;;  %v4513_v5 = vsub.f32 %v19821_v10, %v21820_v52 }
 0x788   : > { %v4615_v20 = vsub.f32 %v19847_v25, %v21821_v62  ;;  %v21827_v12 = vand.u32 4294901760, %v19860_v49  ;;  %v4508_v60 = vand.u32 4294901760, %v4507_v56  ;;  %v4621_v42 = vsub.f32 %v19849_v23, %v21824_v48 }
 0x789   : > { %22057 = vst [vmem:[#allocation46_spill] sm:$0xff] %v19987_v50  ;;  %v21826_v34 = vand.u32 4294901760, %v19862_v8  ;;  %v20006_v1 = vpack.c.bf16 %v4610_v63, %v4604_v11  ;;  %v4514_v26 = vand.u32 4294901760, %v4513_v5 }
 0x78a   : > { %v4616_v52 = vand.u32 4294901760, %v4615_v20  ;;  %v4519_v62 = vsub.f32 %v19860_v49, %v21827_v12  ;;  %v4622_v13 = vand.u32 4294901760, %v4621_v42 }
 0x78b   : > { %v4525_v56 = vsub.f32 %v19862_v8, %v21826_v34  ;;  %v20016_v14 = vpack.c.bf16 %v4514_v26, %v4508_v60 }
 0x78c   : > { %v4520_v50 = vand.u32 4294901760, %v4519_v62  ;;  %v20022_v5 = vpack.c.bf16 %v4622_v13, %v4616_v52 }
 0x78d   : > { %v4526_v20 = vand.u32 4294901760, %v4525_v56 }
 0x78f   : > { %v16949_v12 = vpack.c.bf16 %v4526_v20, %v4520_v50 }
 0x7d8   : > { %v4213_v26 = vpop.permute.xlu0 %4212  ;;  %v4215_v13 = vpop.permute.xlu1 %4214 }
 0x7d9   : > { %v4220_v34 = vsel %vm22058_vm3, %v4213_v26, %v4215_v13  ;;  %v4228_v52 = vsel %vm22059_vm7, %v4215_v13, %v4213_v26 }
 0x7da   : > { %v4230_v56 = vmax.f32 %v19746_v54, %v4220_v34  ;;  %v4231_v42 = vmax.f32 %v19750_v28, %v4228_v52 }
 0x7dc   : > { %v20052_v50 = vand.u32 4294901760, %v4231_v42  ;;  %v20054_v11 = vand.u32 4294901760, %v4230_v56  ;;  %v4217_v20 = vpop.permute.xlu0 %4216  ;;  %v4219_v63 = vpop.permute.xlu1 %4218 }
 0x7dd   : > { %v4221_v62 = vsel %vm22060_vm0, %v4217_v20, %v4219_v63  ;;  %v4229_v60 = vsel %vm22061_vm10, %v4219_v63, %v4217_v20 }
 0x7de   : > { %v20059_v48 = vsub.f32 %v4231_v42, %v20052_v50  ;;  %v20062_v4 = vsub.f32 %v4230_v56, %v20054_v11  ;;  %v4232_v54 = vmax.f32 %v19786_v15, %v4221_v62  ;;  %v4233_v28 = vmax.f32 %v19790_v32, %v4229_v60 }
 0x7e0   : > { %v21832_v34 = vand.u32 4294901760, %v20062_v4  ;;  %v20067_v26 = vand.u32 4294901760, %v4233_v28  ;;  %v20069_v13 = vand.u32 4294901760, %v4232_v54  ;;  %v4403_v52 = vand.u32 4294901760, %v20059_v48 }
 0x7e2   : > { %v4410_v63 = vsub.f32 %v20062_v4, %v21832_v34  ;;  %v20076_v42 = vsub.f32 %v4233_v28, %v20067_v26  ;;  %v20079_v56 = vsub.f32 %v4232_v54, %v20069_v13  ;;  %v4404_v15 = vsub.f32 %v20059_v48, %v4403_v52 }
 0x7e4   : > { %v4411_v32 = vand.u32 4294901760, %v4410_v63  ;;  %v4405_v62 = vand.u32 4294901760, %v4404_v15  ;;  %v21834_v60 = vand.u32 4294901760, %v20076_v42  ;;  %v21833_v20 = vand.u32 4294901760, %v20079_v56 }
 0x7e5   : > { %v22080_v15 = vmov 1.0|1.0  }
 0x7e6   : > { %4406 = vmatprep.mubr.f32.mxu1 %v4405_v62  ;;  %v4419_v49 = vsub.f32 %v20076_v42, %v21834_v60  ;;  %v4425_v28 = vsub.f32 %v20079_v56, %v21833_v20  ;;  %v22105_v20 = vand.u32 4294901760, %v19664_v21  ;;  %v22106_v60 = vand.u32 4294901760, %v19666_v55 }
 0x7e7   : > { %4412 = vmatmul.mubr.f32.vlgmr.msra.gmra.mrb[18].mxu1 %v4411_v32 }
 0x7e8   : > { %16922 = vmatpush3.bf16.msra.mxu1 %v19893_v29  ;;  %v4420_v54 = vand.u32 4294901760, %v4419_v49  ;;  %v4426_v34 = vand.u32 4294901760, %v4425_v28  ;;  %v22065_v49 = vpack.c.bf16 %v19666_v55, %v19664_v21  ;;  %v22068_v29 = vpack.c.bf16 %v19700_v9, %v19698_v18 }
 0x7e9   : > { %16924 = vmatprep.subr.bf16.mxu1 %v19900_v6  ;;  %v22062_v6 = vld [vmem:[#allocation46_spill] sm:$0xff]  ;;  %v22112_v21 = vand.u32 4294901760, %v19688_v39  ;;  %v22113_v55 = vand.u32 4294901760, %v20079_v56 }
 0x7ea   : > { %4421 = vmatprep.mubr.f32.mxu1 %v4420_v54 }
 0x7eb   : > { %4427 = vmatmul.mubr.f32.gmra.mrb[20].mxu1 %v4426_v34  ;;  %v22078_v34 = vld [vmem:[#allocation45_spill] sm:$0xff] }
 0x7ec   : > { %16926 = vmatpush3.bf16.msra.mxu1 %v19907_v27  ;;  %4625 = vmatprep.mubr.f32.mxu1 %v20052_v50  ;;  %v22069_v27 = vpack.c.bf16 %v19710_v36, %v19708_v33  ;;  %v22079_v63 = vpack.c.bf16 %v19862_v8, %v22078_v34 }
 0x7ed   : > { %16928 = vmatprep.subr.bf16.mxu1 %v19925_v3  ;;  %v22070_v3 = vpack.c.bf16 %v19720_v43, %v19718_v44 }
 0x7f0   : > { %16930 = vmatpush3.bf16.msra.mxu1 %v19937_v35  ;;  %v22063_v35 = vpack.c.bf16 %v19644_v17, %v19642_v2 }
 0x7f1   : > { %16932 = vmatprep.subr.bf16.mxu1 %v19941_v19  ;;  %v22071_v19 = vpack.c.bf16 %v19726_v7, %v19724_v0 }
 0x7f4   : > { %16934 = vmatpush3.bf16.msra.mxu1 %v19954_v30  ;;  %v22072_v30 = vpack.c.bf16 %v19732_v31, %v19730_v40 }
 0x7f5   : > { %16936 = vmatprep.subr.bf16.mxu1 %v19964_v38  ;;  %v22064_v38 = vpack.c.bf16 %v19656_v37, %v19654_v24 }
 0x7f8   : > { %16938 = vmatpush3.bf16.msra.mxu1 %v19973_v41  ;;  %v22074_v41 = vpack.c.bf16 %v19776_v46, %v19774_v22 }
 0x7f9   : > { %16940 = vmatprep.subr.bf16.mxu1 %v19980_v61  ;;  %v22073_v61 = vpack.c.bf16 %v19763_v45, %v19761_v59 }
 0x7fc   : > { %16942 = vmatpush3.bf16.msra.mxu1 %v22062_v6 }
 0x7fd   : > { %16944 = vmatprep.subr.bf16.mxu1 %v20006_v1  ;;  %v22075_v1 = vpack.c.bf16 %v19808_v58, %v19806_v57 }
 0x800   : > { %16946 = vmatpush3.bf16.msra.mxu1 %v20016_v14  ;;  %v22067_v14 = vpack.c.bf16 %v19688_v39, %v19686_v53  ;;  %v22118_v39 = vand.u32 4294901760, %v19718_v44  ;;  %v22125_v44 = vand.u32 4294901760, %v19763_v45  ;;  %v22132_v45 = vand.u32 4294901760, %v19847_v25 }
 0x801   : > { %16948 = vmatprep.subr.bf16.mxu1 %v20022_v5  ;;  %v22077_v5 = vpack.c.bf16 %v19849_v23, %v19847_v25 }
 0x804   : > { %16950 = vmatpush3.bf16.msra.mxu1 %v16949_v12  ;;  %v22066_v12 = vpack.c.bf16 %v19678_v47, %v19676_v16 }
 0x805   : > { %16952 = vmatprep.subr.bf16.mxu1 %v22063_v35 }
 0x807   : > { %4627 = vmatmul.mubr.f32.vlgmr.msra.gmra.mrb[22].mxu1 %v20054_v11 }
 0x808   : > { %4632 = vmatprep.mubr.f32.mxu1 %v20067_v26  ;;  %16954 = vmatpush3.bf16.msra.mxu1 %v22064_v38 }
 0x809   : > { %16956 = vmatprep.subr.bf16.mxu1 %v22065_v49 }
 0x80b   : > { %4634 = vmatmul.mubr.f32.gmra.mrb[24].mxu1 %v20069_v13 }
 0x80c   : > { %16958 = vmatpush3.bf16.msra.mxu1 %v22066_v12  ;;  %4737 = vmatprep.mubr.f32.mxu1 %v20059_v48  ;;  %v22076_v48 = vpack.c.bf16 %v19821_v10, %v19819_v51 }
 0x80d   : > { %16960 = vmatprep.subr.bf16.mxu1 %v22067_v14 }
 0x810   : > { %16962 = vmatpush3.bf16.msra.mxu1 %v22068_v29 }
 0x811   : > { %16964 = vmatprep.subr.bf16.mxu1 %v22069_v27  ;;  %v22094_v27 = vld [vmem:[#allocation41_spill] sm:$0xff] }
 0x812   : > { %vm22095_vm3 = vnez %v22094_v27 }
 0x814   : > { %16966 = vmatpush3.bf16.msra.mxu1 %v22070_v3  ;;  %v22096_v3 = vld [vmem:[#allocation42_spill] sm:$0xff] }
 0x815   : > { %16968 = vmatprep.subr.bf16.mxu1 %v22071_v19  ;;  %vm22097_vm7 = vnez %v22096_v3  ;;  %v17019_v19 = vpack.c.bf16 %v22106_v60, %v22105_v20  ;;  %v22117_v60 = vand.u32 4294901760, %v19710_v36  ;;  %v22124_v36 = vand.u32 4294901760, %v19761_v59 }
 0x816   : > { %v22131_v59 = vand.u32 4294901760, %v19821_v10 }
 0x818   : > { %16970 = vmatpush3.bf16.msra.mxu1 %v22072_v30  ;;  %v22099_v30 = vand.u32 4294901760, %v19642_v2  ;;  %v22107_v2 = vand.u32 4294901760, %v20062_v4 }
 0x819   : > { %16972 = vmatprep.subr.bf16.mxu1 %v22073_v61  ;;  %v22100_v61 = vand.u32 4294901760, %v19644_v17  ;;  %v22108_v17 = vand.u32 4294901760, %v20076_v42 }
 0x81c   : > { %16974 = vmatpush3.bf16.msra.mxu1 %v22074_v41  ;;  %v17015_v41 = vpack.c.bf16 %v22100_v61, %v22099_v30  ;;  %v22109_v30 = vand.u32 4294901760, %v19676_v16 }
 0x81d   : > { %16976 = vmatprep.subr.bf16.mxu1 %v22075_v1  ;;  %v22101_v1 = vld [vmem:[#allocation44_spill] sm:$0xff] }
 0x81e   : > { %vm22102_vm0 = vnez %v22101_v1 }
 0x820   : > { %16978 = vmatpush3.bf16.msra.mxu1 %v22076_v48  ;;  %v22103_v48 = vand.u32 4294901760, %v19654_v24  ;;  %v22110_v24 = vand.u32 4294901760, %v19678_v47  ;;  %v22116_v47 = vand.u32 4294901760, %v19708_v33  ;;  %v22123_v33 = vand.u32 4294901760, %v19732_v31 }
 0x821   : > { %16980 = vmatprep.subr.bf16.mxu1 %v22077_v5  ;;  %v22104_v5 = vand.u32 4294901760, %v19656_v37  ;;  %v22111_v37 = vand.u32 4294901760, %v19686_v53  ;;  %v22130_v31 = vand.u32 4294901760, %v19819_v51  ;;  %v22137_v51 = vmov 0.0|0.0  }
 0x822   : > { %v17021_v61 = vpack.c.bf16 %v22110_v24, %v22109_v30  ;;  %v17027_v53 = vpack.c.bf16 %v22117_v60, %v22116_v47 }
 0x823   : > { %v17041_v30 = vpack.c.bf16 %v22131_v59, %v22130_v31 }
 0x824   : > { %16982 = vmatpush3.bf16.msra.mxu1 %v22079_v63  ;;  %v17017_v63 = vpack.c.bf16 %v22104_v5, %v22103_v48 }
 0x825   : > { %16984 = vmatprep.subr.msk.bf16.mxu1 %vm19433_vm9, %v22080_v15 }
 0x827   : > { %4740 = vmatmul.mubr.f32.vlgmr.msra.gmra.mrb[26].mxu1 %v20062_v4  ;;  %v22114_v4 = vand.u32 4294901760, %v19698_v18  ;;  %v22121_v18 = vand.u32 4294901760, %v19726_v7  ;;  %v22128_v7 = vand.u32 4294901760, %v19806_v57  ;;  %v22135_v57 = vand.u32 4294901760, %v19862_v8 }
 0x828   : > { %4746 = vmatprep.mubr.f32.mxu1 %v20076_v42  ;;  %16986 = vmatpush3.bf16.msk.msra.mxu1 %vm19462_vm2, %v22080_v15  ;;  %v22115_v42 = vand.u32 4294901760, %v19700_v9  ;;  %v22122_v9 = vand.u32 4294901760, %v19730_v40  ;;  %v22129_v40 = vand.u32 4294901760, %v19808_v58  ;;  %v5078_v58 = vld [vmem:[%s21632_s11 + $0x8] sm:$0xff] }
 0x829   : > { %16988 = vmatprep.subr.msk.bf16.mxu1 %vm19487_vm11, %v22080_v15 }
 0x82a   : > { %v17025_v16 = vpack.c.bf16 %v22115_v42, %v22114_v4  ;;  %v17033_v5 = vpack.c.bf16 %v22123_v33, %v22122_v9 }
 0x82b   : > { %4749 = vmatmul.mubr.f32.gmra.mrb[28].mxu1 %v20079_v56  ;;  %v22119_v56 = vand.u32 4294901760, %v19720_v43  ;;  %v22126_v43 = vand.u32 4294901760, %v19774_v22  ;;  %v22133_v22 = vand.u32 4294901760, %v19849_v23 }
 0x82c   : > { %16990 = vmatpush3.bf16.msk.msra.mxu1 %vm19509_vm8, %v22080_v15  ;;  %4821 = vmatprep.mubr.f32.mxu1 %v4403_v52  ;;  %v22090_v52 = vld [vmem:[#allocation38_spill] sm:$0xff] }
 0x82d   : > { %16992 = vmatprep.subr.msk.bf16.mxu1 %vm19528_vm4, %v22080_v15  ;;  %vm22091_vm10 = vnez %v22090_v52  ;;  %v17029_v20 = vpack.c.bf16 %v22119_v56, %v22118_v39  ;;  %v17043_v24 = vpack.c.bf16 %v22133_v22, %v22132_v45 }
 0x830   : > { %16994 = vmatpush3.bf16.msk.msra.mxu1 %vm19547_vm14, %v22080_v15 }
 0x831   : > { %16996 = vmatprep.subr.msk.bf16.mxu1 %vm19566_vm5, %v22080_v15 }
 0x834   : > { %16998 = vmatpush3.bf16.msk.msra.mxu1 %vm19585_vm12, %v22080_v15 }
 0x835   : > { %17000 = vmatprep.subr.msk.bf16.mxu1 %vm19600_vm6, %v22080_v15 }
 0x838   : > { %17002 = vmatpush3.bf16.msk.msra.mxu1 %vm22091_vm10, %v22080_v15 }
 0x839   : > { %17004 = vmatprep.subr.msk.bf16.mxu1 %vm19738_vm1, %v22080_v15 }
 0x83c   : > { %17006 = vmatpush3.bf16.msk.msra.mxu1 %vm19757_vm13, %v22080_v15 }
 0x83d   : > { %17008 = vmatprep.subr.msk.bf16.mxu1 %vm22095_vm3, %v22080_v15 }
 0x840   : > { %17010 = vmatpush3.bf16.msk.msra.mxu1 %vm22097_vm7, %v22080_v15 }
 0x841   : > { %17012 = vmatprep.subr.msk.bf16.mxu1 %vm19838_vm15, %v22080_v15 }
 0x844   : > { %17014 = vmatpush3.bf16.msk.msra.mxu1 %vm22102_vm0, %v22080_v15 }
 0x845   : > { %17016 = vmatprep.subr.bf16.mxu1 %v17015_v41  ;;  %v17023_v41 = vpack.c.bf16 %v22112_v21, %v22111_v37 }
 0x847   : > { %4825 = vmatmul.mubr.f32.vlgmr.msra.gmra.mrb[30].mxu1 %v22107_v2 }
 0x848   : > { %4832 = vmatprep.mubr.f32.mxu1 %v22108_v17  ;;  %17018 = vmatpush3.bf16.msra.mxu1 %v17017_v63  ;;  %v17035_v63 = vpack.c.bf16 %v22125_v44, %v22124_v36  ;;  %v17039_v17 = vpack.c.bf16 %v22129_v40, %v22128_v7 }
 0x849   : > { %17020 = vmatprep.subr.bf16.mxu1 %v17019_v19  ;;  %v22120_v19 = vand.u32 4294901760, %v19724_v0  ;;  %v22127_v0 = vand.u32 4294901760, %v19776_v46  ;;  %v22134_v46 = vand.u32 4294901760, %v22078_v34 }
 0x84b   : > { %4836 = vmatmul.mubr.f32.gmra.mrb[32].mxu1 %v22113_v55  ;;  %v17031_v48 = vpack.c.bf16 %v22121_v18, %v22120_v19  ;;  %v17037_v2 = vpack.c.bf16 %v22127_v0, %v22126_v43 }
 0x84c   : > { %17022 = vmatpush3.bf16.msra.mxu1 %v17021_v61  ;;  %4970 = vmatprep.mubr.f32.mxu1 %v20052_v50  ;;  %v17045_v61 = vpack.c.bf16 %v22135_v57, %v22134_v46 }
 0x84d   : > { %17024 = vmatprep.subr.bf16.mxu1 %v17023_v41 }
 0x850   : > { %17026 = vmatpush3.bf16.msra.mxu1 %v17025_v16 }
 0x851   : > { %17028 = vmatprep.subr.bf16.mxu1 %v17027_v53 }
 0x854   : > { %17030 = vmatpush3.bf16.msra.mxu1 %v17029_v20 }
 0x855   : > { %17032 = vmatprep.subr.bf16.mxu1 %v17031_v48 }
 0x858   : > { %17034 = vmatpush3.bf16.msra.mxu1 %v17033_v5 }
 0x859   : > { %17036 = vmatprep.subr.bf16.mxu1 %v17035_v63 }
 0x85c   : > { %17038 = vmatpush3.bf16.msra.mxu1 %v17037_v2 }
 0x85d   : > { %17040 = vmatprep.subr.bf16.mxu1 %v17039_v17 }
 0x860   : > { %17042 = vmatpush3.bf16.msra.mxu1 %v17041_v30 }
 0x861   : > { %17044 = vmatprep.subr.bf16.mxu1 %v17043_v24 }
 0x864   : > { %17046 = vmatpush3.bf16.msra.mxu1 %v17045_v61  ;;  %v14862_v61 = vld [vmem:[%s21633_s12 + $0x10] sm:$0xff] }
 0x865   : > { %17048 = vmatprep.subr.msk.bf16.mxu1 %vm19433_vm9, %v22080_v15  ;;  %vm22140_vm9 = vcmask 130048  }
 0x867   : > { %4972 = vmatmul.mubr.f32.vlgmr.msra.gmra.mrb[34].mxu1 %v20054_v11 }
 0x868   : > { %4977 = vmatprep.mubr.f32.mxu1 %v20067_v26  ;;  %17050 = vmatpush3.bf16.msk.msra.mxu1 %vm19462_vm2, %v22080_v15 }
 0x869   : > { %17052 = vmatprep.subr.msk.bf16.mxu1 %vm19487_vm11, %v22080_v15 }
 0x86b   : > { %4979 = vmatmul.mubr.f32.gmra.mrb[36].mxu1 %v20069_v13 }
 0x86c   : > { %17054 = vmatpush3.bf16.msk.msra.mxu1 %vm19509_vm8, %v22080_v15  ;;  %5049 = vmatprep.mubr.f32.mxu1 %v20052_v50 }
 0x86d   : > { %17056 = vmatprep.subr.msk.bf16.mxu1 %vm19528_vm4, %v22080_v15 }
 0x870   : > { %17058 = vmatpush3.bf16.msk.msra.mxu1 %vm19547_vm14, %v22080_v15  ;;  %vm22147_vm14 = vcmask 64512  }
 0x871   : > { %17060 = vmatprep.subr.msk.bf16.mxu1 %vm19566_vm5, %v22080_v15  ;;  %vm5095_vm5 = vcmask 72704  }
 0x874   : > { %17062 = vmatpush3.bf16.msk.msra.mxu1 %vm19585_vm12, %v22080_v15 }
 0x875   : > { %17064 = vmatprep.subr.msk.bf16.mxu1 %vm19600_vm6, %v22080_v15 }
 0x878   : > { %17066 = vmatpush3.bf16.msk.msra.mxu1 %vm22091_vm10, %v22080_v15  ;;  %vm22151_vm10 = vcmask 7168  }
 0x879   : > { %17068 = vmatprep.subr.msk.bf16.mxu1 %vm19738_vm1, %v22080_v15  ;;  %vm22148_vm1 = vmmov %vm22147_vm14 }
 0x87c   : > { %17070 = vmatpush3.bf16.msk.msra.mxu1 %vm19757_vm13, %v22080_v15  ;;  %vm5141_vm13 = vcmask 56320  }
 0x87d   : > { %17072 = vmatprep.subr.msk.bf16.mxu1 %vm22095_vm3, %v22080_v15  ;;  %vm22152_vm3 = vmmov %vm22151_vm10 }
 0x880   : > { %17074 = vmatpush3.bf16.msk.msra.mxu1 %vm22097_vm7, %v22080_v15  ;;  %vm5183_vm7 = vcmask 515072  }
 0x881   : > { %17076 = vmatprep.subr.msk.bf16.mxu1 %vm19838_vm15, %v22080_v15 }
 0x884   : > { %17078 = vmatpush3.bf16.msk.msra.mxu1 %vm22102_vm0, %v22080_v15 }
 0x885   : > { %17079 = vmatprep.subr.bf16.mxu1 %v22137_v51 }
 0x887   : > { %5051 = vmatmul.mubr.f32.vlgmr.msra.gmra.mrb[38].mxu1 %v20054_v11 }
 0x888   : > { %5056 = vmatprep.mubr.f32.mxu1 %v20067_v26 }
 0x88b   : > { %5058 = vmatmul.mubr.f32.gmra.mrb[40].mxu1 %v20069_v13 }
 0x8ba   : > { %v15041_v10 = vpop.f32.mrb[18].mxu1 }
 0x8bb   : > { %v15042_v25 = vpop.f32.mrb[19].mxu1 }
 0x8bc   : > { %v15043_v23 = vadd.f32 %v15042_v25, %v15041_v10  ;;  %v22138_v10 = vld [vmem:[#allocation17_spill] sm:$0xff] }
 0x8bd   : > { %v22139_v25 = vmax.f32 %v22138_v10, 0.0 }
 0x8be   : > { %v15044_v8 = vpop.f32.mrb[20].mxu1 }
 0x8bf   : > { %v15045_v50 = vpop.f32.mrb[21].mxu1 }
 0x8c0   : > { %v15046_v34 = vadd.f32 %v15045_v50, %v15044_v8  ;;  %v5254_v8 = vsel %vm22140_vm9, %v5078_v58, 0  ;;  %v5068_v50 = vld [vmem:[%s21633_s12] sm:$0xff] }
 0x8da   : > { %v15079_v32 = vpop.f32.mrb[22].mxu1 }
 0x8db   : > { %v15080_v62 = vpop.f32.mrb[23].mxu1 }
 0x8dc   : > { %v15081_v28 = vadd.f32 %v15080_v62, %v15079_v32  ;;  %v20413_v32 = vand.u32 4294901760, %v5254_v8 }
 0x8de   : > { %v4629_v54 = vadd.f32 %v15081_v28, %v15043_v23  ;;  %v15082_v6 = vpop.f32.mrb[24].mxu1  ;;  %v5066_v23 = vmul.f32 %v14862_v61, %v22139_v25  ;;  %v20418_v62 = vsub.f32 %v5254_v8, %v20413_v32 }
 0x8df   : > { %v15083_v35 = vpop.f32.mrb[25].mxu1 }
 0x8e0   : > { %v15084_v38 = vadd.f32 %v15083_v35, %v15082_v6  ;;  %v5070_v28 = vmul.f32 %v5068_v50, %v5066_v23 }
 0x8e2   : > { %v4636_v49 = vadd.f32 %v15084_v38, %v15046_v34  ;;  %v14863_v34 = vld [vmem:[%s21633_s12 + $0x18] sm:$0xff]  ;;  %v5069_v38 = vld [vmem:[%s21633_s12 + $0x8] sm:$0xff] }
 0x8fa   : > { %v15117_v12 = vpop.f32.mrb[26].mxu1 }
 0x8fb   : > { %v15118_v11 = vpop.f32.mrb[27].mxu1 }
 0x8fc   : > { %v15119_v52 = vadd.f32 %v15118_v11, %v15117_v12  ;;  %v21835_v12 = vand.u32 4294901760, %v20418_v62 }
 0x8fe   : > { %v4742_v26 = vadd.f32 %v15119_v52, %v4629_v54  ;;  %v15120_v14 = vpop.f32.mrb[28].mxu1  ;;  %v22141_v54 = vld [vmem:[#allocation18_spill] sm:$0xff]  ;;  %v5344_v11 = vsub.f32 %v20418_v62, %v21835_v12 }
 0x8ff   : > { %v15121_v13 = vpop.f32.mrb[29].mxu1  ;;  %v22142_v6 = vmax.f32 %v22141_v54, 0.0 }
 0x900   : > { %v15122_v29 = vadd.f32 %v15121_v13, %v15120_v14  ;;  %v14865_v14 = vld [vmem:[%s21633_s12 + $0x28] sm:$0xff]  ;;  %v5345_v13 = vand.u32 4294901760, %v5344_v11 }
 0x901   : > { %v5067_v35 = vmul.f32 %v14863_v34, %v22142_v6 }
 0x902   : > { %v4751_v27 = vadd.f32 %v15122_v29, %v4636_v49  ;;  %v14864_v49 = vld [vmem:[%s21633_s12 + $0x20] sm:$0xff]  ;;  %5346 = vmatprep.mubr.f32.mxu1 %v5345_v13 }
 0x903   : > { %v5071_v52 = vmul.f32 %v5069_v38, %v5067_v35 }
 0x905   : > { %v5076_v29 = vadd.f32 %v14865_v14, %v5071_v52 }
 0x91a   : > { %v15155_v3 = vpop.f32.mrb[30].mxu1 }
 0x91b   : > { %v15156_v1 = vpop.f32.mrb[31].mxu1 }
 0x91c   : > { %v15157_v37 = vadd.f32 %v15156_v1, %v15155_v3  ;;  %v22144_v1 = vld [vmem:[#allocation20_spill] sm:$0xff] }
 0x91e   : > { %v4827_v21 = vadd.f32 %v15157_v37, %v4742_v26  ;;  %v15158_v41 = vpop.f32.mrb[32].mxu1  ;;  %v5075_v26 = vadd.f32 %v14864_v49, %v5070_v28  ;;  %v20438_v37 = vadd.s32 4294967295, %v22144_v1 }
 0x91f   : > { %v15159_v55 = vpop.f32.mrb[33].mxu1 }
 0x920   : > { %v15160_v4 = vadd.f32 %v15159_v55, %v15158_v41  ;;  %vm5099_vm11 = vcmp.ge.s32.totalorder %v20438_v37, 0 }
 0x922   : > { %v4838_v42 = vadd.f32 %v15160_v4, %v4751_v27  ;;  %v22143_v27 = vld [vmem:[#allocation19_spill] sm:$0xff] }
 0x923   : > { %v5102_v3 = vadd.s32 4294967295, %v22143_v27 }
 0x925   : > { %vm5103_vm2 = vcmp.ge.s32.totalorder %v5102_v3, 0  ;;  %vm5104_vm6 = vcmp.le.s32.totalorder %v5102_v3, 7 }
 0x926   : > { %vm20441_vm12 = vmand %vm5103_vm2, %vm5104_vm6  ;;  %vm5202_vm6 = vcmask 465920  }
 0x927   : > { %vm5106_vm8 = vmand %vm5099_vm11, %vm20441_vm12 }
 0x93a   : > { %v15193_v16 = vpop.f32.mrb[34].mxu1 }
 0x93b   : > { %v15194_v47 = vpop.f32.mrb[35].mxu1 }
 0x93c   : > { %v15195_v60 = vadd.f32 %v15194_v47, %v15193_v16 }
 0x93e   : > { %v4974_v53 = vadd.f32 %v15195_v60, %v4827_v21  ;;  %v15196_v39 = vpop.f32.mrb[36].mxu1 }
 0x93f   : > { %v15197_v56 = vpop.f32.mrb[37].mxu1 }
 0x940   : > { %v15198_v20 = vadd.f32 %v15197_v56, %v15196_v39 }
 0x942   : > { %v4981_v19 = vadd.f32 %v15198_v20, %v4838_v42 }
 0x95a   : > { %v15231_v18 = vpop.f32.mrb[38].mxu1 }
 0x95b   : > { %v15232_v48 = vpop.f32.mrb[39].mxu1 }
 0x95c   : > { %v15233_v9 = vadd.f32 %v15232_v48, %v15231_v18 }
 0x95e   : > { %v20335_v33 = vadd.f32 %v15233_v9, %v4974_v53  ;;  %v15234_v5 = vpop.f32.mrb[40].mxu1  ;;  %v20452_v9 = vadd.s32 1, %v22144_v1 }
 0x95f   : > { %v15235_v36 = vpop.f32.mrb[41].mxu1 }
 0x960   : > { %v15236_v44 = vadd.f32 %v15235_v36, %v15234_v5  ;;  %5083 = vrot.lane.b32.xlu0 %v20335_v33, %s18174_s2  ;;  %v5284_v63 = vand.u32 4294901760, %v20335_v33  ;;  %vm5146_vm4 = vcmp.le.s32.totalorder %v20452_v9, 7 }
 0x961   : > { %vm20481_vm15 = vmand %vm5146_vm4, %vm20441_vm12 }
 0x962   : > { %v20339_v43 = vadd.f32 %v15236_v44, %v4981_v19  ;;  %v20342_v0 = vsub.f32 %v20335_v33, %v5284_v63 }
 0x964   : > { %5089 = vrot.lane.b32.xlu0 %v20335_v33, %s18175_s4  ;;  %5085 = vrot.lane.b32.xlu1 %v20339_v43, %s18174_s2  ;;  %v5287_v2 = vand.u32 4294901760, %v20339_v43  ;;  %v5431_v7 = vand.u32 4294901760, %v20342_v0  ;;  %s18184_s2 = smov 120  }
 0x966   : > { %v20348_v40 = vpack.c.bf16 %v5287_v2, %v5284_v63  ;;  %v20351_v17 = vsub.f32 %v20339_v43, %v5287_v2  ;;  %v5432_v31 = vsub.f32 %v20342_v0, %v5431_v7 }
 0x968   : > { %5111 = vrot.lane.b32.xlu0 %v20335_v33, %s18176_s23  ;;  %5091 = vrot.lane.b32.xlu1 %v20339_v43, %s18175_s4  ;;  %v5438_v59 = vand.u32 4294901760, %v20351_v17  ;;  %v5433_v24 = vand.u32 4294901760, %v5432_v31  ;;  %s14920_s4 = sshll.u32 %s18310_s1, 4  ;;  %s18188_s1 = smov [#allocation2]  }
 0x96a   : > { %v5439_v45 = vsub.f32 %v20351_v17, %v5438_v59  ;;  %v20360_v22 = vpack.c.bf16 %v5438_v59, %v5431_v7 }
 0x96c   : > { %5117 = vrot.lane.b32.xlu0 %v20335_v33, %s18177_s5  ;;  %5113 = vrot.lane.b32.xlu1 %v20339_v43, %s18176_s23  ;;  %v5440_v46 = vand.u32 4294901760, %v5439_v45  ;;  %s18187_s23 = smov 55  }
 0x96e   : > { %v20364_v57 = vpack.c.bf16 %v5440_v46, %v5433_v24 }
 0x970   : > { %5129 = vrot.lane.b32.xlu0 %v20335_v33, %s18178_s7  ;;  %5119 = vrot.lane.b32.xlu1 %v20339_v43, %s18177_s5  ;;  %s18186_s5 = smov 119  }
 0x974   : > { %5135 = vrot.lane.b32.xlu0 %v20335_v33, %s18179_s24  ;;  %5131 = vrot.lane.b32.xlu1 %v20339_v43, %s18178_s7 }
 0x978   : > { %5153 = vrot.lane.b32.xlu0 %v20335_v33, %s18180_s8  ;;  %5137 = vrot.lane.b32.xlu1 %v20339_v43, %s18179_s24 }
 0x97c   : > { %5159 = vrot.lane.b32.xlu0 %v20335_v33, %s21920_s22  ;;  %5155 = vrot.lane.b32.xlu1 %v20339_v43, %s18180_s8  ;;  %s21579_s8 = scalar_lea.hbm %s21638_s17, %s14920_s4 }
 0x980   : > { %5171 = vrot.lane.b32.xlu0 %v20335_v33, %s21927_s6  ;;  %5161 = vrot.lane.b32.xlu1 %v20339_v43, %s21920_s22  ;;  %s18185_s22 = smov 56  }
 0x984   : > { %5177 = vrot.lane.b32.xlu0 %v20335_v33, %s18181_s28  ;;  %5173 = vrot.lane.b32.xlu1 %v20339_v43, %s21927_s6 }
 0x988   : > { %5190 = vrot.lane.b32.xlu0 %v20335_v33, %s18182_s25  ;;  %5179 = vrot.lane.b32.xlu1 %v20339_v43, %s18181_s28 }
 0x98c   : > { %5196 = vrot.lane.b32.xlu0 %v20335_v33, %s18183_s20  ;;  %5192 = vrot.lane.b32.xlu1 %v20339_v43, %s18182_s25 }
 0x990   : > { %5214 = vrot.lane.b32.xlu0 %v20335_v33, %s18184_s2  ;;  %5198 = vrot.lane.b32.xlu1 %v20339_v43, %s18183_s20 }
 0x994   : > { %5220 = vrot.lane.b32.xlu0 %v20335_v33, %s18185_s22  ;;  %5216 = vrot.lane.b32.xlu1 %v20339_v43, %s18184_s2 }
 0x998   : > { %5233 = vrot.lane.b32.xlu0 %v20335_v33, %s18186_s5  ;;  %5222 = vrot.lane.b32.xlu1 %v20339_v43, %s18185_s22 }
 0x99c   : > { %5239 = vrot.lane.b32.xlu0 %v20335_v33, %s18187_s23  ;;  %5235 = vrot.lane.b32.xlu1 %v20339_v43, %s18186_s5  ;;  %s594_s5 = sand.u32 1, %s18151_s30  }
 0x99d   : > { %s14618_s25 = scalar_lea.sflag [#allocation3], %s594_s5 }
 0x9a0   : > { %5997 = vperm.xlu0 %18094, %v5066_v23   ;;  %5241 = vrot.lane.b32.xlu1 %v20339_v43, %s18187_s23 }
 0x9a4   : > { %6009 = vperm.xlu0 %18094, %v5075_v26   ;;  %6002 = vperm.xlu1 %18095, %v5067_v35  }
 0x9a8   : > { %6014 = vperm.xlu1 %18095, %v5076_v29  }
 0x9d2   : > { %v5084_v21 = vpop.permute.xlu0 %5083 }
 0x9d6   : > { %v5090_v55 = vpop.permute.xlu0 %5089  ;;  %v5086_v4 = vpop.permute.xlu1 %5085 }
 0x9d7   : > { %v5096_v42 = vsel %vm5095_vm5, %v5084_v21, %v5090_v55 }
 0x9d8   : > { %v5109_v16 = vsel %vm5106_vm8, %v5096_v42, 0.0 }
 0x9d9   : > { %v5260_v47 = vand.u32 4294901760, %v5109_v16 }
 0x9da   : > { %v5112_v60 = vpop.permute.xlu0 %5111  ;;  %v5092_v53 = vpop.permute.xlu1 %5091 }
 0x9db   : > { %v5097_v39 = vsel %vm5095_vm5, %v5086_v4, %v5092_v53  ;;  %v20449_v20 = vsub.f32 %v5109_v16, %v5260_v47  ;;  %vm22157_vm5 = vcmask 130048  }
 0x9dc   : > { %v5110_v56 = vsel %vm5106_vm8, %v5097_v39, 0.0  ;;  %vm5245_vm8 = vcmask 449536  }
 0x9dd   : > { %v5263_v19 = vand.u32 4294901760, %v5110_v56  ;;  %v5375_v63 = vand.u32 4294901760, %v20449_v20 }
 0x9de   : > { %v5118_v18 = vpop.permute.xlu0 %5117  ;;  %v5114_v48 = vpop.permute.xlu1 %5113 }
 0x9df   : > { %v20454_v33 = vpack.c.bf16 %v5263_v19, %v5260_v47  ;;  %v20456_v5 = vsub.f32 %v5110_v56, %v5263_v19  ;;  %v5123_v36 = vsel %vm22147_vm14, %v5112_v60, %v5118_v18  ;;  %v5205_v60 = vadd.s32 1, %v22143_v27 }
 0x9e0   : > { %v5127_v44 = vsel %vm20441_vm12, %v5123_v36, 0.0 }
 0x9e1   : > { %v5382_v43 = vand.u32 4294901760, %v20456_v5  ;;  %v5266_v2 = vand.u32 4294901760, %v5127_v44  ;;  %17081 = vmatpush1.bf16.msra.mxu1 %v20454_v33  ;;  %vm5206_vm0 = vcmp.ge.s32.totalorder %v5205_v60, 0  ;;  %vm5207_vm9 = vcmp.le.s32.totalorder %v5205_v60, 7  ;;  %v5080_v60 = vld [vmem:[%s21632_s11 + $0x18] sm:$0xff] }
 0x9e2   : > { %v5130_v7 = vpop.permute.xlu0 %5129  ;;  %v5120_v31 = vpop.permute.xlu1 %5119  ;;  %17082 = vmatprep.subr.bf16.mxu1 %v22137_v51  ;;  %vm20541_vm2 = vmand %vm5206_vm0, %vm5207_vm9 }
 0x9e3   : > { %v5124_v59 = vsel %vm22148_vm1, %v5114_v48, %v5120_v31  ;;  %v20471_v45 = vpack.c.bf16 %v5382_v43, %v5375_v63  ;;  %v20475_v46 = vsub.f32 %v5127_v44, %v5266_v2  ;;  %vm20636_vm14 = vmand %vm5146_vm4, %vm20541_vm2 }
 0x9e4   : > { %v5128_v24 = vsel %vm20441_vm12, %v5124_v59, 0.0  ;;  %vm20561_vm12 = vmand %vm5099_vm11, %vm20541_vm2 }
 0x9e5   : > { %v5269_v61 = vand.u32 4294901760, %v5128_v24  ;;  %v5389_v28 = vand.u32 4294901760, %v20475_v46 }
 0x9e6   : > { %v5136_v10 = vpop.permute.xlu0 %5135  ;;  %v5132_v25 = vpop.permute.xlu1 %5131 }
 0x9e7   : > { %v20485_v23 = vpack.c.bf16 %v5269_v61, %v5266_v2  ;;  %v20487_v8 = vsub.f32 %v5128_v24, %v5269_v61  ;;  %v5142_v50 = vsel %vm5141_vm13, %v5130_v7, %v5136_v10 }
 0x9e8   : > { %v5151_v34 = vsel %vm20481_vm15, %v5142_v50, 0.0 }
 0x9e9   : > { %v5396_v54 = vand.u32 4294901760, %v20487_v8  ;;  %v5272_v6 = vand.u32 4294901760, %v5151_v34  ;;  %17084 = vmatpush1.bf16.msra.mxu1 %v20485_v23 }
 0x9ea   : > { %v5154_v35 = vpop.permute.xlu0 %5153  ;;  %v5138_v38 = vpop.permute.xlu1 %5137  ;;  %17085 = vmatprep.subr.bf16.mxu1 %v22137_v51 }
 0x9eb   : > { %v5143_v49 = vsel %vm5141_vm13, %v5132_v25, %v5138_v38  ;;  %v20501_v11 = vpack.c.bf16 %v5396_v54, %v5389_v28  ;;  %v20505_v26 = vsub.f32 %v5151_v34, %v5272_v6 }
 0x9ec   : > { %v5152_v52 = vsel %vm20481_vm15, %v5143_v49, 0.0 }
 0x9ed   : > { %v5275_v14 = vand.u32 4294901760, %v5152_v52  ;;  %v21846_v55 = vand.u32 4294901760, %v20505_v26 }
 0x9ee   : > { %v5160_v13 = vpop.permute.xlu0 %5159  ;;  %v5156_v29 = vpop.permute.xlu1 %5155 }
 0x9ef   : > { %v20507_v3 = vpack.c.bf16 %v5275_v14, %v5272_v6  ;;  %v20509_v1 = vsub.f32 %v5152_v52, %v5275_v14  ;;  %v5165_v21 = vsel %vm22151_vm10, %v5154_v35, %v5160_v13 }
 0x9f0   : > { %v5169_v41 = vsel %vm5099_vm11, %v5165_v21, 0.0 }
 0x9f1   : > { %v21847_v4 = vand.u32 4294901760, %v20509_v1  ;;  %v5278_v42 = vand.u32 4294901760, %v5169_v41  ;;  %17087 = vmatpush1.bf16.msra.mxu1 %v20507_v3 }
 0x9f2   : > { %v5172_v16 = vpop.permute.xlu0 %5171  ;;  %v5162_v47 = vpop.permute.xlu1 %5161  ;;  %17088 = vmatprep.subr.bf16.mxu1 %v22137_v51 }
 0x9f3   : > { %v5166_v53 = vsel %vm22152_vm3, %v5156_v29, %v5162_v47  ;;  %v20524_v39 = vpack.c.bf16 %v21847_v4, %v21846_v55  ;;  %v20528_v19 = vsub.f32 %v5169_v41, %v5278_v42 }
 0x9f4   : > { %v5170_v56 = vsel %vm5099_vm11, %v5166_v53, 0.0  ;;  %vm5226_vm11 = vcmask 457728  }
 0x9f5   : > { %v5281_v18 = vand.u32 4294901760, %v5170_v56  ;;  %v21840_v31 = vand.u32 4294901760, %v20528_v19 }
 0x9f6   : > { %v5178_v48 = vpop.permute.xlu0 %5177  ;;  %v5174_v36 = vpop.permute.xlu1 %5173 }
 0x9f7   : > { %v20530_v44 = vpack.c.bf16 %v5281_v18, %v5278_v42  ;;  %v20532_v27 = vsub.f32 %v5170_v56, %v5281_v18  ;;  %v5184_v2 = vsel %vm5183_vm7, %v5172_v16, %v5178_v48 }
 0x9f8   : > { %v5188_v7 = vsel %vm5146_vm4, %v5184_v2, 0.0  ;;  %v5077_v2 = vld [vmem:[%s21632_s11] sm:$0xff] }
 0x9f9   : > { %v21844_v59 = vand.u32 4294901760, %v20532_v27  ;;  %v5290_v24 = vand.u32 4294901760, %v5188_v7  ;;  %17090 = vmatpush1.bf16.msra.mxu1 %v20530_v44  ;;  %v20602_v38 = vand.u32 4294901760, %v5077_v2 }
 0x9fa   : > { %v5191_v61 = vpop.permute.xlu0 %5190  ;;  %v5180_v58 = vpop.permute.xlu1 %5179  ;;  %17091 = vmatprep.subr.bf16.mxu1 %v22137_v51 }
 0x9fb   : > { %v5185_v25 = vsel %vm5183_vm7, %v5174_v36, %v5180_v58  ;;  %v20550_v50 = vpack.c.bf16 %v21844_v59, %v21840_v31  ;;  %v20554_v6 = vsub.f32 %v5188_v7, %v5290_v24  ;;  %v5257_v7 = vsel %vm22157_vm5, %v5080_v60, 0 }
 0x9fc   : > { %v5189_v34 = vsel %vm5146_vm4, %v5185_v25, 0.0 }
 0x9fd   : > { %v5293_v35 = vand.u32 4294901760, %v5189_v34  ;;  %17093 = vmatpush1.bf16.msra.mxu1 %v20348_v40  ;;  %v21838_v41 = vand.u32 4294901760, %v20554_v6 }
 0x9fe   : > { %v5197_v49 = vpop.permute.xlu0 %5196  ;;  %v5193_v52 = vpop.permute.xlu1 %5192  ;;  %17094 = vmatprep.subr.bf16.mxu1 %v22137_v51 }
 0x9ff   : > { %v20566_v14 = vpack.c.bf16 %v5293_v35, %v5290_v24  ;;  %v20568_v13 = vsub.f32 %v5189_v34, %v5293_v35  ;;  %v5203_v29 = vsel %vm5202_vm6, %v5191_v61, %v5197_v49  ;;  %v20604_v49 = vand.u32 4294901760, %v5257_v7 }
 0xa00   : > { %v5212_v21 = vsel %vm20561_vm12, %v5203_v29, 0.0 }
 0xa01   : > { %v21839_v37 = vand.u32 4294901760, %v20568_v13  ;;  %v5296_v42 = vand.u32 4294901760, %v5212_v21  ;;  %17096 = vmatpush1.bf16.msra.mxu1 %v20566_v14 }
 0xa02   : > { %v5215_v16 = vpop.permute.xlu0 %5214  ;;  %v5199_v47 = vpop.permute.xlu1 %5198  ;;  %17097 = vmatprep.subr.bf16.mxu1 %v22137_v51 }
 0xa03   : > { %v5204_v53 = vsel %vm5202_vm6, %v5193_v52, %v5199_v47  ;;  %v20585_v56 = vpack.c.bf16 %v21839_v37, %v21838_v41  ;;  %v20589_v48 = vsub.f32 %v5212_v21, %v5296_v42 }
 0xa04   : > { %v5213_v18 = vsel %vm20561_vm12, %v5204_v53, 0.0 }
 0xa05   : > { %v5299_v36 = vand.u32 4294901760, %v5213_v18  ;;  %v21836_v52 = vand.u32 4294901760, %v20589_v48 }
 0xa06   : > { %v5221_v24 = vpop.permute.xlu0 %5220  ;;  %v5217_v61 = vpop.permute.xlu1 %5216 }
 0xa07   : > { %v20595_v58 = vpack.c.bf16 %v5299_v36, %v5296_v42  ;;  %v20597_v25 = vsub.f32 %v5213_v18, %v5299_v36  ;;  %v5227_v34 = vsel %vm5226_vm11, %v5215_v16, %v5221_v24  ;;  %v5079_v42 = vld [vmem:[%s21632_s11 + $0x10] sm:$0xff]  ;;  %v20623_v36 = vsub.f32 %v5077_v2, %v20602_v38 }
 0xa08   : > { %v5231_v35 = vsel %vm20541_vm2, %v5227_v34, 0.0  ;;  %v20626_v24 = vsub.f32 %v5257_v7, %v20604_v49  ;;  %v20628_v34 = vand.u32 4294901760, %v5079_v42 }
 0xa09   : > { %v21837_v29 = vand.u32 4294901760, %v20597_v25  ;;  %v5302_v21 = vand.u32 4294901760, %v5231_v35  ;;  %17099 = vmatpush1.bf16.msra.mxu1 %v20595_v58 }
 0xa0a   : > { %v5234_v47 = vpop.permute.xlu0 %5233  ;;  %v5223_v16 = vpop.permute.xlu1 %5222  ;;  %17100 = vmatprep.subr.bf16.mxu1 %v22137_v51  ;;  %v21845_v10 = vand.u32 4294901760, %v20626_v24  ;;  %v20650_v9 = vsub.f32 %v5079_v42, %v20628_v34 }
 0xa0b   : > { %v5228_v60 = vsel %vm5226_vm11, %v5217_v61, %v5223_v16  ;;  %v20618_v53 = vpack.c.bf16 %v21837_v29, %v21836_v52  ;;  %v20630_v12 = vsub.f32 %v5231_v35, %v5302_v21  ;;  %v21843_v29 = vand.u32 4294901760, %v20623_v36 }
 0xa0c   : > { %v5232_v18 = vsel %vm20541_vm2, %v5228_v60, 0.0  ;;  %v5359_v31 = vsub.f32 %v20626_v24, %v21845_v10  ;;  %v5397_v16 = vsub.f32 %v20487_v8, %v5396_v54 }
 0xa0d   : > { %v5305_v61 = vand.u32 4294901760, %v5232_v18  ;;  %v21841_v41 = vand.u32 4294901760, %v20630_v12 }
 0xa0e   : > { %v5240_v60 = vpop.permute.xlu0 %5239  ;;  %v5236_v30 = vpop.permute.xlu1 %5235  ;;  %v5360_v10 = vand.u32 4294901760, %v5359_v31  ;;  %v5398_v54 = vand.u32 4294901760, %v5397_v16  ;;  %v22161_v31 = vand.u32 4294901760, %v20509_v1  ;;  %v22163_v16 = vand.u32 4294901760, %v20532_v27 }
 0xa0f   : > { %v20640_v2 = vpack.c.bf16 %v5305_v61, %v5302_v21  ;;  %v20642_v52 = vsub.f32 %v5232_v18, %v5305_v61  ;;  %v5246_v7 = vsel %vm5245_vm8, %v5234_v47, %v5240_v60  ;;  %v5383_v47 = vsub.f32 %v20456_v5, %v5382_v43 }
 0xa10   : > { %v5251_v35 = vsel %vm20636_vm14, %v5246_v7, 0.0  ;;  %v5350_v7 = vsub.f32 %v20623_v36, %v21843_v29  ;;  %v21848_v43 = vand.u32 4294901760, %v20650_v9 }
 0xa11   : > { %v21842_v37 = vand.u32 4294901760, %v20642_v52  ;;  %v5308_v21 = vand.u32 4294901760, %v5251_v35  ;;  %17102 = vmatpush1.bf16.msra.mxu1 %v20640_v2 }
 0xa12   : > { %v5242_v18 = vpop.permute.xlu1 %5241  ;;  %17103 = vmatprep.subr.bf16.mxu1 %v22137_v51  ;;  %v5351_v59 = vand.u32 4294901760, %v5350_v7  ;;  %v5365_v55 = vsub.f32 %v20650_v9, %v21848_v43 }
 0xa13   : > { %v5247_v61 = vsel %vm5245_vm8, %v5236_v30, %v5242_v18  ;;  %v20664_v42 = vpack.c.bf16 %v21842_v37, %v21841_v41  ;;  %v5376_v30 = vsub.f32 %v20449_v20, %v5375_v63  ;;  %v20678_v18 = vsub.f32 %v5251_v35, %v5308_v21 }
 0xa14   : > { %v5252_v60 = vsel %vm20636_vm14, %v5247_v61, 0.0  ;;  %v5384_v37 = vand.u32 4294901760, %v5383_v47  ;;  %v5390_v63 = vsub.f32 %v20475_v46, %v5389_v28  ;;  %v5366_v7 = vand.u32 4294901760, %v5365_v55 }
 0xa15   : > { %22160 = vst [vmem:[#allocation46_spill] sm:$0xff] %v20664_v42  ;;  %v5311_v41 = vand.u32 4294901760, %v5252_v60  ;;  %v5377_v4 = vand.u32 4294901760, %v5376_v30  ;;  %v5487_v35 = vand.u32 4294901760, %v20678_v18  ;;  %v22162_v28 = vand.u32 4294901760, %v20505_v26 }
 0xa16   : > { %v5391_v30 = vand.u32 4294901760, %v5390_v63  ;;  %v5425_v42 = vsub.f32 %v20532_v27, %v22163_v16  ;;  %v22168_v16 = vand.u32 4294901760, %v20589_v48  ;;  %vm6079_vm8 = vcmask 523264  }
 0xa17   : > { %v20683_v61 = vpack.c.bf16 %v5311_v41, %v5308_v21  ;;  %v20685_v29 = vsub.f32 %v5252_v60, %v5311_v41  ;;  %v5411_v41 = vsub.f32 %v20509_v1, %v22161_v31  ;;  %v17107_v21 = vpack.c.bf16 %v5384_v37, %v5377_v4 }
 0xa18   : > { %v5404_v43 = vsub.f32 %v20505_v26, %v22162_v28  ;;  %v17110_v31 = vpack.c.bf16 %v5398_v54, %v5391_v30  ;;  %v5426_v37 = vand.u32 4294901760, %v5425_v42  ;;  %v22167_v42 = vand.u32 4294901760, %v20597_v25 }
 0xa19   : > { %v5494_v47 = vand.u32 4294901760, %v20685_v29  ;;  %17105 = vmatpush1.bf16.msra.mxu1 %v20683_v61  ;;  %v5412_v15 = vand.u32 4294901760, %v5411_v41  ;;  %v22165_v41 = vand.u32 4294901760, %v20568_v13 }
 0xa1a   : > { %17106 = vmatprep.subr.bf16.mxu1 %v22137_v51  ;;  %v5405_v4 = vand.u32 4294901760, %v5404_v43 }
 0xa1b   : > { %v20700_v60 = vpack.c.bf16 %v5494_v47, %v5487_v35  ;;  %v5453_v54 = vsub.f32 %v20568_v13, %v22165_v41 }
 0xa1c   : > { %5352 = vmatmul.mubr.f32.vlgmr.msra.gmra.mrb[42].mxu1 %v5351_v59  ;;  %v22164_v59 = vand.u32 4294901760, %v20528_v19 }
 0xa1d   : > { %17108 = vmatpush1.bf16.msra.mxu1 %v17107_v21  ;;  %5361 = vmatprep.mubr.f32.mxu1 %v5360_v10  ;;  %v17113_v10 = vpack.c.bf16 %v5412_v15, %v5405_v4  ;;  %v22166_v21 = vand.u32 4294901760, %v20554_v6  ;;  %v5454_v30 = vand.u32 4294901760, %v5453_v54  ;;  %v5467_v15 = vsub.f32 %v20597_v25, %v22167_v42 }
 0xa1e   : > { %17109 = vmatprep.subr.bf16.mxu1 %v22137_v51  ;;  %v5418_v55 = vsub.f32 %v20528_v19, %v22164_v59  ;;  %v22169_v59 = vand.u32 4294901760, %v20642_v52 }
 0xa1f   : > { %v5468_v4 = vand.u32 4294901760, %v5467_v15 }
 0xa20   : > { %5367 = vmatmul.mubr.f32.gmra.mrb[44].mxu1 %v5366_v7  ;;  %v5419_v63 = vand.u32 4294901760, %v5418_v55  ;;  %v5446_v7 = vsub.f32 %v20554_v6, %v22166_v21  ;;  %v5481_v55 = vsub.f32 %v20642_v52, %v22169_v59 }
 0xa21   : > { %17111 = vmatpush1.bf16.msra.mxu1 %v17110_v31  ;;  %5527 = vmatprep.mubr.f32.mxu1 %v20413_v32  ;;  %v5460_v31 = vsub.f32 %v20589_v48, %v22168_v16 }
 0xa22   : > { %17112 = vmatprep.subr.bf16.mxu1 %v22137_v51  ;;  %v17116_v43 = vpack.c.bf16 %v5426_v37, %v5419_v63  ;;  %v5447_v28 = vand.u32 4294901760, %v5446_v7  ;;  %v22170_v63 = vand.u32 4294901760, %v20630_v12  ;;  %v5482_v54 = vand.u32 4294901760, %v5481_v55 }
 0xa23   : > { %v5488_v7 = vsub.f32 %v20678_v18, %v5487_v35  ;;  %v17137_v35 = vpack.c.bf16 %v20487_v8, %v20475_v46  ;;  %v22171_v46 = vpack.c.bf16 %v20351_v17, %v20342_v0  ;;  %v17149_v8 = vpack.c.bf16 %v20568_v13, %v20554_v6  ;;  %v22183_v6 = vld [vmem:[#allocation26_spill] sm:$0xff]  ;;  %v6003_v16 = vpop.permute.xlu1 %6002  ;;  %v6620_v13 = vld [vmem:[%s21634_s13 + $0x8] sm:$0xff] }
 0xa24   : > { %v17122_v37 = vpack.c.bf16 %v5454_v30, %v5447_v28  ;;  %v5474_v41 = vsub.f32 %v20630_v12, %v22170_v63  ;;  %v17158_v0 = vpack.c.bf16 %v20685_v29, %v20678_v18  ;;  %v22172_v17 = vand.u32 4294901760, %v20418_v62 }
 0xa25   : > { %17114 = vmatpush1.bf16.msra.mxu1 %v17113_v10  ;;  %v5461_v10 = vand.u32 4294901760, %v5460_v31  ;;  %v5489_v15 = vand.u32 4294901760, %v5488_v7 }
 0xa26   : > { %17115 = vmatprep.subr.bf16.mxu1 %v22137_v51  ;;  %v5475_v21 = vand.u32 4294901760, %v5474_v41 }
 0xa28   : > { %v17128_v30 = vpack.c.bf16 %v5482_v54, %v5475_v21 }
 0xa29   : > { %17117 = vmatpush1.bf16.msra.mxu1 %v17116_v43  ;;  %v5495_v43 = vsub.f32 %v20685_v29, %v5494_v47  ;;  %v17134_v47 = vpack.c.bf16 %v20456_v5, %v20449_v20  ;;  %v17140_v20 = vpack.c.bf16 %v20509_v1, %v20505_v26  ;;  %v17143_v5 = vpack.c.bf16 %v20532_v27, %v20528_v19  ;;  %v22179_v27 = vld [vmem:[#allocation22_spill] sm:$0xff] }
 0xa2a   : > { %17118 = vmatprep.subr.bf16.mxu1 %v22137_v51  ;;  %v17152_v26 = vpack.c.bf16 %v20597_v25, %v20589_v48  ;;  %v17155_v1 = vpack.c.bf16 %v20642_v52, %v20630_v12  ;;  %v22174_v12 = vand.u32 4294901760, %v20626_v24  ;;  %v22175_v19 = vand.u32 4294901760, %v20650_v9  ;;  %v22188_v48 = vld [vmem:[#allocation30_spill] sm:$0xff]  ;;  %v22191_v25 = vld [vmem:[#allocation33_spill] sm:$0xff] }
 0xa2b   : > { %v5496_v42 = vand.u32 4294901760, %v5495_v43  ;;  %v22195_v52 = vld [vmem:[#allocation9_spill] sm:$0xff]  ;;  %v22196_v29 = vmov 0.0  }
 0xa2d   : > { %17120 = vmatpush1.bf16.msra.mxu1 %v20364_v57  ;;  %v17125_v57 = vpack.c.bf16 %v5468_v4, %v5461_v10  ;;  %v17131_v28 = vpack.c.bf16 %v5496_v42, %v5489_v15 }
 0xa2e   : > { %17121 = vmatprep.subr.bf16.mxu1 %v22137_v51 }
 0xa31   : > { %17123 = vmatpush1.bf16.msra.mxu1 %v17122_v37 }
 0xa32   : > { %17124 = vmatprep.subr.bf16.mxu1 %v22137_v51 }
 0xa35   : > { %17126 = vmatpush1.bf16.msra.mxu1 %v17125_v57 }
 0xa36   : > { %17127 = vmatprep.subr.bf16.mxu1 %v22137_v51 }
 0xa39   : > { %17129 = vmatpush1.bf16.msra.mxu1 %v17128_v30 }
 0xa3a   : > { %17130 = vmatprep.subr.bf16.mxu1 %v22137_v51 }
 0xa3d   : > { %17132 = vmatpush1.bf16.msra.mxu1 %v17131_v28 }
 0xa3e   : > { %17133 = vmatprep.subr.bf16.mxu1 %v22137_v51 }
 0xa40   : > { %5529 = vmatmul.mubr.f32.vlgmr.msra.gmra.mrb[42].mxu1 %v20602_v38 }
 0xa41   : > { %17135 = vmatpush1.bf16.msra.mxu1 %v17134_v47  ;;  %5534 = vmatprep.mubr.f32.mxu1 %v20604_v49 }
 0xa42   : > { %17136 = vmatprep.subr.bf16.mxu1 %v22137_v51 }
 0xa44   : > { %5536 = vmatmul.mubr.f32.gmra.mrb[44].mxu1 %v20628_v34 }
 0xa45   : > { %17138 = vmatpush1.bf16.msra.mxu1 %v17137_v35  ;;  %5643 = vmatprep.mubr.f32.mxu1 %v20418_v62  ;;  %v22173_v62 = vand.u32 4294901760, %v20623_v36 }
 0xa46   : > { %17139 = vmatprep.subr.bf16.mxu1 %v22137_v51 }
 0xa49   : > { %17141 = vmatpush1.bf16.msra.mxu1 %v17140_v20  ;;  %v6015_v20 = vpop.permute.xlu1 %6014 }
 0xa4a   : > { %17142 = vmatprep.subr.bf16.mxu1 %v22137_v51 }
 0xa4d   : > { %17144 = vmatpush1.bf16.msra.mxu1 %v17143_v5 }
 0xa4e   : > { %17145 = vmatprep.subr.bf16.mxu1 %v22137_v51 }
 0xa51   : > { %17147 = vmatpush1.bf16.msra.mxu1 %v22171_v46 }
 0xa52   : > { %17148 = vmatprep.subr.bf16.mxu1 %v22137_v51 }
 0xa55   : > { %17150 = vmatpush1.bf16.msra.mxu1 %v17149_v8 }
 0xa56   : > { %17151 = vmatprep.subr.bf16.mxu1 %v22137_v51 }
 0xa59   : > { %17153 = vmatpush1.bf16.msra.mxu1 %v17152_v26 }
 0xa5a   : > { %17154 = vmatprep.subr.bf16.mxu1 %v22137_v51 }
 0xa5d   : > { %17156 = vmatpush1.bf16.msra.mxu1 %v17155_v1 }
 0xa5e   : > { %17157 = vmatprep.subr.bf16.mxu1 %v22137_v51 }
 0xa61   : > { %17159 = vmatpush1.bf16.msra.mxu1 %v17158_v0 }
 0xa62   : > { %17160 = vmatprep.subr.bf16.mxu1 %v22137_v51 }
 0xa64   : > { %5646 = vmatmul.mubr.f32.vlgmr.msra.gmra.mrb[42].mxu1 %v20623_v36 }
 0xa65   : > { %17162 = vmatpush1.bf16.msra.mxu1 %v20454_v33  ;;  %5652 = vmatprep.mubr.f32.mxu1 %v20626_v24 }
 0xa66   : > { %17163 = vmatprep.subr.bf16.mxu1 %v22137_v51 }
 0xa68   : > { %5655 = vmatmul.mubr.f32.gmra.mrb[44].mxu1 %v20650_v9 }
 0xa69   : > { %17165 = vmatpush1.bf16.msra.mxu1 %v20485_v23  ;;  %5745 = vmatprep.mubr.f32.mxu1 %v22172_v17 }
 0xa6a   : > { %17166 = vmatprep.subr.bf16.mxu1 %v22137_v51 }
 0xa6d   : > { %17168 = vmatpush1.bf16.msra.mxu1 %v20507_v3 }
 0xa6e   : > { %17169 = vmatprep.subr.bf16.mxu1 %v22137_v51 }
 0xa71   : > { %17171 = vmatpush1.bf16.msra.mxu1 %v20530_v44 }
 0xa72   : > { %17172 = vmatprep.subr.bf16.mxu1 %v22137_v51 }
 0xa75   : > { %17174 = vmatpush1.bf16.msra.mxu1 %v20348_v40 }
 0xa76   : > { %17175 = vmatprep.subr.bf16.mxu1 %v22137_v51 }
 0xa79   : > { %17177 = vmatpush1.bf16.msra.mxu1 %v20566_v14 }
 0xa7a   : > { %17178 = vmatprep.subr.bf16.mxu1 %v22137_v51 }
 0xa7d   : > { %17180 = vmatpush1.bf16.msra.mxu1 %v20595_v58 }
 0xa7e   : > { %17181 = vmatprep.subr.bf16.mxu1 %v22137_v51 }
 0xa81   : > { %17183 = vmatpush1.bf16.msra.mxu1 %v20640_v2 }
 0xa82   : > { %17184 = vmatprep.subr.bf16.mxu1 %v22137_v51 }
 0xa85   : > { %17186 = vmatpush1.bf16.msra.mxu1 %v20683_v61 }
 0xa86   : > { %17187 = vmatprep.subr.bf16.mxu1 %v22137_v51 }
 0xa88   : > { %5749 = vmatmul.mubr.f32.vlgmr.msra.gmra.mrb[42].mxu1 %v22173_v62 }
 0xa89   : > { %17189 = vmatpush1.bf16.msra.mxu1 %v20471_v45  ;;  %5756 = vmatprep.mubr.f32.mxu1 %v22174_v12  ;;  %v22176_v45 = vld [vmem:[#allocation46_spill] sm:$0xff] }
 0xa8a   : > { %17190 = vmatprep.subr.bf16.mxu1 %v22137_v51 }
 0xa8c   : > { %5760 = vmatmul.mubr.f32.gmra.mrb[44].mxu1 %v22175_v19 }
 0xa8d   : > { %17192 = vmatpush1.bf16.msra.mxu1 %v20501_v11  ;;  %5884 = vmatprep.mubr.f32.mxu1 %v20413_v32 }
 0xa8e   : > { %17193 = vmatprep.subr.bf16.mxu1 %v22137_v51 }
 0xa91   : > { %17195 = vmatpush1.bf16.msra.mxu1 %v20524_v39 }
 0xa92   : > { %17196 = vmatprep.subr.bf16.mxu1 %v22137_v51 }
 0xa95   : > { %17198 = vmatpush1.bf16.msra.mxu1 %v20550_v50  ;;  %v22182_v50 = vld [vmem:[#allocation25_spill] sm:$0xff] }
 0xa96   : > { %17199 = vmatprep.subr.bf16.mxu1 %v22137_v51 }
 0xa99   : > { %17201 = vmatpush1.bf16.msra.mxu1 %v20360_v22  ;;  %v22177_v22 = vld [vmem:[#allocation8_spill] sm:$0xff] }
 0xa9a   : > { %17202 = vmatprep.subr.bf16.mxu1 %v22137_v51  ;;  %v6058_v11 = vshra.s32 %v22177_v22, 2 }
 0xa9c   : > { %v6059_v39 = vmul.u32 2, %v6058_v11 }
 0xa9d   : > { %17204 = vmatpush1.bf16.msra.mxu1 %v20585_v56  ;;  %v22187_v56 = vld [vmem:[#allocation29_spill] sm:$0xff] }
 0xa9e   : > { %17205 = vmatprep.subr.bf16.mxu1 %v22137_v51 }
 0xaa1   : > { %17207 = vmatpush1.bf16.msra.mxu1 %v20618_v53 }
 0xaa2   : > { %17208 = vmatprep.subr.bf16.mxu1 %v22137_v51 }
 0xaa5   : > { %17210 = vmatpush1.bf16.msra.mxu1 %v22176_v45 }
 0xaa6   : > { %17211 = vmatprep.subr.bf16.mxu1 %v22137_v51 }
 0xaa9   : > { %17213 = vmatpush1.bf16.msra.mxu1 %v20700_v60 }
 0xaaa   : > { %17214 = vmatprep.subr.bf16.mxu1 %v22137_v51 }
 0xaac   : > { %5886 = vmatmul.mubr.f32.vlgmr.msra.gmra.mrb[42].mxu1 %v20602_v38 }
 0xaad   : > { %17216 = vmatpush1.bf16.msra.mxu1 %v20454_v33  ;;  %5891 = vmatprep.mubr.f32.mxu1 %v20604_v49  ;;  %v6057_v33 = vand.u32 3, %v22177_v22 }
 0xaae   : > { %17217 = vmatprep.subr.bf16.mxu1 %v22137_v51 }
 0xab0   : > { %5893 = vmatmul.mubr.f32.gmra.mrb[44].mxu1 %v20628_v34 }
 0xab1   : > { %17219 = vmatpush1.bf16.msra.mxu1 %v20485_v23  ;;  %5981 = vmatprep.mubr.f32.mxu1 %v20413_v32  ;;  %v6060_v32 = vmul.u32 8, %v6059_v39  ;;  %v6061_v23 = vmul.u32 2, %v6057_v33 }
 0xab2   : > { %17220 = vmatprep.subr.bf16.mxu1 %v22137_v51 }
 0xab5   : > { %17222 = vmatpush1.bf16.msra.mxu1 %v20507_v3  ;;  %v20840_v3 = vadd.s32 %v6061_v23, %v6060_v32 }
 0xab6   : > { %17223 = vmatprep.subr.bf16.mxu1 %v22137_v51 }
 0xab7   : > { %vm6064_vm1 = vcmp.eq.s32.totalorder %v22179_v27, %v20840_v3  ;;  %vm6065_vm15 = vcmp.eq.s32.totalorder %v22182_v50, %v20840_v3  ;;  %vm6066_vm10 = vcmp.eq.s32.totalorder %v22183_v6, %v20840_v3  ;;  %vm6067_vm0 = vcmp.eq.s32.totalorder %v22187_v56, %v20840_v3 }
 0xab8   : > { %vm20874_vm3 = vmpackc.low %vm6066_vm10, %vm6065_vm15  ;;  %vm6068_vm9 = vcmp.eq.s32.totalorder %v22188_v48, %v20840_v3  ;;  %vm6069_vm6 = vcmp.eq.s32.totalorder %v22191_v25, %v20840_v3  ;;  %v6072_v36 = vsel %vm6064_vm1, 1.0, %v22196_v29  ;;  %v6073_v24 = vsel %vm6065_vm15, 1.0, %v22196_v29 }
 0xab9   : > { %17225 = vmatpush1.bf16.msra.mxu1 %v20530_v44  ;;  %v22178_v44 = vld [vmem:[#allocation21_spill] sm:$0xff]  ;;  %vm20896_vm2 = vmpackc.low %vm6068_vm9, %vm6067_vm0  ;;  %v20949_v18 = vsub.f32 %v6072_v36, %v6072_v36  ;;  %v6075_v17 = vsel %vm6067_vm0, 1.0, %v22196_v29  ;;  %v6076_v62 = vsel %vm6068_vm9, 1.0, %v22196_v29  ;;  %v6077_v45 = vsel %vm6069_vm6, 1.0, %v22196_v29 }
 0xaba   : > { %17226 = vmatprep.subr.bf16.mxu1 %v22137_v51  ;;  %vm6063_vm4 = vcmp.eq.s32.totalorder %v22178_v44, %v20840_v3  ;;  %v6196_v12 = vsub.f32 %v6075_v17, %v6075_v17  ;;  %v6202_v19 = vsub.f32 %v6076_v62, %v6076_v62  ;;  %v6208_v11 = vsub.f32 %v6077_v45, %v6077_v45 }
 0xabb   : > { %vm20856_vm13 = vmpackc.low %vm6064_vm1, %vm6063_vm4  ;;  %v6071_v53 = vsel %vm6063_vm4, 1.0, %v22196_v29  ;;  %v6179_v37 = vand.u32 4294901760, %v20949_v18  ;;  %vm22207_vm4 = vcmask 130048  }
 0xabc   : > { %v20947_v9 = vsub.f32 %v6071_v53, %v6071_v53  ;;  %v6197_v39 = vand.u32 4294901760, %v6196_v12  ;;  %v6203_v32 = vand.u32 4294901760, %v6202_v19  ;;  %v6209_v6 = vand.u32 4294901760, %v6208_v11  ;;  %vm22208_vm1 = vmmov %vm22207_vm4 }
 0xabd   : > { %17228 = vmatpush1.bf16.msra.mxu1 %v20348_v40  ;;  %v6180_v57 = vsub.f32 %v20949_v18, %v6179_v37  ;;  %v6619_v40 = vld [vmem:[%s21634_s13] sm:$0xff]  ;;  %vm22210_vm15 = vmmov %vm22208_vm1 }
 0xabe   : > { %17229 = vmatprep.subr.bf16.mxu1 %v22137_v51  ;;  %v6173_v55 = vand.u32 4294901760, %v20947_v9  ;;  %v6198_v23 = vsub.f32 %v6196_v12, %v6197_v39  ;;  %v6204_v44 = vsub.f32 %v6202_v19, %v6203_v32  ;;  %v6210_v53 = vsub.f32 %v6208_v11, %v6209_v6  ;;  %vm22213_vm0 = vmmov %vm22208_vm1 }
 0xabf   : > { %v6181_v35 = vand.u32 4294901760, %v6180_v57  ;;  %vm22214_vm9 = vmmov %vm22213_vm0 }
 0xac0   : > { %v6174_v43 = vsub.f32 %v20947_v9, %v6173_v55  ;;  %v6199_v27 = vand.u32 4294901760, %v6198_v23  ;;  %v6205_v50 = vand.u32 4294901760, %v6204_v44 }
 0xac1   : > { %17231 = vmatpush1.bf16.msra.mxu1 %v20566_v14  ;;  %v22184_v14 = vmov 1.0|1.0  }
 0xac2   : > { %17232 = vmatprep.subr.bf16.mxu1 %v22137_v51  ;;  %v6175_v47 = vand.u32 4294901760, %v6174_v43  ;;  %v17265_v48 = vpack.c.bf16 %v6205_v50, %v6199_v27  ;;  %v17281_v43 = vpack.c.bf16 %v6202_v19, %v6196_v12 }
 0xac4   : > { %v17257_v26 = vpack.c.bf16 %v6181_v35, %v6175_v47  ;;  %v14077_v35 = vld [vmem:[%s21636_s15 + $0x8] sm:$0x3] }
 0xac5   : > { %17234 = vmatpush1.bf16.msra.mxu1 %v20595_v58  ;;  %v6625_v58 = vand.u32 4294901760, %v6619_v40 }
 0xac6   : > { %17235 = vmatprep.subr.bf16.mxu1 %v22137_v51  ;;  %17258 = vmatprep.subr.bf16.mxu0 %v17257_v26 }
 0xac7   : > { %17260 = vmatpush3.bf16.msra.mxu0 %v17257_v26 }
 0xac9   : > { %17237 = vmatpush1.bf16.msra.mxu1 %v20640_v2  ;;  %v5998_v2 = vpop.permute.xlu0 %5997 }
 0xaca   : > { %17238 = vmatprep.subr.bf16.mxu1 %v22137_v51 }
 0xacd   : > { %17240 = vmatpush1.bf16.msra.mxu1 %v20683_v61  ;;  %v20951_v61 = vsub.f32 %v6073_v24, %v6073_v24  ;;  %v6010_v63 = vpop.permute.xlu0 %6009 }
 0xace   : > { %17242 = vmatprep.subr.msk.bf16.mxu1 %vm20856_vm13, %v22184_v14 }
 0xacf   : > { %v6185_v10 = vand.u32 4294901760, %v20951_v61 }
 0xad0   : > { %5983 = vmatmul.mubr.f32.vlgmr.msra.gmra.mrb[42].mxu1 %v20602_v38  ;;  %v22192_v38 = vld [vmem:[#allocation34_spill] sm:$0xff] }
 0xad1   : > { %17244 = vmatpush3.bf16.msk.msra.mxu1 %vm20856_vm13, %v22184_v14  ;;  %5988 = vmatprep.mubr.f32.mxu1 %v20604_v49  ;;  %vm6070_vm12 = vcmp.eq.s32.totalorder %v22192_v38, %v20840_v3  ;;  %v6186_v21 = vsub.f32 %v20951_v61, %v6185_v10  ;;  %v6211_v3 = vand.u32 4294901760, %v6210_v53  ;;  %v6703_v49 = vsub.f32 %v6619_v40, %v6625_v58 }
 0xad2   : > { %17246 = vmatprep.subr.msk.bf16.mxu1 %vm20874_vm3, %v22184_v14  ;;  %vm20917_vm5 = vmpackc.low %vm6070_vm12, %vm6069_vm6  ;;  %v6078_v22 = vsel %vm6070_vm12, 1.0, %v22196_v29 }
 0xad3   : > { %v6187_v5 = vand.u32 4294901760, %v6186_v21  ;;  %v6214_v33 = vsub.f32 %v6078_v22, %v6078_v22  ;;  %v20999_v21 = vpack.c.bf16 %v6203_v32, %v6197_v39  ;;  %vm22216_vm6 = vmmov %vm22213_vm0 }
 0xad4   : > { %5990 = vmatmul.mubr.f32.gmra.mrb[44].mxu1 %v20628_v34  ;;  %v6074_v34 = vsel %vm6066_vm10, 1.0, %v22196_v29  ;;  %vm22211_vm10 = vmmov %vm22208_vm1 }
 0xad5   : > { %17248 = vmatpush3.bf16.msk.msra.mxu1 %vm20874_vm3, %v22184_v14  ;;  %v20953_v60 = vsub.f32 %v6074_v34, %v6074_v34  ;;  %v6215_v56 = vand.u32 4294901760, %v6214_v33  ;;  %v17285_v57 = vpack.c.bf16 %v6214_v33, %v6208_v11  ;;  %vm22217_vm12 = vmmov %vm22213_vm0 }
 0xad6   : > { %17250 = vmatprep.subr.msk.bf16.mxu1 %vm20896_vm2, %v22184_v14 }
 0xad7   : > { %v6191_v41 = vand.u32 4294901760, %v20953_v60  ;;  %v6216_v36 = vsub.f32 %v6214_v33, %v6215_v56  ;;  %v17277_v33 = vpack.c.bf16 %v20953_v60, %v20951_v61 }
 0xad9   : > { %17252 = vmatpush3.bf16.msk.msra.mxu1 %vm20896_vm2, %v22184_v14  ;;  %v6192_v42 = vsub.f32 %v20953_v60, %v6191_v41  ;;  %v6217_v38 = vand.u32 4294901760, %v6216_v36  ;;  %v6704_v60 = vand.u32 4294901760, %v6703_v49 }
 0xada   : > { %17254 = vmatprep.subr.msk.bf16.mxu1 %vm20917_vm5, %v22184_v14 }
 0xadb   : > { %v6193_v46 = vand.u32 4294901760, %v6192_v42  ;;  %v14076_v42 = vld [vmem:[%s21636_s15] sm:$0xff] }
 0xadd   : > { %17256 = vmatpush3.bf16.msk.msra.mxu1 %vm20917_vm5, %v22184_v14  ;;  %v17261_v1 = vpack.c.bf16 %v6193_v46, %v6187_v5 }
 0xade   : > { %17626 = vmatprep.subr.bf16.mxu1 %v22195_v52 }
 0xadf   : > { %17262 = vmatprep.subr.bf16.mxu0 %v17261_v1 }
 0xae0   : > { %17264 = vmatpush3.bf16.msra.mxu0 %v17261_v1 }
 0xae1   : > { %17266 = vmatprep.subr.bf16.mxu0 %v17265_v48 }
 0xae4   : > { %17268 = vmatpush3.bf16.msra.mxu0 %v17265_v48 }
 0xba3   : > { %v5984_v31 = vpop.f32.mrb[42].mxu1 }
 0xba4   : > { %v6005_v4 = vmul.f32 %v5998_v2, %v5984_v31  ;;  %v5986_v59 = vpop.f32.mrb[43].mxu1 }
 0xba6   : > { %v6017_v54 = vadd.f32 %v6010_v63, %v6005_v4 }
 0xba7   : > { %v5991_v7 = vpop.f32.mrb[44].mxu1 }
 0xba8   : > { %v6019_v30 = vmax.f32 %v6017_v54, 0.0  ;;  %v6006_v15 = vmul.f32 %v6003_v16, %v5991_v7  ;;  %v5993_v28 = vpop.f32.mrb[45].mxu1  ;;  %v17269_v16 = vpack.c.bf16 %v6217_v38, %v6211_v3  ;;  %v17273_v54 = vpack.c.bf16 %v20949_v18, %v20947_v9  ;;  %v22200_v38 = vld [vmem:[#allocation14_spill] sm:$0xff]  ;;  %v22204_v9 = vld [vmem:[#allocation12_spill] sm:$0xff]  ;;  %v22205_v18 = vld [vmem:[#allocation15_spill] sm:$0xff] }
 0xba9   : > { %v21001_v7 = vpack.c.bf16 %v6215_v56, %v6209_v6 }
 0xbaa   : > { %v6018_v8 = vadd.f32 %v6015_v20, %v6006_v15  ;;  %6029 = vrot.lane.b32.xlu1 %v6019_v30, %s18181_s28  ;;  %6023 = vrot.lane.b32.xlu0 %v6019_v30, %s21927_s6 }
 0xbab   : > { %17270 = vmatprep.subr.bf16.mxu0 %v17269_v16 }
 0xbac   : > { %v6020_v0 = vmax.f32 %v6018_v8, 0.0  ;;  %17272 = vmatpush3.bf16.msra.mxu0 %v17269_v16  ;;  %v22202_v16 = vld [vmem:[#allocation10_spill] sm:$0xff] }
 0xbad   : > { %17274 = vmatprep.subr.bf16.mxu0 %v17273_v54 }
 0xbae   : > { %6031 = vrot.lane.b32.xlu1 %v6020_v0, %s18181_s28  ;;  %6025 = vrot.lane.b32.xlu0 %v6020_v0, %s21927_s6  ;;  %s14924_s6 = sshll.u32 %s18339_s27, 4  ;;  %s18101_s28 = sshll.u32 %s18188_s1, 4  ;;  %s18102_s28 = int_to_ptr.vmem [resolvable:$false] %s18101_s28 }
 0xbaf   : > { %s624_s23 = scalar_lea.vmem %s21640_s19, %s14924_s6 }
 0xc1c   : > { %v6030_v25 = vpop.permute.xlu1 %6029  ;;  %v6024_v24 = vpop.permute.xlu0 %6023 }
 0xc1d   : > { %v6035_v34 = vsel %vm5183_vm7, %v6024_v24, %v6030_v25 }
 0xc1e   : > { %v6037_v2 = vmax.f32 %v6019_v30, %v6035_v34  ;;  %v22199_v34 = vld [vmem:[#allocation11_spill] sm:$0xff] }
 0xc20   : > { %6047 = vrot.lane.b32.xlu1 %v6037_v2, %s18185_s22  ;;  %v6032_v31 = vpop.permute.xlu1 %6031  ;;  %6041 = vrot.lane.b32.xlu0 %v6037_v2, %s18184_s2  ;;  %v6026_v4 = vpop.permute.xlu0 %6025 }
 0xc21   : > { %v6036_v59 = vsel %vm5183_vm7, %v6026_v4, %v6032_v31  ;;  %vm22197_vm7 = vcmask 261120   ;;  %v17305_v31 = vpack.c.bf16 %v6179_v37, %v6173_v55  ;;  %v22203_v4 = vld [vmem:[#allocation13_spill] sm:$0xff]  ;;  %v6705_v37 = vsub.f32 %v6703_v49, %v6704_v60 }
 0xc22   : > { %v6038_v63 = vmax.f32 %v6020_v0, %v6036_v59  ;;  %v14081_v30 = vsel %vm22197_vm7, %v14076_v42, 0  ;;  %vm22198_vm14 = vmmov %vm22197_vm7  ;;  %v17309_v59 = vpack.c.bf16 %v6191_v41, %v6185_v10 }
 0xc23   : > { %v21011_v5 = vand.u32 4294901760, %v14081_v30  ;;  %v14084_v1 = vsel %vm22198_vm14, %v14077_v35, 0  ;;  %v6706_v41 = vand.u32 4294901760, %v6705_v37  ;;  %vm22219_vm7 = vmmov %vm22213_vm0  ;;  %vm14615_vm14 = vcmask 1024  }
 0xc24   : > { %6049 = vrot.lane.b32.xlu1 %v6038_v63, %s18185_s22  ;;  %6043 = vrot.lane.b32.xlu0 %v6038_v63, %s18184_s2  ;;  %v21023_v45 = vand.u32 4294901760, %v14084_v1  ;;  %s18103_s22 = scalar_lea.vmem %s18102_s28, 32 }
 0xc25   : > { %v21019_v12 = vsub.f32 %v14081_v30, %v21011_v5 }
 0xc26   : > { %v21034_v27 = vsub.f32 %v14084_v1, %v21023_v45  ;;  %v14891_v1 = vld [vmem:[%s21634_s13 + $0x18] sm:$0xff] }
 0xc27   : > { %v14157_v32 = vand.u32 4294901760, %v21019_v12 }
 0xc28   : > { %v14167_v53 = vand.u32 4294901760, %v21034_v27 }
 0xc29   : > { %v14158_v56 = vsub.f32 %v21019_v12, %v14157_v32 }
 0xc2a   : > { %v14168_v24 = vsub.f32 %v21034_v27, %v14167_v53 }
 0xc2b   : > { %v14159_v25 = vand.u32 4294901760, %v14158_v56 }
 0xc2c   : > { %v14169_v3 = vand.u32 4294901760, %v14168_v24  ;;  %v14892_v24 = vld [vmem:[%s21634_s13 + $0x20] sm:$0xff] }
 0xc92   : > { %v6048_v15 = vpop.permute.xlu1 %6047  ;;  %v6042_v28 = vpop.permute.xlu0 %6041 }
 0xc93   : > { %v6053_v47 = vsel %vm5226_vm11, %v6042_v28, %v6048_v15 }
 0xc94   : > { %v6055_v20 = vmax.f32 %v6037_v2, %v6053_v47  ;;  %v22201_v2 = vld [vmem:[#allocation16_spill] sm:$0xff] }
 0xc96   : > { %v6081_v46 = vsel %vm6079_vm8, %v6055_v20, 0  ;;  %v6050_v8 = vpop.permute.xlu1 %6049  ;;  %v6044_v26 = vpop.permute.xlu0 %6043 }
 0xc97   : > { %v21015_v0 = vand.u32 4294901760, %v6081_v46  ;;  %v6054_v17 = vsel %vm5226_vm11, %v6044_v26, %v6050_v8  ;;  %vm22206_vm11 = vmmov 0   ;;  %v14890_v26 = vld [vmem:[%s21634_s13 + $0x10] sm:$0xff] }
 0xc98   : > { %v6056_v62 = vmax.f32 %v6038_v63, %v6054_v17  ;;  %v7091_v17 = vand.u32 4294901760, %v14890_v26 }
 0xc99   : > { %15842 = vmatprep.mubr.f32.mxu0 %v21015_v0  ;;  %v6152_v19 = vsub.f32 %v6081_v46, %v21015_v0 }
 0xc9a   : > { %v6084_v22 = vsel %vm6079_vm8, %v6056_v62, 0  ;;  %v7094_v62 = vand.u32 4294901760, %v14891_v1  ;;  %vm22220_vm8 = vmmov %vm22213_vm0 }
 0xc9b   : > { %v21026_v11 = vand.u32 4294901760, %v6084_v22  ;;  %v6153_v39 = vand.u32 4294901760, %v6152_v19 }
 0xc9d   : > { %v6162_v23 = vsub.f32 %v6084_v22, %v21026_v11  ;;  %15843 = vmatmul.mubr.f32.vlgmr.msra.gmra.mrb[8].mxu0 %v21026_v11  ;;  %v6154_v44 = vsub.f32 %v6152_v19, %v6153_v39 }
 0xc9e   : > { %17276 = vmatpush3.bf16.msra.mxu0 %v17273_v54  ;;  %15861 = vmatprep.mubr.f32.mxu0 %v6152_v19  ;;  %v7169_v19 = vsub.f32 %v14890_v26, %v7091_v17 }
 0xc9f   : > { %v6163_v50 = vand.u32 4294901760, %v6162_v23  ;;  %17278 = vmatprep.subr.bf16.mxu0 %v17277_v33  ;;  %v6155_v6 = vand.u32 4294901760, %v6154_v44 }
 0xca1   : > { %v6164_v48 = vsub.f32 %v6162_v23, %v6163_v50  ;;  %15823 = vmatprep.mubr.f32.mxu1 %v6155_v6 }
 0xca2   : > { %17280 = vmatpush3.bf16.msra.mxu0 %v17277_v33 }
 0xca3   : > { %v6165_v36 = vand.u32 4294901760, %v6164_v48  ;;  %17282 = vmatprep.subr.bf16.mxu0 %v17281_v43 }
 0xca5   : > { %15824 = vmatmul.mubr.f32.vlgmr.msra.gmra.mrb[46].mxu1 %v6165_v36 }
 0xca6   : > { %17284 = vmatpush3.bf16.msra.mxu0 %v17281_v43  ;;  %17628 = vmatpush3.bf16.msra.mxu1 %v22195_v52 }
 0xca7   : > { %17630 = vmatprep.subr.bf16.mxu1 %v22199_v34  ;;  %17286 = vmatprep.subr.bf16.mxu0 %v17285_v57 }
 0xca8   : > { %16601 = vmatprep.mubr.f32.mxu1 %v14159_v25 }
 0xcaa   : > { %17288 = vmatpush3.bf16.msra.mxu0 %v17285_v57  ;;  %17632 = vmatpush3.bf16.msra.mxu1 %v22199_v34 }
 0xcab   : > { %17634 = vmatprep.subr.bf16.mxu1 %v22200_v38  ;;  %17290 = vmatprep.subr.msk.bf16.mxu0 %vm20856_vm13, %v22184_v14 }
 0xcad   : > { %15862 = vmatmul.mubr.f32.vlgmr.msra.gmra.mrb[8].mxu0 %v6162_v23  ;;  %16602 = vmatmul.mubr.f32.vlgmr.msra.gmra.mrb[48].mxu1 %v14169_v3 }
 0xcae   : > { %17292 = vmatpush3.bf16.msk.msra.mxu0 %vm20856_vm13, %v22184_v14  ;;  %15880 = vmatprep.mubr.f32.mxu0 %v6153_v39 }
 0xcaf   : > { %17636 = vmatpush3.bf16.msra.mxu1 %v22200_v38  ;;  %17294 = vmatprep.subr.msk.bf16.mxu0 %vm20874_vm3, %v22184_v14  ;;  %v7557_v38 = vand.u32 4294901760, %v14892_v24 }
 0xcb0   : > { %17638 = vmatprep.subr.bf16.mxu1 %v22201_v2  ;;  %16612 = vmatprep.mubr.f32.mxu1 %v21011_v5 }
 0xcb2   : > { %17296 = vmatpush3.bf16.msk.msra.mxu0 %vm20874_vm3, %v22184_v14 }
 0xcb3   : > { %17640 = vmatpush3.bf16.msra.mxu1 %v22201_v2  ;;  %17298 = vmatprep.subr.msk.bf16.mxu0 %vm20896_vm2, %v22184_v14 }
 0xcb4   : > { %17642 = vmatprep.subr.bf16.mxu1 %v22202_v16 }
 0xcb6   : > { %17300 = vmatpush3.bf16.msk.msra.mxu0 %vm20896_vm2, %v22184_v14  ;;  %16613 = vmatmul.mubr.f32.vlgmr.msra.gmra.mrb[48].mxu1 %v21023_v45 }
 0xcb7   : > { %17644 = vmatpush3.bf16.msra.mxu1 %v22202_v16  ;;  %17302 = vmatprep.subr.msk.bf16.mxu0 %vm20917_vm5, %v22184_v14 }
 0xcb8   : > { %17646 = vmatprep.subr.bf16.mxu1 %v22203_v4  ;;  %16623 = vmatprep.mubr.f32.mxu1 %v21019_v12 }
 0xcba   : > { %17304 = vmatpush3.bf16.msk.msra.mxu0 %vm20917_vm5, %v22184_v14 }
 0xcbb   : > { %17648 = vmatpush3.bf16.msra.mxu1 %v22203_v4  ;;  %17306 = vmatprep.subr.bf16.mxu0 %v17305_v31 }
 0xcbc   : > { %17650 = vmatprep.subr.bf16.mxu1 %v22195_v52 }
 0xcbd   : > { %15881 = vmatmul.mubr.f32.vlgmr.msra.gmra.mrb[8].mxu0 %v6163_v50 }
 0xcbe   : > { %17308 = vmatpush3.bf16.msra.mxu0 %v17305_v31  ;;  %15899 = vmatprep.mubr.f32.mxu0 %v21015_v0  ;;  %v7635_v31 = vsub.f32 %v14892_v24, %v7557_v38 }
 0xcbf   : > { %16624 = vmatmul.mubr.f32.vlgmr.msra.gmra.mrb[48].mxu1 %v21034_v27  ;;  %17310 = vmatprep.subr.bf16.mxu0 %v17309_v59 }
 0xcc0   : > { %17652 = vmatpush3.bf16.msra.mxu1 %v22195_v52  ;;  %16634 = vmatprep.mubr.f32.mxu1 %v14157_v32  ;;  %v17356_v32 = vpack.c.bf16 %v7094_v62, %v7091_v17 }
 0xcc1   : > { %17654 = vmatprep.subr.bf16.mxu1 %v22199_v34 }
 0xcc2   : > { %17312 = vmatpush3.bf16.msra.mxu0 %v17309_v59 }
 0xcc3   : > { %17314 = vmatprep.subr.bf16.mxu0 %v20999_v21 }
 0xcc4   : > { %17656 = vmatpush3.bf16.msra.mxu1 %v22199_v34 }
 0xcc5   : > { %17658 = vmatprep.subr.bf16.mxu1 %v22204_v9 }
 0xcc6   : > { %17316 = vmatpush3.bf16.msra.mxu0 %v20999_v21 }
 0xcc7   : > { %16635 = vmatmul.mubr.f32.vlgmr.msra.gmra.mrb[48].mxu1 %v14167_v53  ;;  %17318 = vmatprep.subr.bf16.mxu0 %v21001_v7 }
 0xcc8   : > { %17660 = vmatpush3.bf16.msra.mxu1 %v22204_v9  ;;  %16645 = vmatprep.mubr.f32.mxu1 %v21011_v5  ;;  %v7636_v9 = vand.u32 4294901760, %v7635_v31 }
 0xcc9   : > { %17662 = vmatprep.subr.bf16.mxu1 %v22205_v18 }
 0xcca   : > { %17320 = vmatpush3.bf16.msra.mxu0 %v21001_v7 }
 0xccb   : > { %17322 = vmatprep.subr.msk.bf16.mxu0 %vm20856_vm13, %v22184_v14 }
 0xccc   : > { %17664 = vmatpush3.bf16.msra.mxu1 %v22205_v18 }
 0xccd   : > { %17666 = vmatprep.subr.bf16.mxu1 %v22195_v52  ;;  %15900 = vmatmul.mubr.f32.vlgmr.msra.gmra.mrb[8].mxu0 %v21026_v11 }
 0xcce   : > { %17324 = vmatpush3.bf16.msk.msra.mxu0 %vm20856_vm13, %v22184_v14  ;;  %15918 = vmatprep.mubr.f32.mxu0 %v21015_v0  ;;  %vm22209_vm13 = vmmov %vm22208_vm1 }
 0xccf   : > { %16646 = vmatmul.mubr.f32.vlgmr.msra.gmra.mrb[48].mxu1 %v21023_v45  ;;  %17326 = vmatprep.subr.msk.bf16.mxu0 %vm20874_vm3, %v22184_v14 }
 0xcd0   : > { %17668 = vmatpush3.bf16.msra.mxu1 %v22195_v52  ;;  %16656 = vmatprep.mubr.f32.mxu1 %v21011_v5  ;;  %v6628_v52 = vand.u32 4294901760, %v6620_v13 }
 0xcd1   : > { %17670 = vmatprep.subr.bf16.mxu1 %v22199_v34 }
 0xcd2   : > { %17328 = vmatpush3.bf16.msk.msra.mxu0 %vm20874_vm3, %v22184_v14  ;;  %v17338_v61 = vpack.c.bf16 %v6628_v52, %v6625_v58  ;;  %v7637_v58 = vsub.f32 %v7635_v31, %v7636_v9  ;;  %vm22212_vm3 = vmmov %vm22208_vm1 }
 0xcd3   : > { %17330 = vmatprep.subr.msk.bf16.mxu0 %vm20896_vm2, %v22184_v14 }
 0xcd4   : > { %17672 = vmatpush3.bf16.msra.mxu1 %v22199_v34  ;;  %v14893_v34 = vld [vmem:[%s21634_s13 + $0x28] sm:$0xff] }
 0xcd5   : > { %v7560_v2 = vand.u32 4294901760, %v14893_v34 }
 0xcd6   : > { %17332 = vmatpush3.bf16.msk.msra.mxu0 %vm20896_vm2, %v22184_v14  ;;  %vm22215_vm2 = vmmov %vm22213_vm0 }
 0xcd7   : > { %17334 = vmatprep.subr.msk.bf16.mxu0 %vm20917_vm5, %v22184_v14  ;;  %16657 = vmatmul.mubr.f32.vlgmr.msra.gmra.mrb[48].mxu1 %v21023_v45  ;;  %v7176_v45 = vsub.f32 %v14891_v1, %v7094_v62  ;;  %v7642_v4 = vsub.f32 %v14893_v34, %v7560_v2 }
 0xcd9   : > { %v7177_v33 = vand.u32 4294901760, %v7176_v45  ;;  %v17362_v36 = vpack.c.bf16 %v7176_v45, %v7169_v19  ;;  %v7643_v18 = vand.u32 4294901760, %v7642_v4 }
 0xcda   : > { %17336 = vmatpush3.bf16.msk.msra.mxu0 %vm20917_vm5, %v22184_v14  ;;  %v6710_v14 = vsub.f32 %v6620_v13, %v6628_v52  ;;  %v17374_v13 = vpack.c.bf16 %v7560_v2, %v7557_v38  ;;  %vm22218_vm5 = vmmov %vm22213_vm0 }
 0xcdb   : > { %17337 = vmatprep.subr.bf16.mxu0 %v22137_v51  ;;  %v7178_v44 = vsub.f32 %v7176_v45, %v7177_v33  ;;  %v7644_v52 = vsub.f32 %v7642_v4, %v7643_v18 }
 0xcdc   : > { %v6711_v55 = vand.u32 4294901760, %v6710_v14  ;;  %v17344_v43 = vpack.c.bf16 %v6710_v14, %v6703_v49  ;;  %v7638_v49 = vand.u32 4294901760, %v7637_v58 }
 0xcdd   : > { %15919 = vmatmul.mubr.f32.vlgmr.msra.gmra.mrb[8].mxu0 %v21026_v11  ;;  %v7170_v11 = vand.u32 4294901760, %v7169_v19  ;;  %v7179_v6 = vand.u32 4294901760, %v7178_v44 }
 0xcde   : > { %15925 = vmatprep.mubr.msk.f32.mxu0 %vm22206_vm11, %v22196_v29  ;;  %17339 = vmatpush3.bf16.msra.mxu0 %v17338_v61  ;;  %v6712_v10 = vsub.f32 %v6710_v14, %v6711_v55  ;;  %v17350_v57 = vpack.c.bf16 %v6711_v55, %v6704_v60  ;;  %v7645_v14 = vand.u32 4294901760, %v7644_v52 }
 0xcdf   : > { %17340 = vmatprep.subr.bf16.mxu0 %v22137_v51  ;;  %v7171_v23 = vsub.f32 %v7169_v19, %v7170_v11  ;;  %v17368_v25 = vpack.c.bf16 %v7177_v33, %v7170_v11  ;;  %v14896_v11 = vld [vmem:[%s21634_s13 + $0x40] sm:$0xff]  ;;  %v14897_v33 = vld [vmem:[%s21634_s13 + $0x48] sm:$0xff] }
 0xce0   : > { %v6713_v63 = vand.u32 4294901760, %v6712_v10  ;;  %v17377_v55 = vpack.c.bf16 %v7645_v14, %v7638_v49  ;;  %v17380_v10 = vpack.c.bf16 %v7642_v4, %v7635_v31 }
 0xce1   : > { %v7172_v50 = vand.u32 4294901760, %v7171_v23  ;;  %v8492_v23 = vand.u32 4294901760, %v14897_v33 }
 0xce2   : > { %v17341_v54 = vpack.c.bf16 %v6713_v63, %v6706_v41  ;;  %v17386_v41 = vpack.c.bf16 %v7643_v18, %v7636_v9  ;;  %v14894_v63 = vld [vmem:[%s21634_s13 + $0x30] sm:$0xff]  ;;  %v14899_v18 = vld [vmem:[%s21634_s13 + $0x58] sm:$0xff] }
 0xce3   : > { %v17359_v48 = vpack.c.bf16 %v7179_v6, %v7172_v50  ;;  %v8574_v50 = vsub.f32 %v14897_v33, %v8492_v23  ;;  %v14898_v9 = vld [vmem:[%s21634_s13 + $0x50] sm:$0xff]  ;;  %v8958_v58 = vand.u32 4294901760, %v14899_v18 }
 0xce5   : > { %v9040_v49 = vsub.f32 %v14899_v18, %v8958_v58 }
 0xd78   : > { %v15825_v21 = vpop.f32.mrb[46].mxu1 }
 0xd79   : > { %v6157_v7 = vpop.f32.mrb[47].mxu1 }
 0xdb0   : > { %v15920_v42 = vpop.f32.mrb[8].mxu0 }
 0xdb1   : > { %v21144_v30 = vadd.f32 %v15920_v42, %v15825_v21  ;;  %v6608_v15 = vpop.f32.mrb[9].mxu0 }
 0xdb2   : > { %v21146_v28 = vadd.f32 %v6608_v15, %v6157_v7 }
 0xdb4   : > { %v6622_v47 = vsel %vm22207_vm4, %v21146_v28, 0  ;;  %v7087_v0 = vrot.slane %v21146_v28, 1  ;;  %v7553_v3 = vrot.slane %v21146_v28, 2  ;;  %vm22221_vm4 = vcmask 7168  }
 0xdb5   : > { %v6691_v35 = vand.u32 4294901760, %v6622_v47 }
 0xdb6   : > { %v7088_v12 = vsel %vm22208_vm1, %v7087_v0, 0  ;;  %v7554_v16 = vsel %vm22209_vm13, %v7553_v3, 0  ;;  %vm22222_vm1 = vmmov %vm22213_vm0 }
 0xdb7   : > { %v6692_v20 = vsub.f32 %v6622_v47, %v6691_v35  ;;  %v7157_v22 = vand.u32 4294901760, %v7088_v12  ;;  %v7623_v59 = vand.u32 4294901760, %v7554_v16  ;;  %vm22223_vm13 = vmmov %vm22213_vm0 }
 0xdb9   : > { %v6693_v5 = vand.u32 4294901760, %v6692_v20  ;;  %v7158_v39 = vsub.f32 %v7088_v12, %v7157_v22  ;;  %v7624_v40 = vsub.f32 %v7554_v16, %v7623_v59 }
 0xdbb   : > { %v6694_v46 = vsub.f32 %v6692_v20, %v6693_v5  ;;  %v7159_v27 = vand.u32 4294901760, %v7158_v39 }
 0xdbd   : > { %v6695_v8 = vand.u32 4294901760, %v6694_v46  ;;  %v7160_v56 = vsub.f32 %v7158_v39, %v7159_v27 }
 0xdbf   : > { %15926 = vmatmul.mubr.f32.vlgmr.msra.gmra.mrb[10].mxu0 %v6695_v8  ;;  %v7161_v53 = vand.u32 4294901760, %v7160_v56 }
 0xdc0   : > { %17342 = vmatpush3.bf16.msra.mxu0 %v17341_v54  ;;  %15932 = vmatprep.mubr.msk.f32.mxu0 %vm22206_vm11, %v22196_v29  ;;  %v14895_v54 = vld [vmem:[%s21634_s13 + $0x38] sm:$0xff] }
 0xdc1   : > { %17343 = vmatprep.subr.bf16.mxu0 %v22137_v51  ;;  %v8026_v21 = vand.u32 4294901760, %v14895_v54 }
 0xdc3   : > { %v8108_v15 = vsub.f32 %v14895_v54, %v8026_v21 }
 0xdc7   : > { %15933 = vmatmul.mubr.f32.vlgmr.msra.gmra.mrb[10].mxu0 %v6691_v35 }
 0xdc8   : > { %17345 = vmatpush3.bf16.msra.mxu0 %v17344_v43  ;;  %15939 = vmatprep.mubr.msk.f32.mxu0 %vm22206_vm11, %v22196_v29  ;;  %v8019_v43 = vrot.slane %v21146_v28, 3 }
 0xdc9   : > { %17346 = vmatprep.subr.bf16.mxu0 %v22137_v51 }
 0xdca   : > { %v8020_v7 = vsel %vm22210_vm15, %v8019_v43, 0  ;;  %vm14074_vm15 = vcmask 73728  }
 0xdcb   : > { %v8089_v47 = vand.u32 4294901760, %v8020_v7 }
 0xdcf   : > { %15940 = vmatmul.mubr.f32.vlgmr.msra.gmra.mrb[10].mxu0 %v6692_v20  ;;  %v8109_v20 = vand.u32 4294901760, %v8108_v15 }
 0xdd0   : > { %17348 = vmatpush3.bf16.msra.mxu0 %v17338_v61  ;;  %15946 = vmatprep.mubr.msk.f32.mxu0 %vm22206_vm11, %v22196_v29 }
 0xdd1   : > { %17349 = vmatprep.subr.bf16.mxu0 %v22137_v51  ;;  %v8110_v26 = vsub.f32 %v8108_v15, %v8109_v20 }
 0xdd3   : > { %v8111_v17 = vand.u32 4294901760, %v8110_v26 }
 0xdd7   : > { %15947 = vmatmul.mubr.f32.vlgmr.msra.gmra.mrb[10].mxu0 %v6693_v5  ;;  %v8090_v5 = vsub.f32 %v8020_v7, %v8089_v47 }
 0xdd8   : > { %17351 = vmatpush3.bf16.msra.mxu0 %v17350_v57  ;;  %15953 = vmatprep.mubr.msk.f32.mxu0 %vm22206_vm11, %v22196_v29  ;;  %v8023_v57 = vand.u32 4294901760, %v14894_v63 }
 0xdd9   : > { %17352 = vmatprep.subr.bf16.mxu0 %v22137_v51  ;;  %v8091_v1 = vand.u32 4294901760, %v8090_v5 }
 0xdda   : > { %v8101_v42 = vsub.f32 %v14894_v63, %v8023_v57  ;;  %v17392_v46 = vpack.c.bf16 %v8026_v21, %v8023_v57 }
 0xddb   : > { %v8092_v62 = vsub.f32 %v8090_v5, %v8091_v1 }
 0xddc   : > { %v17398_v45 = vpack.c.bf16 %v8108_v15, %v8101_v42 }
 0xddd   : > { %v8093_v19 = vand.u32 4294901760, %v8092_v62 }
 0xddf   : > { %15954 = vmatmul.mubr.f32.vlgmr.msra.gmra.mrb[10].mxu0 %v6691_v35 }
 0xde0   : > { %17354 = vmatpush3.bf16.msra.mxu0 %v17338_v61  ;;  %15960 = vmatprep.mubr.msk.f32.mxu0 %vm22206_vm11, %v22196_v29  ;;  %v7625_v61 = vand.u32 4294901760, %v7624_v40 }
 0xde1   : > { %17355 = vmatprep.subr.bf16.mxu0 %v22137_v51 }
 0xde2   : > { %v7626_v60 = vsub.f32 %v7624_v40, %v7625_v61 }
 0xde4   : > { %v7627_v37 = vand.u32 4294901760, %v7626_v60 }
 0xde7   : > { %15961 = vmatmul.mubr.f32.vlgmr.msra.gmra.mrb[10].mxu0 %v6691_v35  ;;  %v8102_v35 = vand.u32 4294901760, %v8101_v42 }
 0xde8   : > { %17357 = vmatpush3.bf16.msra.mxu0 %v17356_v32  ;;  %15967 = vmatprep.mubr.msk.f32.mxu0 %vm22206_vm11, %v22196_v29 }
 0xde9   : > { %17358 = vmatprep.subr.bf16.mxu0 %v22137_v51  ;;  %v8103_v8 = vsub.f32 %v8101_v42, %v8102_v35 }
 0xdeb   : > { %v8104_v0 = vand.u32 4294901760, %v8103_v8 }
 0xded   : > { %v17395_v12 = vpack.c.bf16 %v8111_v17, %v8104_v0 }
 0xdef   : > { %15968 = vmatmul.mubr.f32.vlgmr.msra.gmra.mrb[10].mxu0 %v7161_v53 }
 0xdf0   : > { %17360 = vmatpush3.bf16.msra.mxu0 %v17359_v48  ;;  %15974 = vmatprep.mubr.msk.f32.mxu0 %vm22206_vm11, %v22196_v29  ;;  %v8575_v48 = vand.u32 4294901760, %v8574_v50 }
 0xdf1   : > { %17361 = vmatprep.subr.bf16.mxu0 %v22137_v51 }
 0xdf2   : > { %v8576_v24 = vsub.f32 %v8574_v50, %v8575_v48 }
 0xdf4   : > { %v8577_v38 = vand.u32 4294901760, %v8576_v24 }
 0xdf7   : > { %15975 = vmatmul.mubr.f32.vlgmr.msra.gmra.mrb[10].mxu0 %v7157_v22 }
 0xdf8   : > { %17363 = vmatpush3.bf16.msra.mxu0 %v17362_v36  ;;  %15981 = vmatprep.mubr.msk.f32.mxu0 %vm22206_vm11, %v22196_v29 }
 0xdf9   : > { %17364 = vmatprep.subr.bf16.mxu0 %v22137_v51 }
 0xdff   : > { %15982 = vmatmul.mubr.f32.vlgmr.msra.gmra.mrb[10].mxu0 %v7158_v39  ;;  %v8485_v39 = vrot.slane %v21146_v28, 4 }
 0xe00   : > { %17366 = vmatpush3.bf16.msra.mxu0 %v17356_v32  ;;  %15988 = vmatprep.mubr.msk.f32.mxu0 %vm22206_vm11, %v22196_v29 }
 0xe01   : > { %17367 = vmatprep.subr.bf16.mxu0 %v22137_v51  ;;  %v8486_v44 = vsel %vm22211_vm10, %v8485_v39, 0 }
 0xe02   : > { %v8555_v6 = vand.u32 4294901760, %v8486_v44 }
 0xe04   : > { %v8556_v53 = vsub.f32 %v8486_v44, %v8555_v6 }
 0xe06   : > { %v8557_v34 = vand.u32 4294901760, %v8556_v53 }
 0xe07   : > { %15989 = vmatmul.mubr.f32.vlgmr.msra.gmra.mrb[10].mxu0 %v7159_v27 }
 0xe08   : > { %17369 = vmatpush3.bf16.msra.mxu0 %v17368_v25  ;;  %15995 = vmatprep.mubr.msk.f32.mxu0 %vm22206_vm11, %v22196_v29  ;;  %v8558_v2 = vsub.f32 %v8556_v53, %v8557_v34 }
 0xe09   : > { %17370 = vmatprep.subr.bf16.mxu0 %v22137_v51 }
 0xe0a   : > { %v8559_v31 = vand.u32 4294901760, %v8558_v2 }
 0xe0f   : > { %15996 = vmatmul.mubr.f32.vlgmr.msra.gmra.mrb[10].mxu0 %v7157_v22 }
 0xe10   : > { %17372 = vmatpush3.bf16.msra.mxu0 %v17356_v32  ;;  %16002 = vmatprep.mubr.msk.f32.mxu0 %vm22206_vm11, %v22196_v29  ;;  %v8489_v32 = vand.u32 4294901760, %v14896_v11 }
 0xe11   : > { %17373 = vmatprep.subr.bf16.mxu0 %v22137_v51 }
 0xe12   : > { %v8567_v27 = vsub.f32 %v14896_v11, %v8489_v32  ;;  %v17410_v36 = vpack.c.bf16 %v8492_v23, %v8489_v32 }
 0xe14   : > { %v8568_v56 = vand.u32 4294901760, %v8567_v27  ;;  %v17416_v4 = vpack.c.bf16 %v8574_v50, %v8567_v27 }
 0xe16   : > { %v8569_v25 = vsub.f32 %v8567_v27, %v8568_v56 }
 0xe17   : > { %16003 = vmatmul.mubr.f32.vlgmr.msra.gmra.mrb[10].mxu0 %v7157_v22  ;;  %v17404_v22 = vpack.c.bf16 %v8109_v20, %v8102_v35  ;;  %v14900_v35 = vld [vmem:[%s21634_s13 + $0x60] sm:$0xff]  ;;  %v14901_v20 = vld [vmem:[%s21634_s13 + $0x68] sm:$0xff] }
 0xe18   : > { %17375 = vmatpush3.bf16.msra.mxu0 %v17374_v13  ;;  %16009 = vmatprep.mubr.msk.f32.mxu0 %vm22206_vm11, %v22196_v29  ;;  %v8570_v3 = vand.u32 4294901760, %v8569_v25  ;;  %v9424_v8 = vand.u32 4294901760, %v14901_v20 }
 0xe19   : > { %17376 = vmatprep.subr.bf16.mxu0 %v22137_v51 }
 0xe1a   : > { %v17413_v16 = vpack.c.bf16 %v8577_v38, %v8570_v3  ;;  %v9506_v0 = vsub.f32 %v14901_v20, %v9424_v8 }
 0xe1f   : > { %16010 = vmatmul.mubr.f32.vlgmr.msra.gmra.mrb[10].mxu0 %v7627_v37 }
 0xe20   : > { %17378 = vmatpush3.bf16.msra.mxu0 %v17377_v55  ;;  %16016 = vmatprep.mubr.msk.f32.mxu0 %vm22206_vm11, %v22196_v29  ;;  %v9041_v55 = vand.u32 4294901760, %v9040_v49 }
 0xe21   : > { %17379 = vmatprep.subr.bf16.mxu0 %v22137_v51 }
 0xe22   : > { %v9042_v63 = vsub.f32 %v9040_v49, %v9041_v55 }
 0xe24   : > { %v9043_v57 = vand.u32 4294901760, %v9042_v63 }
 0xe27   : > { %16017 = vmatmul.mubr.f32.vlgmr.msra.gmra.mrb[10].mxu0 %v7623_v59 }
 0xe28   : > { %17381 = vmatpush3.bf16.msra.mxu0 %v17380_v10  ;;  %16023 = vmatprep.mubr.msk.f32.mxu0 %vm22206_vm11, %v22196_v29 }
 0xe29   : > { %17382 = vmatprep.subr.bf16.mxu0 %v22137_v51 }
 0xe2f   : > { %16024 = vmatmul.mubr.f32.vlgmr.msra.gmra.mrb[10].mxu0 %v7624_v40  ;;  %v8951_v40 = vrot.slane %v21146_v28, 5 }
 0xe30   : > { %17384 = vmatpush3.bf16.msra.mxu0 %v17374_v13  ;;  %16030 = vmatprep.mubr.msk.f32.mxu0 %vm22206_vm11, %v22196_v29 }
 0xe31   : > { %17385 = vmatprep.subr.bf16.mxu0 %v22137_v51  ;;  %v8952_v52 = vsel %vm22212_vm3, %v8951_v40, 0 }
 0xe32   : > { %v9021_v14 = vand.u32 4294901760, %v8952_v52 }
 0xe34   : > { %v9022_v37 = vsub.f32 %v8952_v52, %v9021_v14 }
 0xe36   : > { %v9023_v54 = vand.u32 4294901760, %v9022_v37 }
 0xe37   : > { %16031 = vmatmul.mubr.f32.vlgmr.msra.gmra.mrb[10].mxu0 %v7625_v61 }
 0xe38   : > { %17387 = vmatpush3.bf16.msra.mxu0 %v17386_v41  ;;  %16037 = vmatprep.mubr.msk.f32.mxu0 %vm22206_vm11, %v22196_v29  ;;  %v9024_v21 = vsub.f32 %v9022_v37, %v9023_v54 }
 0xe39   : > { %17388 = vmatprep.subr.bf16.mxu0 %v22137_v51 }
 0xe3a   : > { %v9025_v42 = vand.u32 4294901760, %v9024_v21 }
 0xe3f   : > { %16038 = vmatmul.mubr.f32.vlgmr.msra.gmra.mrb[10].mxu0 %v7623_v59 }
 0xe40   : > { %17390 = vmatpush3.bf16.msra.mxu0 %v17374_v13  ;;  %16044 = vmatprep.mubr.msk.f32.mxu0 %vm22206_vm11, %v22196_v29  ;;  %v8955_v13 = vand.u32 4294901760, %v14898_v9 }
 0xe41   : > { %17391 = vmatprep.subr.bf16.mxu0 %v22137_v51 }
 0xe42   : > { %v9033_v61 = vsub.f32 %v14898_v9, %v8955_v13  ;;  %v17428_v10 = vpack.c.bf16 %v8958_v58, %v8955_v13 }
 0xe44   : > { %v9034_v60 = vand.u32 4294901760, %v9033_v61  ;;  %v17434_v15 = vpack.c.bf16 %v9040_v49, %v9033_v61 }
 0xe46   : > { %v9035_v41 = vsub.f32 %v9033_v61, %v9034_v60 }
 0xe47   : > { %16045 = vmatmul.mubr.f32.vlgmr.msra.gmra.mrb[10].mxu0 %v7623_v59  ;;  %v17422_v59 = vpack.c.bf16 %v8575_v48, %v8568_v56  ;;  %v14902_v56 = vld [vmem:[%s21634_s13 + $0x70] sm:$0xff]  ;;  %v14903_v48 = vld [vmem:[%s21634_s13 + $0x78] sm:$0xff] }
 0xe48   : > { %17393 = vmatpush3.bf16.msra.mxu0 %v17392_v46  ;;  %16051 = vmatprep.mubr.msk.f32.mxu0 %vm22206_vm11, %v22196_v29  ;;  %v9036_v43 = vand.u32 4294901760, %v9035_v41  ;;  %v9890_v25 = vand.u32 4294901760, %v14903_v48 }
 0xe49   : > { %17394 = vmatprep.subr.bf16.mxu0 %v22137_v51 }
 0xe4a   : > { %v17431_v7 = vpack.c.bf16 %v9043_v57, %v9036_v43  ;;  %v9972_v3 = vsub.f32 %v14903_v48, %v9890_v25 }
 0xe4c   : > { %v9973_v2 = vand.u32 4294901760, %v9972_v3 }
 0xe4f   : > { %16052 = vmatmul.mubr.f32.vlgmr.msra.gmra.mrb[10].mxu0 %v8093_v19 }
 0xe50   : > { %17396 = vmatpush3.bf16.msra.mxu0 %v17395_v12  ;;  %16058 = vmatprep.mubr.msk.f32.mxu0 %vm22206_vm11, %v22196_v29  ;;  %v9507_v12 = vand.u32 4294901760, %v9506_v0 }
 0xe51   : > { %17397 = vmatprep.subr.bf16.mxu0 %v22137_v51 }
 0xe52   : > { %v9508_v11 = vsub.f32 %v9506_v0, %v9507_v12 }
 0xe54   : > { %v9509_v32 = vand.u32 4294901760, %v9508_v11 }
 0xe57   : > { %16059 = vmatmul.mubr.f32.vlgmr.msra.gmra.mrb[10].mxu0 %v8089_v47 }
 0xe58   : > { %17399 = vmatpush3.bf16.msra.mxu0 %v17398_v45  ;;  %16065 = vmatprep.mubr.msk.f32.mxu0 %vm22206_vm11, %v22196_v29 }
 0xe59   : > { %17400 = vmatprep.subr.bf16.mxu0 %v22137_v51 }
 0xe5f   : > { %16066 = vmatmul.mubr.f32.vlgmr.msra.gmra.mrb[10].mxu0 %v8090_v5  ;;  %v9417_v5 = vrot.slane %v21146_v28, 6 }
 0xe60   : > { %17402 = vmatpush3.bf16.msra.mxu0 %v17392_v46  ;;  %16072 = vmatprep.mubr.msk.f32.mxu0 %vm22206_vm11, %v22196_v29 }
 0xe61   : > { %17403 = vmatprep.subr.bf16.mxu0 %v22137_v51  ;;  %v9418_v26 = vsel %vm22213_vm0, %v9417_v5, 0 }
 0xe62   : > { %v9487_v17 = vand.u32 4294901760, %v9418_v26 }
 0xe64   : > { %v9488_v19 = vsub.f32 %v9418_v26, %v9487_v17 }
 0xe66   : > { %v9489_v33 = vand.u32 4294901760, %v9488_v19 }
 0xe67   : > { %16073 = vmatmul.mubr.f32.vlgmr.msra.gmra.mrb[10].mxu0 %v8091_v1 }
 0xe68   : > { %17405 = vmatpush3.bf16.msra.mxu0 %v17404_v22  ;;  %16079 = vmatprep.mubr.msk.f32.mxu0 %vm22206_vm11, %v22196_v29  ;;  %v9490_v23 = vsub.f32 %v9488_v19, %v9489_v33 }
 0xe69   : > { %17406 = vmatprep.subr.bf16.mxu0 %v22137_v51 }
 0xe6a   : > { %v9491_v27 = vand.u32 4294901760, %v9490_v23 }
 0xe6f   : > { %16080 = vmatmul.mubr.f32.vlgmr.msra.gmra.mrb[10].mxu0 %v8089_v47 }
 0xe70   : > { %17408 = vmatpush3.bf16.msra.mxu0 %v17392_v46  ;;  %16086 = vmatprep.mubr.msk.f32.mxu0 %vm22206_vm11, %v22196_v29  ;;  %v9421_v46 = vand.u32 4294901760, %v14900_v35 }
 0xe71   : > { %17409 = vmatprep.subr.bf16.mxu0 %v22137_v51 }
 0xe72   : > { %v9499_v1 = vsub.f32 %v14900_v35, %v9421_v46  ;;  %v17446_v45 = vpack.c.bf16 %v9424_v8, %v9421_v46 }
 0xe74   : > { %v9500_v62 = vand.u32 4294901760, %v9499_v1  ;;  %v17452_v50 = vpack.c.bf16 %v9506_v0, %v9499_v1  ;;  %v14906_v0 = vld [vmem:[%s21634_s13 + $0x90] sm:$0xff] }
 0xe76   : > { %v9501_v22 = vsub.f32 %v9499_v1, %v9500_v62 }
 0xe77   : > { %16087 = vmatmul.mubr.f32.vlgmr.msra.gmra.mrb[10].mxu0 %v8089_v47  ;;  %v17440_v47 = vpack.c.bf16 %v9041_v55, %v9034_v60  ;;  %v14905_v60 = vld [vmem:[%s21634_s13 + $0x88] sm:$0xff] }
 0xe78   : > { %17411 = vmatpush3.bf16.msra.mxu0 %v17410_v36  ;;  %16093 = vmatprep.mubr.msk.f32.mxu0 %vm22206_vm11, %v22196_v29  ;;  %v9502_v39 = vand.u32 4294901760, %v9501_v22 }
 0xe79   : > { %17412 = vmatprep.subr.bf16.mxu0 %v22137_v51 }
 0xe7a   : > { %v17449_v44 = vpack.c.bf16 %v9509_v32, %v9502_v39 }
 0xe7f   : > { %16094 = vmatmul.mubr.f32.vlgmr.msra.gmra.mrb[10].mxu0 %v8559_v31 }
 0xe80   : > { %17414 = vmatpush3.bf16.msra.mxu0 %v17413_v16  ;;  %16100 = vmatprep.mubr.msk.f32.mxu0 %vm22206_vm11, %v22196_v29 }
 0xe81   : > { %17415 = vmatprep.subr.bf16.mxu0 %v22137_v51 }
 0xe87   : > { %16101 = vmatmul.mubr.f32.vlgmr.msra.gmra.mrb[10].mxu0 %v8555_v6 }
 0xe88   : > { %17417 = vmatpush3.bf16.msra.mxu0 %v17416_v4  ;;  %16107 = vmatprep.mubr.msk.f32.mxu0 %vm22206_vm11, %v22196_v29 }
 0xe89   : > { %17418 = vmatprep.subr.bf16.mxu0 %v22137_v51 }
 0xe8f   : > { %16108 = vmatmul.mubr.f32.vlgmr.msra.gmra.mrb[10].mxu0 %v8556_v53  ;;  %v9883_v53 = vrot.slane %v21146_v28, 7 }
 0xe90   : > { %17420 = vmatpush3.bf16.msra.mxu0 %v17410_v36  ;;  %16114 = vmatprep.mubr.msk.f32.mxu0 %vm22206_vm11, %v22196_v29 }
 0xe91   : > { %17421 = vmatprep.subr.bf16.mxu0 %v22137_v51  ;;  %v9884_v24 = vsel %vm22214_vm9, %v9883_v53, 0 }
 0xe92   : > { %v9953_v38 = vand.u32 4294901760, %v9884_v24 }
 0xe94   : > { %v9954_v16 = vsub.f32 %v9884_v24, %v9953_v38 }
 0xe96   : > { %v9955_v9 = vand.u32 4294901760, %v9954_v16 }
 0xe97   : > { %16115 = vmatmul.mubr.f32.vlgmr.msra.gmra.mrb[10].mxu0 %v8557_v34 }
 0xe98   : > { %17423 = vmatpush3.bf16.msra.mxu0 %v17422_v59  ;;  %16121 = vmatprep.mubr.msk.f32.mxu0 %vm22206_vm11, %v22196_v29  ;;  %v9974_v59 = vsub.f32 %v9972_v3, %v9973_v2  ;;  %v9956_v13 = vsub.f32 %v9954_v16, %v9955_v9 }
 0xe99   : > { %17424 = vmatprep.subr.bf16.mxu0 %v22137_v51 }
 0xe9a   : > { %v9975_v40 = vand.u32 4294901760, %v9974_v59  ;;  %v9957_v52 = vand.u32 4294901760, %v9956_v13 }
 0xe9f   : > { %16122 = vmatmul.mubr.f32.vlgmr.msra.gmra.mrb[10].mxu0 %v8555_v6 }
 0xea0   : > { %17426 = vmatpush3.bf16.msra.mxu0 %v17410_v36  ;;  %16128 = vmatprep.mubr.msk.f32.mxu0 %vm22206_vm11, %v22196_v29  ;;  %v9887_v36 = vand.u32 4294901760, %v14902_v56 }
 0xea1   : > { %17427 = vmatprep.subr.bf16.mxu0 %v22137_v51 }
 0xea2   : > { %v9965_v34 = vsub.f32 %v14902_v56, %v9887_v36  ;;  %v17464_v31 = vpack.c.bf16 %v9890_v25, %v9887_v36 }
 0xea4   : > { %v9966_v28 = vand.u32 4294901760, %v9965_v34  ;;  %v17470_v61 = vpack.c.bf16 %v9972_v3, %v9965_v34  ;;  %v14908_v3 = vld [vmem:[%s21634_s13 + $0xa0] sm:$0xff] }
 0xea6   : > { %v9967_v4 = vsub.f32 %v9965_v34, %v9966_v28  ;;  %v17476_v49 = vpack.c.bf16 %v9973_v2, %v9966_v28  ;;  %v11281_v28 = vrot.slane %v21144_v30, 2  ;;  %v11285_v2 = vand.u32 4294901760, %v14908_v3 }
 0xea7   : > { %16129 = vmatmul.mubr.f32.vlgmr.msra.gmra.mrb[10].mxu0 %v8555_v6  ;;  %v17458_v6 = vpack.c.bf16 %v9507_v12, %v9500_v62  ;;  %v10815_v62 = vrot.slane %v21144_v30, 1  ;;  %v10819_v12 = vand.u32 4294901760, %v14906_v0 }
 0xea8   : > { %17429 = vmatpush3.bf16.msra.mxu0 %v17428_v10  ;;  %16135 = vmatprep.mubr.msk.f32.mxu0 %vm22206_vm11, %v22196_v29  ;;  %v9968_v18 = vand.u32 4294901760, %v9967_v4  ;;  %v11363_v4 = vsub.f32 %v14908_v3, %v11285_v2 }
 0xea9   : > { %17430 = vmatprep.subr.bf16.mxu0 %v22137_v51  ;;  %v10897_v22 = vsub.f32 %v14906_v0, %v10819_v12 }
 0xeaa   : > { %v17467_v58 = vpack.c.bf16 %v9975_v40, %v9968_v18  ;;  %v11364_v18 = vand.u32 4294901760, %v11363_v4 }
 0xeab   : > { %v10898_v39 = vand.u32 4294901760, %v10897_v22 }
 0xeaf   : > { %16136 = vmatmul.mubr.f32.vlgmr.msra.gmra.mrb[10].mxu0 %v9025_v42 }
 0xeb0   : > { %17432 = vmatpush3.bf16.msra.mxu0 %v17431_v7  ;;  %16142 = vmatprep.mubr.msk.f32.mxu0 %vm22206_vm11, %v22196_v29 }
 0xeb1   : > { %17433 = vmatprep.subr.bf16.mxu0 %v22137_v51 }
 0xeb7   : > { %16143 = vmatmul.mubr.f32.vlgmr.msra.gmra.mrb[10].mxu0 %v9021_v14 }
 0xeb8   : > { %17435 = vmatpush3.bf16.msra.mxu0 %v17434_v15  ;;  %16149 = vmatprep.mubr.msk.f32.mxu0 %vm22206_vm11, %v22196_v29 }
 0xeb9   : > { %17436 = vmatprep.subr.bf16.mxu0 %v22137_v51 }
 0xebf   : > { %16150 = vmatmul.mubr.f32.vlgmr.msra.gmra.mrb[10].mxu0 %v9022_v37  ;;  %v10356_v37 = vand.u32 4294901760, %v14905_v60 }
 0xec0   : > { %17438 = vmatpush3.bf16.msra.mxu0 %v17428_v10  ;;  %16156 = vmatprep.mubr.msk.f32.mxu0 %vm22206_vm11, %v22196_v29 }
 0xec1   : > { %17439 = vmatprep.subr.bf16.mxu0 %v22137_v51  ;;  %v10438_v63 = vsub.f32 %v14905_v60, %v10356_v37 }
 0xec3   : > { %v10439_v57 = vand.u32 4294901760, %v10438_v63 }
 0xec5   : > { %v10440_v15 = vsub.f32 %v10438_v63, %v10439_v57 }
 0xec7   : > { %16157 = vmatmul.mubr.f32.vlgmr.msra.gmra.mrb[10].mxu0 %v9023_v54  ;;  %v10441_v20 = vand.u32 4294901760, %v10440_v15 }
 0xec8   : > { %17441 = vmatpush3.bf16.msra.mxu0 %v17440_v47  ;;  %16163 = vmatprep.mubr.msk.f32.mxu0 %vm22206_vm11, %v22196_v29 }
 0xec9   : > { %17442 = vmatprep.subr.bf16.mxu0 %v22137_v51 }
 0xecf   : > { %16164 = vmatmul.mubr.f32.vlgmr.msra.gmra.mrb[10].mxu0 %v9021_v14 }
 0xed0   : > { %17444 = vmatpush3.bf16.msra.mxu0 %v17428_v10  ;;  %16170 = vmatprep.mubr.msk.f32.mxu0 %vm22206_vm11, %v22196_v29  ;;  %v10350_v10 = vsel %vm22215_vm2, %v21144_v30, 0 }
 0xed1   : > { %17445 = vmatprep.subr.bf16.mxu0 %v22137_v51  ;;  %v10419_v54 = vand.u32 4294901760, %v10350_v10 }
 0xed3   : > { %v10420_v21 = vsub.f32 %v10350_v10, %v10419_v54 }
 0xed5   : > { %v10421_v47 = vand.u32 4294901760, %v10420_v21 }
 0xed7   : > { %16171 = vmatmul.mubr.f32.vlgmr.msra.gmra.mrb[10].mxu0 %v9021_v14  ;;  %v14904_v14 = vld [vmem:[%s21634_s13 + $0x80] sm:$0xff]  ;;  %v10422_v5 = vsub.f32 %v10420_v21, %v10421_v47 }
 0xed8   : > { %17447 = vmatpush3.bf16.msra.mxu0 %v17446_v45  ;;  %16177 = vmatprep.mubr.msk.f32.mxu0 %vm22206_vm11, %v22196_v29  ;;  %v10353_v55 = vand.u32 4294901760, %v14904_v14 }
 0xed9   : > { %17448 = vmatprep.subr.bf16.mxu0 %v22137_v51  ;;  %v10423_v8 = vand.u32 4294901760, %v10422_v5 }
 0xeda   : > { %v10431_v41 = vsub.f32 %v14904_v14, %v10353_v55  ;;  %v17482_v7 = vpack.c.bf16 %v10356_v37, %v10353_v55 }
 0xedc   : > { %v10432_v43 = vand.u32 4294901760, %v10431_v41  ;;  %v17488_v26 = vpack.c.bf16 %v10438_v63, %v10431_v41 }
 0xede   : > { %v10433_v42 = vsub.f32 %v10431_v41, %v10432_v43  ;;  %v17494_v1 = vpack.c.bf16 %v10439_v57, %v10432_v43  ;;  %v14911_v43 = vld [vmem:[%s21634_s13 + $0xb8] sm:$0xff]  ;;  %v11747_v57 = vrot.slane %v21144_v30, 3 }
 0xedf   : > { %16178 = vmatmul.mubr.f32.vlgmr.msra.gmra.mrb[10].mxu0 %v9491_v27  ;;  %v10899_v27 = vsub.f32 %v10897_v22, %v10898_v39 }
 0xee0   : > { %17450 = vmatpush3.bf16.msra.mxu0 %v17449_v44  ;;  %16184 = vmatprep.mubr.msk.f32.mxu0 %vm22206_vm11, %v22196_v29  ;;  %v10434_v35 = vand.u32 4294901760, %v10433_v42  ;;  %v11748_v42 = vsel %vm22218_vm5, %v11747_v57, 0 }
 0xee1   : > { %17451 = vmatprep.subr.bf16.mxu0 %v22137_v51  ;;  %v10900_v56 = vand.u32 4294901760, %v10899_v27 }
 0xee2   : > { %v17485_v46 = vpack.c.bf16 %v10441_v20, %v10434_v35  ;;  %v11817_v35 = vand.u32 4294901760, %v11748_v42 }
 0xee7   : > { %16185 = vmatmul.mubr.f32.vlgmr.msra.gmra.mrb[10].mxu0 %v9487_v17 }
 0xee8   : > { %17453 = vmatpush3.bf16.msra.mxu0 %v17452_v50  ;;  %16191 = vmatprep.mubr.msk.f32.mxu0 %vm22206_vm11, %v22196_v29 }
 0xee9   : > { %17454 = vmatprep.subr.bf16.mxu0 %v22137_v51 }
 0xeef   : > { %16192 = vmatmul.mubr.f32.vlgmr.msra.gmra.mrb[10].mxu0 %v9488_v19 }
 0xef0   : > { %17456 = vmatpush3.bf16.msra.mxu0 %v17446_v45  ;;  %16198 = vmatprep.mubr.msk.f32.mxu0 %vm22206_vm11, %v22196_v29 }
 0xef1   : > { %17457 = vmatprep.subr.bf16.mxu0 %v22137_v51 }
 0xef7   : > { %16199 = vmatmul.mubr.f32.vlgmr.msra.gmra.mrb[10].mxu0 %v9489_v33 }
 0xef8   : > { %17459 = vmatpush3.bf16.msra.mxu0 %v17458_v6  ;;  %16205 = vmatprep.mubr.msk.f32.mxu0 %vm22206_vm11, %v22196_v29 }
 0xef9   : > { %17460 = vmatprep.subr.bf16.mxu0 %v22137_v51 }
 0xeff   : > { %16206 = vmatmul.mubr.f32.vlgmr.msra.gmra.mrb[10].mxu0 %v9487_v17 }
 0xf00   : > { %17462 = vmatpush3.bf16.msra.mxu0 %v17446_v45  ;;  %16212 = vmatprep.mubr.msk.f32.mxu0 %vm22206_vm11, %v22196_v29  ;;  %v10816_v45 = vsel %vm22216_vm6, %v10815_v62, 0 }
 0xf01   : > { %17463 = vmatprep.subr.bf16.mxu0 %v22137_v51  ;;  %v10885_v33 = vand.u32 4294901760, %v10816_v45 }
 0xf03   : > { %v10886_v23 = vsub.f32 %v10816_v45, %v10885_v33 }
 0xf05   : > { %v10887_v6 = vand.u32 4294901760, %v10886_v23 }
 0xf07   : > { %16213 = vmatmul.mubr.f32.vlgmr.msra.gmra.mrb[10].mxu0 %v9487_v17  ;;  %v14907_v17 = vld [vmem:[%s21634_s13 + $0x98] sm:$0xff]  ;;  %v10888_v53 = vsub.f32 %v10886_v23, %v10887_v6 }
 0xf08   : > { %17465 = vmatpush3.bf16.msra.mxu0 %v17464_v31  ;;  %16219 = vmatprep.mubr.msk.f32.mxu0 %vm22206_vm11, %v22196_v29  ;;  %v10822_v19 = vand.u32 4294901760, %v14907_v17 }
 0xf09   : > { %17466 = vmatprep.subr.bf16.mxu0 %v22137_v51  ;;  %v10889_v25 = vand.u32 4294901760, %v10888_v53 }
 0xf0a   : > { %v10904_v11 = vsub.f32 %v14907_v17, %v10822_v19  ;;  %v17500_v44 = vpack.c.bf16 %v10822_v19, %v10819_v12 }
 0xf0c   : > { %v10905_v32 = vand.u32 4294901760, %v10904_v11  ;;  %v17506_v24 = vpack.c.bf16 %v10904_v11, %v10897_v22 }
 0xf0e   : > { %v10906_v50 = vsub.f32 %v10904_v11, %v10905_v32  ;;  %v17512_v34 = vpack.c.bf16 %v10905_v32, %v10898_v39  ;;  %v14913_v39 = vld [vmem:[%s21634_s13 + $0xc8] sm:$0xff]  ;;  %v12213_v32 = vrot.slane %v21144_v30, 4 }
 0xf0f   : > { %16220 = vmatmul.mubr.f32.vlgmr.msra.gmra.mrb[10].mxu0 %v9957_v52  ;;  %v11365_v52 = vsub.f32 %v11363_v4, %v11364_v18 }
 0xf10   : > { %17468 = vmatpush3.bf16.msra.mxu0 %v17467_v58  ;;  %16226 = vmatprep.mubr.msk.f32.mxu0 %vm22206_vm11, %v22196_v29  ;;  %v10907_v48 = vand.u32 4294901760, %v10906_v50  ;;  %v12214_v27 = vsel %vm22219_vm7, %v12213_v32, 0 }
 0xf11   : > { %17469 = vmatprep.subr.bf16.mxu0 %v22137_v51  ;;  %v11366_v14 = vand.u32 4294901760, %v11365_v52 }
 0xf12   : > { %v17503_v36 = vpack.c.bf16 %v10907_v48, %v10900_v56  ;;  %v12283_v56 = vand.u32 4294901760, %v12214_v27 }
 0xf17   : > { %16227 = vmatmul.mubr.f32.vlgmr.msra.gmra.mrb[10].mxu0 %v9953_v38 }
 0xf18   : > { %17471 = vmatpush3.bf16.msra.mxu0 %v17470_v61  ;;  %16233 = vmatprep.mubr.msk.f32.mxu0 %vm22206_vm11, %v22196_v29 }
 0xf19   : > { %17472 = vmatprep.subr.bf16.mxu0 %v22137_v51 }
 0xf1f   : > { %16234 = vmatmul.mubr.f32.vlgmr.msra.gmra.mrb[10].mxu0 %v9954_v16 }
 0xf20   : > { %17474 = vmatpush3.bf16.msra.mxu0 %v17464_v31  ;;  %16240 = vmatprep.mubr.msk.f32.mxu0 %vm22206_vm11, %v22196_v29 }
 0xf21   : > { %17475 = vmatprep.subr.bf16.mxu0 %v22137_v51 }
 0xf27   : > { %16241 = vmatmul.mubr.f32.vlgmr.msra.gmra.mrb[10].mxu0 %v9955_v9 }
 0xf28   : > { %17477 = vmatpush3.bf16.msra.mxu0 %v17476_v49  ;;  %16247 = vmatprep.mubr.msk.f32.mxu0 %vm22206_vm11, %v22196_v29 }
 0xf29   : > { %17478 = vmatprep.subr.bf16.mxu0 %v22137_v51 }
 0xf2f   : > { %16248 = vmatmul.mubr.f32.vlgmr.msra.gmra.mrb[10].mxu0 %v9953_v38 }
 0xf30   : > { %17480 = vmatpush3.bf16.msra.mxu0 %v17464_v31  ;;  %16254 = vmatprep.mubr.msk.f32.mxu0 %vm22206_vm11, %v22196_v29  ;;  %v11282_v31 = vsel %vm22217_vm12, %v11281_v28, 0 }
 0xf31   : > { %17481 = vmatprep.subr.bf16.mxu0 %v22137_v51  ;;  %v11351_v9 = vand.u32 4294901760, %v11282_v31 }
 0xf33   : > { %v11352_v13 = vsub.f32 %v11282_v31, %v11351_v9 }
 0xf35   : > { %v11353_v49 = vand.u32 4294901760, %v11352_v13 }
 0xf37   : > { %16255 = vmatmul.mubr.f32.vlgmr.msra.gmra.mrb[10].mxu0 %v9953_v38  ;;  %v14909_v38 = vld [vmem:[%s21634_s13 + $0xa8] sm:$0xff]  ;;  %v11354_v55 = vsub.f32 %v11352_v13, %v11353_v49 }
 0xf38   : > { %17483 = vmatpush3.bf16.msra.mxu0 %v17482_v7  ;;  %16261 = vmatprep.mubr.msk.f32.mxu0 %vm22206_vm11, %v22196_v29  ;;  %v11288_v16 = vand.u32 4294901760, %v14909_v38 }
 0xf39   : > { %17484 = vmatprep.subr.bf16.mxu0 %v22137_v51  ;;  %v11355_v10 = vand.u32 4294901760, %v11354_v55 }
 0xf3a   : > { %v11370_v59 = vsub.f32 %v14909_v38, %v11288_v16  ;;  %v17518_v58 = vpack.c.bf16 %v11288_v16, %v11285_v2 }
 0xf3c   : > { %v11371_v40 = vand.u32 4294901760, %v11370_v59  ;;  %v17524_v41 = vpack.c.bf16 %v11370_v59, %v11363_v4 }
 0xf3e   : > { %v11372_v61 = vsub.f32 %v11370_v59, %v11371_v40  ;;  %v17530_v63 = vpack.c.bf16 %v11371_v40, %v11364_v18  ;;  %v14915_v18 = vld [vmem:[%s21634_s13 + $0xd8] sm:$0xff]  ;;  %v12679_v40 = vrot.slane %v21144_v30, 5 }
 0xf3f   : > { %16262 = vmatmul.mubr.f32.vlgmr.msra.gmra.mrb[10].mxu0 %v10423_v8 }
 0xf40   : > { %17486 = vmatpush3.bf16.msra.mxu0 %v17485_v46  ;;  %16268 = vmatprep.mubr.msk.f32.mxu0 %vm22206_vm11, %v22196_v29  ;;  %v11373_v60 = vand.u32 4294901760, %v11372_v61  ;;  %v11818_v46 = vsub.f32 %v11748_v42, %v11817_v35  ;;  %v12680_v52 = vsel %vm22220_vm8, %v12679_v40, 0 }
 0xf41   : > { %17487 = vmatprep.subr.bf16.mxu0 %v22137_v51 }
 0xf42   : > { %v17521_v37 = vpack.c.bf16 %v11373_v60, %v11366_v14  ;;  %v11819_v0 = vand.u32 4294901760, %v11818_v46  ;;  %v21482_v14 = vand.u32 4294901760, %v12680_v52 }
 0xf44   : > { %v11820_v12 = vsub.f32 %v11818_v46, %v11819_v0 }
 0xf46   : > { %v11821_v45 = vand.u32 4294901760, %v11820_v12 }
 0xf47   : > { %16269 = vmatmul.mubr.f32.vlgmr.msra.gmra.mrb[10].mxu0 %v10419_v54 }
 0xf48   : > { %17489 = vmatpush3.bf16.msra.mxu0 %v17488_v26  ;;  %16275 = vmatprep.mubr.msk.f32.mxu0 %vm22206_vm11, %v22196_v29 }
 0xf49   : > { %17490 = vmatprep.subr.bf16.mxu0 %v22137_v51 }
 0xf4f   : > { %16276 = vmatmul.mubr.f32.vlgmr.msra.gmra.mrb[10].mxu0 %v10420_v21 }
 0xf50   : > { %17492 = vmatpush3.bf16.msra.mxu0 %v17482_v7  ;;  %16282 = vmatprep.mubr.msk.f32.mxu0 %vm22206_vm11, %v22196_v29 }
 0xf51   : > { %17493 = vmatprep.subr.bf16.mxu0 %v22137_v51 }
 0xf57   : > { %16283 = vmatmul.mubr.f32.vlgmr.msra.gmra.mrb[10].mxu0 %v10421_v47 }
 0xf58   : > { %17495 = vmatpush3.bf16.msra.mxu0 %v17494_v1  ;;  %16289 = vmatprep.mubr.msk.f32.mxu0 %vm22206_vm11, %v22196_v29 }
 0xf59   : > { %17496 = vmatprep.subr.bf16.mxu0 %v22137_v51 }
 0xf5f   : > { %16290 = vmatmul.mubr.f32.vlgmr.msra.gmra.mrb[10].mxu0 %v10419_v54 }
 0xf60   : > { %17498 = vmatpush3.bf16.msra.mxu0 %v17482_v7  ;;  %16296 = vmatprep.mubr.msk.f32.mxu0 %vm22206_vm11, %v22196_v29  ;;  %v11754_v7 = vand.u32 4294901760, %v14911_v43 }
 0xf61   : > { %17499 = vmatprep.subr.bf16.mxu0 %v22137_v51 }
 0xf62   : > { %v11836_v47 = vsub.f32 %v14911_v43, %v11754_v7 }
 0xf64   : > { %v11837_v5 = vand.u32 4294901760, %v11836_v47 }
 0xf66   : > { %v11838_v1 = vsub.f32 %v11836_v47, %v11837_v5 }
 0xf67   : > { %16297 = vmatmul.mubr.f32.vlgmr.msra.gmra.mrb[10].mxu0 %v10419_v54  ;;  %v14910_v54 = vld [vmem:[%s21634_s13 + $0xb0] sm:$0xff] }
 0xf68   : > { %17501 = vmatpush3.bf16.msra.mxu0 %v17500_v44  ;;  %16303 = vmatprep.mubr.msk.f32.mxu0 %vm22206_vm11, %v22196_v29  ;;  %v11751_v21 = vand.u32 4294901760, %v14910_v54  ;;  %v11839_v62 = vand.u32 4294901760, %v11838_v1  ;;  %v14916_v1 = vld [vmem:[%s21634_s13 + $0xe0] sm:$0xff] }
 0xf69   : > { %17502 = vmatprep.subr.bf16.mxu0 %v22137_v51 }
 0xf6a   : > { %v11829_v15 = vsub.f32 %v14910_v54, %v11751_v21  ;;  %v17536_v8 = vpack.c.bf16 %v11754_v7, %v11751_v21 }
 0xf6c   : > { %v11830_v20 = vand.u32 4294901760, %v11829_v15  ;;  %v17542_v22 = vpack.c.bf16 %v11836_v47, %v11829_v15  ;;  %v14079_v47 = vld [vmem:[%s21637_s16 + $0x8] sm:$0x3] }
 0xf6e   : > { %v11831_v26 = vsub.f32 %v11829_v15, %v11830_v20  ;;  %v17548_v11 = vpack.c.bf16 %v11837_v5, %v11830_v20  ;;  %v14078_v20 = vld [vmem:[%s21637_s16] sm:$0xff] }
 0xf6f   : > { %16304 = vmatmul.mubr.f32.vlgmr.msra.gmra.mrb[10].mxu0 %v10889_v25 }
 0xf70   : > { %17504 = vmatpush3.bf16.msra.mxu0 %v17503_v36  ;;  %16310 = vmatprep.mubr.msk.f32.mxu0 %vm22206_vm11, %v22196_v29  ;;  %v11832_v17 = vand.u32 4294901760, %v11831_v26  ;;  %v12284_v36 = vsub.f32 %v12214_v27, %v12283_v56 }
 0xf71   : > { %17505 = vmatprep.subr.bf16.mxu0 %v22137_v51 }
 0xf72   : > { %v17539_v19 = vpack.c.bf16 %v11839_v62, %v11832_v17  ;;  %v12285_v3 = vand.u32 4294901760, %v12284_v36  ;;  %v13145_v17 = vrot.slane %v21144_v30, 6  ;;  %v13149_v62 = vand.u32 4294901760, %v14916_v1 }
 0xf74   : > { %v12286_v2 = vsub.f32 %v12284_v36, %v12285_v3 }
 0xf76   : > { %v12287_v31 = vand.u32 4294901760, %v12286_v2 }
 0xf77   : > { %16311 = vmatmul.mubr.f32.vlgmr.msra.gmra.mrb[10].mxu0 %v10885_v33 }
 0xf78   : > { %17507 = vmatpush3.bf16.msra.mxu0 %v17506_v24  ;;  %16317 = vmatprep.mubr.msk.f32.mxu0 %vm22206_vm11, %v22196_v29 }
 0xf79   : > { %17508 = vmatprep.subr.bf16.mxu0 %v22137_v51 }
 0xf7f   : > { %16318 = vmatmul.mubr.f32.vlgmr.msra.gmra.mrb[10].mxu0 %v10886_v23 }
 0xf80   : > { %17510 = vmatpush3.bf16.msra.mxu0 %v17500_v44  ;;  %16324 = vmatprep.mubr.msk.f32.mxu0 %vm22206_vm11, %v22196_v29 }
 0xf81   : > { %17511 = vmatprep.subr.bf16.mxu0 %v22137_v51 }
 0xf87   : > { %16325 = vmatmul.mubr.f32.vlgmr.msra.gmra.mrb[10].mxu0 %v10887_v6 }
 0xf88   : > { %17513 = vmatpush3.bf16.msra.mxu0 %v17512_v34  ;;  %16331 = vmatprep.mubr.msk.f32.mxu0 %vm22206_vm11, %v22196_v29 }
 0xf89   : > { %17514 = vmatprep.subr.bf16.mxu0 %v22137_v51 }
 0xf8f   : > { %16332 = vmatmul.mubr.f32.vlgmr.msra.gmra.mrb[10].mxu0 %v10885_v33 }
 0xf90   : > { %17516 = vmatpush3.bf16.msra.mxu0 %v17500_v44  ;;  %16338 = vmatprep.mubr.msk.f32.mxu0 %vm22206_vm11, %v22196_v29  ;;  %v12220_v44 = vand.u32 4294901760, %v14913_v39 }
 0xf91   : > { %17517 = vmatprep.subr.bf16.mxu0 %v22137_v51 }
 0xf92   : > { %v12302_v6 = vsub.f32 %v14913_v39, %v12220_v44 }
 0xf94   : > { %v12303_v53 = vand.u32 4294901760, %v12302_v6 }
 0xf96   : > { %v12304_v34 = vsub.f32 %v12302_v6, %v12303_v53 }
 0xf97   : > { %16339 = vmatmul.mubr.f32.vlgmr.msra.gmra.mrb[10].mxu0 %v10885_v33  ;;  %v14912_v33 = vld [vmem:[%s21634_s13 + $0xc0] sm:$0xff] }
 0xf98   : > { %17519 = vmatpush3.bf16.msra.mxu0 %v17518_v58  ;;  %16345 = vmatprep.mubr.msk.f32.mxu0 %vm22206_vm11, %v22196_v29  ;;  %v12217_v23 = vand.u32 4294901760, %v14912_v33  ;;  %v12305_v28 = vand.u32 4294901760, %v12304_v34  ;;  %v14918_v34 = vld [vmem:[%s21634_s13 + $0xf0] sm:$0xff] }
 0xf99   : > { %17520 = vmatprep.subr.bf16.mxu0 %v22137_v51 }
 0xf9a   : > { %v12295_v50 = vsub.f32 %v14912_v33, %v12217_v23  ;;  %v17554_v25 = vpack.c.bf16 %v12220_v44, %v12217_v23 }
 0xf9c   : > { %v12296_v48 = vand.u32 4294901760, %v12295_v50  ;;  %v17560_v4 = vpack.c.bf16 %v12302_v6, %v12295_v50 }
 0xf9e   : > { %v12297_v24 = vsub.f32 %v12295_v50, %v12296_v48  ;;  %v17566_v59 = vpack.c.bf16 %v12303_v53, %v12296_v48 }
 0xf9f   : > { %16346 = vmatmul.mubr.f32.vlgmr.msra.gmra.mrb[10].mxu0 %v11355_v10 }
 0xfa0   : > { %17522 = vmatpush3.bf16.msra.mxu0 %v17521_v37  ;;  %16352 = vmatprep.mubr.msk.f32.mxu0 %vm22206_vm11, %v22196_v29  ;;  %v12298_v38 = vand.u32 4294901760, %v12297_v24  ;;  %v12750_v37 = vsub.f32 %v12680_v52, %v21482_v14 }
 0xfa1   : > { %17523 = vmatprep.subr.bf16.mxu0 %v22137_v51 }
 0xfa2   : > { %v17557_v16 = vpack.c.bf16 %v12305_v28, %v12298_v38  ;;  %v12751_v54 = vand.u32 4294901760, %v12750_v37  ;;  %v13611_v38 = vrot.slane %v21144_v30, 7  ;;  %v13615_v28 = vand.u32 4294901760, %v14918_v34 }
 0xfa4   : > { %v12752_v21 = vsub.f32 %v12750_v37, %v12751_v54 }
 0xfa6   : > { %v12753_v42 = vand.u32 4294901760, %v12752_v21 }
 0xfa7   : > { %16353 = vmatmul.mubr.f32.vlgmr.msra.gmra.mrb[10].mxu0 %v11351_v9 }
 0xfa8   : > { %17525 = vmatpush3.bf16.msra.mxu0 %v17524_v41  ;;  %16359 = vmatprep.mubr.msk.f32.mxu0 %vm22206_vm11, %v22196_v29 }
 0xfa9   : > { %17526 = vmatprep.subr.bf16.mxu0 %v22137_v51 }
 0xfaf   : > { %16360 = vmatmul.mubr.f32.vlgmr.msra.gmra.mrb[10].mxu0 %v11352_v13 }
 0xfb0   : > { %17528 = vmatpush3.bf16.msra.mxu0 %v17518_v58  ;;  %16366 = vmatprep.mubr.msk.f32.mxu0 %vm22206_vm11, %v22196_v29 }
 0xfb1   : > { %17529 = vmatprep.subr.bf16.mxu0 %v22137_v51 }
 0xfb7   : > { %16367 = vmatmul.mubr.f32.vlgmr.msra.gmra.mrb[10].mxu0 %v11353_v49 }
 0xfb8   : > { %17531 = vmatpush3.bf16.msra.mxu0 %v17530_v63  ;;  %16373 = vmatprep.mubr.msk.f32.mxu0 %vm22206_vm11, %v22196_v29 }
 0xfb9   : > { %17532 = vmatprep.subr.bf16.mxu0 %v22137_v51 }
 0xfbf   : > { %16374 = vmatmul.mubr.f32.vlgmr.msra.gmra.mrb[10].mxu0 %v11351_v9 }
 0xfc0   : > { %17534 = vmatpush3.bf16.msra.mxu0 %v17518_v58  ;;  %16380 = vmatprep.mubr.msk.f32.mxu0 %vm22206_vm11, %v22196_v29  ;;  %v12686_v58 = vand.u32 4294901760, %v14915_v18 }
 0xfc1   : > { %17535 = vmatprep.subr.bf16.mxu0 %v22137_v51 }
 0xfc2   : > { %v12768_v49 = vsub.f32 %v14915_v18, %v12686_v58 }
 0xfc4   : > { %v12769_v55 = vand.u32 4294901760, %v12768_v49 }
 0xfc6   : > { %v12770_v63 = vsub.f32 %v12768_v49, %v12769_v55 }
 0xfc7   : > { %16381 = vmatmul.mubr.f32.vlgmr.msra.gmra.mrb[10].mxu0 %v11351_v9  ;;  %v14914_v9 = vld [vmem:[%s21634_s13 + $0xd0] sm:$0xff] }
 0xfc8   : > { %17537 = vmatpush3.bf16.msra.mxu0 %v17536_v8  ;;  %16387 = vmatprep.mubr.msk.f32.mxu0 %vm22206_vm11, %v22196_v29  ;;  %v12683_v13 = vand.u32 4294901760, %v14914_v9  ;;  %v12771_v57 = vand.u32 4294901760, %v12770_v63 }
 0xfc9   : > { %17538 = vmatprep.subr.bf16.mxu0 %v22137_v51 }
 0xfca   : > { %v12761_v61 = vsub.f32 %v14914_v9, %v12683_v13  ;;  %v17572_v10 = vpack.c.bf16 %v12686_v58, %v12683_v13 }
 0xfcc   : > { %v12762_v60 = vand.u32 4294901760, %v12761_v61  ;;  %v17578_v15 = vpack.c.bf16 %v12768_v49, %v12761_v61 }
 0xfce   : > { %v12763_v41 = vsub.f32 %v12761_v61, %v12762_v60  ;;  %v17584_v26 = vpack.c.bf16 %v12769_v55, %v12762_v60 }
 0xfcf   : > { %16388 = vmatmul.mubr.f32.vlgmr.msra.gmra.mrb[10].mxu0 %v11821_v45  ;;  %v13227_v45 = vsub.f32 %v14916_v1, %v13149_v62 }
 0xfd0   : > { %17540 = vmatpush3.bf16.msra.mxu0 %v17539_v19  ;;  %16394 = vmatprep.mubr.msk.f32.mxu0 %vm22206_vm11, %v22196_v29  ;;  %v12764_v43 = vand.u32 4294901760, %v12763_v41  ;;  %v13146_v19 = vsel %vm22222_vm1, %v13145_v17, 0  ;;  %v6618_v41 = vld [vmem:[%s21635_s14] sm:$0x1] }
 0xfd1   : > { %17541 = vmatprep.subr.bf16.mxu0 %v22137_v51  ;;  %v13228_v33 = vand.u32 4294901760, %v13227_v45 }
 0xfd2   : > { %v17575_v7 = vpack.c.bf16 %v12771_v57, %v12764_v43 }
 0xfd3   : > { %v13229_v44 = vsub.f32 %v13227_v45, %v13228_v33 }
 0xfd5   : > { %v13230_v6 = vand.u32 4294901760, %v13229_v44 }
 0xfd7   : > { %16395 = vmatmul.mubr.f32.vlgmr.msra.gmra.mrb[10].mxu0 %v11817_v35 }
 0xfd8   : > { %17543 = vmatpush3.bf16.msra.mxu0 %v17542_v22  ;;  %16401 = vmatprep.mubr.msk.f32.mxu0 %vm22206_vm11, %v22196_v29 }
 0xfd9   : > { %17544 = vmatprep.subr.bf16.mxu0 %v22137_v51 }
 0xfdf   : > { %16402 = vmatmul.mubr.f32.vlgmr.msra.gmra.mrb[10].mxu0 %v11818_v46 }
 0xfe0   : > { %17546 = vmatpush3.bf16.msra.mxu0 %v17536_v8  ;;  %16408 = vmatprep.mubr.msk.f32.mxu0 %vm22206_vm11, %v22196_v29 }
 0xfe1   : > { %17547 = vmatprep.subr.bf16.mxu0 %v22137_v51 }
 0xfe7   : > { %16409 = vmatmul.mubr.f32.vlgmr.msra.gmra.mrb[10].mxu0 %v11819_v0  ;;  %v14917_v0 = vld [vmem:[%s21634_s13 + $0xe8] sm:$0xff] }
 0xfe8   : > { %17549 = vmatpush3.bf16.msra.mxu0 %v17548_v11  ;;  %16415 = vmatprep.mubr.msk.f32.mxu0 %vm22206_vm11, %v22196_v29  ;;  %v13152_v12 = vand.u32 4294901760, %v14917_v0  ;;  %v13215_v11 = vand.u32 4294901760, %v13146_v19 }
 0xfe9   : > { %17550 = vmatprep.subr.bf16.mxu0 %v22137_v51 }
 0xfea   : > { %v13234_v22 = vsub.f32 %v14917_v0, %v13152_v12  ;;  %v13216_v32 = vsub.f32 %v13146_v19, %v13215_v11  ;;  %v17590_v23 = vpack.c.bf16 %v13152_v12, %v13149_v62 }
 0xfec   : > { %v13235_v39 = vand.u32 4294901760, %v13234_v22  ;;  %v13217_v50 = vand.u32 4294901760, %v13216_v32 }
 0xfee   : > { %v13236_v27 = vsub.f32 %v13234_v22, %v13235_v39  ;;  %v13218_v48 = vsub.f32 %v13216_v32, %v13217_v50  ;;  %v17602_v24 = vpack.c.bf16 %v13235_v39, %v13228_v33 }
 0xfef   : > { %16416 = vmatmul.mubr.f32.vlgmr.msra.gmra.mrb[10].mxu0 %v11817_v35 }
 0xff0   : > { %17552 = vmatpush3.bf16.msra.mxu0 %v17536_v8  ;;  %16422 = vmatprep.mubr.msk.f32.mxu0 %vm22206_vm11, %v22196_v29 }
 0xff1   : > { %17553 = vmatprep.subr.bf16.mxu0 %v22137_v51 }
 0xff7   : > { %16423 = vmatmul.mubr.f32.vlgmr.msra.gmra.mrb[10].mxu0 %v11817_v35  ;;  %v16658_v35 = vpop.f32.mrb[48].mxu1 }
 0xff8   : > { %17555 = vmatpush3.bf16.msra.mxu0 %v17554_v25  ;;  %16429 = vmatprep.mubr.msk.f32.mxu0 %vm22206_vm11, %v22196_v29  ;;  %v17691_v5 = vadd.f32 %v16658_v35, %v14079_v47  ;;  %v14604_v46 = vpop.f32.mrb[49].mxu1 }
 0xff9   : > { %17556 = vmatprep.subr.bf16.mxu0 %v22137_v51  ;;  %v17692_v8 = vadd.f32 %v14604_v46, %v14078_v20 }
 0xffa   : > { %14616 = vst.msk [vmem:[%s624_s23 + $0x8] sm:$0x3] %vm14615_vm14, %v17691_v5 }
 0xffb   : > { %14614 = vst.msk [vmem:[%s624_s23] sm:$0xff] %vm22221_vm4, %v17692_v8  ;;  %s595_s23 = scalar_lea.vmem [#allocation2], %s594_s5 }
 0xffc   : > { %s14640_s27 = sshll.u32 %s595_s23, 4  ;;  %s21581_s27 = int_to_ptr.vmem [resolvable:$true] %s14640_s27 }
 0xffd   : > { %s18097_s6 = scalar_lea.vmem %s21581_s27, 16  ;;  %p18104_p0 = scmp.lt.s32.totalorder %s21581_s27, %s18102_s28 }
 0xffe   : > { %p18098_p11 = scmp.ne.s32.totalorder %s21581_s27, %s18097_s6  ;;  %p18105_p1 = scmp.lt.s32.totalorder %s18103_s22, %s18097_s6 }
 0xfff   : > { %16430 = vmatmul.mubr.f32.vlgmr.msra.gmra.mrb[10].mxu0 %v12287_v31  ;;  %v13693_v31 = vsub.f32 %v14918_v34, %v13615_v28 }
0x1000   : > { %17558 = vmatpush3.bf16.msra.mxu0 %v17557_v16  ;;  %16436 = vmatprep.mubr.msk.f32.mxu0 %vm22206_vm11, %v22196_v29  ;;  %v13612_v16 = vsel %vm22223_vm13, %v13611_v38, 0  ;;  %p18099_p12 = pnand %p18098_p11, %p18327_p5  ;;  %p18106_p2 = por %p18105_p1, %p18104_p0 }
0x1001   : > { %17559 = vmatprep.subr.bf16.mxu0 %v22137_v51  ;;  %v13694_v30 = vand.u32 4294901760, %v13693_v31 }
0x1002   : > { %p18100_p13 = pneg %p18099_p12 }
0x1003   : > { %v13695_v13 = vsub.f32 %v13693_v31, %v13694_v30 }
0x1004   : > { %p18107_p3 = pnand %p18106_p2, %p18100_p13 }
0x1005   : > { %v13696_v61 = vand.u32 4294901760, %v13695_v13 }
0x1007   : > { %16437 = vmatmul.mubr.f32.vlgmr.msra.gmra.mrb[10].mxu0 %v12283_v56 }
0x1008   : > { %17561 = vmatpush3.bf16.msra.mxu0 %v17560_v4  ;;  %16443 = vmatprep.mubr.msk.f32.mxu0 %vm22206_vm11, %v22196_v29 }
0x1009   : > { %17562 = vmatprep.subr.bf16.mxu0 %v22137_v51 }
0x100f   : > { %16444 = vmatmul.mubr.f32.vlgmr.msra.gmra.mrb[10].mxu0 %v12284_v36  ;;  %v13219_v36 = vand.u32 4294901760, %v13218_v48 }
0x1010   : > { %17564 = vmatpush3.bf16.msra.mxu0 %v17554_v25  ;;  %16450 = vmatprep.mubr.msk.f32.mxu0 %vm22206_vm11, %v22196_v29 }
0x1011   : > { %17565 = vmatprep.subr.bf16.mxu0 %v22137_v51 }
0x1017   : > { %16451 = vmatmul.mubr.f32.vlgmr.msra.gmra.mrb[10].mxu0 %v12285_v3  ;;  %v14919_v3 = vld [vmem:[%s21634_s13 + $0xf8] sm:$0xff] }
0x1018   : > { %17567 = vmatpush3.bf16.msra.mxu0 %v17566_v59  ;;  %16457 = vmatprep.mubr.msk.f32.mxu0 %vm22206_vm11, %v22196_v29  ;;  %v13618_v2 = vand.u32 4294901760, %v14919_v3  ;;  %v13681_v59 = vand.u32 4294901760, %v13612_v16 }
0x1019   : > { %17568 = vmatprep.subr.bf16.mxu0 %v22137_v51 }
0x101a   : > { %v13700_v4 = vsub.f32 %v14919_v3, %v13618_v2  ;;  %v13682_v18 = vsub.f32 %v13612_v16, %v13681_v59  ;;  %v17608_v40 = vpack.c.bf16 %v13618_v2, %v13615_v28 }
0x101c   : > { %v13701_v9 = vand.u32 4294901760, %v13700_v4  ;;  %v13683_v52 = vand.u32 4294901760, %v13682_v18 }
0x101e   : > { %v13702_v58 = vsub.f32 %v13700_v4, %v13701_v9 }
0x101f   : > { %16458 = vmatmul.mubr.f32.vlgmr.msra.gmra.mrb[10].mxu0 %v12283_v56 }
0x1020   : > { %17570 = vmatpush3.bf16.msra.mxu0 %v17554_v25  ;;  %16464 = vmatprep.mubr.msk.f32.mxu0 %vm22206_vm11, %v22196_v29  ;;  %v17596_v25 = vpack.c.bf16 %v13234_v22, %v13227_v45  ;;  %v13703_v49 = vand.u32 4294901760, %v13702_v58 }
0x1021   : > { %17571 = vmatprep.subr.bf16.mxu0 %v22137_v51 }
0x1022   : > { %v17611_v60 = vpack.c.bf16 %v13703_v49, %v13696_v61 }
0x1027   : > { %16465 = vmatmul.mubr.f32.vlgmr.msra.gmra.mrb[10].mxu0 %v12283_v56  ;;  %v13237_v56 = vand.u32 4294901760, %v13236_v27 }
0x1028   : > { %17573 = vmatpush3.bf16.msra.mxu0 %v17572_v10  ;;  %16471 = vmatprep.mubr.msk.f32.mxu0 %vm22206_vm11, %v22196_v29 }
0x1029   : > { %17574 = vmatprep.subr.bf16.mxu0 %v22137_v51  ;;  %v17593_v53 = vpack.c.bf16 %v13237_v56, %v13230_v6 }
0x102f   : > { %16472 = vmatmul.mubr.f32.vlgmr.msra.gmra.mrb[10].mxu0 %v12753_v42 }
0x1030   : > { %17576 = vmatpush3.bf16.msra.mxu0 %v17575_v7  ;;  %16478 = vmatprep.mubr.msk.f32.mxu0 %vm22206_vm11, %v22196_v29 }
0x1031   : > { %17577 = vmatprep.subr.bf16.mxu0 %v22137_v51 }
0x1037   : > { %16479 = vmatmul.mubr.f32.vlgmr.msra.gmra.mrb[10].mxu0 %v21482_v14 }
0x1038   : > { %17579 = vmatpush3.bf16.msra.mxu0 %v17578_v15  ;;  %16485 = vmatprep.mubr.msk.f32.mxu0 %vm22206_vm11, %v22196_v29 }
0x1039   : > { %17580 = vmatprep.subr.bf16.mxu0 %v22137_v51 }
0x103f   : > { %16486 = vmatmul.mubr.f32.vlgmr.msra.gmra.mrb[10].mxu0 %v12750_v37  ;;  %v17614_v37 = vpack.c.bf16 %v13700_v4, %v13693_v31 }
0x1040   : > { %17582 = vmatpush3.bf16.msra.mxu0 %v17572_v10  ;;  %16492 = vmatprep.mubr.msk.f32.mxu0 %vm22206_vm11, %v22196_v29 }
0x1041   : > { %17583 = vmatprep.subr.bf16.mxu0 %v22137_v51 }
0x1047   : > { %16493 = vmatmul.mubr.f32.vlgmr.msra.gmra.mrb[10].mxu0 %v12751_v54 }
0x1048   : > { %17585 = vmatpush3.bf16.msra.mxu0 %v17584_v26  ;;  %16499 = vmatprep.mubr.msk.f32.mxu0 %vm22206_vm11, %v22196_v29 }
0x1049   : > { %17586 = vmatprep.subr.bf16.mxu0 %v22137_v51 }
0x104f   : > { %16500 = vmatmul.mubr.f32.vlgmr.msra.gmra.mrb[10].mxu0 %v21482_v14 }
0x1050   : > { %17588 = vmatpush3.bf16.msra.mxu0 %v17572_v10  ;;  %16506 = vmatprep.mubr.msk.f32.mxu0 %vm22206_vm11, %v22196_v29  ;;  %v17620_v10 = vpack.c.bf16 %v13701_v9, %v13694_v30 }
0x1051   : > { %17589 = vmatprep.subr.bf16.mxu0 %v22137_v51 }
0x1057   : > { %16507 = vmatmul.mubr.f32.vlgmr.msra.gmra.mrb[10].mxu0 %v21482_v14  ;;  %v13684_v14 = vsub.f32 %v13682_v18, %v13683_v52 }
0x1058   : > { %17591 = vmatpush3.bf16.msra.mxu0 %v17590_v23  ;;  %16513 = vmatprep.mubr.msk.f32.mxu0 %vm22206_vm11, %v22196_v29 }
0x1059   : > { %17592 = vmatprep.subr.bf16.mxu0 %v22137_v51  ;;  %v13685_v55 = vand.u32 4294901760, %v13684_v14 }
0x105f   : > { %16514 = vmatmul.mubr.f32.vlgmr.msra.gmra.mrb[10].mxu0 %v13219_v36 }
0x1060   : > { %17594 = vmatpush3.bf16.msra.mxu0 %v17593_v53  ;;  %16520 = vmatprep.mubr.msk.f32.mxu0 %vm22206_vm11, %v22196_v29 }
0x1061   : > { %17595 = vmatprep.subr.bf16.mxu0 %v22137_v51 }
0x1067   : > { %16521 = vmatmul.mubr.f32.vlgmr.msra.gmra.mrb[10].mxu0 %v13215_v11 }
0x1068   : > { %17597 = vmatpush3.bf16.msra.mxu0 %v17596_v25  ;;  %16527 = vmatprep.mubr.msk.f32.mxu0 %vm22206_vm11, %v22196_v29 }
0x1069   : > { %17598 = vmatprep.subr.bf16.mxu0 %v22137_v51 }
0x106f   : > { %16528 = vmatmul.mubr.f32.vlgmr.msra.gmra.mrb[10].mxu0 %v13216_v32 }
0x1070   : > { %17600 = vmatpush3.bf16.msra.mxu0 %v17590_v23  ;;  %16534 = vmatprep.mubr.msk.f32.mxu0 %vm22206_vm11, %v22196_v29 }
0x1071   : > { %17601 = vmatprep.subr.bf16.mxu0 %v22137_v51 }
0x1077   : > { %16535 = vmatmul.mubr.f32.vlgmr.msra.gmra.mrb[10].mxu0 %v13217_v50 }
0x1078   : > { %17603 = vmatpush3.bf16.msra.mxu0 %v17602_v24  ;;  %16541 = vmatprep.mubr.msk.f32.mxu0 %vm22206_vm11, %v22196_v29 }
0x1079   : > { %17604 = vmatprep.subr.bf16.mxu0 %v22137_v51 }
0x107f   : > { %16542 = vmatmul.mubr.f32.vlgmr.msra.gmra.mrb[10].mxu0 %v13215_v11 }
0x1080   : > { %17606 = vmatpush3.bf16.msra.mxu0 %v17590_v23  ;;  %16548 = vmatprep.mubr.msk.f32.mxu0 %vm22206_vm11, %v22196_v29 }
0x1081   : > { %17607 = vmatprep.subr.bf16.mxu0 %v22137_v51 }
0x1087   : > { %16549 = vmatmul.mubr.f32.vlgmr.msra.gmra.mrb[10].mxu0 %v13215_v11 }
0x1088   : > { %17609 = vmatpush3.bf16.msra.mxu0 %v17608_v40  ;;  %16555 = vmatprep.mubr.msk.f32.mxu0 %vm22206_vm11, %v22196_v29 }
0x1089   : > { %17610 = vmatprep.subr.bf16.mxu0 %v22137_v51 }
0x108f   : > { %16556 = vmatmul.mubr.f32.vlgmr.msra.gmra.mrb[10].mxu0 %v13685_v55 }
0x1090   : > { %17612 = vmatpush3.bf16.msra.mxu0 %v17611_v60  ;;  %16562 = vmatprep.mubr.msk.f32.mxu0 %vm22206_vm11, %v22196_v29 }
0x1091   : > { %17613 = vmatprep.subr.bf16.mxu0 %v22137_v51 }
0x1097   : > { %16563 = vmatmul.mubr.f32.vlgmr.msra.gmra.mrb[10].mxu0 %v13681_v59 }
0x1098   : > { %17615 = vmatpush3.bf16.msra.mxu0 %v17614_v37  ;;  %16569 = vmatprep.mubr.msk.f32.mxu0 %vm22206_vm11, %v22196_v29 }
0x1099   : > { %17616 = vmatprep.subr.bf16.mxu0 %v22137_v51 }
0x109f   : > { %16570 = vmatmul.mubr.f32.vlgmr.msra.gmra.mrb[10].mxu0 %v13682_v18 }
0x10a0   : > { %17618 = vmatpush3.bf16.msra.mxu0 %v17608_v40  ;;  %16576 = vmatprep.mubr.msk.f32.mxu0 %vm22206_vm11, %v22196_v29 }
0x10a1   : > { %17619 = vmatprep.subr.bf16.mxu0 %v22137_v51 }
0x10a7   : > { %16577 = vmatmul.mubr.f32.vlgmr.msra.gmra.mrb[10].mxu0 %v13683_v52 }
0x10a8   : > { %17621 = vmatpush3.bf16.msra.mxu0 %v17620_v10  ;;  %16583 = vmatprep.mubr.msk.f32.mxu0 %vm22206_vm11, %v22196_v29 }
0x10a9   : > { %17622 = vmatprep.subr.bf16.mxu0 %v22137_v51 }
0x10af   : > { %16584 = vmatmul.mubr.f32.vlgmr.msra.gmra.mrb[10].mxu0 %v13681_v59 }
0x10b0   : > { %17624 = vmatpush3.bf16.msra.mxu0 %v17608_v40  ;;  %16590 = vmatprep.mubr.msk.f32.mxu0 %vm22206_vm11, %v22196_v29 }
0x10b7   : > { %16591 = vmatmul.mubr.f32.vlgmr.msra.gmra.mrb[10].mxu0 %v13681_v59 }
0x118a   : > { %v14069_v63 = vpop.f32.mrb[10].mxu0 }
0x118b   : > { %v17690_v54 = vadd.f32 %v14069_v63, %v6618_v41  ;;  %v16592_v43 = vpop.f32.mrb[11].mxu0 }
0x118d   : > { %14075 = vst.msk [vmem:[%s595_s23] sm:$0x1] %vm14074_vm15, %v17690_v54 }
0x118e   : > { %18110 = shalt.err (!%p18107_p3)
}
0x118f   : > { %s18111_s5 = scalar_lea.hbm %s21579_s8, 16  ;;  %s18115_s4 = scalar_lea.hbm %s21638_s17, 32 }
0x1190   : > { %p18112_p4 = scmp.ne.s32.totalorder %s21579_s8, %s18111_s5  ;;  %p18116_p9 = scmp.lt.u32.totalorder %s21579_s8, %s21638_s17 }
0x1191   : > { %p18117_p10 = scmp.lt.u32.totalorder %s18115_s4, %s18111_s5  ;;  %p18119_p12 = scmp.lt.u32.totalorder %s18111_s5, %s21579_s8 }
0x1192   : > { %p18113_p7 = pnand %p18112_p4, %p18327_p5 }
0x1193   : > { %p18118_p11 = por %p18117_p10, %p18116_p9 }
0x1194   : > { %p18114_p8 = pneg %p18113_p7 }
0x1195   : > { %p18120_p13 = por %p18119_p12, %p18118_p11 }
0x1197   : > { %p18121_p0 = pnand %p18120_p13, %p18114_p8 }
0x1199   : > { %18124 = shalt.err (!%p18121_p0)
}
0x119a   : > { %18028 = dma.vmem_to_hbm [thread:$0]  (%p18327_p5), %s21581_s27, 16, %s21579_s8, %s14618_s25  }
0x119b PF: > { %p18034_p1 = scmp.ge.s32.totalorder %s18159_s21, 2  ;;  %s14658_s24 = sand.u32 1, %s18147_s0  }
0x119c   : > { %s14659_s6 = scalar_lea.sflag [#allocation3], %s14658_s24 }
0x119d   : > { %p18031_p2 = pnand %p18034_p1, %p18331_p6 }
0x119f   : > { %18142 = dma.done.wait (!%p18031_p2), %s14659_s6, 16  }
0x11a0   : > { %18144 = vsyncadd (!%p18031_p2), %s14659_s6, 4294967280  ;;  %s22224_s21 = sld [smem:[#allocation6_spill]]  ;;  %s22225_s1 = sld [smem:[#allocation5_spill]] }
0x11a1   : > { %s22226_s20 = sld [smem:[#allocation7_spill]]  ;;  %s22227_s0 = smov %s18151_s30 }
0x11a6   : > { %p30_p3 = scmp.ge.s32.totalorder %s22224_s21, 4   ;;  %s22228_s30 = smov %s22225_s1 }
0x11a8   :  { %32 = sbr.rel (!%p30_p3) target bundleno = 13 (0xd), region = 168 }
0x11af   :  { %14679 = vsyncpa [#allocation3], 1 }
0x11b0   :  { %14681 = vsyncpa [#allocation3 + $0x1], 1 }

</bundles_post_ra>
